<compile_context>
chip_gen: v6e
topology: v6e:2x2x1
jax: 0.10.0
libtpu: 0.0.40
codegen_flags: <defaults>
</compile_context>

<pallas_src>
import jax
import jax.numpy as jnp
from jax.experimental import pallas as pl
from jax.experimental.pallas import tpu as pltpu


def _local_module_kernel(xp_ref, w3s_ref, shift_ref, w1_ref, b1_ref, o_ref):
    """One (batch, row-tile) per grid step.

    xp_ref   : (1, Cin1, TH+2, W+2)  VMEM  zero-padded input tile (init_map ++ x)
    w3s_ref  : (Cmid*Cin1*9,)        SMEM  3x3 weights with BN scale folded, [m,c,ky,kx]
    shift_ref: (Cmid,)               SMEM  folded BN shift per mid channel
    w1_ref   : (Cmid,)               SMEM  1x1 conv weights
    b1_ref   : (1,)                  SMEM  1x1 conv bias
    o_ref    : (1, TH, W)            VMEM  lane-dense output tile (W on lanes)
    """
    TH = o_ref.shape[1]
    W = o_ref.shape[2]
    Cin1 = xp_ref.shape[1]
    Cmid = shift_ref.shape[0]

    # Per-mid-channel accumulators, initialized with the folded BN shift
    # (the multiplicative BN scale is already folded into w3s in the wrapper).
    h = [jnp.full((TH, W), shift_ref[m], dtype=jnp.float32) for m in range(Cmid)]

    # 3x3 conv as fully unrolled scalar-weight VPU FMAs over W-on-lane tiles.
    # 9 static shifted patches per input channel, reused across all Cmid outputs.
    for c in range(Cin1):
        xc = xp_ref[0, c, :, :].astype(jnp.float32)          # (TH+2, W+2)
        for ky in range(3):
            for kx in range(3):
                patch = xc[ky:ky + TH, kx:kx + W]            # (TH, W) static slice
                base = c * 9 + ky * 3 + kx
                for m in range(Cmid):
                    h[m] = h[m] + w3s_ref[m * Cin1 * 9 + base] * patch

    # ReLU + 1x1 conv (channel reduction to a single output channel) + bias.
    out = jnp.full((TH, W), b1_ref[0], dtype=jnp.float32)
    for m in range(Cmid):
        out = out + w1_ref[m] * jnp.maximum(h[m], 0.0)

    o_ref[0, :, :] = out.astype(o_ref.dtype)


def local_module_forward(x, init_map, distance_map, params, *,
                         tile_h=None, storage_dtype=jnp.float32):
    """Pallas-backed LocalModule.forward.

    x            : (N, in_c, H, W)   NCHW, like PyTorch
    init_map     : (N, 1, H, W)
    distance_map : unused (matches the PyTorch forward)
    returns      : (N, 1, H, W) float32

    storage_dtype: HBM dtype of the padded input tiles. Use jnp.bfloat16 to
                   halve HBM traffic (math is f32 in-kernel); defaults to f32
                   so results match the f32 reference exactly.
    """
    del distance_map  # unused in the reference forward
    eps = 1e-5
    N, in_c, H, W = x.shape
    cin1 = in_c + 1
    cmid = params['w3'].shape[0]

    # ---- parameter prep (plain JAX, once): fold BN into the 3x3 weights ----
    scale = params['bn_gamma'] / jnp.sqrt(params['bn_var'] + eps)            # (Cmid,)
    shift = params['bn_beta'] - params['bn_mean'] * scale                    # (Cmid,)
    w3s = params['w3'].astype(jnp.float32) * scale[:, None, None, None]      # (Cmid,Cin1,3,3)
    w3s_flat = w3s.reshape(-1).astype(jnp.float32)                           # [m, c, ky, kx]
    shift_v = shift.astype(jnp.float32)                                      # (Cmid,)
    w1_v = params['w1'].reshape(cmid).astype(jnp.float32)                    # (Cmid,)
    b1_v = params['b1'].reshape(1).astype(jnp.float32)                       # (1,)

    # ---- spatial row tiling: grid = N * n_row_tiles, all "parallel" ----
    # tile_h capped at 128 rows keeps the f32 working set (input tile + Cmid
    # accumulators + output) well under v7x's 32 MiB scoped VMEM at 736x736.
    if tile_h is None:
        tile_h = H if H <= 256 else 128
    tile_h = min(tile_h, H)
    if tile_h < H:
        tile_h = max(8, (tile_h // 8) * 8)
    n_th = pl.cdiv(H, tile_h)
    h_pad = n_th * tile_h

    # ---- glue (plain JAX): channel concat, zero-pad, overlapping row tiles ----
    outf = jnp.concatenate([init_map, x], axis=1)                            # (N,Cin1,H,W)
    xp = jnp.pad(outf, ((0, 0), (0, 0), (1, 1 + h_pad - H), (1, 1)))         # (N,Cin1,h_pad+2,W+2)
    if n_th == 1:
        xp_tiles = xp                                                        # (N,Cin1,H+2,W+2)
    else:
        xp_tiles = jnp.stack(
            [xp[:, :, t * tile_h: t * tile_h + tile_h + 2, :] for t in range(n_th)],
            axis=1).reshape(N * n_th, cin1, tile_h + 2, W + 2)
    xp_tiles = xp_tiles.astype(storage_dtype)

    grid_spec = pltpu.PrefetchScalarGridSpec(
        num_scalar_prefetch=0,
        grid=(N * n_th,),
        in_specs=[
            # Padded input tile: last two dims are full array dims, W on lanes.
            pl.BlockSpec((1, cin1, tile_h + 2, W + 2), lambda i: (i, 0, 0, 0)),
            # Small parameters live in SMEM (scalar reads, no lane-padded tiles).
            pl.BlockSpec(memory_space=pltpu.MemorySpace.SMEM),
            pl.BlockSpec(memory_space=pltpu.MemorySpace.SMEM),
            pl.BlockSpec(memory_space=pltpu.MemorySpace.SMEM),
            pl.BlockSpec(memory_space=pltpu.MemorySpace.SMEM),
        ],
        out_specs=pl.BlockSpec((1, tile_h, W), lambda i: (i, 0, 0)),
    )

    out_tiles = pl.pallas_call(
        _local_module_kernel,
        out_shape=jax.ShapeDtypeStruct((N * n_th, tile_h, W), jnp.float32),
        grid_spec=grid_spec,
        compiler_params=pltpu.CompilerParams(
            dimension_semantics=("parallel",)),
    )(xp_tiles, w3s_flat, shift_v, w1_v, b1_v)

    out = out_tiles.reshape(N, h_pad, W)[:, :H, :]                           # drop pad rows
    return out[:, None, :, :]                                                # NCHW (N,1,H,W)


def _reference_forward(x, init_map, params):
    """Pure-JAX (lax.conv) reference mirroring the PyTorch forward, for checking."""
    eps = 1e-5
    outf = jnp.concatenate([init_map, x], axis=1)
    h = jax.lax.conv_general_dilated(
        outf, params['w3'], window_strides=(1, 1), padding=((1, 1), (1, 1)),
        dimension_numbers=('NCHW', 'OIHW', 'NCHW'))
    scale = params['bn_gamma'] / jnp.sqrt(params['bn_var'] + eps)
    shift = params['bn_beta'] - params['bn_mean'] * scale
    h = h * scale[None, :, None, None] + shift[None, :, None, None]
    h = jnp.maximum(h, 0.0)
    out = jax.lax.conv_general_dilated(
        h, params['w1'], window_strides=(1, 1), padding=((0, 0), (0, 0)),
        dimension_numbers=('NCHW', 'OIHW', 'NCHW'))
    return out + params['b1'][None, :, None, None]


if __name__ == "__main__":
    key = jax.random.PRNGKey(0)
    N, in_c, mid_c, H, W = 2, 4, 8, 16, 16

    k = jax.random.split(key, 9)
    x = jax.random.normal(k[0], (N, in_c, H, W), jnp.float32)
    init_map = jax.random.normal(k[1], (N, 1, H, W), jnp.float32)
    distance_map = jax.random.normal(k[2], (N, 1, H, W), jnp.float32)

    # Deterministic synthetic parameters (shapes per LocalModule.__init__).
    params = {
        'w3': 0.1 * jax.random.normal(k[3], (mid_c, in_c + 1, 3, 3), jnp.float32),
        'bn_gamma': 1.0 + 0.05 * jax.random.normal(k[4], (mid_c,), jnp.float32),
        'bn_beta': 0.05 * jax.random.normal(k[5], (mid_c,), jnp.float32),
        'bn_mean': 0.05 * jax.random.normal(k[6], (mid_c,), jnp.float32),
        'bn_var': jnp.abs(jax.random.normal(k[7], (mid_c,), jnp.float32)) + 0.5,
        'w1': 0.1 * jax.random.normal(k[8], (1, mid_c, 1, 1), jnp.float32),
        'b1': jnp.array([0.01], jnp.float32),
    }

    ref = jax.block_until_ready(_reference_forward(x, init_map, params))

    # Single row tile per image (tile_h == H path).
    out = jax.block_until_ready(
        local_module_forward(x, init_map, distance_map, params))
    assert out.shape == (N, 1, H, W), out.shape
    assert jnp.allclose(out, ref, rtol=1e-4, atol=1e-4), \
        float(jnp.max(jnp.abs(out - ref)))

    # Multi-row-tile path (exercises the overlapping-halo row tiling).
    out_t = jax.block_until_ready(
        local_module_forward(x, init_map, distance_map, params, tile_h=8))
    assert jnp.allclose(out_t, ref, rtol=1e-4, atol=1e-4), \
        float(jnp.max(jnp.abs(out_t - ref)))

    print("KERNEL_OK")
</pallas_src>

<mosaic_0001>
module attributes {stable_mosaic.version = 11 : i64} {
  func.func @_local_module_kernel(%arg0: i32, %arg1: memref<1x5x18x18xf32, #tpu.memory_space<vmem>>, %arg2: memref<360xf32, #tpu.memory_space<smem>>, %arg3: memref<8xf32, #tpu.memory_space<smem>>, %arg4: memref<8xf32, #tpu.memory_space<smem>>, %arg5: memref<1xf32, #tpu.memory_space<smem>>, %arg6: memref<1x16x16xf32, #tpu.memory_space<vmem>>) attributes {dimension_semantics = [#tpu.dimension_semantics<parallel>], iteration_bounds = array<i64: 2>, scalar_prefetch = 0 : i64, scratch_operands = 0 : i64, tpu.core_type = #tpu.core_type<tc>, window_params = [{transform_indices = @transform_0, window_bounds = array<i64: 1, 5, 18, 18>}, {transform_indices = @transform_1, window_bounds = array<i64: 360>}, {transform_indices = @transform_2, window_bounds = array<i64: 8>}, {transform_indices = @transform_3, window_bounds = array<i64: 8>}, {transform_indices = @transform_4, window_bounds = array<i64: 1>}, {transform_indices = @transform_5, window_bounds = array<i64: 1, 16, 16>}]} {
    %c0 = arith.constant 0 : index
    %0 = memref.load %arg3[%c0] : memref<8xf32, #tpu.memory_space<smem>>
    %1 = vector.broadcast %0 : f32 to vector<16x16xf32>
    %c1 = arith.constant 1 : index
    %2 = memref.load %arg3[%c1] : memref<8xf32, #tpu.memory_space<smem>>
    %3 = vector.broadcast %2 : f32 to vector<16x16xf32>
    %c2 = arith.constant 2 : index
    %4 = memref.load %arg3[%c2] : memref<8xf32, #tpu.memory_space<smem>>
    %5 = vector.broadcast %4 : f32 to vector<16x16xf32>
    %c3 = arith.constant 3 : index
    %6 = memref.load %arg3[%c3] : memref<8xf32, #tpu.memory_space<smem>>
    %7 = vector.broadcast %6 : f32 to vector<16x16xf32>
    %c4 = arith.constant 4 : index
    %8 = memref.load %arg3[%c4] : memref<8xf32, #tpu.memory_space<smem>>
    %9 = vector.broadcast %8 : f32 to vector<16x16xf32>
    %c5 = arith.constant 5 : index
    %10 = memref.load %arg3[%c5] : memref<8xf32, #tpu.memory_space<smem>>
    %11 = vector.broadcast %10 : f32 to vector<16x16xf32>
    %c6 = arith.constant 6 : index
    %12 = memref.load %arg3[%c6] : memref<8xf32, #tpu.memory_space<smem>>
    %13 = vector.broadcast %12 : f32 to vector<16x16xf32>
    %c7 = arith.constant 7 : index
    %14 = memref.load %arg3[%c7] : memref<8xf32, #tpu.memory_space<smem>>
    %15 = vector.broadcast %14 : f32 to vector<16x16xf32>
    %c0_0 = arith.constant 0 : index
    %c0_1 = arith.constant 0 : index
    %c0_2 = arith.constant 0 : index
    %c0_3 = arith.constant 0 : index
    %16 = vector.load %arg1[%c0_0, %c0_1, %c0_2, %c0_3] : memref<1x5x18x18xf32, #tpu.memory_space<vmem>>, vector<1x1x18x18xf32>
    %17 = vector.shape_cast %16 : vector<1x1x18x18xf32> to vector<18x18xf32>
    %18 = vector.extract_strided_slice %17 {offsets = [0, 0], sizes = [16, 16], strides = [1, 1]} : vector<18x18xf32> to vector<16x16xf32>
    %c0_4 = arith.constant 0 : index
    %19 = memref.load %arg2[%c0_4] : memref<360xf32, #tpu.memory_space<smem>>
    %20 = vector.broadcast %19 : f32 to vector<16x16xf32>
    %21 = arith.mulf %20, %18 : vector<16x16xf32>
    %22 = arith.addf %1, %21 : vector<16x16xf32>
    %c45 = arith.constant 45 : index
    %23 = memref.load %arg2[%c45] : memref<360xf32, #tpu.memory_space<smem>>
    %24 = vector.broadcast %23 : f32 to vector<16x16xf32>
    %25 = arith.mulf %24, %18 : vector<16x16xf32>
    %26 = arith.addf %3, %25 : vector<16x16xf32>
    %c90 = arith.constant 90 : index
    %27 = memref.load %arg2[%c90] : memref<360xf32, #tpu.memory_space<smem>>
    %28 = vector.broadcast %27 : f32 to vector<16x16xf32>
    %29 = arith.mulf %28, %18 : vector<16x16xf32>
    %30 = arith.addf %5, %29 : vector<16x16xf32>
    %c135 = arith.constant 135 : index
    %31 = memref.load %arg2[%c135] : memref<360xf32, #tpu.memory_space<smem>>
    %32 = vector.broadcast %31 : f32 to vector<16x16xf32>
    %33 = arith.mulf %32, %18 : vector<16x16xf32>
    %34 = arith.addf %7, %33 : vector<16x16xf32>
    %c180 = arith.constant 180 : index
    %35 = memref.load %arg2[%c180] : memref<360xf32, #tpu.memory_space<smem>>
    %36 = vector.broadcast %35 : f32 to vector<16x16xf32>
    %37 = arith.mulf %36, %18 : vector<16x16xf32>
    %38 = arith.addf %9, %37 : vector<16x16xf32>
    %c225 = arith.constant 225 : index
    %39 = memref.load %arg2[%c225] : memref<360xf32, #tpu.memory_space<smem>>
    %40 = vector.broadcast %39 : f32 to vector<16x16xf32>
    %41 = arith.mulf %40, %18 : vector<16x16xf32>
    %42 = arith.addf %11, %41 : vector<16x16xf32>
    %c270 = arith.constant 270 : index
    %43 = memref.load %arg2[%c270] : memref<360xf32, #tpu.memory_space<smem>>
    %44 = vector.broadcast %43 : f32 to vector<16x16xf32>
    %45 = arith.mulf %44, %18 : vector<16x16xf32>
    %46 = arith.addf %13, %45 : vector<16x16xf32>
    %c315 = arith.constant 315 : index
    %47 = memref.load %arg2[%c315] : memref<360xf32, #tpu.memory_space<smem>>
    %48 = vector.broadcast %47 : f32 to vector<16x16xf32>
    %49 = arith.mulf %48, %18 : vector<16x16xf32>
    %50 = arith.addf %15, %49 : vector<16x16xf32>
    %51 = vector.extract_strided_slice %17 {offsets = [0, 1], sizes = [16, 16], strides = [1, 1]} : vector<18x18xf32> to vector<16x16xf32>
    %c1_5 = arith.constant 1 : index
    %52 = memref.load %arg2[%c1_5] : memref<360xf32, #tpu.memory_space<smem>>
    %53 = vector.broadcast %52 : f32 to vector<16x16xf32>
    %54 = arith.mulf %53, %51 : vector<16x16xf32>
    %55 = arith.addf %22, %54 : vector<16x16xf32>
    %c46 = arith.constant 46 : index
    %56 = memref.load %arg2[%c46] : memref<360xf32, #tpu.memory_space<smem>>
    %57 = vector.broadcast %56 : f32 to vector<16x16xf32>
    %58 = arith.mulf %57, %51 : vector<16x16xf32>
    %59 = arith.addf %26, %58 : vector<16x16xf32>
    %c91 = arith.constant 91 : index
    %60 = memref.load %arg2[%c91] : memref<360xf32, #tpu.memory_space<smem>>
    %61 = vector.broadcast %60 : f32 to vector<16x16xf32>
    %62 = arith.mulf %61, %51 : vector<16x16xf32>
    %63 = arith.addf %30, %62 : vector<16x16xf32>
    %c136 = arith.constant 136 : index
    %64 = memref.load %arg2[%c136] : memref<360xf32, #tpu.memory_space<smem>>
    %65 = vector.broadcast %64 : f32 to vector<16x16xf32>
    %66 = arith.mulf %65, %51 : vector<16x16xf32>
    %67 = arith.addf %34, %66 : vector<16x16xf32>
    %c181 = arith.constant 181 : index
    %68 = memref.load %arg2[%c181] : memref<360xf32, #tpu.memory_space<smem>>
    %69 = vector.broadcast %68 : f32 to vector<16x16xf32>
    %70 = arith.mulf %69, %51 : vector<16x16xf32>
    %71 = arith.addf %38, %70 : vector<16x16xf32>
    %c226 = arith.constant 226 : index
    %72 = memref.load %arg2[%c226] : memref<360xf32, #tpu.memory_space<smem>>
    %73 = vector.broadcast %72 : f32 to vector<16x16xf32>
    %74 = arith.mulf %73, %51 : vector<16x16xf32>
    %75 = arith.addf %42, %74 : vector<16x16xf32>
    %c271 = arith.constant 271 : index
    %76 = memref.load %arg2[%c271] : memref<360xf32, #tpu.memory_space<smem>>
    %77 = vector.broadcast %76 : f32 to vector<16x16xf32>
    %78 = arith.mulf %77, %51 : vector<16x16xf32>
    %79 = arith.addf %46, %78 : vector<16x16xf32>
    %c316 = arith.constant 316 : index
    %80 = memref.load %arg2[%c316] : memref<360xf32, #tpu.memory_space<smem>>
    %81 = vector.broadcast %80 : f32 to vector<16x16xf32>
    %82 = arith.mulf %81, %51 : vector<16x16xf32>
    %83 = arith.addf %50, %82 : vector<16x16xf32>
    %84 = vector.extract_strided_slice %17 {offsets = [0, 2], sizes = [16, 16], strides = [1, 1]} : vector<18x18xf32> to vector<16x16xf32>
    %c2_6 = arith.constant 2 : index
    %85 = memref.load %arg2[%c2_6] : memref<360xf32, #tpu.memory_space<smem>>
    %86 = vector.broadcast %85 : f32 to vector<16x16xf32>
    %87 = arith.mulf %86, %84 : vector<16x16xf32>
    %88 = arith.addf %55, %87 : vector<16x16xf32>
    %c47 = arith.constant 47 : index
    %89 = memref.load %arg2[%c47] : memref<360xf32, #tpu.memory_space<smem>>
    %90 = vector.broadcast %89 : f32 to vector<16x16xf32>
    %91 = arith.mulf %90, %84 : vector<16x16xf32>
    %92 = arith.addf %59, %91 : vector<16x16xf32>
    %c92 = arith.constant 92 : index
    %93 = memref.load %arg2[%c92] : memref<360xf32, #tpu.memory_space<smem>>
    %94 = vector.broadcast %93 : f32 to vector<16x16xf32>
    %95 = arith.mulf %94, %84 : vector<16x16xf32>
    %96 = arith.addf %63, %95 : vector<16x16xf32>
    %c137 = arith.constant 137 : index
    %97 = memref.load %arg2[%c137] : memref<360xf32, #tpu.memory_space<smem>>
    %98 = vector.broadcast %97 : f32 to vector<16x16xf32>
    %99 = arith.mulf %98, %84 : vector<16x16xf32>
    %100 = arith.addf %67, %99 : vector<16x16xf32>
    %c182 = arith.constant 182 : index
    %101 = memref.load %arg2[%c182] : memref<360xf32, #tpu.memory_space<smem>>
    %102 = vector.broadcast %101 : f32 to vector<16x16xf32>
    %103 = arith.mulf %102, %84 : vector<16x16xf32>
    %104 = arith.addf %71, %103 : vector<16x16xf32>
    %c227 = arith.constant 227 : index
    %105 = memref.load %arg2[%c227] : memref<360xf32, #tpu.memory_space<smem>>
    %106 = vector.broadcast %105 : f32 to vector<16x16xf32>
    %107 = arith.mulf %106, %84 : vector<16x16xf32>
    %108 = arith.addf %75, %107 : vector<16x16xf32>
    %c272 = arith.constant 272 : index
    %109 = memref.load %arg2[%c272] : memref<360xf32, #tpu.memory_space<smem>>
    %110 = vector.broadcast %109 : f32 to vector<16x16xf32>
    %111 = arith.mulf %110, %84 : vector<16x16xf32>
    %112 = arith.addf %79, %111 : vector<16x16xf32>
    %c317 = arith.constant 317 : index
    %113 = memref.load %arg2[%c317] : memref<360xf32, #tpu.memory_space<smem>>
    %114 = vector.broadcast %113 : f32 to vector<16x16xf32>
    %115 = arith.mulf %114, %84 : vector<16x16xf32>
    %116 = arith.addf %83, %115 : vector<16x16xf32>
    %117 = vector.extract_strided_slice %17 {offsets = [1, 0], sizes = [16, 16], strides = [1, 1]} : vector<18x18xf32> to vector<16x16xf32>
    %c3_7 = arith.constant 3 : index
    %118 = memref.load %arg2[%c3_7] : memref<360xf32, #tpu.memory_space<smem>>
    %119 = vector.broadcast %118 : f32 to vector<16x16xf32>
    %120 = arith.mulf %119, %117 : vector<16x16xf32>
    %121 = arith.addf %88, %120 : vector<16x16xf32>
    %c48 = arith.constant 48 : index
    %122 = memref.load %arg2[%c48] : memref<360xf32, #tpu.memory_space<smem>>
    %123 = vector.broadcast %122 : f32 to vector<16x16xf32>
    %124 = arith.mulf %123, %117 : vector<16x16xf32>
    %125 = arith.addf %92, %124 : vector<16x16xf32>
    %c93 = arith.constant 93 : index
    %126 = memref.load %arg2[%c93] : memref<360xf32, #tpu.memory_space<smem>>
    %127 = vector.broadcast %126 : f32 to vector<16x16xf32>
    %128 = arith.mulf %127, %117 : vector<16x16xf32>
    %129 = arith.addf %96, %128 : vector<16x16xf32>
    %c138 = arith.constant 138 : index
    %130 = memref.load %arg2[%c138] : memref<360xf32, #tpu.memory_space<smem>>
    %131 = vector.broadcast %130 : f32 to vector<16x16xf32>
    %132 = arith.mulf %131, %117 : vector<16x16xf32>
    %133 = arith.addf %100, %132 : vector<16x16xf32>
    %c183 = arith.constant 183 : index
    %134 = memref.load %arg2[%c183] : memref<360xf32, #tpu.memory_space<smem>>
    %135 = vector.broadcast %134 : f32 to vector<16x16xf32>
    %136 = arith.mulf %135, %117 : vector<16x16xf32>
    %137 = arith.addf %104, %136 : vector<16x16xf32>
    %c228 = arith.constant 228 : index
    %138 = memref.load %arg2[%c228] : memref<360xf32, #tpu.memory_space<smem>>
    %139 = vector.broadcast %138 : f32 to vector<16x16xf32>
    %140 = arith.mulf %139, %117 : vector<16x16xf32>
    %141 = arith.addf %108, %140 : vector<16x16xf32>
    %c273 = arith.constant 273 : index
    %142 = memref.load %arg2[%c273] : memref<360xf32, #tpu.memory_space<smem>>
    %143 = vector.broadcast %142 : f32 to vector<16x16xf32>
    %144 = arith.mulf %143, %117 : vector<16x16xf32>
    %145 = arith.addf %112, %144 : vector<16x16xf32>
    %c318 = arith.constant 318 : index
    %146 = memref.load %arg2[%c318] : memref<360xf32, #tpu.memory_space<smem>>
    %147 = vector.broadcast %146 : f32 to vector<16x16xf32>
    %148 = arith.mulf %147, %117 : vector<16x16xf32>
    %149 = arith.addf %116, %148 : vector<16x16xf32>
    %150 = vector.extract_strided_slice %17 {offsets = [1, 1], sizes = [16, 16], strides = [1, 1]} : vector<18x18xf32> to vector<16x16xf32>
    %c4_8 = arith.constant 4 : index
    %151 = memref.load %arg2[%c4_8] : memref<360xf32, #tpu.memory_space<smem>>
    %152 = vector.broadcast %151 : f32 to vector<16x16xf32>
    %153 = arith.mulf %152, %150 : vector<16x16xf32>
    %154 = arith.addf %121, %153 : vector<16x16xf32>
    %c49 = arith.constant 49 : index
    %155 = memref.load %arg2[%c49] : memref<360xf32, #tpu.memory_space<smem>>
    %156 = vector.broadcast %155 : f32 to vector<16x16xf32>
    %157 = arith.mulf %156, %150 : vector<16x16xf32>
    %158 = arith.addf %125, %157 : vector<16x16xf32>
    %c94 = arith.constant 94 : index
    %159 = memref.load %arg2[%c94] : memref<360xf32, #tpu.memory_space<smem>>
    %160 = vector.broadcast %159 : f32 to vector<16x16xf32>
    %161 = arith.mulf %160, %150 : vector<16x16xf32>
    %162 = arith.addf %129, %161 : vector<16x16xf32>
    %c139 = arith.constant 139 : index
    %163 = memref.load %arg2[%c139] : memref<360xf32, #tpu.memory_space<smem>>
    %164 = vector.broadcast %163 : f32 to vector<16x16xf32>
    %165 = arith.mulf %164, %150 : vector<16x16xf32>
    %166 = arith.addf %133, %165 : vector<16x16xf32>
    %c184 = arith.constant 184 : index
    %167 = memref.load %arg2[%c184] : memref<360xf32, #tpu.memory_space<smem>>
    %168 = vector.broadcast %167 : f32 to vector<16x16xf32>
    %169 = arith.mulf %168, %150 : vector<16x16xf32>
    %170 = arith.addf %137, %169 : vector<16x16xf32>
    %c229 = arith.constant 229 : index
    %171 = memref.load %arg2[%c229] : memref<360xf32, #tpu.memory_space<smem>>
    %172 = vector.broadcast %171 : f32 to vector<16x16xf32>
    %173 = arith.mulf %172, %150 : vector<16x16xf32>
    %174 = arith.addf %141, %173 : vector<16x16xf32>
    %c274 = arith.constant 274 : index
    %175 = memref.load %arg2[%c274] : memref<360xf32, #tpu.memory_space<smem>>
    %176 = vector.broadcast %175 : f32 to vector<16x16xf32>
    %177 = arith.mulf %176, %150 : vector<16x16xf32>
    %178 = arith.addf %145, %177 : vector<16x16xf32>
    %c319 = arith.constant 319 : index
    %179 = memref.load %arg2[%c319] : memref<360xf32, #tpu.memory_space<smem>>
    %180 = vector.broadcast %179 : f32 to vector<16x16xf32>
    %181 = arith.mulf %180, %150 : vector<16x16xf32>
    %182 = arith.addf %149, %181 : vector<16x16xf32>
    %183 = vector.extract_strided_slice %17 {offsets = [1, 2], sizes = [16, 16], strides = [1, 1]} : vector<18x18xf32> to vector<16x16xf32>
    %c5_9 = arith.constant 5 : index
    %184 = memref.load %arg2[%c5_9] : memref<360xf32, #tpu.memory_space<smem>>
    %185 = vector.broadcast %184 : f32 to vector<16x16xf32>
    %186 = arith.mulf %185, %183 : vector<16x16xf32>
    %187 = arith.addf %154, %186 : vector<16x16xf32>
    %c50 = arith.constant 50 : index
    %188 = memref.load %arg2[%c50] : memref<360xf32, #tpu.memory_space<smem>>
    %189 = vector.broadcast %188 : f32 to vector<16x16xf32>
    %190 = arith.mulf %189, %183 : vector<16x16xf32>
    %191 = arith.addf %158, %190 : vector<16x16xf32>
    %c95 = arith.constant 95 : index
    %192 = memref.load %arg2[%c95] : memref<360xf32, #tpu.memory_space<smem>>
    %193 = vector.broadcast %192 : f32 to vector<16x16xf32>
    %194 = arith.mulf %193, %183 : vector<16x16xf32>
    %195 = arith.addf %162, %194 : vector<16x16xf32>
    %c140 = arith.constant 140 : index
    %196 = memref.load %arg2[%c140] : memref<360xf32, #tpu.memory_space<smem>>
    %197 = vector.broadcast %196 : f32 to vector<16x16xf32>
    %198 = arith.mulf %197, %183 : vector<16x16xf32>
    %199 = arith.addf %166, %198 : vector<16x16xf32>
    %c185 = arith.constant 185 : index
    %200 = memref.load %arg2[%c185] : memref<360xf32, #tpu.memory_space<smem>>
    %201 = vector.broadcast %200 : f32 to vector<16x16xf32>
    %202 = arith.mulf %201, %183 : vector<16x16xf32>
    %203 = arith.addf %170, %202 : vector<16x16xf32>
    %c230 = arith.constant 230 : index
    %204 = memref.load %arg2[%c230] : memref<360xf32, #tpu.memory_space<smem>>
    %205 = vector.broadcast %204 : f32 to vector<16x16xf32>
    %206 = arith.mulf %205, %183 : vector<16x16xf32>
    %207 = arith.addf %174, %206 : vector<16x16xf32>
    %c275 = arith.constant 275 : index
    %208 = memref.load %arg2[%c275] : memref<360xf32, #tpu.memory_space<smem>>
    %209 = vector.broadcast %208 : f32 to vector<16x16xf32>
    %210 = arith.mulf %209, %183 : vector<16x16xf32>
    %211 = arith.addf %178, %210 : vector<16x16xf32>
    %c320 = arith.constant 320 : index
    %212 = memref.load %arg2[%c320] : memref<360xf32, #tpu.memory_space<smem>>
    %213 = vector.broadcast %212 : f32 to vector<16x16xf32>
    %214 = arith.mulf %213, %183 : vector<16x16xf32>
    %215 = arith.addf %182, %214 : vector<16x16xf32>
    %216 = vector.extract_strided_slice %17 {offsets = [2, 0], sizes = [16, 16], strides = [1, 1]} : vector<18x18xf32> to vector<16x16xf32>
    %c6_10 = arith.constant 6 : index
    %217 = memref.load %arg2[%c6_10] : memref<360xf32, #tpu.memory_space<smem>>
    %218 = vector.broadcast %217 : f32 to vector<16x16xf32>
    %219 = arith.mulf %218, %216 : vector<16x16xf32>
    %220 = arith.addf %187, %219 : vector<16x16xf32>
    %c51 = arith.constant 51 : index
    %221 = memref.load %arg2[%c51] : memref<360xf32, #tpu.memory_space<smem>>
    %222 = vector.broadcast %221 : f32 to vector<16x16xf32>
    %223 = arith.mulf %222, %216 : vector<16x16xf32>
    %224 = arith.addf %191, %223 : vector<16x16xf32>
    %c96 = arith.constant 96 : index
    %225 = memref.load %arg2[%c96] : memref<360xf32, #tpu.memory_space<smem>>
    %226 = vector.broadcast %225 : f32 to vector<16x16xf32>
    %227 = arith.mulf %226, %216 : vector<16x16xf32>
    %228 = arith.addf %195, %227 : vector<16x16xf32>
    %c141 = arith.constant 141 : index
    %229 = memref.load %arg2[%c141] : memref<360xf32, #tpu.memory_space<smem>>
    %230 = vector.broadcast %229 : f32 to vector<16x16xf32>
    %231 = arith.mulf %230, %216 : vector<16x16xf32>
    %232 = arith.addf %199, %231 : vector<16x16xf32>
    %c186 = arith.constant 186 : index
    %233 = memref.load %arg2[%c186] : memref<360xf32, #tpu.memory_space<smem>>
    %234 = vector.broadcast %233 : f32 to vector<16x16xf32>
    %235 = arith.mulf %234, %216 : vector<16x16xf32>
    %236 = arith.addf %203, %235 : vector<16x16xf32>
    %c231 = arith.constant 231 : index
    %237 = memref.load %arg2[%c231] : memref<360xf32, #tpu.memory_space<smem>>
    %238 = vector.broadcast %237 : f32 to vector<16x16xf32>
    %239 = arith.mulf %238, %216 : vector<16x16xf32>
    %240 = arith.addf %207, %239 : vector<16x16xf32>
    %c276 = arith.constant 276 : index
    %241 = memref.load %arg2[%c276] : memref<360xf32, #tpu.memory_space<smem>>
    %242 = vector.broadcast %241 : f32 to vector<16x16xf32>
    %243 = arith.mulf %242, %216 : vector<16x16xf32>
    %244 = arith.addf %211, %243 : vector<16x16xf32>
    %c321 = arith.constant 321 : index
    %245 = memref.load %arg2[%c321] : memref<360xf32, #tpu.memory_space<smem>>
    %246 = vector.broadcast %245 : f32 to vector<16x16xf32>
    %247 = arith.mulf %246, %216 : vector<16x16xf32>
    %248 = arith.addf %215, %247 : vector<16x16xf32>
    %249 = vector.extract_strided_slice %17 {offsets = [2, 1], sizes = [16, 16], strides = [1, 1]} : vector<18x18xf32> to vector<16x16xf32>
    %c7_11 = arith.constant 7 : index
    %250 = memref.load %arg2[%c7_11] : memref<360xf32, #tpu.memory_space<smem>>
    %251 = vector.broadcast %250 : f32 to vector<16x16xf32>
    %252 = arith.mulf %251, %249 : vector<16x16xf32>
    %253 = arith.addf %220, %252 : vector<16x16xf32>
    %c52 = arith.constant 52 : index
    %254 = memref.load %arg2[%c52] : memref<360xf32, #tpu.memory_space<smem>>
    %255 = vector.broadcast %254 : f32 to vector<16x16xf32>
    %256 = arith.mulf %255, %249 : vector<16x16xf32>
    %257 = arith.addf %224, %256 : vector<16x16xf32>
    %c97 = arith.constant 97 : index
    %258 = memref.load %arg2[%c97] : memref<360xf32, #tpu.memory_space<smem>>
    %259 = vector.broadcast %258 : f32 to vector<16x16xf32>
    %260 = arith.mulf %259, %249 : vector<16x16xf32>
    %261 = arith.addf %228, %260 : vector<16x16xf32>
    %c142 = arith.constant 142 : index
    %262 = memref.load %arg2[%c142] : memref<360xf32, #tpu.memory_space<smem>>
    %263 = vector.broadcast %262 : f32 to vector<16x16xf32>
    %264 = arith.mulf %263, %249 : vector<16x16xf32>
    %265 = arith.addf %232, %264 : vector<16x16xf32>
    %c187 = arith.constant 187 : index
    %266 = memref.load %arg2[%c187] : memref<360xf32, #tpu.memory_space<smem>>
    %267 = vector.broadcast %266 : f32 to vector<16x16xf32>
    %268 = arith.mulf %267, %249 : vector<16x16xf32>
    %269 = arith.addf %236, %268 : vector<16x16xf32>
    %c232 = arith.constant 232 : index
    %270 = memref.load %arg2[%c232] : memref<360xf32, #tpu.memory_space<smem>>
    %271 = vector.broadcast %270 : f32 to vector<16x16xf32>
    %272 = arith.mulf %271, %249 : vector<16x16xf32>
    %273 = arith.addf %240, %272 : vector<16x16xf32>
    %c277 = arith.constant 277 : index
    %274 = memref.load %arg2[%c277] : memref<360xf32, #tpu.memory_space<smem>>
    %275 = vector.broadcast %274 : f32 to vector<16x16xf32>
    %276 = arith.mulf %275, %249 : vector<16x16xf32>
    %277 = arith.addf %244, %276 : vector<16x16xf32>
    %c322 = arith.constant 322 : index
    %278 = memref.load %arg2[%c322] : memref<360xf32, #tpu.memory_space<smem>>
    %279 = vector.broadcast %278 : f32 to vector<16x16xf32>
    %280 = arith.mulf %279, %249 : vector<16x16xf32>
    %281 = arith.addf %248, %280 : vector<16x16xf32>
    %282 = vector.extract_strided_slice %17 {offsets = [2, 2], sizes = [16, 16], strides = [1, 1]} : vector<18x18xf32> to vector<16x16xf32>
    %c8 = arith.constant 8 : index
    %283 = memref.load %arg2[%c8] : memref<360xf32, #tpu.memory_space<smem>>
    %284 = vector.broadcast %283 : f32 to vector<16x16xf32>
    %285 = arith.mulf %284, %282 : vector<16x16xf32>
    %286 = arith.addf %253, %285 : vector<16x16xf32>
    %c53 = arith.constant 53 : index
    %287 = memref.load %arg2[%c53] : memref<360xf32, #tpu.memory_space<smem>>
    %288 = vector.broadcast %287 : f32 to vector<16x16xf32>
    %289 = arith.mulf %288, %282 : vector<16x16xf32>
    %290 = arith.addf %257, %289 : vector<16x16xf32>
    %c98 = arith.constant 98 : index
    %291 = memref.load %arg2[%c98] : memref<360xf32, #tpu.memory_space<smem>>
    %292 = vector.broadcast %291 : f32 to vector<16x16xf32>
    %293 = arith.mulf %292, %282 : vector<16x16xf32>
    %294 = arith.addf %261, %293 : vector<16x16xf32>
    %c143 = arith.constant 143 : index
    %295 = memref.load %arg2[%c143] : memref<360xf32, #tpu.memory_space<smem>>
    %296 = vector.broadcast %295 : f32 to vector<16x16xf32>
    %297 = arith.mulf %296, %282 : vector<16x16xf32>
    %298 = arith.addf %265, %297 : vector<16x16xf32>
    %c188 = arith.constant 188 : index
    %299 = memref.load %arg2[%c188] : memref<360xf32, #tpu.memory_space<smem>>
    %300 = vector.broadcast %299 : f32 to vector<16x16xf32>
    %301 = arith.mulf %300, %282 : vector<16x16xf32>
    %302 = arith.addf %269, %301 : vector<16x16xf32>
    %c233 = arith.constant 233 : index
    %303 = memref.load %arg2[%c233] : memref<360xf32, #tpu.memory_space<smem>>
    %304 = vector.broadcast %303 : f32 to vector<16x16xf32>
    %305 = arith.mulf %304, %282 : vector<16x16xf32>
    %306 = arith.addf %273, %305 : vector<16x16xf32>
    %c278 = arith.constant 278 : index
    %307 = memref.load %arg2[%c278] : memref<360xf32, #tpu.memory_space<smem>>
    %308 = vector.broadcast %307 : f32 to vector<16x16xf32>
    %309 = arith.mulf %308, %282 : vector<16x16xf32>
    %310 = arith.addf %277, %309 : vector<16x16xf32>
    %c323 = arith.constant 323 : index
    %311 = memref.load %arg2[%c323] : memref<360xf32, #tpu.memory_space<smem>>
    %312 = vector.broadcast %311 : f32 to vector<16x16xf32>
    %313 = arith.mulf %312, %282 : vector<16x16xf32>
    %314 = arith.addf %281, %313 : vector<16x16xf32>
    %c0_12 = arith.constant 0 : index
    %c1_13 = arith.constant 1 : index
    %c0_14 = arith.constant 0 : index
    %c0_15 = arith.constant 0 : index
    %315 = vector.load %arg1[%c0_12, %c1_13, %c0_14, %c0_15] : memref<1x5x18x18xf32, #tpu.memory_space<vmem>>, vector<1x1x18x18xf32>
    %316 = vector.shape_cast %315 : vector<1x1x18x18xf32> to vector<18x18xf32>
    %317 = vector.extract_strided_slice %316 {offsets = [0, 0], sizes = [16, 16], strides = [1, 1]} : vector<18x18xf32> to vector<16x16xf32>
    %c9 = arith.constant 9 : index
    %318 = memref.load %arg2[%c9] : memref<360xf32, #tpu.memory_space<smem>>
    %319 = vector.broadcast %318 : f32 to vector<16x16xf32>
    %320 = arith.mulf %319, %317 : vector<16x16xf32>
    %321 = arith.addf %286, %320 : vector<16x16xf32>
    %c54 = arith.constant 54 : index
    %322 = memref.load %arg2[%c54] : memref<360xf32, #tpu.memory_space<smem>>
    %323 = vector.broadcast %322 : f32 to vector<16x16xf32>
    %324 = arith.mulf %323, %317 : vector<16x16xf32>
    %325 = arith.addf %290, %324 : vector<16x16xf32>
    %c99 = arith.constant 99 : index
    %326 = memref.load %arg2[%c99] : memref<360xf32, #tpu.memory_space<smem>>
    %327 = vector.broadcast %326 : f32 to vector<16x16xf32>
    %328 = arith.mulf %327, %317 : vector<16x16xf32>
    %329 = arith.addf %294, %328 : vector<16x16xf32>
    %c144 = arith.constant 144 : index
    %330 = memref.load %arg2[%c144] : memref<360xf32, #tpu.memory_space<smem>>
    %331 = vector.broadcast %330 : f32 to vector<16x16xf32>
    %332 = arith.mulf %331, %317 : vector<16x16xf32>
    %333 = arith.addf %298, %332 : vector<16x16xf32>
    %c189 = arith.constant 189 : index
    %334 = memref.load %arg2[%c189] : memref<360xf32, #tpu.memory_space<smem>>
    %335 = vector.broadcast %334 : f32 to vector<16x16xf32>
    %336 = arith.mulf %335, %317 : vector<16x16xf32>
    %337 = arith.addf %302, %336 : vector<16x16xf32>
    %c234 = arith.constant 234 : index
    %338 = memref.load %arg2[%c234] : memref<360xf32, #tpu.memory_space<smem>>
    %339 = vector.broadcast %338 : f32 to vector<16x16xf32>
    %340 = arith.mulf %339, %317 : vector<16x16xf32>
    %341 = arith.addf %306, %340 : vector<16x16xf32>
    %c279 = arith.constant 279 : index
    %342 = memref.load %arg2[%c279] : memref<360xf32, #tpu.memory_space<smem>>
    %343 = vector.broadcast %342 : f32 to vector<16x16xf32>
    %344 = arith.mulf %343, %317 : vector<16x16xf32>
    %345 = arith.addf %310, %344 : vector<16x16xf32>
    %c324 = arith.constant 324 : index
    %346 = memref.load %arg2[%c324] : memref<360xf32, #tpu.memory_space<smem>>
    %347 = vector.broadcast %346 : f32 to vector<16x16xf32>
    %348 = arith.mulf %347, %317 : vector<16x16xf32>
    %349 = arith.addf %314, %348 : vector<16x16xf32>
    %350 = vector.extract_strided_slice %316 {offsets = [0, 1], sizes = [16, 16], strides = [1, 1]} : vector<18x18xf32> to vector<16x16xf32>
    %c10 = arith.constant 10 : index
    %351 = memref.load %arg2[%c10] : memref<360xf32, #tpu.memory_space<smem>>
    %352 = vector.broadcast %351 : f32 to vector<16x16xf32>
    %353 = arith.mulf %352, %350 : vector<16x16xf32>
    %354 = arith.addf %321, %353 : vector<16x16xf32>
    %c55 = arith.constant 55 : index
    %355 = memref.load %arg2[%c55] : memref<360xf32, #tpu.memory_space<smem>>
    %356 = vector.broadcast %355 : f32 to vector<16x16xf32>
    %357 = arith.mulf %356, %350 : vector<16x16xf32>
    %358 = arith.addf %325, %357 : vector<16x16xf32>
    %c100 = arith.constant 100 : index
    %359 = memref.load %arg2[%c100] : memref<360xf32, #tpu.memory_space<smem>>
    %360 = vector.broadcast %359 : f32 to vector<16x16xf32>
    %361 = arith.mulf %360, %350 : vector<16x16xf32>
    %362 = arith.addf %329, %361 : vector<16x16xf32>
    %c145 = arith.constant 145 : index
    %363 = memref.load %arg2[%c145] : memref<360xf32, #tpu.memory_space<smem>>
    %364 = vector.broadcast %363 : f32 to vector<16x16xf32>
    %365 = arith.mulf %364, %350 : vector<16x16xf32>
    %366 = arith.addf %333, %365 : vector<16x16xf32>
    %c190 = arith.constant 190 : index
    %367 = memref.load %arg2[%c190] : memref<360xf32, #tpu.memory_space<smem>>
    %368 = vector.broadcast %367 : f32 to vector<16x16xf32>
    %369 = arith.mulf %368, %350 : vector<16x16xf32>
    %370 = arith.addf %337, %369 : vector<16x16xf32>
    %c235 = arith.constant 235 : index
    %371 = memref.load %arg2[%c235] : memref<360xf32, #tpu.memory_space<smem>>
    %372 = vector.broadcast %371 : f32 to vector<16x16xf32>
    %373 = arith.mulf %372, %350 : vector<16x16xf32>
    %374 = arith.addf %341, %373 : vector<16x16xf32>
    %c280 = arith.constant 280 : index
    %375 = memref.load %arg2[%c280] : memref<360xf32, #tpu.memory_space<smem>>
    %376 = vector.broadcast %375 : f32 to vector<16x16xf32>
    %377 = arith.mulf %376, %350 : vector<16x16xf32>
    %378 = arith.addf %345, %377 : vector<16x16xf32>
    %c325 = arith.constant 325 : index
    %379 = memref.load %arg2[%c325] : memref<360xf32, #tpu.memory_space<smem>>
    %380 = vector.broadcast %379 : f32 to vector<16x16xf32>
    %381 = arith.mulf %380, %350 : vector<16x16xf32>
    %382 = arith.addf %349, %381 : vector<16x16xf32>
    %383 = vector.extract_strided_slice %316 {offsets = [0, 2], sizes = [16, 16], strides = [1, 1]} : vector<18x18xf32> to vector<16x16xf32>
    %c11 = arith.constant 11 : index
    %384 = memref.load %arg2[%c11] : memref<360xf32, #tpu.memory_space<smem>>
    %385 = vector.broadcast %384 : f32 to vector<16x16xf32>
    %386 = arith.mulf %385, %383 : vector<16x16xf32>
    %387 = arith.addf %354, %386 : vector<16x16xf32>
    %c56 = arith.constant 56 : index
    %388 = memref.load %arg2[%c56] : memref<360xf32, #tpu.memory_space<smem>>
    %389 = vector.broadcast %388 : f32 to vector<16x16xf32>
    %390 = arith.mulf %389, %383 : vector<16x16xf32>
    %391 = arith.addf %358, %390 : vector<16x16xf32>
    %c101 = arith.constant 101 : index
    %392 = memref.load %arg2[%c101] : memref<360xf32, #tpu.memory_space<smem>>
    %393 = vector.broadcast %392 : f32 to vector<16x16xf32>
    %394 = arith.mulf %393, %383 : vector<16x16xf32>
    %395 = arith.addf %362, %394 : vector<16x16xf32>
    %c146 = arith.constant 146 : index
    %396 = memref.load %arg2[%c146] : memref<360xf32, #tpu.memory_space<smem>>
    %397 = vector.broadcast %396 : f32 to vector<16x16xf32>
    %398 = arith.mulf %397, %383 : vector<16x16xf32>
    %399 = arith.addf %366, %398 : vector<16x16xf32>
    %c191 = arith.constant 191 : index
    %400 = memref.load %arg2[%c191] : memref<360xf32, #tpu.memory_space<smem>>
    %401 = vector.broadcast %400 : f32 to vector<16x16xf32>
    %402 = arith.mulf %401, %383 : vector<16x16xf32>
    %403 = arith.addf %370, %402 : vector<16x16xf32>
    %c236 = arith.constant 236 : index
    %404 = memref.load %arg2[%c236] : memref<360xf32, #tpu.memory_space<smem>>
    %405 = vector.broadcast %404 : f32 to vector<16x16xf32>
    %406 = arith.mulf %405, %383 : vector<16x16xf32>
    %407 = arith.addf %374, %406 : vector<16x16xf32>
    %c281 = arith.constant 281 : index
    %408 = memref.load %arg2[%c281] : memref<360xf32, #tpu.memory_space<smem>>
    %409 = vector.broadcast %408 : f32 to vector<16x16xf32>
    %410 = arith.mulf %409, %383 : vector<16x16xf32>
    %411 = arith.addf %378, %410 : vector<16x16xf32>
    %c326 = arith.constant 326 : index
    %412 = memref.load %arg2[%c326] : memref<360xf32, #tpu.memory_space<smem>>
    %413 = vector.broadcast %412 : f32 to vector<16x16xf32>
    %414 = arith.mulf %413, %383 : vector<16x16xf32>
    %415 = arith.addf %382, %414 : vector<16x16xf32>
    %416 = vector.extract_strided_slice %316 {offsets = [1, 0], sizes = [16, 16], strides = [1, 1]} : vector<18x18xf32> to vector<16x16xf32>
    %c12 = arith.constant 12 : index
    %417 = memref.load %arg2[%c12] : memref<360xf32, #tpu.memory_space<smem>>
    %418 = vector.broadcast %417 : f32 to vector<16x16xf32>
    %419 = arith.mulf %418, %416 : vector<16x16xf32>
    %420 = arith.addf %387, %419 : vector<16x16xf32>
    %c57 = arith.constant 57 : index
    %421 = memref.load %arg2[%c57] : memref<360xf32, #tpu.memory_space<smem>>
    %422 = vector.broadcast %421 : f32 to vector<16x16xf32>
    %423 = arith.mulf %422, %416 : vector<16x16xf32>
    %424 = arith.addf %391, %423 : vector<16x16xf32>
    %c102 = arith.constant 102 : index
    %425 = memref.load %arg2[%c102] : memref<360xf32, #tpu.memory_space<smem>>
    %426 = vector.broadcast %425 : f32 to vector<16x16xf32>
    %427 = arith.mulf %426, %416 : vector<16x16xf32>
    %428 = arith.addf %395, %427 : vector<16x16xf32>
    %c147 = arith.constant 147 : index
    %429 = memref.load %arg2[%c147] : memref<360xf32, #tpu.memory_space<smem>>
    %430 = vector.broadcast %429 : f32 to vector<16x16xf32>
    %431 = arith.mulf %430, %416 : vector<16x16xf32>
    %432 = arith.addf %399, %431 : vector<16x16xf32>
    %c192 = arith.constant 192 : index
    %433 = memref.load %arg2[%c192] : memref<360xf32, #tpu.memory_space<smem>>
    %434 = vector.broadcast %433 : f32 to vector<16x16xf32>
    %435 = arith.mulf %434, %416 : vector<16x16xf32>
    %436 = arith.addf %403, %435 : vector<16x16xf32>
    %c237 = arith.constant 237 : index
    %437 = memref.load %arg2[%c237] : memref<360xf32, #tpu.memory_space<smem>>
    %438 = vector.broadcast %437 : f32 to vector<16x16xf32>
    %439 = arith.mulf %438, %416 : vector<16x16xf32>
    %440 = arith.addf %407, %439 : vector<16x16xf32>
    %c282 = arith.constant 282 : index
    %441 = memref.load %arg2[%c282] : memref<360xf32, #tpu.memory_space<smem>>
    %442 = vector.broadcast %441 : f32 to vector<16x16xf32>
    %443 = arith.mulf %442, %416 : vector<16x16xf32>
    %444 = arith.addf %411, %443 : vector<16x16xf32>
    %c327 = arith.constant 327 : index
    %445 = memref.load %arg2[%c327] : memref<360xf32, #tpu.memory_space<smem>>
    %446 = vector.broadcast %445 : f32 to vector<16x16xf32>
    %447 = arith.mulf %446, %416 : vector<16x16xf32>
    %448 = arith.addf %415, %447 : vector<16x16xf32>
    %449 = vector.extract_strided_slice %316 {offsets = [1, 1], sizes = [16, 16], strides = [1, 1]} : vector<18x18xf32> to vector<16x16xf32>
    %c13 = arith.constant 13 : index
    %450 = memref.load %arg2[%c13] : memref<360xf32, #tpu.memory_space<smem>>
    %451 = vector.broadcast %450 : f32 to vector<16x16xf32>
    %452 = arith.mulf %451, %449 : vector<16x16xf32>
    %453 = arith.addf %420, %452 : vector<16x16xf32>
    %c58 = arith.constant 58 : index
    %454 = memref.load %arg2[%c58] : memref<360xf32, #tpu.memory_space<smem>>
    %455 = vector.broadcast %454 : f32 to vector<16x16xf32>
    %456 = arith.mulf %455, %449 : vector<16x16xf32>
    %457 = arith.addf %424, %456 : vector<16x16xf32>
    %c103 = arith.constant 103 : index
    %458 = memref.load %arg2[%c103] : memref<360xf32, #tpu.memory_space<smem>>
    %459 = vector.broadcast %458 : f32 to vector<16x16xf32>
    %460 = arith.mulf %459, %449 : vector<16x16xf32>
    %461 = arith.addf %428, %460 : vector<16x16xf32>
    %c148 = arith.constant 148 : index
    %462 = memref.load %arg2[%c148] : memref<360xf32, #tpu.memory_space<smem>>
    %463 = vector.broadcast %462 : f32 to vector<16x16xf32>
    %464 = arith.mulf %463, %449 : vector<16x16xf32>
    %465 = arith.addf %432, %464 : vector<16x16xf32>
    %c193 = arith.constant 193 : index
    %466 = memref.load %arg2[%c193] : memref<360xf32, #tpu.memory_space<smem>>
    %467 = vector.broadcast %466 : f32 to vector<16x16xf32>
    %468 = arith.mulf %467, %449 : vector<16x16xf32>
    %469 = arith.addf %436, %468 : vector<16x16xf32>
    %c238 = arith.constant 238 : index
    %470 = memref.load %arg2[%c238] : memref<360xf32, #tpu.memory_space<smem>>
    %471 = vector.broadcast %470 : f32 to vector<16x16xf32>
    %472 = arith.mulf %471, %449 : vector<16x16xf32>
    %473 = arith.addf %440, %472 : vector<16x16xf32>
    %c283 = arith.constant 283 : index
    %474 = memref.load %arg2[%c283] : memref<360xf32, #tpu.memory_space<smem>>
    %475 = vector.broadcast %474 : f32 to vector<16x16xf32>
    %476 = arith.mulf %475, %449 : vector<16x16xf32>
    %477 = arith.addf %444, %476 : vector<16x16xf32>
    %c328 = arith.constant 328 : index
    %478 = memref.load %arg2[%c328] : memref<360xf32, #tpu.memory_space<smem>>
    %479 = vector.broadcast %478 : f32 to vector<16x16xf32>
    %480 = arith.mulf %479, %449 : vector<16x16xf32>
    %481 = arith.addf %448, %480 : vector<16x16xf32>
    %482 = vector.extract_strided_slice %316 {offsets = [1, 2], sizes = [16, 16], strides = [1, 1]} : vector<18x18xf32> to vector<16x16xf32>
    %c14 = arith.constant 14 : index
    %483 = memref.load %arg2[%c14] : memref<360xf32, #tpu.memory_space<smem>>
    %484 = vector.broadcast %483 : f32 to vector<16x16xf32>
    %485 = arith.mulf %484, %482 : vector<16x16xf32>
    %486 = arith.addf %453, %485 : vector<16x16xf32>
    %c59 = arith.constant 59 : index
    %487 = memref.load %arg2[%c59] : memref<360xf32, #tpu.memory_space<smem>>
    %488 = vector.broadcast %487 : f32 to vector<16x16xf32>
    %489 = arith.mulf %488, %482 : vector<16x16xf32>
    %490 = arith.addf %457, %489 : vector<16x16xf32>
    %c104 = arith.constant 104 : index
    %491 = memref.load %arg2[%c104] : memref<360xf32, #tpu.memory_space<smem>>
    %492 = vector.broadcast %491 : f32 to vector<16x16xf32>
    %493 = arith.mulf %492, %482 : vector<16x16xf32>
    %494 = arith.addf %461, %493 : vector<16x16xf32>
    %c149 = arith.constant 149 : index
    %495 = memref.load %arg2[%c149] : memref<360xf32, #tpu.memory_space<smem>>
    %496 = vector.broadcast %495 : f32 to vector<16x16xf32>
    %497 = arith.mulf %496, %482 : vector<16x16xf32>
    %498 = arith.addf %465, %497 : vector<16x16xf32>
    %c194 = arith.constant 194 : index
    %499 = memref.load %arg2[%c194] : memref<360xf32, #tpu.memory_space<smem>>
    %500 = vector.broadcast %499 : f32 to vector<16x16xf32>
    %501 = arith.mulf %500, %482 : vector<16x16xf32>
    %502 = arith.addf %469, %501 : vector<16x16xf32>
    %c239 = arith.constant 239 : index
    %503 = memref.load %arg2[%c239] : memref<360xf32, #tpu.memory_space<smem>>
    %504 = vector.broadcast %503 : f32 to vector<16x16xf32>
    %505 = arith.mulf %504, %482 : vector<16x16xf32>
    %506 = arith.addf %473, %505 : vector<16x16xf32>
    %c284 = arith.constant 284 : index
    %507 = memref.load %arg2[%c284] : memref<360xf32, #tpu.memory_space<smem>>
    %508 = vector.broadcast %507 : f32 to vector<16x16xf32>
    %509 = arith.mulf %508, %482 : vector<16x16xf32>
    %510 = arith.addf %477, %509 : vector<16x16xf32>
    %c329 = arith.constant 329 : index
    %511 = memref.load %arg2[%c329] : memref<360xf32, #tpu.memory_space<smem>>
    %512 = vector.broadcast %511 : f32 to vector<16x16xf32>
    %513 = arith.mulf %512, %482 : vector<16x16xf32>
    %514 = arith.addf %481, %513 : vector<16x16xf32>
    %515 = vector.extract_strided_slice %316 {offsets = [2, 0], sizes = [16, 16], strides = [1, 1]} : vector<18x18xf32> to vector<16x16xf32>
    %c15 = arith.constant 15 : index
    %516 = memref.load %arg2[%c15] : memref<360xf32, #tpu.memory_space<smem>>
    %517 = vector.broadcast %516 : f32 to vector<16x16xf32>
    %518 = arith.mulf %517, %515 : vector<16x16xf32>
    %519 = arith.addf %486, %518 : vector<16x16xf32>
    %c60 = arith.constant 60 : index
    %520 = memref.load %arg2[%c60] : memref<360xf32, #tpu.memory_space<smem>>
    %521 = vector.broadcast %520 : f32 to vector<16x16xf32>
    %522 = arith.mulf %521, %515 : vector<16x16xf32>
    %523 = arith.addf %490, %522 : vector<16x16xf32>
    %c105 = arith.constant 105 : index
    %524 = memref.load %arg2[%c105] : memref<360xf32, #tpu.memory_space<smem>>
    %525 = vector.broadcast %524 : f32 to vector<16x16xf32>
    %526 = arith.mulf %525, %515 : vector<16x16xf32>
    %527 = arith.addf %494, %526 : vector<16x16xf32>
    %c150 = arith.constant 150 : index
    %528 = memref.load %arg2[%c150] : memref<360xf32, #tpu.memory_space<smem>>
    %529 = vector.broadcast %528 : f32 to vector<16x16xf32>
    %530 = arith.mulf %529, %515 : vector<16x16xf32>
    %531 = arith.addf %498, %530 : vector<16x16xf32>
    %c195 = arith.constant 195 : index
    %532 = memref.load %arg2[%c195] : memref<360xf32, #tpu.memory_space<smem>>
    %533 = vector.broadcast %532 : f32 to vector<16x16xf32>
    %534 = arith.mulf %533, %515 : vector<16x16xf32>
    %535 = arith.addf %502, %534 : vector<16x16xf32>
    %c240 = arith.constant 240 : index
    %536 = memref.load %arg2[%c240] : memref<360xf32, #tpu.memory_space<smem>>
    %537 = vector.broadcast %536 : f32 to vector<16x16xf32>
    %538 = arith.mulf %537, %515 : vector<16x16xf32>
    %539 = arith.addf %506, %538 : vector<16x16xf32>
    %c285 = arith.constant 285 : index
    %540 = memref.load %arg2[%c285] : memref<360xf32, #tpu.memory_space<smem>>
    %541 = vector.broadcast %540 : f32 to vector<16x16xf32>
    %542 = arith.mulf %541, %515 : vector<16x16xf32>
    %543 = arith.addf %510, %542 : vector<16x16xf32>
    %c330 = arith.constant 330 : index
    %544 = memref.load %arg2[%c330] : memref<360xf32, #tpu.memory_space<smem>>
    %545 = vector.broadcast %544 : f32 to vector<16x16xf32>
    %546 = arith.mulf %545, %515 : vector<16x16xf32>
    %547 = arith.addf %514, %546 : vector<16x16xf32>
    %548 = vector.extract_strided_slice %316 {offsets = [2, 1], sizes = [16, 16], strides = [1, 1]} : vector<18x18xf32> to vector<16x16xf32>
    %c16 = arith.constant 16 : index
    %549 = memref.load %arg2[%c16] : memref<360xf32, #tpu.memory_space<smem>>
    %550 = vector.broadcast %549 : f32 to vector<16x16xf32>
    %551 = arith.mulf %550, %548 : vector<16x16xf32>
    %552 = arith.addf %519, %551 : vector<16x16xf32>
    %c61 = arith.constant 61 : index
    %553 = memref.load %arg2[%c61] : memref<360xf32, #tpu.memory_space<smem>>
    %554 = vector.broadcast %553 : f32 to vector<16x16xf32>
    %555 = arith.mulf %554, %548 : vector<16x16xf32>
    %556 = arith.addf %523, %555 : vector<16x16xf32>
    %c106 = arith.constant 106 : index
    %557 = memref.load %arg2[%c106] : memref<360xf32, #tpu.memory_space<smem>>
    %558 = vector.broadcast %557 : f32 to vector<16x16xf32>
    %559 = arith.mulf %558, %548 : vector<16x16xf32>
    %560 = arith.addf %527, %559 : vector<16x16xf32>
    %c151 = arith.constant 151 : index
    %561 = memref.load %arg2[%c151] : memref<360xf32, #tpu.memory_space<smem>>
    %562 = vector.broadcast %561 : f32 to vector<16x16xf32>
    %563 = arith.mulf %562, %548 : vector<16x16xf32>
    %564 = arith.addf %531, %563 : vector<16x16xf32>
    %c196 = arith.constant 196 : index
    %565 = memref.load %arg2[%c196] : memref<360xf32, #tpu.memory_space<smem>>
    %566 = vector.broadcast %565 : f32 to vector<16x16xf32>
    %567 = arith.mulf %566, %548 : vector<16x16xf32>
    %568 = arith.addf %535, %567 : vector<16x16xf32>
    %c241 = arith.constant 241 : index
    %569 = memref.load %arg2[%c241] : memref<360xf32, #tpu.memory_space<smem>>
    %570 = vector.broadcast %569 : f32 to vector<16x16xf32>
    %571 = arith.mulf %570, %548 : vector<16x16xf32>
    %572 = arith.addf %539, %571 : vector<16x16xf32>
    %c286 = arith.constant 286 : index
    %573 = memref.load %arg2[%c286] : memref<360xf32, #tpu.memory_space<smem>>
    %574 = vector.broadcast %573 : f32 to vector<16x16xf32>
    %575 = arith.mulf %574, %548 : vector<16x16xf32>
    %576 = arith.addf %543, %575 : vector<16x16xf32>
    %c331 = arith.constant 331 : index
    %577 = memref.load %arg2[%c331] : memref<360xf32, #tpu.memory_space<smem>>
    %578 = vector.broadcast %577 : f32 to vector<16x16xf32>
    %579 = arith.mulf %578, %548 : vector<16x16xf32>
    %580 = arith.addf %547, %579 : vector<16x16xf32>
    %581 = vector.extract_strided_slice %316 {offsets = [2, 2], sizes = [16, 16], strides = [1, 1]} : vector<18x18xf32> to vector<16x16xf32>
    %c17 = arith.constant 17 : index
    %582 = memref.load %arg2[%c17] : memref<360xf32, #tpu.memory_space<smem>>
    %583 = vector.broadcast %582 : f32 to vector<16x16xf32>
    %584 = arith.mulf %583, %581 : vector<16x16xf32>
    %585 = arith.addf %552, %584 : vector<16x16xf32>
    %c62 = arith.constant 62 : index
    %586 = memref.load %arg2[%c62] : memref<360xf32, #tpu.memory_space<smem>>
    %587 = vector.broadcast %586 : f32 to vector<16x16xf32>
    %588 = arith.mulf %587, %581 : vector<16x16xf32>
    %589 = arith.addf %556, %588 : vector<16x16xf32>
    %c107 = arith.constant 107 : index
    %590 = memref.load %arg2[%c107] : memref<360xf32, #tpu.memory_space<smem>>
    %591 = vector.broadcast %590 : f32 to vector<16x16xf32>
    %592 = arith.mulf %591, %581 : vector<16x16xf32>
    %593 = arith.addf %560, %592 : vector<16x16xf32>
    %c152 = arith.constant 152 : index
    %594 = memref.load %arg2[%c152] : memref<360xf32, #tpu.memory_space<smem>>
    %595 = vector.broadcast %594 : f32 to vector<16x16xf32>
    %596 = arith.mulf %595, %581 : vector<16x16xf32>
    %597 = arith.addf %564, %596 : vector<16x16xf32>
    %c197 = arith.constant 197 : index
    %598 = memref.load %arg2[%c197] : memref<360xf32, #tpu.memory_space<smem>>
    %599 = vector.broadcast %598 : f32 to vector<16x16xf32>
    %600 = arith.mulf %599, %581 : vector<16x16xf32>
    %601 = arith.addf %568, %600 : vector<16x16xf32>
    %c242 = arith.constant 242 : index
    %602 = memref.load %arg2[%c242] : memref<360xf32, #tpu.memory_space<smem>>
    %603 = vector.broadcast %602 : f32 to vector<16x16xf32>
    %604 = arith.mulf %603, %581 : vector<16x16xf32>
    %605 = arith.addf %572, %604 : vector<16x16xf32>
    %c287 = arith.constant 287 : index
    %606 = memref.load %arg2[%c287] : memref<360xf32, #tpu.memory_space<smem>>
    %607 = vector.broadcast %606 : f32 to vector<16x16xf32>
    %608 = arith.mulf %607, %581 : vector<16x16xf32>
    %609 = arith.addf %576, %608 : vector<16x16xf32>
    %c332 = arith.constant 332 : index
    %610 = memref.load %arg2[%c332] : memref<360xf32, #tpu.memory_space<smem>>
    %611 = vector.broadcast %610 : f32 to vector<16x16xf32>
    %612 = arith.mulf %611, %581 : vector<16x16xf32>
    %613 = arith.addf %580, %612 : vector<16x16xf32>
    %c0_16 = arith.constant 0 : index
    %c2_17 = arith.constant 2 : index
    %c0_18 = arith.constant 0 : index
    %c0_19 = arith.constant 0 : index
    %614 = vector.load %arg1[%c0_16, %c2_17, %c0_18, %c0_19] : memref<1x5x18x18xf32, #tpu.memory_space<vmem>>, vector<1x1x18x18xf32>
    %615 = vector.shape_cast %614 : vector<1x1x18x18xf32> to vector<18x18xf32>
    %616 = vector.extract_strided_slice %615 {offsets = [0, 0], sizes = [16, 16], strides = [1, 1]} : vector<18x18xf32> to vector<16x16xf32>
    %c18 = arith.constant 18 : index
    %617 = memref.load %arg2[%c18] : memref<360xf32, #tpu.memory_space<smem>>
    %618 = vector.broadcast %617 : f32 to vector<16x16xf32>
    %619 = arith.mulf %618, %616 : vector<16x16xf32>
    %620 = arith.addf %585, %619 : vector<16x16xf32>
    %c63 = arith.constant 63 : index
    %621 = memref.load %arg2[%c63] : memref<360xf32, #tpu.memory_space<smem>>
    %622 = vector.broadcast %621 : f32 to vector<16x16xf32>
    %623 = arith.mulf %622, %616 : vector<16x16xf32>
    %624 = arith.addf %589, %623 : vector<16x16xf32>
    %c108 = arith.constant 108 : index
    %625 = memref.load %arg2[%c108] : memref<360xf32, #tpu.memory_space<smem>>
    %626 = vector.broadcast %625 : f32 to vector<16x16xf32>
    %627 = arith.mulf %626, %616 : vector<16x16xf32>
    %628 = arith.addf %593, %627 : vector<16x16xf32>
    %c153 = arith.constant 153 : index
    %629 = memref.load %arg2[%c153] : memref<360xf32, #tpu.memory_space<smem>>
    %630 = vector.broadcast %629 : f32 to vector<16x16xf32>
    %631 = arith.mulf %630, %616 : vector<16x16xf32>
    %632 = arith.addf %597, %631 : vector<16x16xf32>
    %c198 = arith.constant 198 : index
    %633 = memref.load %arg2[%c198] : memref<360xf32, #tpu.memory_space<smem>>
    %634 = vector.broadcast %633 : f32 to vector<16x16xf32>
    %635 = arith.mulf %634, %616 : vector<16x16xf32>
    %636 = arith.addf %601, %635 : vector<16x16xf32>
    %c243 = arith.constant 243 : index
    %637 = memref.load %arg2[%c243] : memref<360xf32, #tpu.memory_space<smem>>
    %638 = vector.broadcast %637 : f32 to vector<16x16xf32>
    %639 = arith.mulf %638, %616 : vector<16x16xf32>
    %640 = arith.addf %605, %639 : vector<16x16xf32>
    %c288 = arith.constant 288 : index
    %641 = memref.load %arg2[%c288] : memref<360xf32, #tpu.memory_space<smem>>
    %642 = vector.broadcast %641 : f32 to vector<16x16xf32>
    %643 = arith.mulf %642, %616 : vector<16x16xf32>
    %644 = arith.addf %609, %643 : vector<16x16xf32>
    %c333 = arith.constant 333 : index
    %645 = memref.load %arg2[%c333] : memref<360xf32, #tpu.memory_space<smem>>
    %646 = vector.broadcast %645 : f32 to vector<16x16xf32>
    %647 = arith.mulf %646, %616 : vector<16x16xf32>
    %648 = arith.addf %613, %647 : vector<16x16xf32>
    %649 = vector.extract_strided_slice %615 {offsets = [0, 1], sizes = [16, 16], strides = [1, 1]} : vector<18x18xf32> to vector<16x16xf32>
    %c19 = arith.constant 19 : index
    %650 = memref.load %arg2[%c19] : memref<360xf32, #tpu.memory_space<smem>>
    %651 = vector.broadcast %650 : f32 to vector<16x16xf32>
    %652 = arith.mulf %651, %649 : vector<16x16xf32>
    %653 = arith.addf %620, %652 : vector<16x16xf32>
    %c64 = arith.constant 64 : index
    %654 = memref.load %arg2[%c64] : memref<360xf32, #tpu.memory_space<smem>>
    %655 = vector.broadcast %654 : f32 to vector<16x16xf32>
    %656 = arith.mulf %655, %649 : vector<16x16xf32>
    %657 = arith.addf %624, %656 : vector<16x16xf32>
    %c109 = arith.constant 109 : index
    %658 = memref.load %arg2[%c109] : memref<360xf32, #tpu.memory_space<smem>>
    %659 = vector.broadcast %658 : f32 to vector<16x16xf32>
    %660 = arith.mulf %659, %649 : vector<16x16xf32>
    %661 = arith.addf %628, %660 : vector<16x16xf32>
    %c154 = arith.constant 154 : index
    %662 = memref.load %arg2[%c154] : memref<360xf32, #tpu.memory_space<smem>>
    %663 = vector.broadcast %662 : f32 to vector<16x16xf32>
    %664 = arith.mulf %663, %649 : vector<16x16xf32>
    %665 = arith.addf %632, %664 : vector<16x16xf32>
    %c199 = arith.constant 199 : index
    %666 = memref.load %arg2[%c199] : memref<360xf32, #tpu.memory_space<smem>>
    %667 = vector.broadcast %666 : f32 to vector<16x16xf32>
    %668 = arith.mulf %667, %649 : vector<16x16xf32>
    %669 = arith.addf %636, %668 : vector<16x16xf32>
    %c244 = arith.constant 244 : index
    %670 = memref.load %arg2[%c244] : memref<360xf32, #tpu.memory_space<smem>>
    %671 = vector.broadcast %670 : f32 to vector<16x16xf32>
    %672 = arith.mulf %671, %649 : vector<16x16xf32>
    %673 = arith.addf %640, %672 : vector<16x16xf32>
    %c289 = arith.constant 289 : index
    %674 = memref.load %arg2[%c289] : memref<360xf32, #tpu.memory_space<smem>>
    %675 = vector.broadcast %674 : f32 to vector<16x16xf32>
    %676 = arith.mulf %675, %649 : vector<16x16xf32>
    %677 = arith.addf %644, %676 : vector<16x16xf32>
    %c334 = arith.constant 334 : index
    %678 = memref.load %arg2[%c334] : memref<360xf32, #tpu.memory_space<smem>>
    %679 = vector.broadcast %678 : f32 to vector<16x16xf32>
    %680 = arith.mulf %679, %649 : vector<16x16xf32>
    %681 = arith.addf %648, %680 : vector<16x16xf32>
    %682 = vector.extract_strided_slice %615 {offsets = [0, 2], sizes = [16, 16], strides = [1, 1]} : vector<18x18xf32> to vector<16x16xf32>
    %c20 = arith.constant 20 : index
    %683 = memref.load %arg2[%c20] : memref<360xf32, #tpu.memory_space<smem>>
    %684 = vector.broadcast %683 : f32 to vector<16x16xf32>
    %685 = arith.mulf %684, %682 : vector<16x16xf32>
    %686 = arith.addf %653, %685 : vector<16x16xf32>
    %c65 = arith.constant 65 : index
    %687 = memref.load %arg2[%c65] : memref<360xf32, #tpu.memory_space<smem>>
    %688 = vector.broadcast %687 : f32 to vector<16x16xf32>
    %689 = arith.mulf %688, %682 : vector<16x16xf32>
    %690 = arith.addf %657, %689 : vector<16x16xf32>
    %c110 = arith.constant 110 : index
    %691 = memref.load %arg2[%c110] : memref<360xf32, #tpu.memory_space<smem>>
    %692 = vector.broadcast %691 : f32 to vector<16x16xf32>
    %693 = arith.mulf %692, %682 : vector<16x16xf32>
    %694 = arith.addf %661, %693 : vector<16x16xf32>
    %c155 = arith.constant 155 : index
    %695 = memref.load %arg2[%c155] : memref<360xf32, #tpu.memory_space<smem>>
    %696 = vector.broadcast %695 : f32 to vector<16x16xf32>
    %697 = arith.mulf %696, %682 : vector<16x16xf32>
    %698 = arith.addf %665, %697 : vector<16x16xf32>
    %c200 = arith.constant 200 : index
    %699 = memref.load %arg2[%c200] : memref<360xf32, #tpu.memory_space<smem>>
    %700 = vector.broadcast %699 : f32 to vector<16x16xf32>
    %701 = arith.mulf %700, %682 : vector<16x16xf32>
    %702 = arith.addf %669, %701 : vector<16x16xf32>
    %c245 = arith.constant 245 : index
    %703 = memref.load %arg2[%c245] : memref<360xf32, #tpu.memory_space<smem>>
    %704 = vector.broadcast %703 : f32 to vector<16x16xf32>
    %705 = arith.mulf %704, %682 : vector<16x16xf32>
    %706 = arith.addf %673, %705 : vector<16x16xf32>
    %c290 = arith.constant 290 : index
    %707 = memref.load %arg2[%c290] : memref<360xf32, #tpu.memory_space<smem>>
    %708 = vector.broadcast %707 : f32 to vector<16x16xf32>
    %709 = arith.mulf %708, %682 : vector<16x16xf32>
    %710 = arith.addf %677, %709 : vector<16x16xf32>
    %c335 = arith.constant 335 : index
    %711 = memref.load %arg2[%c335] : memref<360xf32, #tpu.memory_space<smem>>
    %712 = vector.broadcast %711 : f32 to vector<16x16xf32>
    %713 = arith.mulf %712, %682 : vector<16x16xf32>
    %714 = arith.addf %681, %713 : vector<16x16xf32>
    %715 = vector.extract_strided_slice %615 {offsets = [1, 0], sizes = [16, 16], strides = [1, 1]} : vector<18x18xf32> to vector<16x16xf32>
    %c21 = arith.constant 21 : index
    %716 = memref.load %arg2[%c21] : memref<360xf32, #tpu.memory_space<smem>>
    %717 = vector.broadcast %716 : f32 to vector<16x16xf32>
    %718 = arith.mulf %717, %715 : vector<16x16xf32>
    %719 = arith.addf %686, %718 : vector<16x16xf32>
    %c66 = arith.constant 66 : index
    %720 = memref.load %arg2[%c66] : memref<360xf32, #tpu.memory_space<smem>>
    %721 = vector.broadcast %720 : f32 to vector<16x16xf32>
    %722 = arith.mulf %721, %715 : vector<16x16xf32>
    %723 = arith.addf %690, %722 : vector<16x16xf32>
    %c111 = arith.constant 111 : index
    %724 = memref.load %arg2[%c111] : memref<360xf32, #tpu.memory_space<smem>>
    %725 = vector.broadcast %724 : f32 to vector<16x16xf32>
    %726 = arith.mulf %725, %715 : vector<16x16xf32>
    %727 = arith.addf %694, %726 : vector<16x16xf32>
    %c156 = arith.constant 156 : index
    %728 = memref.load %arg2[%c156] : memref<360xf32, #tpu.memory_space<smem>>
    %729 = vector.broadcast %728 : f32 to vector<16x16xf32>
    %730 = arith.mulf %729, %715 : vector<16x16xf32>
    %731 = arith.addf %698, %730 : vector<16x16xf32>
    %c201 = arith.constant 201 : index
    %732 = memref.load %arg2[%c201] : memref<360xf32, #tpu.memory_space<smem>>
    %733 = vector.broadcast %732 : f32 to vector<16x16xf32>
    %734 = arith.mulf %733, %715 : vector<16x16xf32>
    %735 = arith.addf %702, %734 : vector<16x16xf32>
    %c246 = arith.constant 246 : index
    %736 = memref.load %arg2[%c246] : memref<360xf32, #tpu.memory_space<smem>>
    %737 = vector.broadcast %736 : f32 to vector<16x16xf32>
    %738 = arith.mulf %737, %715 : vector<16x16xf32>
    %739 = arith.addf %706, %738 : vector<16x16xf32>
    %c291 = arith.constant 291 : index
    %740 = memref.load %arg2[%c291] : memref<360xf32, #tpu.memory_space<smem>>
    %741 = vector.broadcast %740 : f32 to vector<16x16xf32>
    %742 = arith.mulf %741, %715 : vector<16x16xf32>
    %743 = arith.addf %710, %742 : vector<16x16xf32>
    %c336 = arith.constant 336 : index
    %744 = memref.load %arg2[%c336] : memref<360xf32, #tpu.memory_space<smem>>
    %745 = vector.broadcast %744 : f32 to vector<16x16xf32>
    %746 = arith.mulf %745, %715 : vector<16x16xf32>
    %747 = arith.addf %714, %746 : vector<16x16xf32>
    %748 = vector.extract_strided_slice %615 {offsets = [1, 1], sizes = [16, 16], strides = [1, 1]} : vector<18x18xf32> to vector<16x16xf32>
    %c22 = arith.constant 22 : index
    %749 = memref.load %arg2[%c22] : memref<360xf32, #tpu.memory_space<smem>>
    %750 = vector.broadcast %749 : f32 to vector<16x16xf32>
    %751 = arith.mulf %750, %748 : vector<16x16xf32>
    %752 = arith.addf %719, %751 : vector<16x16xf32>
    %c67 = arith.constant 67 : index
    %753 = memref.load %arg2[%c67] : memref<360xf32, #tpu.memory_space<smem>>
    %754 = vector.broadcast %753 : f32 to vector<16x16xf32>
    %755 = arith.mulf %754, %748 : vector<16x16xf32>
    %756 = arith.addf %723, %755 : vector<16x16xf32>
    %c112 = arith.constant 112 : index
    %757 = memref.load %arg2[%c112] : memref<360xf32, #tpu.memory_space<smem>>
    %758 = vector.broadcast %757 : f32 to vector<16x16xf32>
    %759 = arith.mulf %758, %748 : vector<16x16xf32>
    %760 = arith.addf %727, %759 : vector<16x16xf32>
    %c157 = arith.constant 157 : index
    %761 = memref.load %arg2[%c157] : memref<360xf32, #tpu.memory_space<smem>>
    %762 = vector.broadcast %761 : f32 to vector<16x16xf32>
    %763 = arith.mulf %762, %748 : vector<16x16xf32>
    %764 = arith.addf %731, %763 : vector<16x16xf32>
    %c202 = arith.constant 202 : index
    %765 = memref.load %arg2[%c202] : memref<360xf32, #tpu.memory_space<smem>>
    %766 = vector.broadcast %765 : f32 to vector<16x16xf32>
    %767 = arith.mulf %766, %748 : vector<16x16xf32>
    %768 = arith.addf %735, %767 : vector<16x16xf32>
    %c247 = arith.constant 247 : index
    %769 = memref.load %arg2[%c247] : memref<360xf32, #tpu.memory_space<smem>>
    %770 = vector.broadcast %769 : f32 to vector<16x16xf32>
    %771 = arith.mulf %770, %748 : vector<16x16xf32>
    %772 = arith.addf %739, %771 : vector<16x16xf32>
    %c292 = arith.constant 292 : index
    %773 = memref.load %arg2[%c292] : memref<360xf32, #tpu.memory_space<smem>>
    %774 = vector.broadcast %773 : f32 to vector<16x16xf32>
    %775 = arith.mulf %774, %748 : vector<16x16xf32>
    %776 = arith.addf %743, %775 : vector<16x16xf32>
    %c337 = arith.constant 337 : index
    %777 = memref.load %arg2[%c337] : memref<360xf32, #tpu.memory_space<smem>>
    %778 = vector.broadcast %777 : f32 to vector<16x16xf32>
    %779 = arith.mulf %778, %748 : vector<16x16xf32>
    %780 = arith.addf %747, %779 : vector<16x16xf32>
    %781 = vector.extract_strided_slice %615 {offsets = [1, 2], sizes = [16, 16], strides = [1, 1]} : vector<18x18xf32> to vector<16x16xf32>
    %c23 = arith.constant 23 : index
    %782 = memref.load %arg2[%c23] : memref<360xf32, #tpu.memory_space<smem>>
    %783 = vector.broadcast %782 : f32 to vector<16x16xf32>
    %784 = arith.mulf %783, %781 : vector<16x16xf32>
    %785 = arith.addf %752, %784 : vector<16x16xf32>
    %c68 = arith.constant 68 : index
    %786 = memref.load %arg2[%c68] : memref<360xf32, #tpu.memory_space<smem>>
    %787 = vector.broadcast %786 : f32 to vector<16x16xf32>
    %788 = arith.mulf %787, %781 : vector<16x16xf32>
    %789 = arith.addf %756, %788 : vector<16x16xf32>
    %c113 = arith.constant 113 : index
    %790 = memref.load %arg2[%c113] : memref<360xf32, #tpu.memory_space<smem>>
    %791 = vector.broadcast %790 : f32 to vector<16x16xf32>
    %792 = arith.mulf %791, %781 : vector<16x16xf32>
    %793 = arith.addf %760, %792 : vector<16x16xf32>
    %c158 = arith.constant 158 : index
    %794 = memref.load %arg2[%c158] : memref<360xf32, #tpu.memory_space<smem>>
    %795 = vector.broadcast %794 : f32 to vector<16x16xf32>
    %796 = arith.mulf %795, %781 : vector<16x16xf32>
    %797 = arith.addf %764, %796 : vector<16x16xf32>
    %c203 = arith.constant 203 : index
    %798 = memref.load %arg2[%c203] : memref<360xf32, #tpu.memory_space<smem>>
    %799 = vector.broadcast %798 : f32 to vector<16x16xf32>
    %800 = arith.mulf %799, %781 : vector<16x16xf32>
    %801 = arith.addf %768, %800 : vector<16x16xf32>
    %c248 = arith.constant 248 : index
    %802 = memref.load %arg2[%c248] : memref<360xf32, #tpu.memory_space<smem>>
    %803 = vector.broadcast %802 : f32 to vector<16x16xf32>
    %804 = arith.mulf %803, %781 : vector<16x16xf32>
    %805 = arith.addf %772, %804 : vector<16x16xf32>
    %c293 = arith.constant 293 : index
    %806 = memref.load %arg2[%c293] : memref<360xf32, #tpu.memory_space<smem>>
    %807 = vector.broadcast %806 : f32 to vector<16x16xf32>
    %808 = arith.mulf %807, %781 : vector<16x16xf32>
    %809 = arith.addf %776, %808 : vector<16x16xf32>
    %c338 = arith.constant 338 : index
    %810 = memref.load %arg2[%c338] : memref<360xf32, #tpu.memory_space<smem>>
    %811 = vector.broadcast %810 : f32 to vector<16x16xf32>
    %812 = arith.mulf %811, %781 : vector<16x16xf32>
    %813 = arith.addf %780, %812 : vector<16x16xf32>
    %814 = vector.extract_strided_slice %615 {offsets = [2, 0], sizes = [16, 16], strides = [1, 1]} : vector<18x18xf32> to vector<16x16xf32>
    %c24 = arith.constant 24 : index
    %815 = memref.load %arg2[%c24] : memref<360xf32, #tpu.memory_space<smem>>
    %816 = vector.broadcast %815 : f32 to vector<16x16xf32>
    %817 = arith.mulf %816, %814 : vector<16x16xf32>
    %818 = arith.addf %785, %817 : vector<16x16xf32>
    %c69 = arith.constant 69 : index
    %819 = memref.load %arg2[%c69] : memref<360xf32, #tpu.memory_space<smem>>
    %820 = vector.broadcast %819 : f32 to vector<16x16xf32>
    %821 = arith.mulf %820, %814 : vector<16x16xf32>
    %822 = arith.addf %789, %821 : vector<16x16xf32>
    %c114 = arith.constant 114 : index
    %823 = memref.load %arg2[%c114] : memref<360xf32, #tpu.memory_space<smem>>
    %824 = vector.broadcast %823 : f32 to vector<16x16xf32>
    %825 = arith.mulf %824, %814 : vector<16x16xf32>
    %826 = arith.addf %793, %825 : vector<16x16xf32>
    %c159 = arith.constant 159 : index
    %827 = memref.load %arg2[%c159] : memref<360xf32, #tpu.memory_space<smem>>
    %828 = vector.broadcast %827 : f32 to vector<16x16xf32>
    %829 = arith.mulf %828, %814 : vector<16x16xf32>
    %830 = arith.addf %797, %829 : vector<16x16xf32>
    %c204 = arith.constant 204 : index
    %831 = memref.load %arg2[%c204] : memref<360xf32, #tpu.memory_space<smem>>
    %832 = vector.broadcast %831 : f32 to vector<16x16xf32>
    %833 = arith.mulf %832, %814 : vector<16x16xf32>
    %834 = arith.addf %801, %833 : vector<16x16xf32>
    %c249 = arith.constant 249 : index
    %835 = memref.load %arg2[%c249] : memref<360xf32, #tpu.memory_space<smem>>
    %836 = vector.broadcast %835 : f32 to vector<16x16xf32>
    %837 = arith.mulf %836, %814 : vector<16x16xf32>
    %838 = arith.addf %805, %837 : vector<16x16xf32>
    %c294 = arith.constant 294 : index
    %839 = memref.load %arg2[%c294] : memref<360xf32, #tpu.memory_space<smem>>
    %840 = vector.broadcast %839 : f32 to vector<16x16xf32>
    %841 = arith.mulf %840, %814 : vector<16x16xf32>
    %842 = arith.addf %809, %841 : vector<16x16xf32>
    %c339 = arith.constant 339 : index
    %843 = memref.load %arg2[%c339] : memref<360xf32, #tpu.memory_space<smem>>
    %844 = vector.broadcast %843 : f32 to vector<16x16xf32>
    %845 = arith.mulf %844, %814 : vector<16x16xf32>
    %846 = arith.addf %813, %845 : vector<16x16xf32>
    %847 = vector.extract_strided_slice %615 {offsets = [2, 1], sizes = [16, 16], strides = [1, 1]} : vector<18x18xf32> to vector<16x16xf32>
    %c25 = arith.constant 25 : index
    %848 = memref.load %arg2[%c25] : memref<360xf32, #tpu.memory_space<smem>>
    %849 = vector.broadcast %848 : f32 to vector<16x16xf32>
    %850 = arith.mulf %849, %847 : vector<16x16xf32>
    %851 = arith.addf %818, %850 : vector<16x16xf32>
    %c70 = arith.constant 70 : index
    %852 = memref.load %arg2[%c70] : memref<360xf32, #tpu.memory_space<smem>>
    %853 = vector.broadcast %852 : f32 to vector<16x16xf32>
    %854 = arith.mulf %853, %847 : vector<16x16xf32>
    %855 = arith.addf %822, %854 : vector<16x16xf32>
    %c115 = arith.constant 115 : index
    %856 = memref.load %arg2[%c115] : memref<360xf32, #tpu.memory_space<smem>>
    %857 = vector.broadcast %856 : f32 to vector<16x16xf32>
    %858 = arith.mulf %857, %847 : vector<16x16xf32>
    %859 = arith.addf %826, %858 : vector<16x16xf32>
    %c160 = arith.constant 160 : index
    %860 = memref.load %arg2[%c160] : memref<360xf32, #tpu.memory_space<smem>>
    %861 = vector.broadcast %860 : f32 to vector<16x16xf32>
    %862 = arith.mulf %861, %847 : vector<16x16xf32>
    %863 = arith.addf %830, %862 : vector<16x16xf32>
    %c205 = arith.constant 205 : index
    %864 = memref.load %arg2[%c205] : memref<360xf32, #tpu.memory_space<smem>>
    %865 = vector.broadcast %864 : f32 to vector<16x16xf32>
    %866 = arith.mulf %865, %847 : vector<16x16xf32>
    %867 = arith.addf %834, %866 : vector<16x16xf32>
    %c250 = arith.constant 250 : index
    %868 = memref.load %arg2[%c250] : memref<360xf32, #tpu.memory_space<smem>>
    %869 = vector.broadcast %868 : f32 to vector<16x16xf32>
    %870 = arith.mulf %869, %847 : vector<16x16xf32>
    %871 = arith.addf %838, %870 : vector<16x16xf32>
    %c295 = arith.constant 295 : index
    %872 = memref.load %arg2[%c295] : memref<360xf32, #tpu.memory_space<smem>>
    %873 = vector.broadcast %872 : f32 to vector<16x16xf32>
    %874 = arith.mulf %873, %847 : vector<16x16xf32>
    %875 = arith.addf %842, %874 : vector<16x16xf32>
    %c340 = arith.constant 340 : index
    %876 = memref.load %arg2[%c340] : memref<360xf32, #tpu.memory_space<smem>>
    %877 = vector.broadcast %876 : f32 to vector<16x16xf32>
    %878 = arith.mulf %877, %847 : vector<16x16xf32>
    %879 = arith.addf %846, %878 : vector<16x16xf32>
    %880 = vector.extract_strided_slice %615 {offsets = [2, 2], sizes = [16, 16], strides = [1, 1]} : vector<18x18xf32> to vector<16x16xf32>
    %c26 = arith.constant 26 : index
    %881 = memref.load %arg2[%c26] : memref<360xf32, #tpu.memory_space<smem>>
    %882 = vector.broadcast %881 : f32 to vector<16x16xf32>
    %883 = arith.mulf %882, %880 : vector<16x16xf32>
    %884 = arith.addf %851, %883 : vector<16x16xf32>
    %c71 = arith.constant 71 : index
    %885 = memref.load %arg2[%c71] : memref<360xf32, #tpu.memory_space<smem>>
    %886 = vector.broadcast %885 : f32 to vector<16x16xf32>
    %887 = arith.mulf %886, %880 : vector<16x16xf32>
    %888 = arith.addf %855, %887 : vector<16x16xf32>
    %c116 = arith.constant 116 : index
    %889 = memref.load %arg2[%c116] : memref<360xf32, #tpu.memory_space<smem>>
    %890 = vector.broadcast %889 : f32 to vector<16x16xf32>
    %891 = arith.mulf %890, %880 : vector<16x16xf32>
    %892 = arith.addf %859, %891 : vector<16x16xf32>
    %c161 = arith.constant 161 : index
    %893 = memref.load %arg2[%c161] : memref<360xf32, #tpu.memory_space<smem>>
    %894 = vector.broadcast %893 : f32 to vector<16x16xf32>
    %895 = arith.mulf %894, %880 : vector<16x16xf32>
    %896 = arith.addf %863, %895 : vector<16x16xf32>
    %c206 = arith.constant 206 : index
    %897 = memref.load %arg2[%c206] : memref<360xf32, #tpu.memory_space<smem>>
    %898 = vector.broadcast %897 : f32 to vector<16x16xf32>
    %899 = arith.mulf %898, %880 : vector<16x16xf32>
    %900 = arith.addf %867, %899 : vector<16x16xf32>
    %c251 = arith.constant 251 : index
    %901 = memref.load %arg2[%c251] : memref<360xf32, #tpu.memory_space<smem>>
    %902 = vector.broadcast %901 : f32 to vector<16x16xf32>
    %903 = arith.mulf %902, %880 : vector<16x16xf32>
    %904 = arith.addf %871, %903 : vector<16x16xf32>
    %c296 = arith.constant 296 : index
    %905 = memref.load %arg2[%c296] : memref<360xf32, #tpu.memory_space<smem>>
    %906 = vector.broadcast %905 : f32 to vector<16x16xf32>
    %907 = arith.mulf %906, %880 : vector<16x16xf32>
    %908 = arith.addf %875, %907 : vector<16x16xf32>
    %c341 = arith.constant 341 : index
    %909 = memref.load %arg2[%c341] : memref<360xf32, #tpu.memory_space<smem>>
    %910 = vector.broadcast %909 : f32 to vector<16x16xf32>
    %911 = arith.mulf %910, %880 : vector<16x16xf32>
    %912 = arith.addf %879, %911 : vector<16x16xf32>
    %c0_20 = arith.constant 0 : index
    %c3_21 = arith.constant 3 : index
    %c0_22 = arith.constant 0 : index
    %c0_23 = arith.constant 0 : index
    %913 = vector.load %arg1[%c0_20, %c3_21, %c0_22, %c0_23] : memref<1x5x18x18xf32, #tpu.memory_space<vmem>>, vector<1x1x18x18xf32>
    %914 = vector.shape_cast %913 : vector<1x1x18x18xf32> to vector<18x18xf32>
    %915 = vector.extract_strided_slice %914 {offsets = [0, 0], sizes = [16, 16], strides = [1, 1]} : vector<18x18xf32> to vector<16x16xf32>
    %c27 = arith.constant 27 : index
    %916 = memref.load %arg2[%c27] : memref<360xf32, #tpu.memory_space<smem>>
    %917 = vector.broadcast %916 : f32 to vector<16x16xf32>
    %918 = arith.mulf %917, %915 : vector<16x16xf32>
    %919 = arith.addf %884, %918 : vector<16x16xf32>
    %c72 = arith.constant 72 : index
    %920 = memref.load %arg2[%c72] : memref<360xf32, #tpu.memory_space<smem>>
    %921 = vector.broadcast %920 : f32 to vector<16x16xf32>
    %922 = arith.mulf %921, %915 : vector<16x16xf32>
    %923 = arith.addf %888, %922 : vector<16x16xf32>
    %c117 = arith.constant 117 : index
    %924 = memref.load %arg2[%c117] : memref<360xf32, #tpu.memory_space<smem>>
    %925 = vector.broadcast %924 : f32 to vector<16x16xf32>
    %926 = arith.mulf %925, %915 : vector<16x16xf32>
    %927 = arith.addf %892, %926 : vector<16x16xf32>
    %c162 = arith.constant 162 : index
    %928 = memref.load %arg2[%c162] : memref<360xf32, #tpu.memory_space<smem>>
    %929 = vector.broadcast %928 : f32 to vector<16x16xf32>
    %930 = arith.mulf %929, %915 : vector<16x16xf32>
    %931 = arith.addf %896, %930 : vector<16x16xf32>
    %c207 = arith.constant 207 : index
    %932 = memref.load %arg2[%c207] : memref<360xf32, #tpu.memory_space<smem>>
    %933 = vector.broadcast %932 : f32 to vector<16x16xf32>
    %934 = arith.mulf %933, %915 : vector<16x16xf32>
    %935 = arith.addf %900, %934 : vector<16x16xf32>
    %c252 = arith.constant 252 : index
    %936 = memref.load %arg2[%c252] : memref<360xf32, #tpu.memory_space<smem>>
    %937 = vector.broadcast %936 : f32 to vector<16x16xf32>
    %938 = arith.mulf %937, %915 : vector<16x16xf32>
    %939 = arith.addf %904, %938 : vector<16x16xf32>
    %c297 = arith.constant 297 : index
    %940 = memref.load %arg2[%c297] : memref<360xf32, #tpu.memory_space<smem>>
    %941 = vector.broadcast %940 : f32 to vector<16x16xf32>
    %942 = arith.mulf %941, %915 : vector<16x16xf32>
    %943 = arith.addf %908, %942 : vector<16x16xf32>
    %c342 = arith.constant 342 : index
    %944 = memref.load %arg2[%c342] : memref<360xf32, #tpu.memory_space<smem>>
    %945 = vector.broadcast %944 : f32 to vector<16x16xf32>
    %946 = arith.mulf %945, %915 : vector<16x16xf32>
    %947 = arith.addf %912, %946 : vector<16x16xf32>
    %948 = vector.extract_strided_slice %914 {offsets = [0, 1], sizes = [16, 16], strides = [1, 1]} : vector<18x18xf32> to vector<16x16xf32>
    %c28 = arith.constant 28 : index
    %949 = memref.load %arg2[%c28] : memref<360xf32, #tpu.memory_space<smem>>
    %950 = vector.broadcast %949 : f32 to vector<16x16xf32>
    %951 = arith.mulf %950, %948 : vector<16x16xf32>
    %952 = arith.addf %919, %951 : vector<16x16xf32>
    %c73 = arith.constant 73 : index
    %953 = memref.load %arg2[%c73] : memref<360xf32, #tpu.memory_space<smem>>
    %954 = vector.broadcast %953 : f32 to vector<16x16xf32>
    %955 = arith.mulf %954, %948 : vector<16x16xf32>
    %956 = arith.addf %923, %955 : vector<16x16xf32>
    %c118 = arith.constant 118 : index
    %957 = memref.load %arg2[%c118] : memref<360xf32, #tpu.memory_space<smem>>
    %958 = vector.broadcast %957 : f32 to vector<16x16xf32>
    %959 = arith.mulf %958, %948 : vector<16x16xf32>
    %960 = arith.addf %927, %959 : vector<16x16xf32>
    %c163 = arith.constant 163 : index
    %961 = memref.load %arg2[%c163] : memref<360xf32, #tpu.memory_space<smem>>
    %962 = vector.broadcast %961 : f32 to vector<16x16xf32>
    %963 = arith.mulf %962, %948 : vector<16x16xf32>
    %964 = arith.addf %931, %963 : vector<16x16xf32>
    %c208 = arith.constant 208 : index
    %965 = memref.load %arg2[%c208] : memref<360xf32, #tpu.memory_space<smem>>
    %966 = vector.broadcast %965 : f32 to vector<16x16xf32>
    %967 = arith.mulf %966, %948 : vector<16x16xf32>
    %968 = arith.addf %935, %967 : vector<16x16xf32>
    %c253 = arith.constant 253 : index
    %969 = memref.load %arg2[%c253] : memref<360xf32, #tpu.memory_space<smem>>
    %970 = vector.broadcast %969 : f32 to vector<16x16xf32>
    %971 = arith.mulf %970, %948 : vector<16x16xf32>
    %972 = arith.addf %939, %971 : vector<16x16xf32>
    %c298 = arith.constant 298 : index
    %973 = memref.load %arg2[%c298] : memref<360xf32, #tpu.memory_space<smem>>
    %974 = vector.broadcast %973 : f32 to vector<16x16xf32>
    %975 = arith.mulf %974, %948 : vector<16x16xf32>
    %976 = arith.addf %943, %975 : vector<16x16xf32>
    %c343 = arith.constant 343 : index
    %977 = memref.load %arg2[%c343] : memref<360xf32, #tpu.memory_space<smem>>
    %978 = vector.broadcast %977 : f32 to vector<16x16xf32>
    %979 = arith.mulf %978, %948 : vector<16x16xf32>
    %980 = arith.addf %947, %979 : vector<16x16xf32>
    %981 = vector.extract_strided_slice %914 {offsets = [0, 2], sizes = [16, 16], strides = [1, 1]} : vector<18x18xf32> to vector<16x16xf32>
    %c29 = arith.constant 29 : index
    %982 = memref.load %arg2[%c29] : memref<360xf32, #tpu.memory_space<smem>>
    %983 = vector.broadcast %982 : f32 to vector<16x16xf32>
    %984 = arith.mulf %983, %981 : vector<16x16xf32>
    %985 = arith.addf %952, %984 : vector<16x16xf32>
    %c74 = arith.constant 74 : index
    %986 = memref.load %arg2[%c74] : memref<360xf32, #tpu.memory_space<smem>>
    %987 = vector.broadcast %986 : f32 to vector<16x16xf32>
    %988 = arith.mulf %987, %981 : vector<16x16xf32>
    %989 = arith.addf %956, %988 : vector<16x16xf32>
    %c119 = arith.constant 119 : index
    %990 = memref.load %arg2[%c119] : memref<360xf32, #tpu.memory_space<smem>>
    %991 = vector.broadcast %990 : f32 to vector<16x16xf32>
    %992 = arith.mulf %991, %981 : vector<16x16xf32>
    %993 = arith.addf %960, %992 : vector<16x16xf32>
    %c164 = arith.constant 164 : index
    %994 = memref.load %arg2[%c164] : memref<360xf32, #tpu.memory_space<smem>>
    %995 = vector.broadcast %994 : f32 to vector<16x16xf32>
    %996 = arith.mulf %995, %981 : vector<16x16xf32>
    %997 = arith.addf %964, %996 : vector<16x16xf32>
    %c209 = arith.constant 209 : index
    %998 = memref.load %arg2[%c209] : memref<360xf32, #tpu.memory_space<smem>>
    %999 = vector.broadcast %998 : f32 to vector<16x16xf32>
    %1000 = arith.mulf %999, %981 : vector<16x16xf32>
    %1001 = arith.addf %968, %1000 : vector<16x16xf32>
    %c254 = arith.constant 254 : index
    %1002 = memref.load %arg2[%c254] : memref<360xf32, #tpu.memory_space<smem>>
    %1003 = vector.broadcast %1002 : f32 to vector<16x16xf32>
    %1004 = arith.mulf %1003, %981 : vector<16x16xf32>
    %1005 = arith.addf %972, %1004 : vector<16x16xf32>
    %c299 = arith.constant 299 : index
    %1006 = memref.load %arg2[%c299] : memref<360xf32, #tpu.memory_space<smem>>
    %1007 = vector.broadcast %1006 : f32 to vector<16x16xf32>
    %1008 = arith.mulf %1007, %981 : vector<16x16xf32>
    %1009 = arith.addf %976, %1008 : vector<16x16xf32>
    %c344 = arith.constant 344 : index
    %1010 = memref.load %arg2[%c344] : memref<360xf32, #tpu.memory_space<smem>>
    %1011 = vector.broadcast %1010 : f32 to vector<16x16xf32>
    %1012 = arith.mulf %1011, %981 : vector<16x16xf32>
    %1013 = arith.addf %980, %1012 : vector<16x16xf32>
    %1014 = vector.extract_strided_slice %914 {offsets = [1, 0], sizes = [16, 16], strides = [1, 1]} : vector<18x18xf32> to vector<16x16xf32>
    %c30 = arith.constant 30 : index
    %1015 = memref.load %arg2[%c30] : memref<360xf32, #tpu.memory_space<smem>>
    %1016 = vector.broadcast %1015 : f32 to vector<16x16xf32>
    %1017 = arith.mulf %1016, %1014 : vector<16x16xf32>
    %1018 = arith.addf %985, %1017 : vector<16x16xf32>
    %c75 = arith.constant 75 : index
    %1019 = memref.load %arg2[%c75] : memref<360xf32, #tpu.memory_space<smem>>
    %1020 = vector.broadcast %1019 : f32 to vector<16x16xf32>
    %1021 = arith.mulf %1020, %1014 : vector<16x16xf32>
    %1022 = arith.addf %989, %1021 : vector<16x16xf32>
    %c120 = arith.constant 120 : index
    %1023 = memref.load %arg2[%c120] : memref<360xf32, #tpu.memory_space<smem>>
    %1024 = vector.broadcast %1023 : f32 to vector<16x16xf32>
    %1025 = arith.mulf %1024, %1014 : vector<16x16xf32>
    %1026 = arith.addf %993, %1025 : vector<16x16xf32>
    %c165 = arith.constant 165 : index
    %1027 = memref.load %arg2[%c165] : memref<360xf32, #tpu.memory_space<smem>>
    %1028 = vector.broadcast %1027 : f32 to vector<16x16xf32>
    %1029 = arith.mulf %1028, %1014 : vector<16x16xf32>
    %1030 = arith.addf %997, %1029 : vector<16x16xf32>
    %c210 = arith.constant 210 : index
    %1031 = memref.load %arg2[%c210] : memref<360xf32, #tpu.memory_space<smem>>
    %1032 = vector.broadcast %1031 : f32 to vector<16x16xf32>
    %1033 = arith.mulf %1032, %1014 : vector<16x16xf32>
    %1034 = arith.addf %1001, %1033 : vector<16x16xf32>
    %c255 = arith.constant 255 : index
    %1035 = memref.load %arg2[%c255] : memref<360xf32, #tpu.memory_space<smem>>
    %1036 = vector.broadcast %1035 : f32 to vector<16x16xf32>
    %1037 = arith.mulf %1036, %1014 : vector<16x16xf32>
    %1038 = arith.addf %1005, %1037 : vector<16x16xf32>
    %c300 = arith.constant 300 : index
    %1039 = memref.load %arg2[%c300] : memref<360xf32, #tpu.memory_space<smem>>
    %1040 = vector.broadcast %1039 : f32 to vector<16x16xf32>
    %1041 = arith.mulf %1040, %1014 : vector<16x16xf32>
    %1042 = arith.addf %1009, %1041 : vector<16x16xf32>
    %c345 = arith.constant 345 : index
    %1043 = memref.load %arg2[%c345] : memref<360xf32, #tpu.memory_space<smem>>
    %1044 = vector.broadcast %1043 : f32 to vector<16x16xf32>
    %1045 = arith.mulf %1044, %1014 : vector<16x16xf32>
    %1046 = arith.addf %1013, %1045 : vector<16x16xf32>
    %1047 = vector.extract_strided_slice %914 {offsets = [1, 1], sizes = [16, 16], strides = [1, 1]} : vector<18x18xf32> to vector<16x16xf32>
    %c31 = arith.constant 31 : index
    %1048 = memref.load %arg2[%c31] : memref<360xf32, #tpu.memory_space<smem>>
    %1049 = vector.broadcast %1048 : f32 to vector<16x16xf32>
    %1050 = arith.mulf %1049, %1047 : vector<16x16xf32>
    %1051 = arith.addf %1018, %1050 : vector<16x16xf32>
    %c76 = arith.constant 76 : index
    %1052 = memref.load %arg2[%c76] : memref<360xf32, #tpu.memory_space<smem>>
    %1053 = vector.broadcast %1052 : f32 to vector<16x16xf32>
    %1054 = arith.mulf %1053, %1047 : vector<16x16xf32>
    %1055 = arith.addf %1022, %1054 : vector<16x16xf32>
    %c121 = arith.constant 121 : index
    %1056 = memref.load %arg2[%c121] : memref<360xf32, #tpu.memory_space<smem>>
    %1057 = vector.broadcast %1056 : f32 to vector<16x16xf32>
    %1058 = arith.mulf %1057, %1047 : vector<16x16xf32>
    %1059 = arith.addf %1026, %1058 : vector<16x16xf32>
    %c166 = arith.constant 166 : index
    %1060 = memref.load %arg2[%c166] : memref<360xf32, #tpu.memory_space<smem>>
    %1061 = vector.broadcast %1060 : f32 to vector<16x16xf32>
    %1062 = arith.mulf %1061, %1047 : vector<16x16xf32>
    %1063 = arith.addf %1030, %1062 : vector<16x16xf32>
    %c211 = arith.constant 211 : index
    %1064 = memref.load %arg2[%c211] : memref<360xf32, #tpu.memory_space<smem>>
    %1065 = vector.broadcast %1064 : f32 to vector<16x16xf32>
    %1066 = arith.mulf %1065, %1047 : vector<16x16xf32>
    %1067 = arith.addf %1034, %1066 : vector<16x16xf32>
    %c256 = arith.constant 256 : index
    %1068 = memref.load %arg2[%c256] : memref<360xf32, #tpu.memory_space<smem>>
    %1069 = vector.broadcast %1068 : f32 to vector<16x16xf32>
    %1070 = arith.mulf %1069, %1047 : vector<16x16xf32>
    %1071 = arith.addf %1038, %1070 : vector<16x16xf32>
    %c301 = arith.constant 301 : index
    %1072 = memref.load %arg2[%c301] : memref<360xf32, #tpu.memory_space<smem>>
    %1073 = vector.broadcast %1072 : f32 to vector<16x16xf32>
    %1074 = arith.mulf %1073, %1047 : vector<16x16xf32>
    %1075 = arith.addf %1042, %1074 : vector<16x16xf32>
    %c346 = arith.constant 346 : index
    %1076 = memref.load %arg2[%c346] : memref<360xf32, #tpu.memory_space<smem>>
    %1077 = vector.broadcast %1076 : f32 to vector<16x16xf32>
    %1078 = arith.mulf %1077, %1047 : vector<16x16xf32>
    %1079 = arith.addf %1046, %1078 : vector<16x16xf32>
    %1080 = vector.extract_strided_slice %914 {offsets = [1, 2], sizes = [16, 16], strides = [1, 1]} : vector<18x18xf32> to vector<16x16xf32>
    %c32 = arith.constant 32 : index
    %1081 = memref.load %arg2[%c32] : memref<360xf32, #tpu.memory_space<smem>>
    %1082 = vector.broadcast %1081 : f32 to vector<16x16xf32>
    %1083 = arith.mulf %1082, %1080 : vector<16x16xf32>
    %1084 = arith.addf %1051, %1083 : vector<16x16xf32>
    %c77 = arith.constant 77 : index
    %1085 = memref.load %arg2[%c77] : memref<360xf32, #tpu.memory_space<smem>>
    %1086 = vector.broadcast %1085 : f32 to vector<16x16xf32>
    %1087 = arith.mulf %1086, %1080 : vector<16x16xf32>
    %1088 = arith.addf %1055, %1087 : vector<16x16xf32>
    %c122 = arith.constant 122 : index
    %1089 = memref.load %arg2[%c122] : memref<360xf32, #tpu.memory_space<smem>>
    %1090 = vector.broadcast %1089 : f32 to vector<16x16xf32>
    %1091 = arith.mulf %1090, %1080 : vector<16x16xf32>
    %1092 = arith.addf %1059, %1091 : vector<16x16xf32>
    %c167 = arith.constant 167 : index
    %1093 = memref.load %arg2[%c167] : memref<360xf32, #tpu.memory_space<smem>>
    %1094 = vector.broadcast %1093 : f32 to vector<16x16xf32>
    %1095 = arith.mulf %1094, %1080 : vector<16x16xf32>
    %1096 = arith.addf %1063, %1095 : vector<16x16xf32>
    %c212 = arith.constant 212 : index
    %1097 = memref.load %arg2[%c212] : memref<360xf32, #tpu.memory_space<smem>>
    %1098 = vector.broadcast %1097 : f32 to vector<16x16xf32>
    %1099 = arith.mulf %1098, %1080 : vector<16x16xf32>
    %1100 = arith.addf %1067, %1099 : vector<16x16xf32>
    %c257 = arith.constant 257 : index
    %1101 = memref.load %arg2[%c257] : memref<360xf32, #tpu.memory_space<smem>>
    %1102 = vector.broadcast %1101 : f32 to vector<16x16xf32>
    %1103 = arith.mulf %1102, %1080 : vector<16x16xf32>
    %1104 = arith.addf %1071, %1103 : vector<16x16xf32>
    %c302 = arith.constant 302 : index
    %1105 = memref.load %arg2[%c302] : memref<360xf32, #tpu.memory_space<smem>>
    %1106 = vector.broadcast %1105 : f32 to vector<16x16xf32>
    %1107 = arith.mulf %1106, %1080 : vector<16x16xf32>
    %1108 = arith.addf %1075, %1107 : vector<16x16xf32>
    %c347 = arith.constant 347 : index
    %1109 = memref.load %arg2[%c347] : memref<360xf32, #tpu.memory_space<smem>>
    %1110 = vector.broadcast %1109 : f32 to vector<16x16xf32>
    %1111 = arith.mulf %1110, %1080 : vector<16x16xf32>
    %1112 = arith.addf %1079, %1111 : vector<16x16xf32>
    %1113 = vector.extract_strided_slice %914 {offsets = [2, 0], sizes = [16, 16], strides = [1, 1]} : vector<18x18xf32> to vector<16x16xf32>
    %c33 = arith.constant 33 : index
    %1114 = memref.load %arg2[%c33] : memref<360xf32, #tpu.memory_space<smem>>
    %1115 = vector.broadcast %1114 : f32 to vector<16x16xf32>
    %1116 = arith.mulf %1115, %1113 : vector<16x16xf32>
    %1117 = arith.addf %1084, %1116 : vector<16x16xf32>
    %c78 = arith.constant 78 : index
    %1118 = memref.load %arg2[%c78] : memref<360xf32, #tpu.memory_space<smem>>
    %1119 = vector.broadcast %1118 : f32 to vector<16x16xf32>
    %1120 = arith.mulf %1119, %1113 : vector<16x16xf32>
    %1121 = arith.addf %1088, %1120 : vector<16x16xf32>
    %c123 = arith.constant 123 : index
    %1122 = memref.load %arg2[%c123] : memref<360xf32, #tpu.memory_space<smem>>
    %1123 = vector.broadcast %1122 : f32 to vector<16x16xf32>
    %1124 = arith.mulf %1123, %1113 : vector<16x16xf32>
    %1125 = arith.addf %1092, %1124 : vector<16x16xf32>
    %c168 = arith.constant 168 : index
    %1126 = memref.load %arg2[%c168] : memref<360xf32, #tpu.memory_space<smem>>
    %1127 = vector.broadcast %1126 : f32 to vector<16x16xf32>
    %1128 = arith.mulf %1127, %1113 : vector<16x16xf32>
    %1129 = arith.addf %1096, %1128 : vector<16x16xf32>
    %c213 = arith.constant 213 : index
    %1130 = memref.load %arg2[%c213] : memref<360xf32, #tpu.memory_space<smem>>
    %1131 = vector.broadcast %1130 : f32 to vector<16x16xf32>
    %1132 = arith.mulf %1131, %1113 : vector<16x16xf32>
    %1133 = arith.addf %1100, %1132 : vector<16x16xf32>
    %c258 = arith.constant 258 : index
    %1134 = memref.load %arg2[%c258] : memref<360xf32, #tpu.memory_space<smem>>
    %1135 = vector.broadcast %1134 : f32 to vector<16x16xf32>
    %1136 = arith.mulf %1135, %1113 : vector<16x16xf32>
    %1137 = arith.addf %1104, %1136 : vector<16x16xf32>
    %c303 = arith.constant 303 : index
    %1138 = memref.load %arg2[%c303] : memref<360xf32, #tpu.memory_space<smem>>
    %1139 = vector.broadcast %1138 : f32 to vector<16x16xf32>
    %1140 = arith.mulf %1139, %1113 : vector<16x16xf32>
    %1141 = arith.addf %1108, %1140 : vector<16x16xf32>
    %c348 = arith.constant 348 : index
    %1142 = memref.load %arg2[%c348] : memref<360xf32, #tpu.memory_space<smem>>
    %1143 = vector.broadcast %1142 : f32 to vector<16x16xf32>
    %1144 = arith.mulf %1143, %1113 : vector<16x16xf32>
    %1145 = arith.addf %1112, %1144 : vector<16x16xf32>
    %1146 = vector.extract_strided_slice %914 {offsets = [2, 1], sizes = [16, 16], strides = [1, 1]} : vector<18x18xf32> to vector<16x16xf32>
    %c34 = arith.constant 34 : index
    %1147 = memref.load %arg2[%c34] : memref<360xf32, #tpu.memory_space<smem>>
    %1148 = vector.broadcast %1147 : f32 to vector<16x16xf32>
    %1149 = arith.mulf %1148, %1146 : vector<16x16xf32>
    %1150 = arith.addf %1117, %1149 : vector<16x16xf32>
    %c79 = arith.constant 79 : index
    %1151 = memref.load %arg2[%c79] : memref<360xf32, #tpu.memory_space<smem>>
    %1152 = vector.broadcast %1151 : f32 to vector<16x16xf32>
    %1153 = arith.mulf %1152, %1146 : vector<16x16xf32>
    %1154 = arith.addf %1121, %1153 : vector<16x16xf32>
    %c124 = arith.constant 124 : index
    %1155 = memref.load %arg2[%c124] : memref<360xf32, #tpu.memory_space<smem>>
    %1156 = vector.broadcast %1155 : f32 to vector<16x16xf32>
    %1157 = arith.mulf %1156, %1146 : vector<16x16xf32>
    %1158 = arith.addf %1125, %1157 : vector<16x16xf32>
    %c169 = arith.constant 169 : index
    %1159 = memref.load %arg2[%c169] : memref<360xf32, #tpu.memory_space<smem>>
    %1160 = vector.broadcast %1159 : f32 to vector<16x16xf32>
    %1161 = arith.mulf %1160, %1146 : vector<16x16xf32>
    %1162 = arith.addf %1129, %1161 : vector<16x16xf32>
    %c214 = arith.constant 214 : index
    %1163 = memref.load %arg2[%c214] : memref<360xf32, #tpu.memory_space<smem>>
    %1164 = vector.broadcast %1163 : f32 to vector<16x16xf32>
    %1165 = arith.mulf %1164, %1146 : vector<16x16xf32>
    %1166 = arith.addf %1133, %1165 : vector<16x16xf32>
    %c259 = arith.constant 259 : index
    %1167 = memref.load %arg2[%c259] : memref<360xf32, #tpu.memory_space<smem>>
    %1168 = vector.broadcast %1167 : f32 to vector<16x16xf32>
    %1169 = arith.mulf %1168, %1146 : vector<16x16xf32>
    %1170 = arith.addf %1137, %1169 : vector<16x16xf32>
    %c304 = arith.constant 304 : index
    %1171 = memref.load %arg2[%c304] : memref<360xf32, #tpu.memory_space<smem>>
    %1172 = vector.broadcast %1171 : f32 to vector<16x16xf32>
    %1173 = arith.mulf %1172, %1146 : vector<16x16xf32>
    %1174 = arith.addf %1141, %1173 : vector<16x16xf32>
    %c349 = arith.constant 349 : index
    %1175 = memref.load %arg2[%c349] : memref<360xf32, #tpu.memory_space<smem>>
    %1176 = vector.broadcast %1175 : f32 to vector<16x16xf32>
    %1177 = arith.mulf %1176, %1146 : vector<16x16xf32>
    %1178 = arith.addf %1145, %1177 : vector<16x16xf32>
    %1179 = vector.extract_strided_slice %914 {offsets = [2, 2], sizes = [16, 16], strides = [1, 1]} : vector<18x18xf32> to vector<16x16xf32>
    %c35 = arith.constant 35 : index
    %1180 = memref.load %arg2[%c35] : memref<360xf32, #tpu.memory_space<smem>>
    %1181 = vector.broadcast %1180 : f32 to vector<16x16xf32>
    %1182 = arith.mulf %1181, %1179 : vector<16x16xf32>
    %1183 = arith.addf %1150, %1182 : vector<16x16xf32>
    %c80 = arith.constant 80 : index
    %1184 = memref.load %arg2[%c80] : memref<360xf32, #tpu.memory_space<smem>>
    %1185 = vector.broadcast %1184 : f32 to vector<16x16xf32>
    %1186 = arith.mulf %1185, %1179 : vector<16x16xf32>
    %1187 = arith.addf %1154, %1186 : vector<16x16xf32>
    %c125 = arith.constant 125 : index
    %1188 = memref.load %arg2[%c125] : memref<360xf32, #tpu.memory_space<smem>>
    %1189 = vector.broadcast %1188 : f32 to vector<16x16xf32>
    %1190 = arith.mulf %1189, %1179 : vector<16x16xf32>
    %1191 = arith.addf %1158, %1190 : vector<16x16xf32>
    %c170 = arith.constant 170 : index
    %1192 = memref.load %arg2[%c170] : memref<360xf32, #tpu.memory_space<smem>>
    %1193 = vector.broadcast %1192 : f32 to vector<16x16xf32>
    %1194 = arith.mulf %1193, %1179 : vector<16x16xf32>
    %1195 = arith.addf %1162, %1194 : vector<16x16xf32>
    %c215 = arith.constant 215 : index
    %1196 = memref.load %arg2[%c215] : memref<360xf32, #tpu.memory_space<smem>>
    %1197 = vector.broadcast %1196 : f32 to vector<16x16xf32>
    %1198 = arith.mulf %1197, %1179 : vector<16x16xf32>
    %1199 = arith.addf %1166, %1198 : vector<16x16xf32>
    %c260 = arith.constant 260 : index
    %1200 = memref.load %arg2[%c260] : memref<360xf32, #tpu.memory_space<smem>>
    %1201 = vector.broadcast %1200 : f32 to vector<16x16xf32>
    %1202 = arith.mulf %1201, %1179 : vector<16x16xf32>
    %1203 = arith.addf %1170, %1202 : vector<16x16xf32>
    %c305 = arith.constant 305 : index
    %1204 = memref.load %arg2[%c305] : memref<360xf32, #tpu.memory_space<smem>>
    %1205 = vector.broadcast %1204 : f32 to vector<16x16xf32>
    %1206 = arith.mulf %1205, %1179 : vector<16x16xf32>
    %1207 = arith.addf %1174, %1206 : vector<16x16xf32>
    %c350 = arith.constant 350 : index
    %1208 = memref.load %arg2[%c350] : memref<360xf32, #tpu.memory_space<smem>>
    %1209 = vector.broadcast %1208 : f32 to vector<16x16xf32>
    %1210 = arith.mulf %1209, %1179 : vector<16x16xf32>
    %1211 = arith.addf %1178, %1210 : vector<16x16xf32>
    %c0_24 = arith.constant 0 : index
    %c4_25 = arith.constant 4 : index
    %c0_26 = arith.constant 0 : index
    %c0_27 = arith.constant 0 : index
    %1212 = vector.load %arg1[%c0_24, %c4_25, %c0_26, %c0_27] : memref<1x5x18x18xf32, #tpu.memory_space<vmem>>, vector<1x1x18x18xf32>
    %1213 = vector.shape_cast %1212 : vector<1x1x18x18xf32> to vector<18x18xf32>
    %1214 = vector.extract_strided_slice %1213 {offsets = [0, 0], sizes = [16, 16], strides = [1, 1]} : vector<18x18xf32> to vector<16x16xf32>
    %c36 = arith.constant 36 : index
    %1215 = memref.load %arg2[%c36] : memref<360xf32, #tpu.memory_space<smem>>
    %1216 = vector.broadcast %1215 : f32 to vector<16x16xf32>
    %1217 = arith.mulf %1216, %1214 : vector<16x16xf32>
    %1218 = arith.addf %1183, %1217 : vector<16x16xf32>
    %c81 = arith.constant 81 : index
    %1219 = memref.load %arg2[%c81] : memref<360xf32, #tpu.memory_space<smem>>
    %1220 = vector.broadcast %1219 : f32 to vector<16x16xf32>
    %1221 = arith.mulf %1220, %1214 : vector<16x16xf32>
    %1222 = arith.addf %1187, %1221 : vector<16x16xf32>
    %c126 = arith.constant 126 : index
    %1223 = memref.load %arg2[%c126] : memref<360xf32, #tpu.memory_space<smem>>
    %1224 = vector.broadcast %1223 : f32 to vector<16x16xf32>
    %1225 = arith.mulf %1224, %1214 : vector<16x16xf32>
    %1226 = arith.addf %1191, %1225 : vector<16x16xf32>
    %c171 = arith.constant 171 : index
    %1227 = memref.load %arg2[%c171] : memref<360xf32, #tpu.memory_space<smem>>
    %1228 = vector.broadcast %1227 : f32 to vector<16x16xf32>
    %1229 = arith.mulf %1228, %1214 : vector<16x16xf32>
    %1230 = arith.addf %1195, %1229 : vector<16x16xf32>
    %c216 = arith.constant 216 : index
    %1231 = memref.load %arg2[%c216] : memref<360xf32, #tpu.memory_space<smem>>
    %1232 = vector.broadcast %1231 : f32 to vector<16x16xf32>
    %1233 = arith.mulf %1232, %1214 : vector<16x16xf32>
    %1234 = arith.addf %1199, %1233 : vector<16x16xf32>
    %c261 = arith.constant 261 : index
    %1235 = memref.load %arg2[%c261] : memref<360xf32, #tpu.memory_space<smem>>
    %1236 = vector.broadcast %1235 : f32 to vector<16x16xf32>
    %1237 = arith.mulf %1236, %1214 : vector<16x16xf32>
    %1238 = arith.addf %1203, %1237 : vector<16x16xf32>
    %c306 = arith.constant 306 : index
    %1239 = memref.load %arg2[%c306] : memref<360xf32, #tpu.memory_space<smem>>
    %1240 = vector.broadcast %1239 : f32 to vector<16x16xf32>
    %1241 = arith.mulf %1240, %1214 : vector<16x16xf32>
    %1242 = arith.addf %1207, %1241 : vector<16x16xf32>
    %c351 = arith.constant 351 : index
    %1243 = memref.load %arg2[%c351] : memref<360xf32, #tpu.memory_space<smem>>
    %1244 = vector.broadcast %1243 : f32 to vector<16x16xf32>
    %1245 = arith.mulf %1244, %1214 : vector<16x16xf32>
    %1246 = arith.addf %1211, %1245 : vector<16x16xf32>
    %1247 = vector.extract_strided_slice %1213 {offsets = [0, 1], sizes = [16, 16], strides = [1, 1]} : vector<18x18xf32> to vector<16x16xf32>
    %c37 = arith.constant 37 : index
    %1248 = memref.load %arg2[%c37] : memref<360xf32, #tpu.memory_space<smem>>
    %1249 = vector.broadcast %1248 : f32 to vector<16x16xf32>
    %1250 = arith.mulf %1249, %1247 : vector<16x16xf32>
    %1251 = arith.addf %1218, %1250 : vector<16x16xf32>
    %c82 = arith.constant 82 : index
    %1252 = memref.load %arg2[%c82] : memref<360xf32, #tpu.memory_space<smem>>
    %1253 = vector.broadcast %1252 : f32 to vector<16x16xf32>
    %1254 = arith.mulf %1253, %1247 : vector<16x16xf32>
    %1255 = arith.addf %1222, %1254 : vector<16x16xf32>
    %c127 = arith.constant 127 : index
    %1256 = memref.load %arg2[%c127] : memref<360xf32, #tpu.memory_space<smem>>
    %1257 = vector.broadcast %1256 : f32 to vector<16x16xf32>
    %1258 = arith.mulf %1257, %1247 : vector<16x16xf32>
    %1259 = arith.addf %1226, %1258 : vector<16x16xf32>
    %c172 = arith.constant 172 : index
    %1260 = memref.load %arg2[%c172] : memref<360xf32, #tpu.memory_space<smem>>
    %1261 = vector.broadcast %1260 : f32 to vector<16x16xf32>
    %1262 = arith.mulf %1261, %1247 : vector<16x16xf32>
    %1263 = arith.addf %1230, %1262 : vector<16x16xf32>
    %c217 = arith.constant 217 : index
    %1264 = memref.load %arg2[%c217] : memref<360xf32, #tpu.memory_space<smem>>
    %1265 = vector.broadcast %1264 : f32 to vector<16x16xf32>
    %1266 = arith.mulf %1265, %1247 : vector<16x16xf32>
    %1267 = arith.addf %1234, %1266 : vector<16x16xf32>
    %c262 = arith.constant 262 : index
    %1268 = memref.load %arg2[%c262] : memref<360xf32, #tpu.memory_space<smem>>
    %1269 = vector.broadcast %1268 : f32 to vector<16x16xf32>
    %1270 = arith.mulf %1269, %1247 : vector<16x16xf32>
    %1271 = arith.addf %1238, %1270 : vector<16x16xf32>
    %c307 = arith.constant 307 : index
    %1272 = memref.load %arg2[%c307] : memref<360xf32, #tpu.memory_space<smem>>
    %1273 = vector.broadcast %1272 : f32 to vector<16x16xf32>
    %1274 = arith.mulf %1273, %1247 : vector<16x16xf32>
    %1275 = arith.addf %1242, %1274 : vector<16x16xf32>
    %c352 = arith.constant 352 : index
    %1276 = memref.load %arg2[%c352] : memref<360xf32, #tpu.memory_space<smem>>
    %1277 = vector.broadcast %1276 : f32 to vector<16x16xf32>
    %1278 = arith.mulf %1277, %1247 : vector<16x16xf32>
    %1279 = arith.addf %1246, %1278 : vector<16x16xf32>
    %1280 = vector.extract_strided_slice %1213 {offsets = [0, 2], sizes = [16, 16], strides = [1, 1]} : vector<18x18xf32> to vector<16x16xf32>
    %c38 = arith.constant 38 : index
    %1281 = memref.load %arg2[%c38] : memref<360xf32, #tpu.memory_space<smem>>
    %1282 = vector.broadcast %1281 : f32 to vector<16x16xf32>
    %1283 = arith.mulf %1282, %1280 : vector<16x16xf32>
    %1284 = arith.addf %1251, %1283 : vector<16x16xf32>
    %c83 = arith.constant 83 : index
    %1285 = memref.load %arg2[%c83] : memref<360xf32, #tpu.memory_space<smem>>
    %1286 = vector.broadcast %1285 : f32 to vector<16x16xf32>
    %1287 = arith.mulf %1286, %1280 : vector<16x16xf32>
    %1288 = arith.addf %1255, %1287 : vector<16x16xf32>
    %c128 = arith.constant 128 : index
    %1289 = memref.load %arg2[%c128] : memref<360xf32, #tpu.memory_space<smem>>
    %1290 = vector.broadcast %1289 : f32 to vector<16x16xf32>
    %1291 = arith.mulf %1290, %1280 : vector<16x16xf32>
    %1292 = arith.addf %1259, %1291 : vector<16x16xf32>
    %c173 = arith.constant 173 : index
    %1293 = memref.load %arg2[%c173] : memref<360xf32, #tpu.memory_space<smem>>
    %1294 = vector.broadcast %1293 : f32 to vector<16x16xf32>
    %1295 = arith.mulf %1294, %1280 : vector<16x16xf32>
    %1296 = arith.addf %1263, %1295 : vector<16x16xf32>
    %c218 = arith.constant 218 : index
    %1297 = memref.load %arg2[%c218] : memref<360xf32, #tpu.memory_space<smem>>
    %1298 = vector.broadcast %1297 : f32 to vector<16x16xf32>
    %1299 = arith.mulf %1298, %1280 : vector<16x16xf32>
    %1300 = arith.addf %1267, %1299 : vector<16x16xf32>
    %c263 = arith.constant 263 : index
    %1301 = memref.load %arg2[%c263] : memref<360xf32, #tpu.memory_space<smem>>
    %1302 = vector.broadcast %1301 : f32 to vector<16x16xf32>
    %1303 = arith.mulf %1302, %1280 : vector<16x16xf32>
    %1304 = arith.addf %1271, %1303 : vector<16x16xf32>
    %c308 = arith.constant 308 : index
    %1305 = memref.load %arg2[%c308] : memref<360xf32, #tpu.memory_space<smem>>
    %1306 = vector.broadcast %1305 : f32 to vector<16x16xf32>
    %1307 = arith.mulf %1306, %1280 : vector<16x16xf32>
    %1308 = arith.addf %1275, %1307 : vector<16x16xf32>
    %c353 = arith.constant 353 : index
    %1309 = memref.load %arg2[%c353] : memref<360xf32, #tpu.memory_space<smem>>
    %1310 = vector.broadcast %1309 : f32 to vector<16x16xf32>
    %1311 = arith.mulf %1310, %1280 : vector<16x16xf32>
    %1312 = arith.addf %1279, %1311 : vector<16x16xf32>
    %1313 = vector.extract_strided_slice %1213 {offsets = [1, 0], sizes = [16, 16], strides = [1, 1]} : vector<18x18xf32> to vector<16x16xf32>
    %c39 = arith.constant 39 : index
    %1314 = memref.load %arg2[%c39] : memref<360xf32, #tpu.memory_space<smem>>
    %1315 = vector.broadcast %1314 : f32 to vector<16x16xf32>
    %1316 = arith.mulf %1315, %1313 : vector<16x16xf32>
    %1317 = arith.addf %1284, %1316 : vector<16x16xf32>
    %c84 = arith.constant 84 : index
    %1318 = memref.load %arg2[%c84] : memref<360xf32, #tpu.memory_space<smem>>
    %1319 = vector.broadcast %1318 : f32 to vector<16x16xf32>
    %1320 = arith.mulf %1319, %1313 : vector<16x16xf32>
    %1321 = arith.addf %1288, %1320 : vector<16x16xf32>
    %c129 = arith.constant 129 : index
    %1322 = memref.load %arg2[%c129] : memref<360xf32, #tpu.memory_space<smem>>
    %1323 = vector.broadcast %1322 : f32 to vector<16x16xf32>
    %1324 = arith.mulf %1323, %1313 : vector<16x16xf32>
    %1325 = arith.addf %1292, %1324 : vector<16x16xf32>
    %c174 = arith.constant 174 : index
    %1326 = memref.load %arg2[%c174] : memref<360xf32, #tpu.memory_space<smem>>
    %1327 = vector.broadcast %1326 : f32 to vector<16x16xf32>
    %1328 = arith.mulf %1327, %1313 : vector<16x16xf32>
    %1329 = arith.addf %1296, %1328 : vector<16x16xf32>
    %c219 = arith.constant 219 : index
    %1330 = memref.load %arg2[%c219] : memref<360xf32, #tpu.memory_space<smem>>
    %1331 = vector.broadcast %1330 : f32 to vector<16x16xf32>
    %1332 = arith.mulf %1331, %1313 : vector<16x16xf32>
    %1333 = arith.addf %1300, %1332 : vector<16x16xf32>
    %c264 = arith.constant 264 : index
    %1334 = memref.load %arg2[%c264] : memref<360xf32, #tpu.memory_space<smem>>
    %1335 = vector.broadcast %1334 : f32 to vector<16x16xf32>
    %1336 = arith.mulf %1335, %1313 : vector<16x16xf32>
    %1337 = arith.addf %1304, %1336 : vector<16x16xf32>
    %c309 = arith.constant 309 : index
    %1338 = memref.load %arg2[%c309] : memref<360xf32, #tpu.memory_space<smem>>
    %1339 = vector.broadcast %1338 : f32 to vector<16x16xf32>
    %1340 = arith.mulf %1339, %1313 : vector<16x16xf32>
    %1341 = arith.addf %1308, %1340 : vector<16x16xf32>
    %c354 = arith.constant 354 : index
    %1342 = memref.load %arg2[%c354] : memref<360xf32, #tpu.memory_space<smem>>
    %1343 = vector.broadcast %1342 : f32 to vector<16x16xf32>
    %1344 = arith.mulf %1343, %1313 : vector<16x16xf32>
    %1345 = arith.addf %1312, %1344 : vector<16x16xf32>
    %1346 = vector.extract_strided_slice %1213 {offsets = [1, 1], sizes = [16, 16], strides = [1, 1]} : vector<18x18xf32> to vector<16x16xf32>
    %c40 = arith.constant 40 : index
    %1347 = memref.load %arg2[%c40] : memref<360xf32, #tpu.memory_space<smem>>
    %1348 = vector.broadcast %1347 : f32 to vector<16x16xf32>
    %1349 = arith.mulf %1348, %1346 : vector<16x16xf32>
    %1350 = arith.addf %1317, %1349 : vector<16x16xf32>
    %c85 = arith.constant 85 : index
    %1351 = memref.load %arg2[%c85] : memref<360xf32, #tpu.memory_space<smem>>
    %1352 = vector.broadcast %1351 : f32 to vector<16x16xf32>
    %1353 = arith.mulf %1352, %1346 : vector<16x16xf32>
    %1354 = arith.addf %1321, %1353 : vector<16x16xf32>
    %c130 = arith.constant 130 : index
    %1355 = memref.load %arg2[%c130] : memref<360xf32, #tpu.memory_space<smem>>
    %1356 = vector.broadcast %1355 : f32 to vector<16x16xf32>
    %1357 = arith.mulf %1356, %1346 : vector<16x16xf32>
    %1358 = arith.addf %1325, %1357 : vector<16x16xf32>
    %c175 = arith.constant 175 : index
    %1359 = memref.load %arg2[%c175] : memref<360xf32, #tpu.memory_space<smem>>
    %1360 = vector.broadcast %1359 : f32 to vector<16x16xf32>
    %1361 = arith.mulf %1360, %1346 : vector<16x16xf32>
    %1362 = arith.addf %1329, %1361 : vector<16x16xf32>
    %c220 = arith.constant 220 : index
    %1363 = memref.load %arg2[%c220] : memref<360xf32, #tpu.memory_space<smem>>
    %1364 = vector.broadcast %1363 : f32 to vector<16x16xf32>
    %1365 = arith.mulf %1364, %1346 : vector<16x16xf32>
    %1366 = arith.addf %1333, %1365 : vector<16x16xf32>
    %c265 = arith.constant 265 : index
    %1367 = memref.load %arg2[%c265] : memref<360xf32, #tpu.memory_space<smem>>
    %1368 = vector.broadcast %1367 : f32 to vector<16x16xf32>
    %1369 = arith.mulf %1368, %1346 : vector<16x16xf32>
    %1370 = arith.addf %1337, %1369 : vector<16x16xf32>
    %c310 = arith.constant 310 : index
    %1371 = memref.load %arg2[%c310] : memref<360xf32, #tpu.memory_space<smem>>
    %1372 = vector.broadcast %1371 : f32 to vector<16x16xf32>
    %1373 = arith.mulf %1372, %1346 : vector<16x16xf32>
    %1374 = arith.addf %1341, %1373 : vector<16x16xf32>
    %c355 = arith.constant 355 : index
    %1375 = memref.load %arg2[%c355] : memref<360xf32, #tpu.memory_space<smem>>
    %1376 = vector.broadcast %1375 : f32 to vector<16x16xf32>
    %1377 = arith.mulf %1376, %1346 : vector<16x16xf32>
    %1378 = arith.addf %1345, %1377 : vector<16x16xf32>
    %1379 = vector.extract_strided_slice %1213 {offsets = [1, 2], sizes = [16, 16], strides = [1, 1]} : vector<18x18xf32> to vector<16x16xf32>
    %c41 = arith.constant 41 : index
    %1380 = memref.load %arg2[%c41] : memref<360xf32, #tpu.memory_space<smem>>
    %1381 = vector.broadcast %1380 : f32 to vector<16x16xf32>
    %1382 = arith.mulf %1381, %1379 : vector<16x16xf32>
    %1383 = arith.addf %1350, %1382 : vector<16x16xf32>
    %c86 = arith.constant 86 : index
    %1384 = memref.load %arg2[%c86] : memref<360xf32, #tpu.memory_space<smem>>
    %1385 = vector.broadcast %1384 : f32 to vector<16x16xf32>
    %1386 = arith.mulf %1385, %1379 : vector<16x16xf32>
    %1387 = arith.addf %1354, %1386 : vector<16x16xf32>
    %c131 = arith.constant 131 : index
    %1388 = memref.load %arg2[%c131] : memref<360xf32, #tpu.memory_space<smem>>
    %1389 = vector.broadcast %1388 : f32 to vector<16x16xf32>
    %1390 = arith.mulf %1389, %1379 : vector<16x16xf32>
    %1391 = arith.addf %1358, %1390 : vector<16x16xf32>
    %c176 = arith.constant 176 : index
    %1392 = memref.load %arg2[%c176] : memref<360xf32, #tpu.memory_space<smem>>
    %1393 = vector.broadcast %1392 : f32 to vector<16x16xf32>
    %1394 = arith.mulf %1393, %1379 : vector<16x16xf32>
    %1395 = arith.addf %1362, %1394 : vector<16x16xf32>
    %c221 = arith.constant 221 : index
    %1396 = memref.load %arg2[%c221] : memref<360xf32, #tpu.memory_space<smem>>
    %1397 = vector.broadcast %1396 : f32 to vector<16x16xf32>
    %1398 = arith.mulf %1397, %1379 : vector<16x16xf32>
    %1399 = arith.addf %1366, %1398 : vector<16x16xf32>
    %c266 = arith.constant 266 : index
    %1400 = memref.load %arg2[%c266] : memref<360xf32, #tpu.memory_space<smem>>
    %1401 = vector.broadcast %1400 : f32 to vector<16x16xf32>
    %1402 = arith.mulf %1401, %1379 : vector<16x16xf32>
    %1403 = arith.addf %1370, %1402 : vector<16x16xf32>
    %c311 = arith.constant 311 : index
    %1404 = memref.load %arg2[%c311] : memref<360xf32, #tpu.memory_space<smem>>
    %1405 = vector.broadcast %1404 : f32 to vector<16x16xf32>
    %1406 = arith.mulf %1405, %1379 : vector<16x16xf32>
    %1407 = arith.addf %1374, %1406 : vector<16x16xf32>
    %c356 = arith.constant 356 : index
    %1408 = memref.load %arg2[%c356] : memref<360xf32, #tpu.memory_space<smem>>
    %1409 = vector.broadcast %1408 : f32 to vector<16x16xf32>
    %1410 = arith.mulf %1409, %1379 : vector<16x16xf32>
    %1411 = arith.addf %1378, %1410 : vector<16x16xf32>
    %1412 = vector.extract_strided_slice %1213 {offsets = [2, 0], sizes = [16, 16], strides = [1, 1]} : vector<18x18xf32> to vector<16x16xf32>
    %c42 = arith.constant 42 : index
    %1413 = memref.load %arg2[%c42] : memref<360xf32, #tpu.memory_space<smem>>
    %1414 = vector.broadcast %1413 : f32 to vector<16x16xf32>
    %1415 = arith.mulf %1414, %1412 : vector<16x16xf32>
    %1416 = arith.addf %1383, %1415 : vector<16x16xf32>
    %c87 = arith.constant 87 : index
    %1417 = memref.load %arg2[%c87] : memref<360xf32, #tpu.memory_space<smem>>
    %1418 = vector.broadcast %1417 : f32 to vector<16x16xf32>
    %1419 = arith.mulf %1418, %1412 : vector<16x16xf32>
    %1420 = arith.addf %1387, %1419 : vector<16x16xf32>
    %c132 = arith.constant 132 : index
    %1421 = memref.load %arg2[%c132] : memref<360xf32, #tpu.memory_space<smem>>
    %1422 = vector.broadcast %1421 : f32 to vector<16x16xf32>
    %1423 = arith.mulf %1422, %1412 : vector<16x16xf32>
    %1424 = arith.addf %1391, %1423 : vector<16x16xf32>
    %c177 = arith.constant 177 : index
    %1425 = memref.load %arg2[%c177] : memref<360xf32, #tpu.memory_space<smem>>
    %1426 = vector.broadcast %1425 : f32 to vector<16x16xf32>
    %1427 = arith.mulf %1426, %1412 : vector<16x16xf32>
    %1428 = arith.addf %1395, %1427 : vector<16x16xf32>
    %c222 = arith.constant 222 : index
    %1429 = memref.load %arg2[%c222] : memref<360xf32, #tpu.memory_space<smem>>
    %1430 = vector.broadcast %1429 : f32 to vector<16x16xf32>
    %1431 = arith.mulf %1430, %1412 : vector<16x16xf32>
    %1432 = arith.addf %1399, %1431 : vector<16x16xf32>
    %c267 = arith.constant 267 : index
    %1433 = memref.load %arg2[%c267] : memref<360xf32, #tpu.memory_space<smem>>
    %1434 = vector.broadcast %1433 : f32 to vector<16x16xf32>
    %1435 = arith.mulf %1434, %1412 : vector<16x16xf32>
    %1436 = arith.addf %1403, %1435 : vector<16x16xf32>
    %c312 = arith.constant 312 : index
    %1437 = memref.load %arg2[%c312] : memref<360xf32, #tpu.memory_space<smem>>
    %1438 = vector.broadcast %1437 : f32 to vector<16x16xf32>
    %1439 = arith.mulf %1438, %1412 : vector<16x16xf32>
    %1440 = arith.addf %1407, %1439 : vector<16x16xf32>
    %c357 = arith.constant 357 : index
    %1441 = memref.load %arg2[%c357] : memref<360xf32, #tpu.memory_space<smem>>
    %1442 = vector.broadcast %1441 : f32 to vector<16x16xf32>
    %1443 = arith.mulf %1442, %1412 : vector<16x16xf32>
    %1444 = arith.addf %1411, %1443 : vector<16x16xf32>
    %1445 = vector.extract_strided_slice %1213 {offsets = [2, 1], sizes = [16, 16], strides = [1, 1]} : vector<18x18xf32> to vector<16x16xf32>
    %c43 = arith.constant 43 : index
    %1446 = memref.load %arg2[%c43] : memref<360xf32, #tpu.memory_space<smem>>
    %1447 = vector.broadcast %1446 : f32 to vector<16x16xf32>
    %1448 = arith.mulf %1447, %1445 : vector<16x16xf32>
    %1449 = arith.addf %1416, %1448 : vector<16x16xf32>
    %c88 = arith.constant 88 : index
    %1450 = memref.load %arg2[%c88] : memref<360xf32, #tpu.memory_space<smem>>
    %1451 = vector.broadcast %1450 : f32 to vector<16x16xf32>
    %1452 = arith.mulf %1451, %1445 : vector<16x16xf32>
    %1453 = arith.addf %1420, %1452 : vector<16x16xf32>
    %c133 = arith.constant 133 : index
    %1454 = memref.load %arg2[%c133] : memref<360xf32, #tpu.memory_space<smem>>
    %1455 = vector.broadcast %1454 : f32 to vector<16x16xf32>
    %1456 = arith.mulf %1455, %1445 : vector<16x16xf32>
    %1457 = arith.addf %1424, %1456 : vector<16x16xf32>
    %c178 = arith.constant 178 : index
    %1458 = memref.load %arg2[%c178] : memref<360xf32, #tpu.memory_space<smem>>
    %1459 = vector.broadcast %1458 : f32 to vector<16x16xf32>
    %1460 = arith.mulf %1459, %1445 : vector<16x16xf32>
    %1461 = arith.addf %1428, %1460 : vector<16x16xf32>
    %c223 = arith.constant 223 : index
    %1462 = memref.load %arg2[%c223] : memref<360xf32, #tpu.memory_space<smem>>
    %1463 = vector.broadcast %1462 : f32 to vector<16x16xf32>
    %1464 = arith.mulf %1463, %1445 : vector<16x16xf32>
    %1465 = arith.addf %1432, %1464 : vector<16x16xf32>
    %c268 = arith.constant 268 : index
    %1466 = memref.load %arg2[%c268] : memref<360xf32, #tpu.memory_space<smem>>
    %1467 = vector.broadcast %1466 : f32 to vector<16x16xf32>
    %1468 = arith.mulf %1467, %1445 : vector<16x16xf32>
    %1469 = arith.addf %1436, %1468 : vector<16x16xf32>
    %c313 = arith.constant 313 : index
    %1470 = memref.load %arg2[%c313] : memref<360xf32, #tpu.memory_space<smem>>
    %1471 = vector.broadcast %1470 : f32 to vector<16x16xf32>
    %1472 = arith.mulf %1471, %1445 : vector<16x16xf32>
    %1473 = arith.addf %1440, %1472 : vector<16x16xf32>
    %c358 = arith.constant 358 : index
    %1474 = memref.load %arg2[%c358] : memref<360xf32, #tpu.memory_space<smem>>
    %1475 = vector.broadcast %1474 : f32 to vector<16x16xf32>
    %1476 = arith.mulf %1475, %1445 : vector<16x16xf32>
    %1477 = arith.addf %1444, %1476 : vector<16x16xf32>
    %1478 = vector.extract_strided_slice %1213 {offsets = [2, 2], sizes = [16, 16], strides = [1, 1]} : vector<18x18xf32> to vector<16x16xf32>
    %c44 = arith.constant 44 : index
    %1479 = memref.load %arg2[%c44] : memref<360xf32, #tpu.memory_space<smem>>
    %1480 = vector.broadcast %1479 : f32 to vector<16x16xf32>
    %1481 = arith.mulf %1480, %1478 : vector<16x16xf32>
    %1482 = arith.addf %1449, %1481 : vector<16x16xf32>
    %c89 = arith.constant 89 : index
    %1483 = memref.load %arg2[%c89] : memref<360xf32, #tpu.memory_space<smem>>
    %1484 = vector.broadcast %1483 : f32 to vector<16x16xf32>
    %1485 = arith.mulf %1484, %1478 : vector<16x16xf32>
    %1486 = arith.addf %1453, %1485 : vector<16x16xf32>
    %c134 = arith.constant 134 : index
    %1487 = memref.load %arg2[%c134] : memref<360xf32, #tpu.memory_space<smem>>
    %1488 = vector.broadcast %1487 : f32 to vector<16x16xf32>
    %1489 = arith.mulf %1488, %1478 : vector<16x16xf32>
    %1490 = arith.addf %1457, %1489 : vector<16x16xf32>
    %c179 = arith.constant 179 : index
    %1491 = memref.load %arg2[%c179] : memref<360xf32, #tpu.memory_space<smem>>
    %1492 = vector.broadcast %1491 : f32 to vector<16x16xf32>
    %1493 = arith.mulf %1492, %1478 : vector<16x16xf32>
    %1494 = arith.addf %1461, %1493 : vector<16x16xf32>
    %c224 = arith.constant 224 : index
    %1495 = memref.load %arg2[%c224] : memref<360xf32, #tpu.memory_space<smem>>
    %1496 = vector.broadcast %1495 : f32 to vector<16x16xf32>
    %1497 = arith.mulf %1496, %1478 : vector<16x16xf32>
    %1498 = arith.addf %1465, %1497 : vector<16x16xf32>
    %c269 = arith.constant 269 : index
    %1499 = memref.load %arg2[%c269] : memref<360xf32, #tpu.memory_space<smem>>
    %1500 = vector.broadcast %1499 : f32 to vector<16x16xf32>
    %1501 = arith.mulf %1500, %1478 : vector<16x16xf32>
    %1502 = arith.addf %1469, %1501 : vector<16x16xf32>
    %c314 = arith.constant 314 : index
    %1503 = memref.load %arg2[%c314] : memref<360xf32, #tpu.memory_space<smem>>
    %1504 = vector.broadcast %1503 : f32 to vector<16x16xf32>
    %1505 = arith.mulf %1504, %1478 : vector<16x16xf32>
    %1506 = arith.addf %1473, %1505 : vector<16x16xf32>
    %c359 = arith.constant 359 : index
    %1507 = memref.load %arg2[%c359] : memref<360xf32, #tpu.memory_space<smem>>
    %1508 = vector.broadcast %1507 : f32 to vector<16x16xf32>
    %1509 = arith.mulf %1508, %1478 : vector<16x16xf32>
    %1510 = arith.addf %1477, %1509 : vector<16x16xf32>
    %c0_28 = arith.constant 0 : index
    %1511 = memref.load %arg5[%c0_28] : memref<1xf32, #tpu.memory_space<smem>>
    %1512 = vector.broadcast %1511 : f32 to vector<16x16xf32>
    %c0_29 = arith.constant 0 : index
    %1513 = memref.load %arg4[%c0_29] : memref<8xf32, #tpu.memory_space<smem>>
    %cst = arith.constant 0.000000e+00 : f32
    %1514 = vector.broadcast %cst : f32 to vector<16x16xf32>
    %1515 = arith.maximumf %1482, %1514 : vector<16x16xf32>
    %1516 = vector.broadcast %1513 : f32 to vector<16x16xf32>
    %1517 = arith.mulf %1516, %1515 : vector<16x16xf32>
    %1518 = arith.addf %1512, %1517 : vector<16x16xf32>
    %c1_30 = arith.constant 1 : index
    %1519 = memref.load %arg4[%c1_30] : memref<8xf32, #tpu.memory_space<smem>>
    %cst_31 = arith.constant 0.000000e+00 : f32
    %1520 = vector.broadcast %cst_31 : f32 to vector<16x16xf32>
    %1521 = arith.maximumf %1486, %1520 : vector<16x16xf32>
    %1522 = vector.broadcast %1519 : f32 to vector<16x16xf32>
    %1523 = arith.mulf %1522, %1521 : vector<16x16xf32>
    %1524 = arith.addf %1518, %1523 : vector<16x16xf32>
    %c2_32 = arith.constant 2 : index
    %1525 = memref.load %arg4[%c2_32] : memref<8xf32, #tpu.memory_space<smem>>
    %cst_33 = arith.constant 0.000000e+00 : f32
    %1526 = vector.broadcast %cst_33 : f32 to vector<16x16xf32>
    %1527 = arith.maximumf %1490, %1526 : vector<16x16xf32>
    %1528 = vector.broadcast %1525 : f32 to vector<16x16xf32>
    %1529 = arith.mulf %1528, %1527 : vector<16x16xf32>
    %1530 = arith.addf %1524, %1529 : vector<16x16xf32>
    %c3_34 = arith.constant 3 : index
    %1531 = memref.load %arg4[%c3_34] : memref<8xf32, #tpu.memory_space<smem>>
    %cst_35 = arith.constant 0.000000e+00 : f32
    %1532 = vector.broadcast %cst_35 : f32 to vector<16x16xf32>
    %1533 = arith.maximumf %1494, %1532 : vector<16x16xf32>
    %1534 = vector.broadcast %1531 : f32 to vector<16x16xf32>
    %1535 = arith.mulf %1534, %1533 : vector<16x16xf32>
    %1536 = arith.addf %1530, %1535 : vector<16x16xf32>
    %c4_36 = arith.constant 4 : index
    %1537 = memref.load %arg4[%c4_36] : memref<8xf32, #tpu.memory_space<smem>>
    %cst_37 = arith.constant 0.000000e+00 : f32
    %1538 = vector.broadcast %cst_37 : f32 to vector<16x16xf32>
    %1539 = arith.maximumf %1498, %1538 : vector<16x16xf32>
    %1540 = vector.broadcast %1537 : f32 to vector<16x16xf32>
    %1541 = arith.mulf %1540, %1539 : vector<16x16xf32>
    %1542 = arith.addf %1536, %1541 : vector<16x16xf32>
    %c5_38 = arith.constant 5 : index
    %1543 = memref.load %arg4[%c5_38] : memref<8xf32, #tpu.memory_space<smem>>
    %cst_39 = arith.constant 0.000000e+00 : f32
    %1544 = vector.broadcast %cst_39 : f32 to vector<16x16xf32>
    %1545 = arith.maximumf %1502, %1544 : vector<16x16xf32>
    %1546 = vector.broadcast %1543 : f32 to vector<16x16xf32>
    %1547 = arith.mulf %1546, %1545 : vector<16x16xf32>
    %1548 = arith.addf %1542, %1547 : vector<16x16xf32>
    %c6_40 = arith.constant 6 : index
    %1549 = memref.load %arg4[%c6_40] : memref<8xf32, #tpu.memory_space<smem>>
    %cst_41 = arith.constant 0.000000e+00 : f32
    %1550 = vector.broadcast %cst_41 : f32 to vector<16x16xf32>
    %1551 = arith.maximumf %1506, %1550 : vector<16x16xf32>
    %1552 = vector.broadcast %1549 : f32 to vector<16x16xf32>
    %1553 = arith.mulf %1552, %1551 : vector<16x16xf32>
    %1554 = arith.addf %1548, %1553 : vector<16x16xf32>
    %c7_42 = arith.constant 7 : index
    %1555 = memref.load %arg4[%c7_42] : memref<8xf32, #tpu.memory_space<smem>>
    %cst_43 = arith.constant 0.000000e+00 : f32
    %1556 = vector.broadcast %cst_43 : f32 to vector<16x16xf32>
    %1557 = arith.maximumf %1510, %1556 : vector<16x16xf32>
    %1558 = vector.broadcast %1555 : f32 to vector<16x16xf32>
    %1559 = arith.mulf %1558, %1557 : vector<16x16xf32>
    %1560 = arith.addf %1554, %1559 : vector<16x16xf32>
    %c0_44 = arith.constant 0 : index
    %c0_45 = arith.constant 0 : index
    %c0_46 = arith.constant 0 : index
    %1561 = vector.load %arg6[%c0_44, %c0_45, %c0_46] : memref<1x16x16xf32, #tpu.memory_space<vmem>>, vector<1x16x16xf32>
    %1562 = vector.shape_cast %1561 : vector<1x16x16xf32> to vector<16x16xf32>
    %1563 = vector.shape_cast %1560 : vector<16x16xf32> to vector<1x16x16xf32>
    tpu.vector_store %arg6[%c0_44, %c0_45, %c0_46], %1563 {strides = array<i32>} : memref<1x16x16xf32, #tpu.memory_space<vmem>>, vector<1x16x16xf32>,
    return
  }
  func.func @transform_0(%arg0: i32) -> (i32, i32, i32, i32) {
    %c0_i32 = arith.constant 0 : i32
    %c0_i32_0 = arith.constant 0 : i32
    %c0_i32_1 = arith.constant 0 : i32
    %c0_i32_2 = arith.constant 0 : i32
    return %arg0, %c0_i32, %c0_i32_0, %c0_i32_1 : i32, i32, i32, i32
  }
  func.func @transform_1(%arg0: i32) -> i32 {
    %c0_i32 = arith.constant 0 : i32
    %c0_i32_0 = arith.constant 0 : i32
    return %c0_i32 : i32
  }
  func.func @transform_2(%arg0: i32) -> i32 {
    %c0_i32 = arith.constant 0 : i32
    %c0_i32_0 = arith.constant 0 : i32
    return %c0_i32 : i32
  }
  func.func @transform_3(%arg0: i32) -> i32 {
    %c0_i32 = arith.constant 0 : i32
    %c0_i32_0 = arith.constant 0 : i32
    return %c0_i32 : i32
  }
  func.func @transform_4(%arg0: i32) -> i32 {
    %c0_i32 = arith.constant 0 : i32
    %c0_i32_0 = arith.constant 0 : i32
    return %c0_i32 : i32
  }
  func.func @transform_5(%arg0: i32) -> (i32, i32, i32) {
    %c0_i32 = arith.constant 0 : i32
    %c0_i32_0 = arith.constant 0 : i32
    %c0_i32_1 = arith.constant 0 : i32
    return %arg0, %c0_i32, %c0_i32_0 : i32, i32, i32
  }
}

</mosaic_0001>

<bundles_post_ra>
// kernel: tpu_custom_call.1
= control target key start
LH: loop header
LB: loop body
LE: loop exit
PB: predicated region body
PF: predicated region fallthrough
CT: control target
= control target key end

     0   :  { %s13374_s0 = inlined_call_operand.vmem [shape: f32[2,5,18,18], index: 0, kind: input, shape index: {}]   ;;  %s13375_s1 = inlined_call_operand.vmem [shape: f32[360], index: 1, kind: input, shape index: {}]   ;;  %s13376_s2 = inlined_call_operand.vmem [shape: f32[8], index: 2, kind: input, shape index: {}]   ;;  %s13377_s3 = inlined_call_operand.vmem [shape: f32[8], index: 3, kind: input, shape index: {}]   ;;  %s13378_s4 = inlined_call_operand.<no memory space> [shape: f32[1], index: 4, kind: input, shape index: {}]   ;;  %s13379_s5 = inlined_call_operand.hbm [shape: f32[2,16,16], index: 5, kind: output, shape index: {}]  }
   0x1   :  { %10 = sst [smem:[#allocation2]] %s13378_s4 }
   0x2   :  { %11 = vsyncpa [#allocation5], 0 }
   0x3   :  { %12 = vsyncpa [#allocation7], 0 }
   0x4   :  { %13 = vsyncpa [#allocation4], 0 }
   0x5   :  { %15 = vsyncpa [#allocation4 + $0x1], 0  ;;  %s7219_s20 = smov 0   ;;  %s7221_s21 = smov 0  }
   0x6   :  { %s7223_s22 = smov 0   ;;  %s7225_s23 = smov 0  }
   0x7 LB: > { %s7240_s4 = sadd.s32 4294967295, %s7176_s23   ;;  %s6556_s24 = sadd.s32 4294967294, %s7176_s23   ;;  %s7176_s23 = sphi %s7225_s23, %s14324_s23   ;;  %s7172_s22 = sphi %s7223_s22, %s14323_s22   ;;  %s7168_s21 = sphi %s7221_s21, %s14322_s21   ;;  %s7164_s20 = sphi %s7219_s20, %s14321_s20  }
   0x8   : > { %s7244_s25 = sadd.s32 1, %s7176_s23   ;;  %s138_s26 = sadd.s32 1, %s7172_s22 }
   0x9   : > { %s135_s27 = ssub.s32 %s7176_s23, %s7244_s25  ;;  %p148_p0 = scmp.ne.s32.totalorder %s7172_s22, %s7168_s21 }
   0xa   : > { %p136_p1 = scmp.eq.s32.totalorder %s135_s27, 0  ;;  %p149_p2 = scmp.eq.s32.totalorder %s7240_s4, 1 }
   0xb   : > { %p154_p3 = scmp.ne.s32.totalorder %s7168_s21, %s7164_s20  ;;  %p155_p4 = scmp.eq.s32.totalorder %s6556_s24, 1 }
   0xc   : > { %s7255_s28 = scalar_select %p136_p1, %s7172_s22, %s138_s26  }
   0xd   : > { %p7257_p5 = por %p149_p2, %p148_p0  ;;  %p7261_p6 = por %p155_p4, %p154_p3 }
   0xe   : > { %p6557_p7 = scmp.ge.s32.totalorder %s7176_s23, 1  ;;  %p162_p8 = scmp.lt.s32.totalorder %s7176_s23, 3 }
   0xf   : > { %s13389_s29 = scalar_select %p7257_p5, 1, 0 }
  0x10   : > { %s13390_s30 = scalar_select %p7261_p6, 1, 0 }
  0x11   : > { %p13380_p9 = scmp.eq.s32.totalorder %s7240_s4, 0  ;;  %p7268_p10 = pnand %p6557_p7, %p162_p8 }
  0x12   : > { %s186_s9 = sshll.u32 %s13376_s2, 4  ;;  %s175_s12 = sshll.u32 %s13375_s1, 4  ;;  %s187_s9 = int_to_ptr.vmem [resolvable:$true] %s186_s9  ;;  %s176_s12 = int_to_ptr.vmem [resolvable:$true] %s175_s12 }
  0x13   : > { %s13391_s6 = scalar_select %p7268_p10, 1, 0 }
  0x14   : > { %p6974_p11 = pneg %p7268_p10  ;;  %s197_s16 = sshll.u32 %s13377_s3, 4  ;;  %s7289_s16 = int_to_ptr.vmem [resolvable:$true] %s197_s16 }
  0x15   : > { %s7063_s17 = scalar_lea.vmem %s187_s9, 16  ;;  %p7071_p3 = scmp.lt.s32.totalorder %s187_s9, %s187_s9 }
  0x16   : > { %p7282_p12 = pnand %p13380_p9, %p6974_p11  ;;  %p7064_p13 = scmp.ne.s32.totalorder %s187_s9, %s7063_s17 }
  0x17   : > { %p7072_p4 = scmp.lt.s32.totalorder %s7063_s17, %s7063_s17 }
  0x18   : > { %p7065_p0 = pneg %p7282_p12 }
  0x19   : > { %p7073_p7 = por %p7072_p4, %p7071_p3 }
  0x1a   : > { %p7066_p1 = pnand %p7065_p0, %p7064_p13 }
  0x1c   : > { %p7067_p2 = pneg %p7066_p1 }
  0x1e   : > { %p7074_p8 = pnand %p7073_p7, %p7067_p2 }
  0x20   : > { %7077 = shalt.err (!%p7074_p8)
}
  0x21   : > { %s7178_s18 = smov [#allocation6]   ;;  %s7078_s19 = scalar_lea.vmem %s176_s12, 48 }
  0x22   : > { %6980 = dma.vmem_to_smem (!%p7282_p12), %s187_s9, 16, %s7178_s18, [#allocation7]  }
  0x23   : > { %p7079_p11 = scmp.ne.s32.totalorder %s176_s12, %s7078_s19  ;;  %s7085_s24 = scalar_lea.vmem %s176_s12, 64 }
  0x24   : > { %p7086_p5 = scmp.lt.s32.totalorder %s176_s12, %s176_s12  ;;  %p7087_p13 = scmp.lt.s32.totalorder %s7085_s24, %s7078_s19 }
  0x25   : > { %p7081_p9 = pnand %p7079_p11, %p7065_p0 }
  0x26   : > { %p7088_p1 = por %p7087_p13, %p7086_p5 }
  0x27   : > { %p7082_p6 = pneg %p7081_p9 }
  0x29   : > { %p7089_p10 = pnand %p7088_p1, %p7082_p6 }
  0x2b   : > { %7092 = shalt.err (!%p7089_p10)
}
  0x2c   : > { %s7179_s26 = smov [#allocation3]   ;;  %s7093_s27 = scalar_lea.vmem %s7289_s16, 16 }
  0x2d   : > { %6977 = dma.vmem_to_smem (!%p7282_p12), %s176_s12, 48, %s7179_s26, [#allocation5]  }
  0x2e   : > { %p7094_p2 = scmp.ne.s32.totalorder %s7289_s16, %s7093_s27  ;;  %p7101_p4 = scmp.lt.s32.totalorder %s7289_s16, %s7289_s16 }
  0x2f   : > { %p7102_p7 = scmp.lt.s32.totalorder %s7093_s27, %s7093_s27 }
  0x30   : > { %p7096_p3 = pnand %p7094_p2, %p7065_p0 }
  0x31   : > { %p7103_p5 = por %p7102_p7, %p7101_p4 }
  0x32   : > { %p7097_p9 = pneg %p7096_p3 }
  0x34   : > { %p7104_p6 = pnand %p7103_p5, %p7097_p9 }
  0x36   : > { %7107 = shalt.err (!%p7104_p6)
}
  0x37   : > { %s7180_s7 = smov [#allocation8]   ;;  %p13393_p10 = scmp.ne.s32.totalorder %s13391_s6, 0 }
  0x38   : > { %6983 = dma.vmem_to_smem (!%p7282_p12), %s7289_s16, 16, %s7180_s7, [#allocation7]  }
  0x39   : > { %221 = sbr.rel (%p13393_p10) target bundleno = 1176 (0x498), region = 40 }
  0x3e   : > { %p13394_p8 = scmp.eq.s32.totalorder %s7240_s4, 0 }
  0x40   : > { %7151 = dma.done.wait (%p13394_p8), [#allocation5], 48   ;;  %p13395_p0 = pmov %p13394_p8 }
  0x42   : > { %7153 = vsyncadd (%p13395_p0), [#allocation5], 4294967248  ;;  %p13396_p11 = pmov %p13395_p0 }
  0x43   : > { %p13397_p13 = pmov %p13395_p0 }
  0x44   : > { %7155 = dma.done.wait (%p13396_p11), [#allocation7], 32  }
  0x45   : > { %7157 = vsyncadd (%p13397_p13), [#allocation7], 4294967264 }
  0x46   : > { %235 = sfence }
  0x47   : > { %p258_p1 = scmp.lt.s32.totalorder %s7240_s4, 1  ;;  %s6583_s8 = sld [smem:[#allocation3 + $0x2e]]  ;;  %vm562_vm0 = vcmask 1046528   ;;  %vm1035_vm1 = vcmask 1045504   ;;  %vm6446_vm2 = vcmask 130048  }
  0x48   : > { %s6582_s6 = sld [smem:[#allocation3 + $0x1]]  ;;  %s7181_s16 = smov 127  }
  0x49   : > { %s259_s9 = scalar_select %p258_p1, %s7240_s4, 1 }
  0x4a   : > { %s6584_s11 = sld [smem:[#allocation3 + $0x5b]]  ;;  %p14319_p2 = scmp.ne.s32.totalorder %s13389_s29, 0 }
  0x4b   : > { %s6959_s10 = smul.u32 120, %s259_s9  ;;  %s6585_s15 = sld [smem:[#allocation3 + $0x88]] }
  0x4c   : > { %s6586_s17 = sld [smem:[#allocation3 + $0xb5]]  ;;  %s7182_s9 = smov 126  }
  0x4d   : > { %s7328_s14 = scalar_lea.vmem %s13374_s0, %s6959_s10  ;;  %v345_v2 = vstv %s6583_s8  ;;  %s6587_s18 = sld [smem:[#allocation3 + $0xe2]] }
  0x4e   : > { %v7331_v0 = vld [vmem:[%s7328_s14] sm:$0xff]  ;;  %v7334_v1 = vld [vmem:[%s7328_s14 + $0x8] sm:$0xff]  ;;  %v331_v4 = vstv %s6582_s6  ;;  %s6588_s19 = sld [smem:[#allocation3 + $0x10f]]  ;;  %v7393_v45 = vld [vmem:[%s7328_s14 + $0x10] sm:$0x3] }
  0x4f   : > { %v346_v3 = vmul.f32 %v345_v2, %v7331_v0  ;;  %v347_v5 = vmul.f32 %v345_v2, %v7334_v1  ;;  %v332_v6 = vmul.f32 %v331_v4, %v7331_v0  ;;  %v333_v8 = vmul.f32 %v331_v4, %v7334_v1  ;;  %s6589_s24 = sld [smem:[#allocation3 + $0x13c]] }
  0x50   : > { %v359_v7 = vstv %s6584_s11  ;;  %s6590_s26 = sld [smem:[#allocation3 + $0x2]] }
  0x51   : > { %350 = vrot.lane.b32.xlu1 %v346_v3, %s7181_s16  ;;  %336 = vrot.lane.b32.xlu0 %v332_v6, %s7181_s16  ;;  %v361_v9 = vmul.f32 %v359_v7, %v7334_v1  ;;  %v373_v10 = vstv %s6585_s15  ;;  %v360_v11 = vmul.f32 %v359_v7, %v7331_v0  ;;  %s6591_s27 = sld [smem:[#allocation3 + $0x2f]] }
  0x52   : > { %v375_v12 = vmul.f32 %v373_v10, %v7334_v1  ;;  %v387_v13 = vstv %s6586_s17  ;;  %v374_v14 = vmul.f32 %v373_v10, %v7331_v0  ;;  %s6592_s7 = sld [smem:[#allocation3 + $0x5c]] }
  0x53   : > { %v389_v15 = vmul.f32 %v387_v13, %v7334_v1  ;;  %v401_v16 = vstv %s6587_s18  ;;  %v388_v17 = vmul.f32 %v387_v13, %v7331_v0  ;;  %s6593_s8 = sld [smem:[#allocation3 + $0x89]] }
  0x54   : > { %v403_v18 = vmul.f32 %v401_v16, %v7334_v1  ;;  %v415_v19 = vstv %s6588_s19  ;;  %v402_v20 = vmul.f32 %v401_v16, %v7331_v0  ;;  %s6594_s6 = sld [smem:[#allocation3 + $0xb6]] }
  0x55   : > { %352 = vrot.lane.b32.xlu1 %v347_v5, %s7181_s16  ;;  %338 = vrot.lane.b32.xlu0 %v333_v8, %s7181_s16  ;;  %v417_v21 = vmul.f32 %v415_v19, %v7334_v1  ;;  %v429_v22 = vstv %s6589_s24  ;;  %v416_v23 = vmul.f32 %v415_v19, %v7331_v0  ;;  %s6595_s10 = sld [smem:[#allocation3 + $0xe3]] }
  0x56   : > { %v431_v24 = vmul.f32 %v429_v22, %v7334_v1  ;;  %v443_v25 = vstv %s6590_s26  ;;  %v430_v26 = vmul.f32 %v429_v22, %v7331_v0  ;;  %s6596_s11 = sld [smem:[#allocation3 + $0x110]] }
  0x57   : > { %v445_v27 = vmul.f32 %v443_v25, %v7334_v1  ;;  %v457_v28 = vstv %s6591_s27  ;;  %v444_v29 = vmul.f32 %v443_v25, %v7331_v0  ;;  %s6606_s12 = sld [smem:[#allocation3 + $0x4]] }
  0x58   : > { %v459_v30 = vmul.f32 %v457_v28, %v7334_v1  ;;  %v471_v31 = vstv %s6592_s7  ;;  %v458_v32 = vmul.f32 %v457_v28, %v7331_v0  ;;  %s7384_s13 = sld [smem:[#allocation3 + $0x13d]] }
  0x59   : > { %366 = vrot.lane.b32.xlu1 %v361_v9, %s7181_s16  ;;  %364 = vrot.lane.b32.xlu0 %v360_v11, %s7181_s16  ;;  %v473_v33 = vmul.f32 %v471_v31, %v7334_v1  ;;  %v485_v34 = vstv %s6593_s8  ;;  %v472_v35 = vmul.f32 %v471_v31, %v7331_v0  ;;  %s6607_s15 = sld [smem:[#allocation3 + $0x31]] }
  0x5a   : > { %v487_v36 = vmul.f32 %v485_v34, %v7334_v1  ;;  %v499_v37 = vstv %s6594_s6  ;;  %v486_v38 = vmul.f32 %v485_v34, %v7331_v0  ;;  %s6608_s17 = sld [smem:[#allocation3 + $0x5e]] }
  0x5b   : > { %v501_v39 = vmul.f32 %v499_v37, %v7334_v1  ;;  %v513_v40 = vstv %s6595_s10  ;;  %v500_v41 = vmul.f32 %v499_v37, %v7331_v0  ;;  %s6609_s18 = sld [smem:[#allocation3 + $0x8b]] }
  0x5c   : > { %v515_v42 = vmul.f32 %v513_v40, %v7334_v1  ;;  %v527_v43 = vstv %s6596_s11  ;;  %v514_v44 = vmul.f32 %v513_v40, %v7331_v0  ;;  %s6610_s19 = sld [smem:[#allocation3 + $0xb8]] }
  0x5d   : > { %380 = vrot.lane.b32.xlu1 %v375_v12, %s7181_s16  ;;  %378 = vrot.lane.b32.xlu0 %v374_v14, %s7181_s16  ;;  %v692_v46 = vstv %s6606_s12  ;;  %v529_v47 = vmul.f32 %v527_v43, %v7334_v1  ;;  %v528_v52 = vmul.f32 %v527_v43, %v7331_v0  ;;  %s6611_s24 = sld [smem:[#allocation3 + $0xe5]] }
  0x5e   : > { %v541_v48 = vstv %s7384_s13  ;;  %v694_v49 = vmul.f32 %v692_v46, %v7334_v1  ;;  %v695_v50 = vmul.f32 %v692_v46, %v7393_v45  ;;  %v693_v53 = vmul.f32 %v692_v46, %v7331_v0  ;;  %s6612_s26 = sld [smem:[#allocation3 + $0x112]] }
  0x5f   : > { %v713_v51 = vstv %s6607_s15  ;;  %v543_v54 = vmul.f32 %v541_v48, %v7334_v1  ;;  %v542_v60 = vmul.f32 %v541_v48, %v7331_v0  ;;  %s6613_s27 = sld [smem:[#allocation3 + $0x13f]] }
  0x60   : > { %v715_v55 = vmul.f32 %v713_v51, %v7334_v1  ;;  %v700_v56 = vrot.slane %v694_v49, 1  ;;  %v702_v57 = vrot.slane %v695_v50, 1  ;;  %v716_v58 = vmul.f32 %v713_v51, %v7393_v45  ;;  %s6614_s7 = sld [smem:[#allocation3 + $0x5]] }
  0x61   : > { %394 = vrot.lane.b32.xlu1 %v389_v15, %s7181_s16  ;;  %392 = vrot.lane.b32.xlu0 %v388_v17, %s7181_s16  ;;  %v734_v59 = vstv %s6608_s17  ;;  %v699_v61 = vrot.slane %v693_v53, 1  ;;  %v714_v62 = vmul.f32 %v713_v51, %v7331_v0  ;;  %v755_v6 = vstv %s6609_s18  ;;  %s6615_s8 = sld [smem:[#allocation3 + $0x32]] }
  0x62   : > { %v736_v63 = vmul.f32 %v734_v59, %v7334_v1  ;;  %v737_v2 = vmul.f32 %v734_v59, %v7393_v45  ;;  %v703_v3 = vsel %vm562_vm0, %v700_v56, %v702_v57  ;;  %v721_v4 = vrot.slane %v715_v55, 1  ;;  %s6616_s6 = sld [smem:[#allocation3 + $0x5f]] }
  0x63   : > { %v723_v5 = vrot.slane %v716_v58, 1  ;;  %v701_v7 = vsel %vm562_vm0, %v699_v61, %v700_v56  ;;  %v720_v8 = vrot.slane %v714_v62, 1  ;;  %v735_v9 = vmul.f32 %v734_v59, %v7331_v0  ;;  %s6617_s10 = sld [smem:[#allocation3 + $0x8c]] }
  0x64   : > { %v742_v10 = vrot.slane %v736_v63, 1  ;;  %v744_v11 = vrot.slane %v737_v2, 1  ;;  %v757_v13 = vmul.f32 %v755_v6, %v7334_v1  ;;  %v758_v14 = vmul.f32 %v755_v6, %v7393_v45  ;;  %s6618_s11 = sld [smem:[#allocation3 + $0xb9]] }
  0x65   : > { %408 = vrot.lane.b32.xlu1 %v403_v18, %s7181_s16  ;;  %406 = vrot.lane.b32.xlu0 %v402_v20, %s7181_s16  ;;  %v724_v12 = vsel %vm562_vm0, %v721_v4, %v723_v5  ;;  %v776_v15 = vstv %s6610_s19  ;;  %v722_v16 = vsel %vm562_vm0, %v720_v8, %v721_v4  ;;  %v741_v17 = vrot.slane %v735_v9, 1  ;;  %s6619_s12 = sld [smem:[#allocation3 + $0xe6]] }
  0x66   : > { %v756_v18 = vmul.f32 %v755_v6, %v7331_v0  ;;  %v745_v19 = vsel %vm562_vm0, %v742_v10, %v744_v11  ;;  %v797_v20 = vstv %s6611_s24  ;;  %v765_v22 = vrot.slane %v758_v14, 1  ;;  %s6620_s13 = sld [smem:[#allocation3 + $0x113]] }
  0x67   : > { %v743_v25 = vsel %vm562_vm0, %v741_v17, %v742_v10  ;;  %v799_v28 = vmul.f32 %v797_v20, %v7334_v1  ;;  %v881_v57 = vstv %s6615_s8  ;;  %s6621_s15 = sld [smem:[#allocation3 + $0x140]] }
  0x68   : > { %v902_v4 = vstv %s6616_s6  ;;  %v884_v8 = vmul.f32 %v881_v57, %v7393_v45  ;;  %v882_v11 = vmul.f32 %v881_v57, %v7331_v0  ;;  %s6630_s17 = sld [smem:[#allocation3 + $0x7]] }
  0x69   : > { %422 = vrot.lane.b32.xlu1 %v417_v21, %s7181_s16  ;;  %420 = vrot.lane.b32.xlu0 %v416_v23, %s7181_s16  ;;  %v763_v21 = vrot.slane %v757_v13, 1  ;;  %v778_v23 = vmul.f32 %v776_v15, %v7334_v1  ;;  %v805_v40 = vrot.slane %v799_v28, 1  ;;  %v905_v13 = vmul.f32 %v902_v4, %v7393_v45  ;;  %s6631_s18 = sld [smem:[#allocation3 + $0x34]] }
  0x6a   : > { %v923_v17 = vstv %s6617_s10  ;;  %s6632_s19 = sld [smem:[#allocation3 + $0x61]] }
  0x6b   : > { %v784_v31 = vrot.slane %v778_v23, 1  ;;  %v925_v23 = vmul.f32 %v923_v17, %v7334_v1  ;;  %s6633_s24 = sld [smem:[#allocation3 + $0x8e]] }
  0x6c   : > { %s6637_s8 = sld [smem:[#allocation3 + $0x142]] }
  0x6d   : > { %436 = vrot.lane.b32.xlu1 %v431_v24, %s7181_s16  ;;  %434 = vrot.lane.b32.xlu0 %v430_v26, %s7181_s16  ;;  %v779_v24 = vmul.f32 %v776_v15, %v7393_v45  ;;  %v762_v26 = vrot.slane %v756_v18, 1  ;;  %s6638_s6 = sld [smem:[#allocation3 + $0x8]] }
  0x6e   : > { %s6639_s10 = sld [smem:[#allocation3 + $0x35]] }
  0x6f   : > { %v764_v34 = vsel %vm562_vm0, %v762_v26, %v763_v21  ;;  %v944_v26 = vstv %s6618_s11  ;;  %s6640_s11 = sld [smem:[#allocation3 + $0x62]] }
  0x71   : > { %450 = vrot.lane.b32.xlu1 %v445_v27, %s7182_s9  ;;  %448 = vrot.lane.b32.xlu0 %v444_v29, %s7182_s9  ;;  %v777_v27 = vmul.f32 %v776_v15, %v7331_v0  ;;  %v818_v29 = vstv %s6612_s26  ;;  %s6634_s26 = sld [smem:[#allocation3 + $0xbb]] }
  0x72   : > { %v820_v37 = vmul.f32 %v818_v29, %v7334_v1  ;;  %v819_v46 = vmul.f32 %v818_v29, %v7331_v0 }
  0x75   : > { %464 = vrot.lane.b32.xlu1 %v459_v30, %s7182_s9  ;;  %462 = vrot.lane.b32.xlu0 %v458_v32, %s7182_s9  ;;  %v766_v30 = vsel %vm562_vm0, %v763_v21, %v765_v22  ;;  %v786_v32 = vrot.slane %v779_v24, 1  ;;  %v912_v22 = vrot.slane %v905_v13, 1 }
  0x79   : > { %478 = vrot.lane.b32.xlu1 %v473_v33, %s7182_s9  ;;  %476 = vrot.lane.b32.xlu0 %v472_v35, %s7182_s9  ;;  %v800_v33 = vmul.f32 %v797_v20, %v7393_v45  ;;  %v783_v35 = vrot.slane %v777_v27, 1 }
  0x7b   : > { %v785_v43 = vsel %vm562_vm0, %v783_v35, %v784_v31  ;;  %v965_v35 = vstv %s6619_s12  ;;  %s6641_s12 = sld [smem:[#allocation3 + $0x8f]] }
  0x7d   : > { %492 = vrot.lane.b32.xlu1 %v487_v36, %s7182_s9  ;;  %490 = vrot.lane.b32.xlu0 %v486_v38, %s7182_s9  ;;  %v798_v36 = vmul.f32 %v797_v20, %v7331_v0  ;;  %v821_v38 = vmul.f32 %v818_v29, %v7393_v45  ;;  %v903_v20 = vmul.f32 %v902_v4, %v7331_v0 }
  0x7e   : > { %v924_v29 = vmul.f32 %v923_v17, %v7331_v0 }
  0x7f   : > { %v828_v48 = vrot.slane %v821_v38, 1  ;;  %v909_v28 = vrot.slane %v903_v20, 1  ;;  %v945_v38 = vmul.f32 %v944_v26, %v7331_v0 }
  0x81   : > { %506 = vrot.lane.b32.xlu1 %v501_v39, %s7182_s9  ;;  %504 = vrot.lane.b32.xlu0 %v500_v41, %s7182_s9  ;;  %v787_v39 = vsel %vm562_vm0, %v784_v31, %v786_v32  ;;  %v807_v41 = vrot.slane %v800_v33, 1  ;;  %v931_v31 = vrot.slane %v925_v23, 1  ;;  %v946_v33 = vmul.f32 %v944_v26, %v7334_v1 }
  0x83   : > { %v808_v49 = vsel %vm562_vm0, %v805_v40, %v807_v41 }
  0x85   : > { %520 = vrot.lane.b32.xlu1 %v515_v42, %s7182_s9  ;;  %518 = vrot.lane.b32.xlu0 %v514_v44, %s7182_s9  ;;  %v839_v42 = vstv %s6613_s27  ;;  %v804_v44 = vrot.slane %v798_v36, 1  ;;  %s6635_s27 = sld [smem:[#allocation3 + $0xe8]] }
  0x86   : > { %v841_v50 = vmul.f32 %v839_v42, %v7334_v1  ;;  %v842_v51 = vmul.f32 %v839_v42, %v7393_v45  ;;  %v840_v55 = vmul.f32 %v839_v42, %v7331_v0  ;;  %v952_v42 = vrot.slane %v946_v33, 1 }
  0x87   : > { %v806_v53 = vsel %vm562_vm0, %v804_v44, %v805_v40  ;;  %v968_v40 = vmul.f32 %v965_v35, %v7393_v45  ;;  %v986_v44 = vstv %s6620_s13  ;;  %s6642_s13 = sld [smem:[#allocation3 + $0xbc]] }
  0x88   : > { %v847_v58 = vrot.slane %v841_v50, 1  ;;  %v849_v59 = vrot.slane %v842_v51, 1  ;;  %v846_v63 = vrot.slane %v840_v55, 1  ;;  %v988_v51 = vmul.f32 %v986_v44, %v7334_v1 }
  0x89   : > { %534 = vrot.lane.b32.xlu1 %v529_v47, %s7182_s9  ;;  %532 = vrot.lane.b32.xlu0 %v528_v52, %s7182_s9  ;;  %v826_v47 = vrot.slane %v820_v37, 1  ;;  %v860_v52 = vstv %s6614_s7  ;;  %v930_v37 = vrot.slane %v924_v29, 1  ;;  %v975_v50 = vrot.slane %v968_v40, 1  ;;  %s6636_s7 = sld [smem:[#allocation3 + $0x115]] }
  0x8a   : > { %v863_v61 = vmul.f32 %v860_v52, %v7393_v45  ;;  %v861_v2 = vmul.f32 %v860_v52, %v7331_v0  ;;  %v850_v5 = vsel %vm562_vm0, %v847_v58, %v849_v59  ;;  %v848_v9 = vsel %vm562_vm0, %v846_v63, %v847_v58 }
  0x8b   : > { %v829_v56 = vsel %vm562_vm0, %v826_v47, %v828_v48  ;;  %v966_v48 = vmul.f32 %v965_v35, %v7331_v0  ;;  %v994_v59 = vrot.slane %v988_v51, 1  ;;  %v1165_v63 = vstv %s6630_s17  ;;  %s6644_s17 = sld [smem:[#allocation3 + $0x116]] }
  0x8c   : > { %v867_v10 = vrot.slane %v861_v2, 1 }
  0x8d   : > { %548 = vrot.lane.b32.xlu1 %v543_v54, %s7182_s9  ;;  %546 = vrot.lane.b32.xlu0 %v542_v60, %s7182_s9  ;;  %v825_v54 = vrot.slane %v819_v46, 1  ;;  %v862_v60 = vmul.f32 %v860_v52, %v7334_v1  ;;  %v932_v46 = vsel %vm562_vm0, %v930_v37, %v931_v31 }
  0x8f   : > { %v827_v62 = vsel %vm562_vm0, %v825_v54, %v826_v47  ;;  %v868_v6 = vrot.slane %v862_v60, 1  ;;  %v951_v47 = vrot.slane %v945_v38, 1  ;;  %v1007_v54 = vstv %s6621_s15  ;;  %s6643_s15 = sld [smem:[#allocation3 + $0xe9]] }
  0x91   : > { %706 = vrot.lane.b32.xlu1 %v703_v3, %s7181_s16  ;;  %704 = vrot.lane.b32.xlu0 %v701_v7, %s7181_s16  ;;  %v883_v3 = vmul.f32 %v881_v57, %v7334_v1  ;;  %v870_v7 = vrot.slane %v863_v61, 1  ;;  %v869_v18 = vsel %vm562_vm0, %v867_v10, %v868_v6  ;;  %v953_v55 = vsel %vm562_vm0, %v951_v47, %v952_v42 }
  0x92   : > { %v987_v57 = vmul.f32 %v986_v44, %v7331_v0  ;;  %v1009_v61 = vmul.f32 %v1007_v54, %v7334_v1 }
  0x93   : > { %v871_v14 = vsel %vm562_vm0, %v868_v6, %v870_v7  ;;  %v889_v15 = vrot.slane %v883_v3, 1  ;;  %v1167_v7 = vmul.f32 %v1165_v63, %v7334_v1 }
  0x94   : > { %v1015_v10 = vrot.slane %v1009_v61, 1 }
  0x95   : > { %727 = vrot.lane.b32.xlu1 %v724_v12, %s7181_s16  ;;  %725 = vrot.lane.b32.xlu0 %v722_v16, %s7181_s16  ;;  %v904_v12 = vmul.f32 %v902_v4, %v7334_v1  ;;  %v891_v16 = vrot.slane %v884_v8, 1  ;;  %v993_v4 = vrot.slane %v987_v57, 1  ;;  %v1168_v8 = vmul.f32 %v1165_v63, %v7393_v45 }
  0x97   : > { %v910_v21 = vrot.slane %v904_v12, 1  ;;  %v892_v24 = vsel %vm562_vm0, %v889_v15, %v891_v16  ;;  %v1186_v12 = vstv %s6631_s18  ;;  %v1166_v16 = vmul.f32 %v1165_v63, %v7331_v0  ;;  %s6645_s18 = sld [smem:[#allocation3 + $0x143]] }
  0x98   : > { %v1188_v20 = vmul.f32 %v1186_v12, %v7334_v1 }
  0x99   : > { %748 = vrot.lane.b32.xlu1 %v745_v19, %s7181_s16  ;;  %746 = vrot.lane.b32.xlu0 %v743_v25, %s7181_s16  ;;  %v888_v19 = vrot.slane %v882_v11, 1  ;;  %v926_v25 = vmul.f32 %v923_v17, %v7393_v45  ;;  %v911_v36 = vsel %vm562_vm0, %v909_v28, %v910_v21 }
  0x9b   : > { %v890_v27 = vsel %vm562_vm0, %v888_v19, %v889_v15  ;;  %v933_v32 = vrot.slane %v926_v25, 1  ;;  %v1175_v19 = vrot.slane %v1168_v8, 2  ;;  %v1291_v8 = vstv %s6636_s7  ;;  %s6661_s7 = sld [smem:[#allocation3 + $0xbe]] }
  0x9d   : > { %769 = vrot.lane.b32.xlu1 %v766_v30, %s7181_s16  ;;  %767 = vrot.lane.b32.xlu0 %v764_v34, %s7181_s16  ;;  %v913_v30 = vsel %vm562_vm0, %v910_v21, %v912_v22  ;;  %v947_v34 = vmul.f32 %v944_v26, %v7393_v45  ;;  %v934_v41 = vsel %vm562_vm0, %v931_v31, %v933_v32  ;;  %v1172_v26 = vrot.slane %v1166_v16, 2 }
  0x9e   : > { %v1189_v22 = vmul.f32 %v1186_v12, %v7393_v45  ;;  %v1312_v16 = vstv %s6637_s8  ;;  %s6662_s8 = sld [smem:[#allocation3 + $0xeb]] }
  0xa0   : > { %v1196_v31 = vrot.slane %v1189_v22, 2 }
  0xa1   : > { %790 = vrot.lane.b32.xlu1 %v787_v39, %s7181_s16  ;;  %788 = vrot.lane.b32.xlu0 %v785_v43, %s7181_s16  ;;  %v967_v39 = vmul.f32 %v965_v35, %v7334_v1  ;;  %v954_v43 = vrot.slane %v947_v34, 1  ;;  %v1228_v34 = vstv %s6633_s24  ;;  %s6658_s24 = sld [smem:[#allocation3 + $0x37]] }
  0xa2   : > { %v1230_v40 = vmul.f32 %v1228_v34, %v7334_v1 }
  0xa3   : > { %v955_v52 = vsel %vm562_vm0, %v952_v42, %v954_v43 }
  0xa5   : > { %811 = vrot.lane.b32.xlu1 %v808_v49, %s7181_s16  ;;  %809 = vrot.lane.b32.xlu0 %v806_v53, %s7181_s16  ;;  %v973_v49 = vrot.slane %v967_v39, 1  ;;  %v989_v53 = vmul.f32 %v986_v44, %v7393_v45 }
  0xa7   : > { %v976_v58 = vsel %vm562_vm0, %v973_v49, %v975_v50  ;;  %v996_v60 = vrot.slane %v989_v53, 1  ;;  %v1229_v50 = vmul.f32 %v1228_v34, %v7331_v0 }
  0xa9   : > { %832 = vrot.lane.b32.xlu1 %v829_v56, %s7181_s16  ;;  %830 = vrot.lane.b32.xlu0 %v827_v62, %s7181_s16  ;;  %v972_v56 = vrot.slane %v966_v48, 1  ;;  %v1010_v62 = vmul.f32 %v1007_v54, %v7393_v45 }
  0xab   : > { %v974_v3 = vsel %vm562_vm0, %v972_v56, %v973_v49  ;;  %v1017_v11 = vrot.slane %v1010_v62, 1 }
  0xad   : > { %853 = vrot.lane.b32.xlu1 %v850_v5, %s7181_s16  ;;  %851 = vrot.lane.b32.xlu0 %v848_v9, %s7181_s16  ;;  %v1008_v5 = vmul.f32 %v1007_v54, %v7331_v0  ;;  %v997_v9 = vsel %vm562_vm0, %v994_v59, %v996_v60  ;;  %v1018_v21 = vsel %vm562_vm0, %v1015_v10, %v1017_v11  ;;  %v1235_v60 = vrot.slane %v1229_v50, 2 }
  0xae   : > { %v1354_v50 = vstv %s6639_s10  ;;  %s6664_s10 = sld [smem:[#allocation3 + $0x145]] }
  0xaf   : > { %v1014_v15 = vrot.slane %v1008_v5, 1 }
  0xb1   : > { %874 = vrot.lane.b32.xlu1 %v871_v14, %s7182_s9  ;;  %872 = vrot.lane.b32.xlu0 %v869_v18, %s7182_s9  ;;  %v995_v14 = vsel %vm562_vm0, %v993_v4, %v994_v59  ;;  %v1173_v18 = vrot.slane %v1167_v7, 2  ;;  %v1016_v25 = vsel %vm562_vm0, %v1014_v15, %v1015_v10  ;;  %v1293_v15 = vmul.f32 %v1291_v8, %v7334_v1 }
  0xb3   : > { %v1176_v29 = vsel %vm1035_vm1, %v1173_v18, %v1175_v19 }
  0xb5   : > { %895 = vrot.lane.b32.xlu1 %v892_v24, %s7182_s9  ;;  %893 = vrot.lane.b32.xlu0 %v890_v27, %s7182_s9  ;;  %v1207_v24 = vstv %s6632_s19  ;;  %v1187_v27 = vmul.f32 %v1186_v12, %v7331_v0  ;;  %s7681_s19 = sld [smem:[#allocation3 + $0xa]] }
  0xb6   : > { %v1209_v32 = vmul.f32 %v1207_v24, %v7334_v1  ;;  %v1210_v33 = vmul.f32 %v1207_v24, %v7393_v45  ;;  %v1208_v38 = vmul.f32 %v1207_v24, %v7331_v0 }
  0xb7   : > { %v1193_v37 = vrot.slane %v1187_v27, 2 }
  0xb8   : > { %v1215_v43 = vrot.slane %v1209_v32, 2  ;;  %v1217_v44 = vrot.slane %v1210_v33, 2  ;;  %v1214_v49 = vrot.slane %v1208_v38, 2  ;;  %v1315_v33 = vmul.f32 %v1312_v16, %v7393_v45 }
  0xb9   : > { %916 = vrot.lane.b32.xlu1 %v913_v30, %s7182_s9  ;;  %914 = vrot.lane.b32.xlu0 %v911_v36, %s7182_s9  ;;  %v1194_v30 = vrot.slane %v1188_v20, 2  ;;  %v1174_v36 = vsel %vm1035_vm1, %v1172_v26, %v1173_v18  ;;  %v1292_v26 = vmul.f32 %v1291_v8, %v7331_v0 }
  0xba   : > { %v1216_v59 = vsel %vm1035_vm1, %v1214_v49, %v1215_v43 }
  0xbb   : > { %v1197_v42 = vsel %vm1035_vm1, %v1194_v30, %v1196_v31  ;;  %v1195_v48 = vsel %vm1035_vm1, %v1193_v37, %v1194_v30  ;;  %v1314_v30 = vmul.f32 %v1312_v16, %v7334_v1  ;;  %v1298_v38 = vrot.slane %v1292_v26, 2 }
  0xbd   : > { %937 = vrot.lane.b32.xlu1 %v934_v41, %s7182_s9  ;;  %935 = vrot.lane.b32.xlu0 %v932_v46, %s7182_s9  ;;  %v1231_v41 = vmul.f32 %v1228_v34, %v7393_v45  ;;  %v1249_v46 = vstv %s6634_s26  ;;  %v1333_v34 = vstv %s6638_s6  ;;  %s6659_s26 = sld [smem:[#allocation3 + $0x64]] }
  0xbe   : > { %v1251_v54 = vmul.f32 %v1249_v46, %v7334_v1  ;;  %v1252_v56 = vmul.f32 %v1249_v46, %v7393_v45  ;;  %v1250_v61 = vmul.f32 %v1249_v46, %v7331_v0  ;;  %v1320_v46 = vrot.slane %v1314_v30, 2  ;;  %s6663_s6 = sld [smem:[#allocation3 + $0x118]] }
  0xbf   : > { %v1238_v53 = vrot.slane %v1231_v41, 2 }
  0xc0   : > { %v1259_v4 = vrot.slane %v1252_v56, 2  ;;  %v1256_v11 = vrot.slane %v1250_v61, 2  ;;  %v1357_v61 = vmul.f32 %v1354_v50, %v7393_v45 }
  0xc1   : > { %958 = vrot.lane.b32.xlu1 %v955_v52, %s7182_s9  ;;  %956 = vrot.lane.b32.xlu0 %v953_v55, %s7182_s9  ;;  %v1236_v52 = vrot.slane %v1230_v40, 2  ;;  %v1218_v55 = vsel %vm1035_vm1, %v1215_v43, %v1217_v44  ;;  %v1313_v40 = vmul.f32 %v1312_v16, %v7331_v0  ;;  %v1336_v43 = vmul.f32 %v1333_v34, %v7393_v45 }
  0xc3   : > { %v7506_v2 = vpop.permute.xlu1 %350  ;;  %v7510_v6 = vpop.permute.xlu0 %336  ;;  %v1239_v63 = vsel %vm1035_vm1, %v1236_v52, %v1238_v53  ;;  %v1237_v10 = vsel %vm1035_vm1, %v1235_v60, %v1236_v52  ;;  %v1319_v53 = vrot.slane %v1313_v40, 2  ;;  %v1356_v60 = vmul.f32 %v1354_v50, %v7334_v1 }
  0xc5   : > { %979 = vrot.lane.b32.xlu1 %v976_v58, %s7182_s9  ;;  %977 = vrot.lane.b32.xlu0 %v974_v3, %s7182_s9  ;;  %v1270_v58 = vstv %s6635_s27  ;;  %v1257_v3 = vrot.slane %v1251_v54, 2  ;;  %v1334_v54 = vmul.f32 %v1333_v34, %v7331_v0  ;;  %s6660_s27 = sld [smem:[#allocation3 + $0x91]] }
  0xc6   : > { %v1272_v5 = vmul.f32 %v1270_v58, %v7334_v1  ;;  %v1273_v7 = vmul.f32 %v1270_v58, %v7393_v45  ;;  %v1271_v12 = vmul.f32 %v1270_v58, %v7331_v0  ;;  %v1343_v58 = vrot.slane %v1336_v43, 2 }
  0xc7   : > { %v7517_v13 = vpop.permute.xlu1 %352  ;;  %v7521_v17 = vpop.permute.xlu0 %338  ;;  %v1260_v18 = vsel %vm1035_vm1, %v1257_v3, %v1259_v4  ;;  %v1258_v24 = vsel %vm1035_vm1, %v1256_v11, %v1257_v3  ;;  %v1375_v3 = vstv %s6640_s11  ;;  %v1321_v4 = vsel %vm1035_vm1, %v1319_v53, %v1320_v46  ;;  %s6665_s11 = sld [smem:[#allocation3 + $0xb]] }
  0xc8   : > { %v1278_v19 = vrot.slane %v1272_v5, 2  ;;  %v1280_v20 = vrot.slane %v1273_v7, 2  ;;  %v1340_v5 = vrot.slane %v1334_v54, 2  ;;  %v1355_v7 = vmul.f32 %v1354_v50, %v7331_v0 }
  0xc9   : > { %1000 = vrot.lane.b32.xlu1 %v997_v9, %s7182_s9  ;;  %998 = vrot.lane.b32.xlu0 %v995_v14, %s7182_s9  ;;  %v1396_v11 = vstv %s6641_s12  ;;  %v1377_v16 = vmul.f32 %v1375_v3, %v7334_v1  ;;  %s6666_s12 = sld [smem:[#allocation3 + $0x38]] }
  0xca   : > { %v1281_v31 = vsel %vm1035_vm1, %v1278_v19, %v1280_v20  ;;  %v1398_v26 = vmul.f32 %v1396_v11, %v7334_v1  ;;  %v1397_v40 = vmul.f32 %v1396_v11, %v7331_v0 }
  0xcb   : > { %v7528_v23 = vpop.permute.xlu1 %366  ;;  %v7532_v28 = vpop.permute.xlu0 %364 }
  0xcc   : > { %v1404_v43 = vrot.slane %v1398_v26, 2 }
  0xcd   : > { %1021 = vrot.lane.b32.xlu1 %v1018_v21, %s7182_s9  ;;  %1019 = vrot.lane.b32.xlu0 %v1016_v25, %s7182_s9  ;;  %v1294_v21 = vmul.f32 %v1291_v8, %v7393_v45  ;;  %v1277_v25 = vrot.slane %v1271_v12, 2  ;;  %v1362_v12 = vrot.slane %v1356_v60, 2 }
  0xcf   : > { %v7539_v35 = vpop.permute.xlu1 %380  ;;  %v7543_v39 = vpop.permute.xlu0 %378  ;;  %v1301_v32 = vrot.slane %v1294_v21, 2  ;;  %v1279_v37 = vsel %vm1035_vm1, %v1277_v25, %v1278_v19  ;;  %v1361_v21 = vrot.slane %v1355_v7, 2 }
  0xd1   : > { %1179 = vrot.lane.b32.xlu1 %v1176_v29, %s7181_s16  ;;  %1177 = vrot.lane.b32.xlu0 %v1174_v36, %s7181_s16  ;;  %v1299_v29 = vrot.slane %v1293_v15, 2  ;;  %v1364_v15 = vrot.slane %v1357_v61, 2 }
  0xd3   : > { %v7550_v47 = vpop.permute.xlu1 %394  ;;  %v7554_v51 = vpop.permute.xlu0 %392  ;;  %v1302_v44 = vsel %vm1035_vm1, %v1299_v29, %v1301_v32  ;;  %v1300_v52 = vsel %vm1035_vm1, %v1298_v38, %v1299_v29  ;;  %v1399_v29 = vmul.f32 %v1396_v11, %v7393_v45  ;;  %v1365_v30 = vsel %vm1035_vm1, %v1362_v12, %v1364_v15 }
  0xd5   : > { %1200 = vrot.lane.b32.xlu1 %v1197_v42, %s7181_s16  ;;  %1198 = vrot.lane.b32.xlu0 %v1195_v48, %s7181_s16  ;;  %v1335_v42 = vmul.f32 %v1333_v34, %v7334_v1  ;;  %v1322_v48 = vrot.slane %v1315_v33, 2  ;;  %v1417_v34 = vstv %s6642_s13  ;;  %s6667_s13 = sld [smem:[#allocation3 + $0x65]] }
  0xd6   : > { %v1420_v50 = vmul.f32 %v1417_v34, %v7393_v45 }
  0xd7   : > { %v7561_v57 = vpop.permute.xlu1 %408  ;;  %v7565_v62 = vpop.permute.xlu0 %406  ;;  %v1341_v56 = vrot.slane %v1335_v42, 2 }
  0xd9   : > { %1221 = vrot.lane.b32.xlu1 %v1218_v55, %s7181_s16  ;;  %1219 = vrot.lane.b32.xlu0 %v1216_v59, %s7181_s16  ;;  %v1323_v59 = vsel %vm1035_vm1, %v1320_v46, %v1322_v48  ;;  %v1342_v20 = vsel %vm1035_vm1, %v1340_v5, %v1341_v56  ;;  %v1419_v48 = vmul.f32 %v1417_v34, %v7334_v1  ;;  %v1427_v5 = vrot.slane %v1420_v50, 2 }
  0xdb   : > { %v7572_v9 = vpop.permute.xlu1 %422  ;;  %v7576_v14 = vpop.permute.xlu0 %420 }
  0xdd   : > { %1242 = vrot.lane.b32.xlu1 %v1239_v63, %s7181_s16  ;;  %1240 = vrot.lane.b32.xlu0 %v1237_v10, %s7181_s16  ;;  %v1344_v10 = vsel %vm1035_vm1, %v1341_v56, %v1343_v58  ;;  %v1403_v56 = vrot.slane %v1397_v40, 2  ;;  %v1418_v58 = vmul.f32 %v1417_v34, %v7331_v0 }
  0xdf   : > { %v7583_v22 = vpop.permute.xlu1 %436  ;;  %v7587_v27 = vpop.permute.xlu0 %434  ;;  %v1405_v11 = vsel %vm1035_vm1, %v1403_v56, %v1404_v43 }
  0xe0   : > { %13398 = vst [vmem:[#allocation13_spill] sm:$0xff] %v7583_v22  ;;  %13399 = vst [vmem:[#allocation14_spill] sm:$0xff] %v7587_v27 }
  0xe1   : > { %1263 = vrot.lane.b32.xlu1 %v1260_v18, %s7181_s16  ;;  %1261 = vrot.lane.b32.xlu0 %v1258_v24, %s7181_s16  ;;  %v1378_v18 = vmul.f32 %v1375_v3, %v7393_v45  ;;  %v1376_v24 = vmul.f32 %v1375_v3, %v7331_v0 }
  0xe3   : > { %v7594_v36 = vpop.permute.xlu1 %450  ;;  %v7598_v41 = vpop.permute.xlu0 %448  ;;  %v1385_v32 = vrot.slane %v1378_v18, 2  ;;  %v1382_v38 = vrot.slane %v1376_v24, 2 }
  0xe4   : > { %13400 = vst [vmem:[#allocation15_spill] sm:$0xff] %v7598_v41 }
  0xe5   : > { %1284 = vrot.lane.b32.xlu1 %v1281_v31, %s7181_s16  ;;  %1282 = vrot.lane.b32.xlu0 %v1279_v37, %s7181_s16  ;;  %v1383_v31 = vrot.slane %v1377_v16, 2  ;;  %v1363_v37 = vsel %vm1035_vm1, %v1361_v21, %v1362_v12  ;;  %v1424_v12 = vrot.slane %v1418_v58, 2 }
  0xe7   : > { %v7605_v49 = vpop.permute.xlu1 %464  ;;  %v7609_v55 = vpop.permute.xlu0 %462  ;;  %v1386_v46 = vsel %vm1035_vm1, %v1383_v31, %v1385_v32  ;;  %v1384_v54 = vsel %vm1035_vm1, %v1382_v38, %v1383_v31 }
  0xe8   : > { %13401 = vst [vmem:[#allocation16_spill] sm:$0xff] %v7605_v49  ;;  %13402 = vst [vmem:[#allocation17_spill] sm:$0xff] %v7609_v55 }
  0xe9   : > { %1305 = vrot.lane.b32.xlu1 %v1302_v44, %s7181_s16  ;;  %1303 = vrot.lane.b32.xlu0 %v1300_v52, %s7181_s16  ;;  %v1406_v44 = vrot.slane %v1399_v29, 2  ;;  %v1438_v52 = vstv %s6643_s15  ;;  %s6668_s15 = sld [smem:[#allocation3 + $0x92]] }
  0xea   : > { %v1440_v60 = vmul.f32 %v1438_v52, %v7334_v1  ;;  %v1441_v61 = vmul.f32 %v1438_v52, %v7393_v45  ;;  %v1439_v15 = vmul.f32 %v1438_v52, %v7331_v0 }
  0xeb   : > { %v7616_v63 = vpop.permute.xlu1 %478  ;;  %v7620_v8 = vpop.permute.xlu0 %476  ;;  %v1407_v3 = vsel %vm1035_vm1, %v1404_v43, %v1406_v44 }
  0xec   : > { %13403 = vst [vmem:[#allocation18_spill] sm:$0xff] %v7616_v63  ;;  %13404 = vst [vmem:[#allocation19_spill] sm:$0xff] %v7620_v8  ;;  %v1446_v18 = vrot.slane %v1440_v60, 2  ;;  %v1445_v32 = vrot.slane %v1439_v15, 2  ;;  %v7709_v15 = vld [vmem:[%s7328_s14 + $0x18] sm:$0xff] }
  0xed   : > { %1326 = vrot.lane.b32.xlu1 %v1323_v59, %s7181_s16  ;;  %1324 = vrot.lane.b32.xlu0 %v1321_v4, %s7181_s16  ;;  %v1425_v4 = vrot.slane %v1419_v48, 2 }
  0xee   : > { %v1447_v50 = vsel %vm1035_vm1, %v1445_v32, %v1446_v18  ;;  %v1581_v32 = vstv %s6659_s26  ;;  %s7813_s26 = sld [smem:[#allocation3 + $0x146]] }
  0xef   : > { %v7627_v19 = vpop.permute.xlu1 %492  ;;  %v7631_v25 = vpop.permute.xlu0 %490  ;;  %v1428_v21 = vsel %vm1035_vm1, %v1425_v4, %v1427_v5  ;;  %v1426_v31 = vsel %vm1035_vm1, %v1424_v12, %v1425_v4  ;;  %v7701_v5 = vld [vmem:[%s7328_s14 + $0x20] sm:$0xff] }
  0xf0   : > { %13405 = vst [vmem:[#allocation20_spill] sm:$0xff] %v7627_v19  ;;  %13406 = vst [vmem:[#allocation21_spill] sm:$0xff] %v7631_v25 }
  0xf1   : > { %1347 = vrot.lane.b32.xlu1 %v1344_v10, %s7182_s9  ;;  %1345 = vrot.lane.b32.xlu0 %v1342_v20, %s7182_s9  ;;  %v1459_v10 = vstv %s6644_s17  ;;  %v1448_v20 = vrot.slane %v1441_v61, 2  ;;  %s6669_s17 = sld [smem:[#allocation3 + $0xbf]] }
  0xf2   : > { %v1461_v24 = vmul.f32 %v1459_v10, %v7334_v1  ;;  %v1462_v26 = vmul.f32 %v1459_v10, %v7393_v45  ;;  %v1460_v34 = vmul.f32 %v1459_v10, %v7331_v0  ;;  %v1553_v10 = vstv %s7681_s19  ;;  %s7803_s19 = sld [smem:[#allocation3 + $0x119]] }
  0xf3   : > { %v7638_v33 = vpop.permute.xlu1 %506  ;;  %v7642_v42 = vpop.permute.xlu0 %504  ;;  %v1449_v38 = vsel %vm1035_vm1, %v1446_v18, %v1448_v20  ;;  %v1555_v20 = vmul.f32 %v7701_v5, %v1553_v10 }
  0xf4   : > { %13407 = vst [vmem:[#allocation22_spill] sm:$0xff] %v7638_v33  ;;  %13408 = vst [vmem:[#allocation23_spill] sm:$0xff] %v7642_v42  ;;  %v1467_v40 = vrot.slane %v1461_v24, 2  ;;  %v1469_v43 = vrot.slane %v1462_v26, 2  ;;  %v1466_v52 = vrot.slane %v1460_v34, 2  ;;  %v1554_v26 = vmul.f32 %v7709_v15, %v1553_v10 }
  0xf5   : > { %1368 = vrot.lane.b32.xlu1 %v1365_v30, %s7182_s9  ;;  %1366 = vrot.lane.b32.xlu0 %v1363_v37, %s7182_s9  ;;  %v1480_v30 = vstv %s6645_s18  ;;  %s6670_s18 = sld [smem:[#allocation3 + $0xec]] }
  0xf6   : > { %v1482_v44 = vmul.f32 %v1480_v30, %v7334_v1  ;;  %v1470_v1 = vsel %vm1035_vm1, %v1467_v40, %v1469_v43  ;;  %v1468_v61 = vsel %vm1035_vm1, %v1466_v52, %v1467_v40  ;;  %v1583_v43 = vmul.f32 %v7701_v5, %v1581_v32 }
  0xf7   : > { %v7649_v53 = vpop.permute.xlu1 %520  ;;  %v7653_v59 = vpop.permute.xlu0 %518 }
  0xf8   : > { %13409 = vst [vmem:[#allocation24_spill] sm:$0xff] %v7649_v53  ;;  %13410 = vst [vmem:[#allocation25_spill] sm:$0xff] %v7653_v59 }
  0xf9   : > { %1389 = vrot.lane.b32.xlu1 %v1386_v46, %s7182_s9  ;;  %1387 = vrot.lane.b32.xlu0 %v1384_v54, %s7182_s9  ;;  %v1483_v46 = vmul.f32 %v1480_v30, %v7393_v45  ;;  %v1481_v54 = vmul.f32 %v1480_v30, %v7331_v0  ;;  %v1488_v45 = vrot.slane %v1482_v44, 2  ;;  %v1595_v44 = vstv %s6660_s27  ;;  %s6682_s27 = sld [smem:[#allocation3 + $0x3a]] }
  0xfb   : > { %v7660_v7 = vpop.permute.xlu1 %534  ;;  %v7664_v16 = vpop.permute.xlu0 %532  ;;  %v1490_v58 = vrot.slane %v1483_v46, 2 }
  0xfc   : > { %13411 = vst [vmem:[#allocation26_spill] sm:$0xff] %v7660_v7  ;;  %13412 = vst [vmem:[#allocation27_spill] sm:$0xff] %v7664_v16 }
  0xfd   : > { %1410 = vrot.lane.b32.xlu1 %v1407_v3, %s7182_s9  ;;  %1408 = vrot.lane.b32.xlu0 %v1405_v11, %s7182_s9  ;;  %v1487_v3 = vrot.slane %v1481_v54, 2  ;;  %v1491_v0 = vsel %vm1035_vm1, %v1488_v45, %v1490_v58  ;;  %v1597_v54 = vmul.f32 %v7701_v5, %v1595_v44  ;;  %v1596_v58 = vmul.f32 %v7709_v15, %v1595_v44 }
  0xfe   : > { %v1651_v44 = vstv %s6664_s10  ;;  %s6686_s10 = sld [smem:[#allocation3 + $0xee]] }
  0xff   : > { %v7671_v29 = vpop.permute.xlu1 %548  ;;  %v7675_v37 = vpop.permute.xlu0 %546  ;;  %v1489_v12 = vsel %vm1035_vm1, %v1487_v3, %v1488_v45 }
 0x100   : > { %13413 = vst [vmem:[#allocation28_spill] sm:$0xff] %v7671_v29  ;;  %13414 = vst [vmem:[#allocation29_spill] sm:$0xff] %v7675_v37 }
 0x101   : > { %1431 = vrot.lane.b32.xlu1 %v1428_v21, %s7182_s9  ;;  %1429 = vrot.lane.b32.xlu0 %v1426_v31, %s7182_s9  ;;  %v1567_v21 = vstv %s6658_s24  ;;  %s6681_s24 = sld [smem:[#allocation3 + $0xd]] }
 0x102   : > { %v1569_v31 = vmul.f32 %v7701_v5, %v1567_v21 }
 0x103   : > { %v7684_v48 = vpop.permute.xlu1 %706  ;;  %v7688_v56 = vpop.permute.xlu0 %704 }
 0x104   : > { %13415 = vst [vmem:[#allocation30_spill] sm:$0xff] %v7684_v48  ;;  %13416 = vst [vmem:[#allocation31_spill] sm:$0xff] %v7688_v56 }
 0x105   : > { %1452 = vrot.lane.b32.xlu1 %v1449_v38, %s7182_s9  ;;  %1450 = vrot.lane.b32.xlu0 %v1447_v50, %s7182_s9  ;;  %v1568_v38 = vmul.f32 %v7709_v15, %v1567_v21  ;;  %v1582_v50 = vmul.f32 %v7709_v15, %v1581_v32 }
 0x107   : > { %v7693_v60 = vpop.permute.xlu1 %727  ;;  %v7696_v4 = vpop.permute.xlu0 %725 }
 0x108   : > { %13417 = vst [vmem:[#allocation32_spill] sm:$0xff] %v7693_v60  ;;  %13418 = vst [vmem:[#allocation33_spill] sm:$0xff] %v7696_v4 }
 0x109   : > { %1473 = vrot.lane.b32.xlu1 %v1470_v1, %s7182_s9  ;;  %1471 = vrot.lane.b32.xlu0 %v1468_v61, %s7182_s9  ;;  %v1609_v1 = vstv %s6661_s7  ;;  %s6683_s7 = sld [smem:[#allocation3 + $0x67]] }
 0x10a   : > { %v1611_v3 = vmul.f32 %v7701_v5, %v1609_v1 }
 0x10b   : > { %v7705_v11 = vpop.permute.xlu1 %748  ;;  %v7711_v18 = vpop.permute.xlu0 %746 }
 0x10c   : > { %13419 = vst [vmem:[#allocation34_spill] sm:$0xff] %v7705_v11  ;;  %13420 = vst [vmem:[#allocation35_spill] sm:$0xff] %v7711_v18  ;;  %v8137_v18 = vld [vmem:[%s7328_s14 + $0x8] sm:$0xff] }
 0x10d   : > { %1494 = vrot.lane.b32.xlu1 %v1491_v0, %s7182_s9  ;;  %1492 = vrot.lane.b32.xlu0 %v1489_v12, %s7182_s9  ;;  %v1623_v0 = vstv %s6662_s8  ;;  %v1610_v12 = vmul.f32 %v7709_v15, %v1609_v1  ;;  %s6684_s8 = sld [smem:[#allocation3 + $0x94]] }
 0x10e   : > { %v1625_v21 = vmul.f32 %v7701_v5, %v1623_v0  ;;  %v1624_v32 = vmul.f32 %v7709_v15, %v1623_v0 }
 0x10f   : > { %v7716_v24 = vpop.permute.xlu1 %769  ;;  %v7719_v30 = vpop.permute.xlu0 %767 }
 0x110   : > { %13421 = vst [vmem:[#allocation36_spill] sm:$0xff] %v7716_v24  ;;  %13422 = vst [vmem:[#allocation37_spill] sm:$0xff] %v7719_v30 }
 0x111   : > { %1560 = vrot.lane.b32.xlu1 %v1555_v20, %s7181_s16  ;;  %1558 = vrot.lane.b32.xlu0 %v1554_v26, %s7181_s16  ;;  %v1637_v26 = vstv %s6663_s6  ;;  %s6685_s6 = sld [smem:[#allocation3 + $0xc1]] }
 0x113   : > { %v7724_v34 = vpop.permute.xlu1 %790  ;;  %v7727_v40 = vpop.permute.xlu0 %788 }
 0x114   : > { %13423 = vst [vmem:[#allocation38_spill] sm:$0xff] %v7724_v34  ;;  %13424 = vst [vmem:[#allocation39_spill] sm:$0xff] %v7727_v40  ;;  %v1976_v40 = vstv %s6684_s8  ;;  %s6706_s8 = sld [smem:[#allocation3 + $0x3d]] }
 0x115   : > { %1574 = vrot.lane.b32.xlu1 %v1569_v31, %s7181_s16  ;;  %1572 = vrot.lane.b32.xlu0 %v1568_v38, %s7181_s16 }
 0x117   : > { %v7732_v46 = vpop.permute.xlu1 %811  ;;  %v7735_v52 = vpop.permute.xlu0 %809  ;;  %v1997_v34 = vstv %s6685_s6  ;;  %s6707_s6 = sld [smem:[#allocation3 + $0x6a]] }
 0x118   : > { %13425 = vst [vmem:[#allocation40_spill] sm:$0xff] %v7732_v46  ;;  %13426 = vst [vmem:[#allocation41_spill] sm:$0xff] %v7735_v52 }
 0x119   : > { %1588 = vrot.lane.b32.xlu1 %v1583_v43, %s7181_s16  ;;  %1586 = vrot.lane.b32.xlu0 %v1582_v50, %s7181_s16  ;;  %v1639_v43 = vmul.f32 %v7701_v5, %v1637_v26 }
 0x11b   : > { %v7740_v45 = vpop.permute.xlu1 %832  ;;  %v7743_v61 = vpop.permute.xlu0 %830 }
 0x11c   : > { %13427 = vst [vmem:[#allocation42_spill] sm:$0xff] %v7740_v45  ;;  %13428 = vst [vmem:[#allocation43_spill] sm:$0xff] %v7743_v61 }
 0x11d   : > { %1602 = vrot.lane.b32.xlu1 %v1597_v54, %s7181_s16  ;;  %1600 = vrot.lane.b32.xlu0 %v1596_v58, %s7181_s16  ;;  %v1638_v54 = vmul.f32 %v7709_v15, %v1637_v26  ;;  %v1653_v58 = vmul.f32 %v7701_v5, %v1651_v44 }
 0x11f   : > { %v7748_v10 = vpop.permute.xlu1 %853  ;;  %v7751_v20 = vpop.permute.xlu0 %851 }
 0x120   : > { %13429 = vst [vmem:[#allocation44_spill] sm:$0xff] %v7748_v10  ;;  %13430 = vst [vmem:[#allocation45_spill] sm:$0xff] %v7751_v20  ;;  %v1934_v20 = vstv %s6682_s27  ;;  %s6696_s27 = sld [smem:[#allocation3 + $0x149]] }
 0x121   : > { %1616 = vrot.lane.b32.xlu1 %v1611_v3, %s7181_s16  ;;  %1614 = vrot.lane.b32.xlu0 %v1610_v12, %s7181_s16  ;;  %v1665_v3 = vstv %s6665_s11  ;;  %v1652_v12 = vmul.f32 %v7709_v15, %v1651_v44  ;;  %v1936_v61 = vmul.f32 %v7701_v5, %v1934_v20  ;;  %s6687_s11 = sld [smem:[#allocation3 + $0x11b]] }
 0x122   : > { %v1667_v26 = vmul.f32 %v7701_v5, %v1665_v3 }
 0x123   : > { %v7756_v31 = vpop.permute.xlu1 %874  ;;  %v7759_v38 = vpop.permute.xlu0 %872 }
 0x124   : > { %13431 = vst [vmem:[#allocation46_spill] sm:$0xff] %v7756_v31  ;;  %13432 = vst [vmem:[#allocation47_spill] sm:$0xff] %v7759_v38  ;;  %v1763_v38 = vstv %s7813_s26  ;;  %s6695_s26 = sld [smem:[#allocation3 + $0x11c]] }
 0x125   : > { %1630 = vrot.lane.b32.xlu1 %v1625_v21, %s7181_s16  ;;  %1628 = vrot.lane.b32.xlu0 %v1624_v32, %s7181_s16  ;;  %v1679_v32 = vstv %s6666_s12  ;;  %s6688_s12 = sld [smem:[#allocation3 + $0x148]] }
 0x126   : > { %v1681_v44 = vmul.f32 %v7701_v5, %v1679_v32 }
 0x127   : > { %v7764_v50 = vpop.permute.xlu1 %895  ;;  %v7767_v1 = vpop.permute.xlu0 %893 }
 0x128   : > { %13433 = vst [vmem:[#allocation48_spill] sm:$0xff] %v7764_v50  ;;  %13434 = vst [vmem:[#allocation49_spill] sm:$0xff] %v7767_v1  ;;  %v1666_v1 = vmul.f32 %v7709_v15, %v1665_v3 }
 0x129   : > { %1644 = vrot.lane.b32.xlu1 %v1639_v43, %s7181_s16  ;;  %1642 = vrot.lane.b32.xlu0 %v1638_v54, %s7181_s16  ;;  %v1693_v54 = vstv %s6667_s13  ;;  %s6689_s13 = sld [smem:[#allocation3 + $0xe]] }
 0x12a   : > { %v1695_v3 = vmul.f32 %v7701_v5, %v1693_v54 }
 0x12b   : > { %v7772_v0 = vpop.permute.xlu1 %916  ;;  %v7775_v21 = vpop.permute.xlu0 %914 }
 0x12c   : > { %13435 = vst [vmem:[#allocation50_spill] sm:$0xff] %v7772_v0  ;;  %13436 = vst [vmem:[#allocation51_spill] sm:$0xff] %v7775_v21  ;;  %v1680_v21 = vmul.f32 %v7709_v15, %v1679_v32  ;;  %v1721_v32 = vstv %s6669_s17  ;;  %s6691_s17 = sld [smem:[#allocation3 + $0x68]] }
 0x12d   : > { %1658 = vrot.lane.b32.xlu1 %v1653_v58, %s7181_s16  ;;  %1656 = vrot.lane.b32.xlu0 %v1652_v12, %s7181_s16  ;;  %v1707_v12 = vstv %s6668_s15  ;;  %s6690_s15 = sld [smem:[#allocation3 + $0x3b]] }
 0x12f   : > { %v7780_v43 = vpop.permute.xlu1 %937  ;;  %v7783_v50 = vpop.permute.xlu0 %935 }
 0x130   : > { %13437 = vst [vmem:[#allocation52_spill] sm:$0xff] %v7780_v43  ;;  %13438 = vst [vmem:[#allocation53_spill] sm:$0xff] %v7783_v50  ;;  %v1694_v50 = vmul.f32 %v7709_v15, %v1693_v54  ;;  %v1723_v54 = vmul.f32 %v7701_v5, %v1721_v32 }
 0x131   : > { %1672 = vrot.lane.b32.xlu1 %v1667_v26, %s7182_s9  ;;  %1670 = vrot.lane.b32.xlu0 %v1666_v1, %s7182_s9  ;;  %v1709_v1 = vmul.f32 %v7701_v5, %v1707_v12 }
 0x133   : > { %v7788_v58 = vpop.permute.xlu1 %958  ;;  %v7791_v0 = vpop.permute.xlu0 %956 }
 0x134   : > { %13439 = vst [vmem:[#allocation54_spill] sm:$0xff] %v7788_v58  ;;  %13440 = vst [vmem:[#allocation55_spill] sm:$0xff] %v7791_v0  ;;  %v1913_v0 = vstv %s6681_s24  ;;  %s6694_s24 = sld [smem:[#allocation3 + $0xef]] }
 0x135   : > { %1686 = vrot.lane.b32.xlu1 %v1681_v44, %s7182_s9  ;;  %1684 = vrot.lane.b32.xlu0 %v1680_v21, %s7182_s9  ;;  %v1708_v21 = vmul.f32 %v7709_v15, %v1707_v12 }
 0x137   : > { %v7796_v26 = vpop.permute.xlu1 %979  ;;  %v7799_v43 = vpop.permute.xlu0 %977 }
 0x138   : > { %13441 = vst [vmem:[#allocation56_spill] sm:$0xff] %v7796_v26  ;;  %13442 = vst [vmem:[#allocation57_spill] sm:$0xff] %v7799_v43 }
 0x139   : > { %1700 = vrot.lane.b32.xlu1 %v1695_v3, %s7182_s9  ;;  %1698 = vrot.lane.b32.xlu0 %v1694_v50, %s7182_s9  ;;  %v1735_v3 = vstv %s6670_s18  ;;  %v1722_v50 = vmul.f32 %v7709_v15, %v1721_v32  ;;  %s6692_s18 = sld [smem:[#allocation3 + $0x95]] }
 0x13a   : > { %v1737_v12 = vmul.f32 %v7701_v5, %v1735_v3 }
 0x13b   : > { %v7806_v44 = vpop.permute.xlu1 %1000  ;;  %v7809_v26 = vpop.permute.xlu0 %998 }
 0x13c   : > { %13443 = vst [vmem:[#allocation58_spill] sm:$0xff] %v7806_v44  ;;  %13444 = vst [vmem:[#allocation59_spill] sm:$0xff] %v7809_v26  ;;  %v7825_v26 = vld [vmem:[%s7328_s14 + $0x28] sm:$0x3] }
 0x13d   : > { %1714 = vrot.lane.b32.xlu1 %v1709_v1, %s7182_s9  ;;  %1712 = vrot.lane.b32.xlu0 %v1708_v21, %s7182_s9  ;;  %v1749_v1 = vstv %s7803_s19  ;;  %v1736_v21 = vmul.f32 %v7709_v15, %v1735_v3  ;;  %v1937_v45 = vmul.f32 %v7825_v26, %v1934_v20  ;;  %s6693_s19 = sld [smem:[#allocation3 + $0xc2]] }
 0x13e   : > { %v1751_v32 = vmul.f32 %v7701_v5, %v1749_v1  ;;  %v1750_v3 = vmul.f32 %v7709_v15, %v1749_v1  ;;  %v1764_v1 = vmul.f32 %v7709_v15, %v1763_v38 }
 0x13f   : > { %v7816_v43 = vpop.permute.xlu1 %1021  ;;  %v7819_v44 = vpop.permute.xlu0 %1019  ;;  %v1944_v52 = vrot.slane %v1937_v45, 1  ;;  %v1978_v45 = vmul.f32 %v7701_v5, %v1976_v40 }
 0x140   : > { %13445 = vst [vmem:[#allocation60_spill] sm:$0xff] %v7816_v43  ;;  %13446 = vst [vmem:[#allocation61_spill] sm:$0xff] %v7819_v44  ;;  %v1916_v44 = vmul.f32 %v7825_v26, %v1913_v0 }
 0x141   : > { %1728 = vrot.lane.b32.xlu1 %v1723_v54, %s7182_s9  ;;  %1726 = vrot.lane.b32.xlu0 %v1722_v50, %s7182_s9  ;;  %v1915_v54 = vmul.f32 %v7701_v5, %v1913_v0 }
 0x142   : > { %v1923_v10 = vrot.slane %v1916_v44, 1 }
 0x143   : > { %v7828_v58 = vpop.permute.xlu1 %1179  ;;  %v7831_v43 = vpop.permute.xlu0 %1177  ;;  %v1921_v31 = vrot.slane %v1915_v54, 1  ;;  %v1942_v54 = vrot.slane %v1936_v61, 1  ;;  %v1979_v61 = vmul.f32 %v7825_v26, %v1976_v40 }
 0x144   : > { %13447 = vst [vmem:[#allocation62_spill] sm:$0xff] %v7828_v58  ;;  %13448 = vst [vmem:[#allocation63_spill] sm:$0xff] %v7831_v43  ;;  %v1914_v58 = vmul.f32 %v7709_v15, %v1913_v0  ;;  %v1955_v0 = vstv %s6683_s7  ;;  %s6705_s7 = sld [smem:[#allocation3 + $0x10]] }
 0x145   : > { %1742 = vrot.lane.b32.xlu1 %v1737_v12, %s7182_s9  ;;  %1740 = vrot.lane.b32.xlu0 %v1736_v21, %s7182_s9  ;;  %v1765_v12 = vmul.f32 %v7701_v5, %v1763_v38  ;;  %v1924_v44 = vsel %vm562_vm0, %v1921_v31, %v1923_v10  ;;  %v1957_v46 = vmul.f32 %v7701_v5, %v1955_v0 }
 0x146   : > { %v1945_v10 = vsel %vm562_vm0, %v1942_v54, %v1944_v52 }
 0x147   : > { %v7839_v50 = vpop.permute.xlu1 %1200  ;;  %v7843_v43 = vpop.permute.xlu0 %1198 }
 0x148   : > { %13449 = vst [vmem:[#allocation64_spill] sm:$0xff] %v7839_v50  ;;  %13450 = vst [vmem:[#allocation65_spill] sm:$0xff] %v7843_v43  ;;  %v1920_v50 = vrot.slane %v1914_v58, 1  ;;  %v1935_v43 = vmul.f32 %v7709_v15, %v1934_v20 }
 0x149   : > { %1756 = vrot.lane.b32.xlu1 %v1751_v32, %s7182_s9  ;;  %1754 = vrot.lane.b32.xlu0 %v1750_v3, %s7182_s9  ;;  %v1958_v3 = vmul.f32 %v7825_v26, %v1955_v0 }
 0x14a   : > { %v1922_v20 = vsel %vm562_vm0, %v1920_v50, %v1921_v31  ;;  %v1941_v58 = vrot.slane %v1935_v43, 1 }
 0x14b   : > { %v7850_v21 = vpop.permute.xlu1 %1221  ;;  %v7854_v32 = vpop.permute.xlu0 %1219 }
 0x14c   : > { %13451 = vst [vmem:[#allocation66_spill] sm:$0xff] %v7850_v21  ;;  %13452 = vst [vmem:[#allocation67_spill] sm:$0xff] %v7854_v32  ;;  %v1956_v32 = vmul.f32 %v7709_v15, %v1955_v0  ;;  %v1963_v21 = vrot.slane %v1957_v46, 1  ;;  %v1943_v43 = vsel %vm562_vm0, %v1941_v58, %v1942_v54  ;;  %v1977_v0 = vmul.f32 %v7709_v15, %v1976_v40 }
 0x14d   : > { %1770 = vrot.lane.b32.xlu1 %v1765_v12, %s7182_s9  ;;  %1768 = vrot.lane.b32.xlu0 %v1764_v1, %s7182_s9  ;;  %v1965_v1 = vrot.slane %v1958_v3, 1  ;;  %v1999_v46 = vmul.f32 %v7701_v5, %v1997_v34  ;;  %v2000_v3 = vmul.f32 %v7825_v26, %v1997_v34  ;;  %v1998_v58 = vmul.f32 %v7709_v15, %v1997_v34 }
 0x14e   : > { %v1962_v50 = vrot.slane %v1956_v32, 1  ;;  %v2018_v32 = vstv %s6686_s10  ;;  %v1983_v54 = vrot.slane %v1977_v0, 1  ;;  %s6708_s10 = sld [smem:[#allocation3 + $0x97]] }
 0x14f   : > { %v7861_v38 = vpop.permute.xlu1 %1242  ;;  %v7865_v12 = vpop.permute.xlu0 %1240  ;;  %v1966_v52 = vsel %vm562_vm0, %v1963_v21, %v1965_v1  ;;  %v2007_v1 = vrot.slane %v2000_v3, 1 }
 0x150   : > { %13453 = vst [vmem:[#allocation68_spill] sm:$0xff] %v7861_v38  ;;  %13454 = vst [vmem:[#allocation69_spill] sm:$0xff] %v7865_v12  ;;  %v1984_v12 = vrot.slane %v1978_v45, 1  ;;  %v1986_v38 = vrot.slane %v1979_v61, 1  ;;  %v1964_v40 = vsel %vm562_vm0, %v1962_v50, %v1963_v21  ;;  %v2005_v61 = vrot.slane %v1999_v46, 1 }
 0x151   : > { %1927 = vrot.lane.b32.xlu1 %v1924_v44, %s7181_s16  ;;  %1925 = vrot.lane.b32.xlu0 %v1922_v20, %s7181_s16  ;;  %v2004_v21 = vrot.slane %v1998_v58, 1  ;;  %v2019_v50 = vmul.f32 %v7709_v15, %v2018_v32 }
 0x152   : > { %v1987_v45 = vsel %vm562_vm0, %v1984_v12, %v1986_v38  ;;  %v1985_v34 = vsel %vm562_vm0, %v1983_v54, %v1984_v12 }
 0x153   : > { %v7872_v31 = vpop.permute.xlu1 %1263  ;;  %v7876_v44 = vpop.permute.xlu0 %1261  ;;  %v2025_v54 = vrot.slane %v2019_v50, 1 }
 0x154   : > { %13455 = vst [vmem:[#allocation70_spill] sm:$0xff] %v7872_v31  ;;  %13456 = vst [vmem:[#allocation71_spill] sm:$0xff] %v7876_v44  ;;  %v2020_v44 = vmul.f32 %v7701_v5, %v2018_v32  ;;  %v2039_v31 = vstv %s6687_s11  ;;  %s6709_s11 = sld [smem:[#allocation3 + $0xc4]] }
 0x155   : > { %1948 = vrot.lane.b32.xlu1 %v1945_v10, %s7181_s16  ;;  %1946 = vrot.lane.b32.xlu0 %v1943_v43, %s7181_s16  ;;  %v2021_v43 = vmul.f32 %v7825_v26, %v2018_v32  ;;  %v2041_v38 = vmul.f32 %v7701_v5, %v2039_v31  ;;  %v2042_v46 = vmul.f32 %v7825_v26, %v2039_v31 }
 0x156   : > { %v2026_v3 = vrot.slane %v2020_v44, 1  ;;  %v2006_v32 = vsel %vm562_vm0, %v2004_v21, %v2005_v61  ;;  %v2040_v58 = vmul.f32 %v7709_v15, %v2039_v31 }
 0x157   : > { %v7883_v20 = vpop.permute.xlu1 %1284  ;;  %v7887_v10 = vpop.permute.xlu0 %1282 }
 0x158   : > { %13457 = vst [vmem:[#allocation72_spill] sm:$0xff] %v7883_v20  ;;  %13458 = vst [vmem:[#allocation73_spill] sm:$0xff] %v7887_v10  ;;  %v2060_v10 = vstv %s6688_s12  ;;  %v2027_v31 = vsel %vm562_vm0, %v2025_v54, %v2026_v3  ;;  %v2046_v21 = vrot.slane %v2040_v58, 1  ;;  %s6710_s12 = sld [smem:[#allocation3 + $0xf1]] }
 0x159   : > { %1969 = vrot.lane.b32.xlu1 %v1966_v52, %s7181_s16  ;;  %1967 = vrot.lane.b32.xlu0 %v1964_v40, %s7181_s16  ;;  %v2008_v52 = vsel %vm562_vm0, %v2005_v61, %v2007_v1  ;;  %v2028_v40 = vrot.slane %v2021_v43, 1  ;;  %v2062_v44 = vmul.f32 %v7701_v5, %v2060_v10  ;;  %v2063_v43 = vmul.f32 %v7825_v26, %v2060_v10 }
 0x15a   : > { %v2081_v61 = vstv %s6689_s13  ;;  %v2061_v50 = vmul.f32 %v7709_v15, %v2060_v10  ;;  %s6711_s13 = sld [smem:[#allocation3 + $0x11e]] }
 0x15b   : > { %v7894_v20 = vpop.permute.xlu1 %1305  ;;  %v7898_v0 = vpop.permute.xlu0 %1303  ;;  %v2029_v1 = vsel %vm562_vm0, %v2026_v3, %v2028_v40  ;;  %v2070_v40 = vrot.slane %v2063_v43, 1  ;;  %v2082_v54 = vmul.f32 %v7709_v15, %v2081_v61 }
 0x15c   : > { %13459 = vst [vmem:[#allocation74_spill] sm:$0xff] %v7894_v20  ;;  %13460 = vst [vmem:[#allocation75_spill] sm:$0xff] %v7898_v0  ;;  %v2047_v0 = vrot.slane %v2041_v38, 1  ;;  %v2049_v20 = vrot.slane %v2042_v46, 1  ;;  %v2068_v46 = vrot.slane %v2062_v44, 1  ;;  %v2067_v3 = vrot.slane %v2061_v50, 1 }
 0x15d   : > { %1990 = vrot.lane.b32.xlu1 %v1987_v45, %s7181_s16  ;;  %1988 = vrot.lane.b32.xlu0 %v1985_v34, %s7181_s16 }
 0x15e   : > { %v2050_v38 = vsel %vm562_vm0, %v2047_v0, %v2049_v20  ;;  %v2048_v10 = vsel %vm562_vm0, %v2046_v21, %v2047_v0  ;;  %v2123_v0 = vstv %s6691_s17  ;;  %v2088_v21 = vrot.slane %v2082_v54, 1  ;;  %s8060_s17 = sld [smem:[#allocation3 + $0x14b]] }
 0x15f   : > { %v7905_v12 = vpop.permute.xlu1 %1326  ;;  %v7909_v45 = vpop.permute.xlu0 %1324  ;;  %v2124_v54 = vmul.f32 %v7709_v15, %v2123_v0 }
 0x160   : > { %13461 = vst [vmem:[#allocation76_spill] sm:$0xff] %v7905_v12  ;;  %13462 = vst [vmem:[#allocation77_spill] sm:$0xff] %v7909_v45  ;;  %v2083_v45 = vmul.f32 %v7701_v5, %v2081_v61 }
 0x161   : > { %2011 = vrot.lane.b32.xlu1 %v2008_v52, %s7181_s16  ;;  %2009 = vrot.lane.b32.xlu0 %v2006_v32, %s7181_s16  ;;  %v2084_v32 = vmul.f32 %v7825_v26, %v2081_v61  ;;  %v2069_v61 = vsel %vm562_vm0, %v2067_v3, %v2068_v46 }
 0x162   : > { %v2089_v43 = vrot.slane %v2083_v45, 1  ;;  %v2125_v45 = vmul.f32 %v7701_v5, %v2123_v0 }
 0x163   : > { %v7916_v34 = vpop.permute.xlu1 %1347  ;;  %v7920_v52 = vpop.permute.xlu0 %1345 }
 0x164   : > { %13463 = vst [vmem:[#allocation78_spill] sm:$0xff] %v7916_v34  ;;  %13464 = vst [vmem:[#allocation79_spill] sm:$0xff] %v7920_v52  ;;  %v2102_v34 = vstv %s6690_s15  ;;  %s8052_s15 = sld [smem:[#allocation3 + $0x2d]] }
 0x165   : > { %2032 = vrot.lane.b32.xlu1 %v2029_v1, %s7181_s16  ;;  %2030 = vrot.lane.b32.xlu0 %v2027_v31, %s7181_s16  ;;  %v2104_v20 = vmul.f32 %v7701_v5, %v2102_v34  ;;  %v2105_v44 = vmul.f32 %v7825_v26, %v2102_v34  ;;  %v2071_v1 = vsel %vm562_vm0, %v2068_v46, %v2070_v40  ;;  %v2091_v31 = vrot.slane %v2084_v32, 1 }
 0x166   : > { %v2103_v50 = vmul.f32 %v7709_v15, %v2102_v34  ;;  %v2126_v32 = vmul.f32 %v7825_v26, %v2123_v0  ;;  %v2144_v46 = vstv %s6692_s18  ;;  %v2090_v34 = vsel %vm562_vm0, %v2088_v21, %v2089_v43  ;;  %s8065_s18 = sld [smem:[#allocation3]] }
 0x167   : > { %v7927_v12 = vpop.permute.xlu1 %1368  ;;  %v7931_v58 = vpop.permute.xlu0 %1366  ;;  %v2112_v52 = vrot.slane %v2105_v44, 1  ;;  %v2092_v40 = vsel %vm562_vm0, %v2089_v43, %v2091_v31  ;;  %v2165_v44 = vstv %s6693_s19  ;;  %v2131_v31 = vrot.slane %v2125_v45, 1  ;;  %s8069_s19 = sld [smem:[#allocation6 + $0x1]] }
 0x168   : > { %13465 = vst [vmem:[#allocation80_spill] sm:$0xff] %v7927_v12  ;;  %13466 = vst [vmem:[#allocation81_spill] sm:$0xff] %v7931_v58  ;;  %v2110_v58 = vrot.slane %v2104_v20, 1  ;;  %v2109_v3 = vrot.slane %v2103_v50, 1  ;;  %v2130_v21 = vrot.slane %v2124_v54, 1  ;;  %v2145_v50 = vmul.f32 %v7709_v15, %v2144_v46 }
 0x169   : > { %2053 = vrot.lane.b32.xlu1 %v2050_v38, %s7181_s16  ;;  %2051 = vrot.lane.b32.xlu0 %v2048_v10, %s7181_s16  ;;  %v2168_v45 = vmul.f32 %v7825_v26, %v2165_v44  ;;  %v2166_v54 = vmul.f32 %v7709_v15, %v2165_v44 }
 0x16a   : > { %v2113_v20 = vsel %vm562_vm0, %v2110_v58, %v2112_v52  ;;  %v2111_v0 = vsel %vm562_vm0, %v2109_v3, %v2110_v58  ;;  %v2167_v52 = vmul.f32 %v7701_v5, %v2165_v44  ;;  %v2186_v58 = vstv %s6694_s24  ;;  %s8077_s24 = sld [smem:[#allocation3 + $0x11]] }
 0x16b   : > { %v7938_v12 = vpop.permute.xlu1 %1389  ;;  %v7942_v38 = vpop.permute.xlu0 %1387  ;;  %v2151_v3 = vrot.slane %v2145_v50, 1 }
 0x16c   : > { %13467 = vst [vmem:[#allocation82_spill] sm:$0xff] %v7938_v12  ;;  %13468 = vst [vmem:[#allocation83_spill] sm:$0xff] %v7942_v38  ;;  %v2133_v38 = vrot.slane %v2126_v32, 1 }
 0x16d   : > { %2074 = vrot.lane.b32.xlu1 %v2071_v1, %s7181_s16  ;;  %2072 = vrot.lane.b32.xlu0 %v2069_v61, %s7181_s16  ;;  %v2146_v61 = vmul.f32 %v7701_v5, %v2144_v46 }
 0x16e   : > { %v2134_v32 = vsel %vm562_vm0, %v2131_v31, %v2133_v38 }
 0x16f   : > { %v7949_v10 = vpop.permute.xlu1 %1410  ;;  %v7953_v1 = vpop.permute.xlu0 %1408 }
 0x170   : > { %13469 = vst [vmem:[#allocation84_spill] sm:$0xff] %v7949_v10  ;;  %13470 = vst [vmem:[#allocation85_spill] sm:$0xff] %v7953_v1  ;;  %v2147_v10 = vmul.f32 %v7825_v26, %v2144_v46  ;;  %v2152_v1 = vrot.slane %v2146_v61, 1  ;;  %v2132_v46 = vsel %vm562_vm0, %v2130_v21, %v2131_v31  ;;  %v2189_v61 = vmul.f32 %v7825_v26, %v2186_v58 }
 0x171   : > { %2095 = vrot.lane.b32.xlu1 %v2092_v40, %s7182_s9  ;;  %2093 = vrot.lane.b32.xlu0 %v2090_v34, %s7182_s9  ;;  %v2172_v31 = vrot.slane %v2166_v54, 1  ;;  %v2187_v21 = vmul.f32 %v7709_v15, %v2186_v58 }
 0x172   : > { %v2154_v12 = vrot.slane %v2147_v10, 1  ;;  %v2188_v10 = vmul.f32 %v7701_v5, %v2186_v58  ;;  %v2153_v44 = vsel %vm562_vm0, %v2151_v3, %v2152_v1 }
 0x173   : > { %v7960_v43 = vpop.permute.xlu1 %1431  ;;  %v7964_v40 = vpop.permute.xlu0 %1429  ;;  %v2193_v3 = vrot.slane %v2187_v21, 1 }
 0x174   : > { %13471 = vst [vmem:[#allocation86_spill] sm:$0xff] %v7960_v43  ;;  %13472 = vst [vmem:[#allocation87_spill] sm:$0xff] %v7964_v40  ;;  %v2173_v40 = vrot.slane %v2167_v52, 1  ;;  %v2175_v43 = vrot.slane %v2168_v45, 1  ;;  %v2155_v38 = vsel %vm562_vm0, %v2152_v1, %v2154_v12 }
 0x175   : > { %2116 = vrot.lane.b32.xlu1 %v2113_v20, %s7182_s9  ;;  %2114 = vrot.lane.b32.xlu0 %v2111_v0, %s7182_s9  ;;  %v2207_v0 = vstv %s6695_s26  ;;  %s8079_s26 = sld [smem:[#allocation6]] }
 0x176   : > { %v2209_v12 = vmul.f32 %v7701_v5, %v2207_v0  ;;  %v2210_v52 = vmul.f32 %v7825_v26, %v2207_v0  ;;  %v2176_v45 = vsel %vm562_vm0, %v2173_v40, %v2175_v43  ;;  %v2174_v58 = vsel %vm562_vm0, %v2172_v31, %v2173_v40 }
 0x177   : > { %v7971_v34 = vpop.permute.xlu1 %1452  ;;  %v7975_v20 = vpop.permute.xlu0 %1450  ;;  %v2208_v54 = vmul.f32 %v7709_v15, %v2207_v0  ;;  %v2385_v40 = vstv %s6705_s7  ;;  %s8094_s7 = sld [smem:[#allocation6 + $0x2]] }
 0x178   : > { %13473 = vst [vmem:[#allocation88_spill] sm:$0xff] %v7971_v34  ;;  %13474 = vst [vmem:[#allocation89_spill] sm:$0xff] %v7975_v20  ;;  %v2228_v20 = vstv %s6696_s27  ;;  %s8084_s27 = sld [smem:[#allocation3 + $0x5a]] }
 0x179   : > { %2137 = vrot.lane.b32.xlu1 %v2134_v32, %s7182_s9  ;;  %2135 = vrot.lane.b32.xlu0 %v2132_v46, %s7182_s9  ;;  %v2194_v32 = vrot.slane %v2188_v10, 1  ;;  %v2196_v46 = vrot.slane %v2189_v61, 1  ;;  %v2230_v43 = vmul.f32 %v7701_v5, %v2228_v20  ;;  %v2231_v61 = vmul.f32 %v7825_v26, %v2228_v20 }
 0x17a   : > { %v2214_v31 = vrot.slane %v2208_v54, 1  ;;  %v2229_v21 = vmul.f32 %v7709_v15, %v2228_v20 }
 0x17b   : > { %v7982_v34 = vpop.permute.xlu1 %1473  ;;  %v7986_v50 = vpop.permute.xlu0 %1471  ;;  %v2197_v10 = vsel %vm562_vm0, %v2194_v32, %v2196_v46  ;;  %v2195_v0 = vsel %vm562_vm0, %v2193_v3, %v2194_v32  ;;  %v2238_v46 = vrot.slane %v2231_v61, 1  ;;  %v2386_v3 = vmul.f32 %v7709_v15, %v2385_v40 }
 0x17c   : > { %13475 = vst [vmem:[#allocation90_spill] sm:$0xff] %v7982_v34  ;;  %13476 = vst [vmem:[#allocation91_spill] sm:$0xff] %v7986_v50  ;;  %v2215_v50 = vrot.slane %v2209_v12, 1  ;;  %v2217_v34 = vrot.slane %v2210_v52, 1  ;;  %v2236_v52 = vrot.slane %v2230_v43, 1  ;;  %v2235_v32 = vrot.slane %v2229_v21, 1 }
 0x17d   : > { %2158 = vrot.lane.b32.xlu1 %v2155_v38, %s7182_s9  ;;  %2156 = vrot.lane.b32.xlu0 %v2153_v44, %s7182_s9  ;;  %v264_v30 = vstv %s8079_s26  ;;  %s8204_s26 = sld [smem:[#allocation6 + $0x6]] }
 0x17e   : > { %v2218_v12 = vsel %vm562_vm0, %v2215_v50, %v2217_v34  ;;  %v2216_v20 = vsel %vm562_vm0, %v2214_v31, %v2215_v50  ;;  %v2392_v31 = vrot.slane %v2386_v3, 2 }
 0x17f   : > { %v7993_v1 = vpop.permute.xlu1 %1494  ;;  %v7997_v38 = vpop.permute.xlu0 %1492 }
 0x180   : > { %13477 = vst [vmem:[#allocation92_spill] sm:$0xff] %v7993_v1  ;;  %13478 = vst [vmem:[#allocation93_spill] sm:$0xff] %v7997_v38  ;;  %v2387_v38 = vmul.f32 %v7701_v5, %v2385_v40  ;;  %v2406_v1 = vstv %s6706_s8  ;;  %s8101_s8 = sld [smem:[#allocation3 + $0x3e]] }
 0x181   : > { %2179 = vrot.lane.b32.xlu1 %v2176_v45, %s7182_s9  ;;  %2177 = vrot.lane.b32.xlu0 %v2174_v58, %s7182_s9  ;;  %v2388_v58 = vmul.f32 %v7825_v26, %v2385_v40  ;;  %v2408_v34 = vmul.f32 %v7701_v5, %v2406_v1  ;;  %v2409_v43 = vmul.f32 %v7825_v26, %v2406_v1 }
 0x182   : > { %v2393_v61 = vrot.slane %v2387_v38, 2  ;;  %v2237_v40 = vsel %vm562_vm0, %v2235_v32, %v2236_v52  ;;  %v2407_v21 = vmul.f32 %v7709_v15, %v2406_v1 }
 0x183   : > { %v8004_v44 = vpop.permute.xlu1 %1560  ;;  %v8008_v45 = vpop.permute.xlu0 %1558  ;;  %v276_v53 = vstv %s8204_s26  ;;  %s8379_s26 = sld [smem:[#allocation3 + $0x13e]] }
 0x184   : > { %13479 = vst [vmem:[#allocation94_spill] sm:$0xff] %v8004_v44  ;;  %13480 = vst [vmem:[#allocation95_spill] sm:$0xff] %v8008_v45  ;;  %v2427_v45 = vstv %s6707_s6  ;;  %v2394_v1 = vsel %vm1035_vm1, %v2392_v31, %v2393_v61  ;;  %v2413_v32 = vrot.slane %v2407_v21, 2  ;;  %s8104_s6 = sld [smem:[#allocation3 + $0x87]] }
 0x185   : > { %2200 = vrot.lane.b32.xlu1 %v2197_v10, %s7182_s9  ;;  %2198 = vrot.lane.b32.xlu0 %v2195_v0, %s7182_s9  ;;  %v2239_v10 = vsel %vm562_vm0, %v2236_v52, %v2238_v46  ;;  %v2395_v0 = vrot.slane %v2388_v58, 2  ;;  %v2429_v38 = vmul.f32 %v7701_v5, %v2427_v45  ;;  %v2430_v58 = vmul.f32 %v7825_v26, %v2427_v45 }
 0x186   : > { %v2448_v52 = vstv %s6708_s10  ;;  %v2428_v3 = vmul.f32 %v7709_v15, %v2427_v45  ;;  %s8121_s10 = sld [smem:[#allocation3 + $0x6b]] }
 0x187   : > { %v8015_v44 = vpop.permute.xlu1 %1574  ;;  %v8019_v54 = vpop.permute.xlu0 %1572  ;;  %v2396_v46 = vsel %vm1035_vm1, %v2393_v61, %v2395_v0  ;;  %v2437_v0 = vrot.slane %v2430_v58, 2  ;;  %v2449_v21 = vmul.f32 %v7709_v15, %v2448_v52 }
 0x188   : > { %13481 = vst [vmem:[#allocation96_spill] sm:$0xff] %v8015_v44  ;;  %13482 = vst [vmem:[#allocation97_spill] sm:$0xff] %v8019_v54  ;;  %v2414_v54 = vrot.slane %v2408_v34, 2  ;;  %v2416_v44 = vrot.slane %v2409_v43, 2  ;;  %v2435_v43 = vrot.slane %v2429_v38, 2  ;;  %v2434_v31 = vrot.slane %v2428_v3, 2 }
 0x189   : > { %2221 = vrot.lane.b32.xlu1 %v2218_v12, %s7182_s9  ;;  %2219 = vrot.lane.b32.xlu0 %v2216_v20, %s7182_s9  ;;  %v2455_v3 = vrot.slane %v2449_v21, 2  ;;  %v289_v21 = vstv %s8052_s15  ;;  %s8158_s15 = sld [smem:[#allocation6 + $0x4]] }
 0x18a   : > { %v2417_v34 = vsel %vm1035_vm1, %v2414_v54, %v2416_v44  ;;  %v2415_v45 = vsel %vm1035_vm1, %v2413_v32, %v2414_v54  ;;  %v2438_v58 = vsel %vm1035_vm1, %v2435_v43, %v2437_v0  ;;  %v2436_v32 = vsel %vm1035_vm1, %v2434_v31, %v2435_v43 }
 0x18b   : > { %v8026_v50 = vpop.permute.xlu1 %1588  ;;  %v8030_v12 = vpop.permute.xlu0 %1586  ;;  %v291_v11 = vmul.f32 %v8137_v18, %v289_v21 }
 0x18c   : > { %13483 = vst [vmem:[#allocation98_spill] sm:$0xff] %v8026_v50  ;;  %13484 = vst [vmem:[#allocation99_spill] sm:$0xff] %v8030_v12  ;;  %v2450_v12 = vmul.f32 %v7701_v5, %v2448_v52 }
 0x18d   : > { %2242 = vrot.lane.b32.xlu1 %v2239_v10, %s7182_s9  ;;  %2240 = vrot.lane.b32.xlu0 %v2237_v40, %s7182_s9  ;;  %v2451_v40 = vmul.f32 %v7825_v26, %v2448_v52  ;;  %v2490_v52 = vstv %s6710_s12  ;;  %s8132_s12 = sld [smem:[#allocation3 + $0xb4]] }
 0x18e   : > { %v2491_v31 = vmul.f32 %v7709_v15, %v2490_v52 }
 0x18f   : > { %v8037_v20 = vpop.permute.xlu1 %1602  ;;  %v8041_v10 = vpop.permute.xlu0 %1600 }
 0x190   : > { %13485 = vst [vmem:[#allocation100_spill] sm:$0xff] %v8037_v20  ;;  %13486 = vst [vmem:[#allocation101_spill] sm:$0xff] %v8041_v10  ;;  %v2469_v20 = vstv %s6709_s11  ;;  %v2458_v10 = vrot.slane %v2451_v40, 2  ;;  %s8126_s11 = sld [smem:[#allocation6 + $0x3]] }
 0x191   : > { %2399 = vrot.lane.b32.xlu1 %v2396_v46, %s7181_s16  ;;  %2397 = vrot.lane.b32.xlu0 %v2394_v1, %s7181_s16  ;;  %v2471_v38 = vmul.f32 %v7701_v5, %v2469_v20  ;;  %v2472_v46 = vmul.f32 %v7825_v26, %v2469_v20  ;;  %v2456_v1 = vrot.slane %v2450_v12, 2 }
 0x193   : > { %v8048_v61 = vpop.permute.xlu1 %1616  ;;  %v8054_v44 = vpop.permute.xlu0 %1614  ;;  %v2477_v12 = vrot.slane %v2471_v38, 2  ;;  %v2479_v0 = vrot.slane %v2472_v46, 2  ;;  %v2459_v40 = vsel %vm1035_vm1, %v2456_v1, %v2458_v10  ;;  %v2457_v43 = vsel %vm1035_vm1, %v2455_v3, %v2456_v1 }
 0x194   : > { %13487 = vst [vmem:[#allocation102_spill] sm:$0xff] %v8048_v61  ;;  %13488 = vst [vmem:[#allocation103_spill] sm:$0xff] %v8054_v44  ;;  %v2511_v61 = vstv %s6711_s13  ;;  %v2532_v3 = vstv %s8060_s17  ;;  %s8152_s13 = sld [smem:[#allocation3 + $0x98]] }
 0x195   : > { %2420 = vrot.lane.b32.xlu1 %v2417_v34, %s7181_s16  ;;  %2418 = vrot.lane.b32.xlu0 %v2415_v45, %s7181_s16  ;;  %v2470_v34 = vmul.f32 %v7709_v15, %v2469_v20  ;;  %v2492_v45 = vmul.f32 %v7701_v5, %v2490_v52  ;;  %v2480_v46 = vsel %vm1035_vm1, %v2477_v12, %v2479_v0  ;;  %s8165_s17 = sld [smem:[#allocation3 + $0xe1]] }
 0x196   : > { %v2514_v1 = vmul.f32 %v7825_v26, %v2511_v61 }
 0x197   : > { %v8063_v54 = vpop.permute.xlu1 %1630  ;;  %v8071_v44 = vpop.permute.xlu0 %1628  ;;  %v2476_v10 = vrot.slane %v2470_v34, 2  ;;  %v283_v34 = vstv %s8065_s18  ;;  %s8172_s18 = sld [smem:[#allocation6 + $0x5]] }
 0x198   : > { %13489 = vst [vmem:[#allocation104_spill] sm:$0xff] %v8063_v54  ;;  %13490 = vst [vmem:[#allocation105_spill] sm:$0xff] %v8071_v44  ;;  %v2493_v54 = vmul.f32 %v7825_v26, %v2490_v52  ;;  %v2535_v44 = vmul.f32 %v7825_v26, %v2532_v3 }
 0x199   : > { %2441 = vrot.lane.b32.xlu1 %v2438_v58, %s7181_s16  ;;  %2439 = vrot.lane.b32.xlu0 %v2436_v32, %s7181_s16  ;;  %v2513_v58 = vmul.f32 %v7701_v5, %v2511_v61  ;;  %v2498_v32 = vrot.slane %v2492_v45, 2  ;;  %v2478_v0 = vsel %vm1035_vm1, %v2476_v10, %v2477_v12  ;;  %v8109_v45 = vld [vmem:[%s7328_s14] sm:$0xff]  ;;  %v2521_v10 = vrot.slane %v2514_v1, 2 }
 0x19a   : > { %v284_v24 = vmul.f32 %v8109_v45, %v283_v34  ;;  %v2533_v1 = vmul.f32 %v7709_v15, %v2532_v3 }
 0x19b   : > { %v8082_v20 = vpop.permute.xlu1 %1644  ;;  %v8089_v38 = vpop.permute.xlu0 %1642  ;;  %v2519_v12 = vrot.slane %v2513_v58, 2 }
 0x19c   : > { %13491 = vst [vmem:[#allocation106_spill] sm:$0xff] %v8082_v20  ;;  %13492 = vst [vmem:[#allocation107_spill] sm:$0xff] %v8089_v38  ;;  %v2500_v20 = vrot.slane %v2493_v54, 2  ;;  %v2512_v54 = vmul.f32 %v7709_v15, %v2511_v61  ;;  %v290_v38 = vmul.f32 %v8109_v45, %v289_v21  ;;  %v2553_v61 = vstv %s8077_s24  ;;  %s8193_s24 = sld [smem:[#allocation3 + $0xc5]] }
 0x19d   : > { %2462 = vrot.lane.b32.xlu1 %v2459_v40, %s7181_s16  ;;  %2460 = vrot.lane.b32.xlu0 %v2457_v43, %s7181_s16  ;;  %v2497_v40 = vrot.slane %v2491_v31, 2  ;;  %v266_v31 = vstv %s8069_s19  ;;  %v8145_v60 = vmul.f32 %v7701_v5, %v2553_v61  ;;  %v2556_v21 = vmul.f32 %v7825_v26, %v2553_v61  ;;  %s8179_s19 = sld [smem:[#allocation3 + $0x10e]] }
 0x19e   : > { %v2501_v50 = vsel %vm1035_vm1, %v2498_v32, %v2500_v20  ;;  %v2518_v58 = vrot.slane %v2512_v54, 2  ;;  %v8154_v54 = vadd.f32 %v284_v24, %v264_v30  ;;  %v2554_v24 = vmul.f32 %v7709_v15, %v2553_v61 }
 0x19f   : > { %v8099_v52 = vpop.permute.xlu1 %1658  ;;  %v8112_v43 = vpop.permute.xlu0 %1656  ;;  %v2499_v20 = vsel %vm1035_vm1, %v2497_v40, %v2498_v32  ;;  %v8147_v32 = vadd.f32 %v290_v38, %v266_v31  ;;  %v2522_v40 = vsel %vm1035_vm1, %v2519_v12, %v2521_v10  ;;  %v2574_v38 = vstv %s8101_s8  ;;  %s8231_s8 = sld [smem:[#allocation3 + $0x3]] }
 0x1a0   : > { %13493 = vst [vmem:[#allocation108_spill] sm:$0xff] %v8099_v52  ;;  %13494 = vst [vmem:[#allocation109_spill] sm:$0xff] %v8112_v43  ;;  %v8116_v52 = vmul.f32 %v7701_v5, %v2532_v3  ;;  %v295_v43 = vstv %s8084_s27  ;;  %v285_v3 = vmul.f32 %v8137_v18, %v283_v34  ;;  %v2520_v34 = vsel %vm1035_vm1, %v2518_v58, %v2519_v12  ;;  %s8218_s27 = sld [smem:[#allocation3 + $0xf2]] }
 0x1a1   : > { %2483 = vrot.lane.b32.xlu1 %v2480_v46, %s7181_s16  ;;  %2481 = vrot.lane.b32.xlu0 %v2478_v0, %s7181_s16  ;;  %v2539_v10 = vrot.slane %v2533_v1, 2  ;;  %v8169_v56 = vadd.f32 %v291_v11, %v266_v31  ;;  %v296_v48 = vmul.f32 %v8109_v45, %v295_v43  ;;  %v2561_v37 = vrot.slane %v8145_v60, 2 }
 0x1a2   : > { %v2540_v0 = vrot.slane %v8116_v52, 2  ;;  %v301_v52 = vstv %s8104_s6  ;;  %v2563_v12 = vrot.slane %v2556_v21, 2  ;;  %v2576_v11 = vmul.f32 %v7701_v5, %v2574_v38  ;;  %v8198_v21 = vld [vmem:[%s7328_s14 + $0x18] sm:$0xff]  ;;  %s8237_s6 = sld [smem:[#allocation6 + $0x7]] }
 0x1a3   : > { %v8129_v46 = vpop.permute.xlu1 %1672  ;;  %v8140_v4 = vpop.permute.xlu0 %1670  ;;  %v2577_v15 = vmul.f32 %v7825_v26, %v2574_v38  ;;  %v8184_v61 = vadd.f32 %v285_v3, %v264_v30  ;;  %v270_v58 = vstv %s8126_s11  ;;  %v303_v1 = vmul.f32 %v8137_v18, %v301_v52  ;;  %13500 = vst [vmem:[#allocation115_spill] sm:$0xff] %v8198_v21  ;;  %s8260_s11 = sld [smem:[#allocation3 + $0x30]] }
 0x1a4   : > { %13495 = vst [vmem:[#allocation110_spill] sm:$0xff] %v8129_v46  ;;  %13496 = vst [vmem:[#allocation111_spill] sm:$0xff] %v8140_v4  ;;  %v2542_v46 = vrot.slane %v2535_v44, 2  ;;  %v297_v4 = vmul.f32 %v8137_v18, %v295_v43  ;;  %v2595_v43 = vstv %s8121_s10  ;;  %v2541_v5 = vsel %vm1035_vm1, %v2539_v10, %v2540_v0  ;;  %s8256_s10 = sld [smem:[#allocation3 + $0x11f]] }
 0x1a5   : > { %2504 = vrot.lane.b32.xlu1 %v2501_v50, %s7181_s16  ;;  %v268_v50 = vstv %s8094_s7  ;;  %2502 = vrot.lane.b32.xlu0 %v2499_v20, %s7181_s16  ;;  %v302_v3 = vmul.f32 %v8109_v45, %v301_v52  ;;  %v2598_v10 = vmul.f32 %v7825_v26, %v2595_v43  ;;  %v8220_v52 = vadd.f32 %v303_v1, %v270_v58  ;;  %s8225_s7 = sld [smem:[#allocation3 + $0x13b]] }
 0x1a6   : > { %v8186_v31 = vadd.f32 %v297_v4, %v268_v50  ;;  %v2575_v4 = vmul.f32 %v8198_v21, %v2574_v38  ;;  %v8201_v30 = vadd.f32 %v296_v48, %v268_v50  ;;  %v2564_v38 = vsel %vm1035_vm1, %v2561_v37, %v2563_v12 }
 0x1a7   : > { %v8161_v44 = vpop.permute.xlu1 %1686  ;;  %v8174_v20 = vpop.permute.xlu0 %1684  ;;  %v2582_v48 = vrot.slane %v2576_v11, 2  ;;  %v2584_v50 = vrot.slane %v2577_v15, 2  ;;  %v313_v12 = vstv %s8165_s17  ;;  %v2596_v1 = vmul.f32 %v8198_v21, %v2595_v43  ;;  %s8328_s17 = sld [smem:[#allocation3 + $0xb7]] }
 0x1a8   : > { %13497 = vst [vmem:[#allocation112_spill] sm:$0xff] %v8161_v44  ;;  %13498 = vst [vmem:[#allocation113_spill] sm:$0xff] %v8174_v20  ;;  %v2543_v44 = vsel %vm1035_vm1, %v2540_v0, %v2542_v46  ;;  %v307_v46 = vstv %s8132_s12  ;;  %v2581_v15 = vrot.slane %v2575_v4, 2  ;;  %v8235_v16 = vadd.f32 %v302_v3, %v270_v58  ;;  %s8282_s12 = sld [smem:[#allocation3 + $0x14c]] }
 0x1a9   : > { %2525 = vrot.lane.b32.xlu1 %v2522_v40, %s7181_s16  ;;  %2523 = vrot.lane.b32.xlu0 %v2520_v34, %s7181_s16  ;;  %v2560_v40 = vrot.slane %v2554_v24, 2  ;;  %v2616_v24 = vstv %s8152_s13  ;;  %v308_v20 = vmul.f32 %v8109_v45, %v307_v46  ;;  %v274_v59 = vstv %s8172_s18  ;;  %s8285_s13 = sld [smem:[#allocation3 + $0x5d]] }
 0x1aa   : > { %v315_v4 = vmul.f32 %v8137_v18, %v313_v12  ;;  %v314_v3 = vmul.f32 %v8109_v45, %v313_v12  ;;  %v573_v19 = vstv %s8260_s11  ;;  %v13511_v63 = vstv %s8237_s6  ;;  %s8347_s18 = sld [smem:[#allocation3 + $0xe4]] }
 0x1ab   : > { %v8191_v60 = vpop.permute.xlu1 %1700  ;;  %v8206_v34 = vpop.permute.xlu0 %1698  ;;  %v2562_v11 = vsel %vm1035_vm1, %v2560_v40, %v2561_v37  ;;  %v319_v37 = vstv %s8179_s19  ;;  %v2585_v40 = vsel %vm1035_vm1, %v2582_v48, %v2584_v50  ;;  %v2583_v50 = vsel %vm1035_vm1, %v2581_v15, %v2582_v48  ;;  %s8358_s19 = sld [smem:[#allocation3 + $0x13]] }
 0x1ac   : > { %13499 = vst [vmem:[#allocation114_spill] sm:$0xff] %v8191_v60  ;;  %13501 = vst [vmem:[#allocation116_spill] sm:$0xff] %v8206_v34  ;;  %v8210_v60 = vld [vmem:[%s7328_s14 + $0x20] sm:$0xff]  ;;  %v272_v34 = vstv %s8158_s15  ;;  %v321_v12 = vmul.f32 %v8137_v18, %v319_v37  ;;  %v2658_v15 = vstv %s8218_s27  ;;  %v320_v33 = vmul.f32 %v8109_v45, %v319_v37  ;;  %s8310_s15 = sld [smem:[#allocation3 + $0x8a]] }
 0x1ad   : > { %2546 = vrot.lane.b32.xlu1 %v2543_v44, %s7181_s16  ;;  %13502 = vst [vmem:[#allocation117_spill] sm:$0xff] %v8210_v60  ;;  %v8213_v0 = vmul.f32 %v8210_v60, %v2595_v43  ;;  %v309_v44 = vmul.f32 %v8137_v18, %v307_v46  ;;  %2544 = vrot.lane.b32.xlu0 %v2541_v5, %s7181_s16  ;;  %v325_v25 = vstv %s8225_s7  ;;  %s8386_s27 = sld [smem:[#allocation3 + $0x40]] }
 0x1ae   : > { %v2618_v7 = vmul.f32 %v8210_v60, %v2616_v24  ;;  %v2619_v43 = vmul.f32 %v7825_v26, %v2616_v24  ;;  %v8335_v55 = vmul.f32 %v8137_v18, %v573_v19  ;;  %v574_v49 = vmul.f32 %v8109_v45, %v573_v19  ;;  %s8415_s7 = sld [smem:[#allocation3 + $0x6d]] }
 0x1af   : > { %v8228_v29 = vpop.permute.xlu1 %1714  ;;  %v8239_v46 = vpop.permute.xlu0 %1712  ;;  %v2603_v5 = vrot.slane %v8213_v0, 2  ;;  %v8248_v58 = vadd.f32 %v309_v44, %v272_v34  ;;  %v2637_v0 = vstv %s8193_s24  ;;  %v2602_v44 = vrot.slane %v2596_v1, 2  ;;  %s8367_s24 = sld [smem:[#allocation3 + $0x111]] }
 0x1b0   : > { %13503 = vst [vmem:[#allocation118_spill] sm:$0xff] %v8228_v29  ;;  %13504 = vst [vmem:[#allocation119_spill] sm:$0xff] %v8239_v46  ;;  %v2605_v29 = vrot.slane %v2598_v10, 2  ;;  %v8258_v10 = vadd.f32 %v308_v20, %v272_v34  ;;  %v2617_v46 = vmul.f32 %v8198_v21, %v2616_v24  ;;  %v2624_v20 = vrot.slane %v2618_v7, 2  ;;  %s8462_s11 = sld [smem:[#allocation3 + $0x60]] }
 0x1b1   : > { %2567 = vrot.lane.b32.xlu1 %v2564_v38, %s7182_s9  ;;  %2565 = vrot.lane.b32.xlu0 %v2562_v11, %s7182_s9  ;;  %v2626_v34 = vrot.slane %v2619_v43, 2  ;;  %v2639_v42 = vmul.f32 %v8210_v60, %v2637_v0  ;;  %v2640_v48 = vmul.f32 %v7825_v26, %v2637_v0  ;;  %v8273_v1 = vadd.f32 %v315_v4, %v274_v59 }
 0x1b2   : > { %v8275_v24 = vadd.f32 %v314_v3, %v274_v59  ;;  %v555_v7 = vstv %s8231_s8  ;;  %v2623_v43 = vrot.slane %v2617_v46, 2  ;;  %v2638_v4 = vmul.f32 %v8198_v21, %v2637_v0  ;;  %s8427_s8 = sld [smem:[#allocation3 + $0x6]] }
 0x1b3   : > { %v8253_v38 = vpop.permute.xlu1 %1728  ;;  %v8266_v11 = vpop.permute.xlu0 %1726  ;;  %v8289_v59 = vadd.f32 %v321_v12, %v276_v53  ;;  %v2627_v46 = vsel %vm1035_vm1, %v2624_v20, %v2626_v34  ;;  %v2647_v0 = vrot.slane %v2640_v48, 2  ;;  %v326_v12 = vmul.f32 %v8109_v45, %v325_v25 }
 0x1b4   : > { %13505 = vst [vmem:[#allocation120_spill] sm:$0xff] %v8253_v38  ;;  %13506 = vst [vmem:[#allocation121_spill] sm:$0xff] %v8266_v11  ;;  %v2606_v38 = vsel %vm1035_vm1, %v2603_v5, %v2605_v29  ;;  %v2604_v29 = vsel %vm1035_vm1, %v2602_v44, %v2603_v5  ;;  %v327_v11 = vmul.f32 %v8137_v18, %v325_v25  ;;  %v2645_v5 = vrot.slane %v2639_v42, 2 }
 0x1b5   : > { %2588 = vrot.lane.b32.xlu1 %v2585_v40, %s7182_s9  ;;  %2586 = vrot.lane.b32.xlu0 %v2583_v50, %s7182_s9  ;;  %v2660_v50 = vmul.f32 %v8210_v60, %v2658_v15  ;;  %v8299_v44 = vadd.f32 %v320_v33, %v276_v53  ;;  %v8303_v37 = vmul.f32 %v8137_v18, %v555_v7  ;;  %v2644_v42 = vrot.slane %v2638_v4, 2  ;;  %v8315_v53 = vld [vmem:[%s7328_s14 + $0x10] sm:$0x3] }
 0x1b6   : > { %v2625_v34 = vsel %vm1035_vm1, %v2623_v43, %v2624_v20  ;;  %v2659_v33 = vmul.f32 %v8198_v21, %v2658_v15  ;;  %v558_v25 = vmul.f32 %v8315_v53, %v555_v7  ;;  %v8319_v48 = vmul.f32 %v8109_v45, %v555_v7 }
 0x1b7   : > { %v8280_v40 = vpop.permute.xlu1 %1742  ;;  %v8292_v3 = vpop.permute.xlu0 %1740  ;;  %v8326_v20 = vadd.f32 %v327_v11, %v13511_v63  ;;  %v564_v7 = vrot.slane %v8303_v37, 1  ;;  %v2700_v63 = vstv %s8282_s12  ;;  %v590_v11 = vstv %s8285_s13  ;;  %s8473_s12 = sld [smem:[#allocation3 + $0xc7]] }
 0x1b8   : > { %13507 = vst [vmem:[#allocation122_spill] sm:$0xff] %v8280_v40  ;;  %13508 = vst [vmem:[#allocation123_spill] sm:$0xff] %v8292_v3  ;;  %v2661_v40 = vmul.f32 %v7825_v26, %v2658_v15  ;;  %v2679_v3 = vstv %s8256_s10  ;;  %v2648_v15 = vsel %vm1035_vm1, %v2645_v5, %v2647_v0  ;;  %v2665_v0 = vrot.slane %v2659_v33, 2  ;;  %s8445_s10 = sld [smem:[#allocation3 + $0x9a]] }
 0x1b9   : > { %2609 = vrot.lane.b32.xlu1 %v2606_v38, %s7182_s9  ;;  %2607 = vrot.lane.b32.xlu0 %v2604_v29, %s7182_s9  ;;  %v2681_v43 = vmul.f32 %v8210_v60, %v2679_v3  ;;  %v2682_v4 = vmul.f32 %v7825_v26, %v2679_v3  ;;  %v566_v26 = vrot.slane %v558_v25, 1  ;;  %v563_v37 = vrot.slane %v8319_v48, 1  ;;  %s8491_s13 = sld [smem:[#allocation3 + $0x8d]] }
 0x1ba   : > { %v2668_v8 = vrot.slane %v2661_v40, 2  ;;  %v592_v25 = vmul.f32 %v8137_v18, %v590_v11  ;;  %v593_v48 = vmul.f32 %v8315_v53, %v590_v11  ;;  %v591_v22 = vmul.f32 %v8109_v45, %v590_v11 }
 0x1bb   : > { %v8306_v38 = vpop.permute.xlu1 %1756  ;;  %v8321_v29 = vpop.permute.xlu0 %1754  ;;  %v2689_v27 = vrot.slane %v2682_v4, 2 }
 0x1bc   : > { %13509 = vst [vmem:[#allocation124_spill] sm:$0xff] %v8306_v38  ;;  %13510 = vst [vmem:[#allocation125_spill] sm:$0xff] %v8321_v29  ;;  %v2666_v38 = vrot.slane %v2660_v50, 2  ;;  %v2646_v50 = vsel %vm1035_vm1, %v2644_v42, %v2645_v5  ;;  %v2680_v29 = vmul.f32 %v8198_v21, %v2679_v3  ;;  %v2702_v5 = vmul.f32 %v8210_v60, %v2700_v63  ;;  %v8355_v3 = vld [vmem:[%s7328_s14 + $0x28] sm:$0x3] }
 0x1bd   : > { %2630 = vrot.lane.b32.xlu1 %v2627_v46, %s7182_s9  ;;  %v576_v46 = vmul.f32 %v8315_v53, %v573_v19  ;;  %2628 = vrot.lane.b32.xlu0 %v2625_v34, %s7182_s9  ;;  %13514 = vst [vmem:[#allocation128_spill] sm:$0xff] %v8355_v3  ;;  %v2703_v42 = vmul.f32 %v8355_v3, %v2700_v63  ;;  %v581_v19 = vrot.slane %v8335_v55, 1  ;;  %v13516_v3 = vstv %s8237_s6  ;;  %s8436_s6 = sld [smem:[#allocation3 + $0x33]] }
 0x1be   : > { %v2669_v34 = vsel %vm1035_vm1, %v2666_v38, %v2668_v8  ;;  %v2686_v4 = vrot.slane %v2680_v29, 2  ;;  %v8373_v55 = vadd.f32 %v326_v12, %v13516_v3  ;;  %v580_v60 = vrot.slane %v574_v49, 1 }
 0x1bf   : > { %v8339_v40 = vpop.permute.xlu1 %1770  ;;  %v8349_v41 = vpop.permute.xlu0 %1768  ;;  %v583_v33 = vrot.slane %v576_v46, 1  ;;  %v8376_v46 = vsel %vm562_vm0, %v564_v7, %v566_v26  ;;  %v2708_v29 = vrot.slane %v2702_v5, 2  ;;  %v598_v12 = vrot.slane %v592_v25, 1 }
 0x1c0   : > { %13512 = vst [vmem:[#allocation126_spill] sm:$0xff] %v8339_v40  ;;  %13513 = vst [vmem:[#allocation127_spill] sm:$0xff] %v8349_v41  ;;  %v2687_v40 = vrot.slane %v2681_v43, 2  ;;  %v2667_v43 = vsel %vm1035_vm1, %v2665_v0, %v2666_v38  ;;  %v2701_v41 = vmul.f32 %v8198_v21, %v2700_v63  ;;  %v2710_v63 = vrot.slane %v2703_v42, 2 }
 0x1c1   : > { %2651 = vrot.lane.b32.xlu1 %v2648_v15, %s7182_s9  ;;  %2649 = vrot.lane.b32.xlu0 %v2646_v50, %s7182_s9  ;;  %v607_v15 = vstv %s8310_s15  ;;  %v600_v0 = vrot.slane %v593_v48, 1  ;;  %v597_v42 = vrot.slane %v591_v22, 1  ;;  %v2773_v22 = vstv %s8358_s19  ;;  %s8505_s15 = sld [smem:[#allocation3 + $0xf4]] }
 0x1c2   : > { %v2690_v38 = vsel %vm1035_vm1, %v2687_v40, %v2689_v27  ;;  %v609_v49 = vmul.f32 %v8137_v18, %v607_v15  ;;  %v610_v11 = vmul.f32 %v8315_v53, %v607_v15  ;;  %v8397_v27 = vsel %vm562_vm0, %v581_v19, %v583_v33  ;;  %s8571_s19 = sld [smem:[#allocation3 + $0xe7]] }
 0x1c3   : > { %v8364_v8 = vpop.permute.xlu1 %1927  ;;  %v8381_v50 = vpop.permute.xlu0 %1925  ;;  %13519 = vst [vmem:[#allocation132_spill] sm:$0xff] %v8397_v27  ;;  %v2688_v5 = vsel %vm1035_vm1, %v2686_v4, %v2687_v40  ;;  %v2707_v3 = vrot.slane %v2701_v41, 2  ;;  %v608_v25 = vmul.f32 %v8109_v45, %v607_v15  ;;  %v2711_v40 = vsel %vm1035_vm1, %v2708_v29, %v2710_v63  ;;  %v8412_v41 = vld [vmem:[%s7328_s14 + $0x38] sm:$0xff] }
 0x1c4   : > { %13515 = vst [vmem:[#allocation129_spill] sm:$0xff] %v8364_v8  ;;  %13517 = vst [vmem:[#allocation130_spill] sm:$0xff] %v8381_v50  ;;  %v624_v8 = vstv %s8328_s17  ;;  %v641_v50 = vstv %s8347_s18  ;;  %v8418_v33 = vsel %vm562_vm0, %v598_v12, %v600_v0  ;;  %v615_v15 = vrot.slane %v609_v49, 1  ;;  %s8525_s17 = sld [smem:[#allocation3 + $0xba]] }
 0x1c5   : > { %2672 = vrot.lane.b32.xlu1 %v2669_v34, %s7182_s9  ;;  %2670 = vrot.lane.b32.xlu0 %v2667_v43, %s7182_s9  ;;  %v8394_v34 = vsel %vm562_vm0, %v563_v37, %v564_v7  ;;  %v626_v48 = vmul.f32 %v8137_v18, %v624_v8  ;;  %v8407_v7 = vsel %vm562_vm0, %v580_v60, %v581_v19  ;;  %v617_v43 = vrot.slane %v610_v11, 1  ;;  %s8550_s18 = sld [smem:[#allocation3 + $0x121]] }
 0x1c6   : > { %13521 = vst [vmem:[#allocation134_spill] sm:$0xff] %v8407_v7  ;;  %v627_v37 = vmul.f32 %v8315_v53, %v624_v8  ;;  %13522 = vst [vmem:[#allocation135_spill] sm:$0xff] %v8418_v33  ;;  %v625_v4 = vmul.f32 %v8109_v45, %v624_v8  ;;  %v643_v19 = vmul.f32 %v8137_v18, %v641_v50  ;;  %v658_v63 = vstv %s8367_s24  ;;  %s8581_s24 = sld [smem:[#allocation3 + $0x14e]] }
 0x1c7   : > { %v8391_v26 = vpop.permute.xlu1 %1948  ;;  %v8403_v21 = vpop.permute.xlu0 %1946  ;;  %v2709_v0 = vsel %vm1035_vm1, %v2707_v3, %v2708_v29  ;;  %v8434_v49 = vsel %vm562_vm0, %v597_v42, %v598_v12  ;;  %v614_v8 = vrot.slane %v608_v25, 1  ;;  %v632_v11 = vrot.slane %v626_v48, 1 }
 0x1c8   : > { %13518 = vst [vmem:[#allocation131_spill] sm:$0xff] %v8391_v26  ;;  %13520 = vst [vmem:[#allocation133_spill] sm:$0xff] %v8403_v21  ;;  %v8431_v21 = vld [vmem:[%s7328_s14 + $0x30] sm:$0xff]  ;;  %v634_v26 = vrot.slane %v627_v37, 1  ;;  %v642_v33 = vmul.f32 %v8109_v45, %v641_v50  ;;  %v675_v7 = vstv %s8379_s26  ;;  %v2787_v29 = vstv %s8386_s27  ;;  %s8605_s26 = sld [smem:[#allocation3 + $0x114]] }
 0x1c9   : > { %2693 = vrot.lane.b32.xlu1 %v2690_v38, %s7182_s9  ;;  %2691 = vrot.lane.b32.xlu0 %v2688_v5, %s7182_s9  ;;  %v644_v38 = vmul.f32 %v8315_v53, %v641_v50  ;;  %13524 = vst [vmem:[#allocation137_spill] sm:$0xff] %v8434_v49  ;;  %v631_v3 = vrot.slane %v625_v4, 1  ;;  %v660_v12 = vmul.f32 %v8137_v18, %v658_v63  ;;  %v649_v50 = vrot.slane %v643_v19, 1  ;;  %s8615_s27 = sld [smem:[#allocation3 + $0x14]] }
 0x1ca   : > { %v661_v42 = vmul.f32 %v8315_v53, %v658_v63  ;;  %v2774_v48 = vmul.f32 %v8431_v21, %v2773_v22  ;;  %v8454_v37 = vsel %vm562_vm0, %v615_v15, %v617_v43  ;;  %v8458_v4 = vsel %vm562_vm0, %v614_v8, %v615_v15 }
 0x1cb   : > { %v8422_v60 = vpop.permute.xlu1 %1969  ;;  %v8438_v5 = vpop.permute.xlu0 %1967  ;;  %v677_v49 = vmul.f32 %v8137_v18, %v675_v7  ;;  %v678_v27 = vmul.f32 %v8315_v53, %v675_v7  ;;  %v8469_v43 = vsel %vm562_vm0, %v632_v11, %v634_v26  ;;  %v648_v19 = vrot.slane %v642_v33, 1 }
 0x1cc   : > { %13523 = vst [vmem:[#allocation136_spill] sm:$0xff] %v8422_v60  ;;  %13525 = vst [vmem:[#allocation138_spill] sm:$0xff] %v8438_v5  ;;  %v2775_v60 = vmul.f32 %v8412_v41, %v2773_v22  ;;  %v659_v5 = vmul.f32 %v8109_v45, %v658_v63  ;;  %v2789_v22 = vmul.f32 %v8412_v41, %v2787_v29  ;;  %v666_v8 = vrot.slane %v660_v12, 1 }
 0x1cd   : > { %2714 = vrot.lane.b32.xlu1 %v2711_v40, %s7182_s9  ;;  %2712 = vrot.lane.b32.xlu0 %v2709_v0, %s7182_s9  ;;  %v651_v40 = vrot.slane %v644_v38, 1  ;;  %13528 = vst [vmem:[#allocation141_spill] sm:$0xff] %v8469_v43  ;;  %v676_v15 = vmul.f32 %v8109_v45, %v675_v7  ;;  %v2801_v38 = vstv %s8415_s7  ;;  %v8476_v63 = vsel %vm562_vm0, %v631_v3, %v632_v11  ;;  %s8640_s7 = sld [smem:[#allocation3 + $0x141]] }
 0x1ce   : > { %v2788_v26 = vmul.f32 %v8431_v21, %v2787_v29  ;;  %v8484_v33 = vadd.f32 %v7506_v2, %v8147_v32  ;;  %v1028_v43 = vstv %s8427_s8  ;;  %v683_v11 = vrot.slane %v677_v49, 1  ;;  %s8653_s8 = sld [smem:[#allocation3 + $0x41]] }
 0x1cf   : > { %v8450_v25 = vpop.permute.xlu1 %1990  ;;  %v8464_v0 = vpop.permute.xlu0 %1988  ;;  %v8487_v7 = vsel %vm562_vm0, %v649_v50, %v651_v40  ;;  %v685_v3 = vrot.slane %v678_v27, 1  ;;  %v1046_v12 = vstv %s8436_s6  ;;  %v2803_v29 = vmul.f32 %v8412_v41, %v2801_v38  ;;  %s8688_s6 = sld [smem:[#allocation3 + $0x6e]] }
 0x1d0   : > { %13526 = vst [vmem:[#allocation139_spill] sm:$0xff] %v8450_v25  ;;  %13527 = vst [vmem:[#allocation140_spill] sm:$0xff] %v8464_v0  ;;  %v668_v0 = vrot.slane %v661_v42, 1  ;;  %v665_v25 = vrot.slane %v659_v5, 1  ;;  %v8499_v2 = vadd.f32 %v7510_v6, %v8154_v54  ;;  %v8502_v32 = vsel %vm562_vm0, %v648_v19, %v649_v50 }
 0x1d1   : > { %2780 = vrot.lane.b32.xlu1 %v2775_v60, %s7181_s16  ;;  %2778 = vrot.lane.b32.xlu0 %v2774_v48, %s7181_s16  ;;  %v682_v5 = vrot.slane %v676_v15, 1  ;;  %v2815_v48 = vstv %s8445_s10  ;;  %v1030_v49 = vmul.f32 %v8137_v18, %v1028_v43  ;;  %v1031_v40 = vmul.f32 %v8315_v53, %v1028_v43  ;;  %s8721_s10 = sld [smem:[#allocation3 + $0x9b]] }
 0x1d2   : > { %v8508_v27 = vsel %vm562_vm0, %v666_v8, %v668_v0  ;;  %v2802_v6 = vmul.f32 %v8431_v21, %v2801_v38  ;;  %v8518_v54 = vadd.f32 %v7517_v13, %v8169_v56  ;;  %v1029_v50 = vmul.f32 %v8109_v45, %v1028_v43 }
 0x1d3   : > { %v8479_v60 = vpop.permute.xlu1 %2011  ;;  %v8493_v42 = vpop.permute.xlu0 %2009  ;;  %v8522_v0 = vmul.f32 %v8137_v18, %v1046_v12  ;;  %v1049_v19 = vmul.f32 %v8315_v53, %v1046_v12  ;;  %v8529_v15 = vadd.f32 %v7521_v17, %v8184_v61  ;;  %v8535_v38 = vsel %vm562_vm0, %v683_v11, %v685_v3 }
 0x1d4   : > { %13529 = vst [vmem:[#allocation142_spill] sm:$0xff] %v8479_v60  ;;  %13530 = vst [vmem:[#allocation143_spill] sm:$0xff] %v8493_v42  ;;  %v2817_v56 = vmul.f32 %v8412_v41, %v2815_v48  ;;  %v8543_v43 = vadd.f32 %v7528_v23, %v8186_v31  ;;  %v1063_v17 = vstv %s8462_s11  ;;  %v2829_v61 = vstv %s8473_s12  ;;  %s8757_s11 = sld [smem:[#allocation3 + $0xc8]] }
 0x1d5   : > { %2794 = vrot.lane.b32.xlu1 %v2789_v22, %s7181_s16  ;;  %2792 = vrot.lane.b32.xlu0 %v2788_v26, %s7181_s16  ;;  %v8532_v26 = vsel %vm562_vm0, %v665_v25, %v666_v8  ;;  %v8554_v25 = vadd.f32 %v7532_v28, %v8201_v30  ;;  %v1037_v8 = vrot.slane %v1030_v49, 2  ;;  %v1039_v3 = vrot.slane %v1031_v40, 2  ;;  %s8764_s12 = sld [smem:[#allocation3 + $0x9]] }
 0x1d6   : > { %v2816_v23 = vmul.f32 %v8431_v21, %v2815_v48  ;;  %v1036_v31 = vrot.slane %v1029_v50, 2  ;;  %v8564_v28 = vadd.f32 %v7539_v35, %v8220_v52  ;;  %v8568_v30 = vadd.f32 %v7543_v39, %v8235_v16 }
 0x1d7   : > { %v8513_v22 = vpop.permute.xlu1 %2032  ;;  %v8537_v13 = vpop.permute.xlu0 %2030  ;;  %v1065_v49 = vmul.f32 %v8137_v18, %v1063_v17  ;;  %v2831_v48 = vmul.f32 %v8412_v41, %v2829_v61  ;;  %v1064_v35 = vmul.f32 %v8109_v45, %v1063_v17  ;;  %v1080_v52 = vstv %s8491_s13  ;;  %s8773_s13 = sld [smem:[#allocation3 + $0x36]] }
 0x1d8   : > { %13531 = vst [vmem:[#allocation144_spill] sm:$0xff] %v8513_v22  ;;  %13532 = vst [vmem:[#allocation145_spill] sm:$0xff] %v8537_v13  ;;  %v8546_v22 = vsel %vm562_vm0, %v682_v5, %v683_v11  ;;  %v1054_v11 = vrot.slane %v8522_v0, 2  ;;  %v1056_v5 = vrot.slane %v1049_v19, 2  ;;  %v1047_v13 = vmul.f32 %v8109_v45, %v1046_v12 }
 0x1d9   : > { %2808 = vrot.lane.b32.xlu1 %v2803_v29, %s7181_s16  ;;  %2806 = vrot.lane.b32.xlu0 %v2802_v6, %s7181_s16  ;;  %v1066_v12 = vmul.f32 %v8315_v53, %v1063_v17  ;;  %v2843_v6 = vstv %s8505_s15  ;;  %v8585_v39 = vadd.f32 %v7550_v47, %v8248_v58  ;;  %v8589_v16 = vadd.f32 %v7554_v51, %v8258_v10  ;;  %s8779_s15 = sld [smem:[#allocation3 + $0x63]] }
 0x1da   : > { %v8592_v50 = vsel %vm1035_vm1, %v1037_v8, %v1039_v3  ;;  %v2830_v19 = vmul.f32 %v8431_v21, %v2829_v61  ;;  %v8602_v47 = vsel %vm1035_vm1, %v1054_v11, %v1056_v5  ;;  %v1053_v58 = vrot.slane %v1047_v13, 2 }
 0x1db   : > { %v8557_v29 = vpop.permute.xlu1 %2053  ;;  %v8573_v40 = vpop.permute.xlu0 %2051  ;;  %v1097_v17 = vstv %s8525_s17  ;;  %v1071_v51 = vrot.slane %v1065_v49, 2  ;;  %v1082_v10 = vmul.f32 %v8137_v18, %v1080_v52  ;;  %v1083_v3 = vmul.f32 %v8315_v53, %v1080_v52  ;;  %s8792_s17 = sld [smem:[#allocation3 + $0xf5]] }
 0x1dc   : > { %13533 = vst [vmem:[#allocation146_spill] sm:$0xff] %v8557_v29  ;;  %13534 = vst [vmem:[#allocation147_spill] sm:$0xff] %v8573_v40  ;;  %v2845_v61 = vmul.f32 %v8412_v41, %v2843_v6  ;;  %v1081_v5 = vmul.f32 %v8109_v45, %v1080_v52  ;;  %v2857_v13 = vstv %s8550_s18  ;;  %v8619_v49 = vadd.f32 %v7561_v57, %v8273_v1  ;;  %s8801_s18 = sld [smem:[#allocation3 + $0x90]] }
 0x1dd   : > { %2822 = vrot.lane.b32.xlu1 %v2817_v56, %s7181_s16  ;;  %2820 = vrot.lane.b32.xlu0 %v2816_v23, %s7181_s16  ;;  %v8599_v56 = vsel %vm1035_vm1, %v1036_v31, %v1037_v8  ;;  %v1073_v8 = vrot.slane %v1066_v12, 2  ;;  %v1070_v31 = vrot.slane %v1064_v35, 2  ;;  %v2844_v12 = vmul.f32 %v8431_v21, %v2843_v6 }
 0x1de   : > { %v8629_v35 = vadd.f32 %v7565_v62, %v8275_v24  ;;  %v8633_v52 = vadd.f32 %v7572_v9, %v8289_v59  ;;  %v8636_v57 = vsel %vm1035_vm1, %v1053_v58, %v1054_v11  ;;  %v1098_v1 = vmul.f32 %v8109_v45, %v1097_v17 }
 0x1df   : > { %v8595_v0 = vpop.permute.xlu1 %2074  ;;  %v8609_v23 = vpop.permute.xlu0 %2072  ;;  %v1088_v40 = vrot.slane %v1082_v10, 2  ;;  %v1114_v29 = vstv %s8571_s19  ;;  %v2859_v62 = vmul.f32 %v8412_v41, %v2857_v13  ;;  %v8647_v9 = vsel %vm1035_vm1, %v1071_v51, %v1073_v8  ;;  %s8814_s19 = sld [smem:[#allocation3 + $0xbd]] }
 0x1e0   : > { %13535 = vst [vmem:[#allocation148_spill] sm:$0xff] %v8595_v0  ;;  %13536 = vst [vmem:[#allocation149_spill] sm:$0xff] %v8609_v23  ;;  %v1099_v0 = vmul.f32 %v8137_v18, %v1097_v17  ;;  %v1100_v23 = vmul.f32 %v8315_v53, %v1097_v17  ;;  %v8650_v24 = vsel %vm1035_vm1, %v1070_v31, %v1071_v51  ;;  %v1087_v59 = vrot.slane %v1081_v5, 2  ;;  %v13540_v5 = vld [vmem:[#allocation13_spill] sm:$0xff] }
 0x1e1   : > { %2836 = vrot.lane.b32.xlu1 %v2831_v48, %s7181_s16  ;;  %2834 = vrot.lane.b32.xlu0 %v2830_v19, %s7181_s16  ;;  %v1090_v19 = vrot.slane %v1083_v3, 2  ;;  %v2871_v11 = vstv %s8581_s24  ;;  %v8657_v6 = vadd.f32 %v7576_v14, %v8299_v44  ;;  %v2858_v3 = vmul.f32 %v8431_v21, %v2857_v13  ;;  %s8825_s24 = sld [smem:[#allocation3 + $0x122]] }
 0x1e2   : > { %v1105_v58 = vrot.slane %v1099_v0, 2  ;;  %v1107_v17 = vrot.slane %v1100_v23, 2  ;;  %v455_v51 = vadd.f32 %v7594_v36, %v8529_v15  ;;  %v1116_v8 = vmul.f32 %v8137_v18, %v1114_v29  ;;  %v13542_v36 = vld [vmem:[#allocation14_spill] sm:$0xff] }
 0x1e3   : > { %v8624_v48 = vpop.permute.xlu1 %2095  ;;  %v1131_v31 = vstv %s8605_s26  ;;  %v8669_v14 = vadd.f32 %v13540_v5, %v8326_v20  ;;  %v8672_v44 = vsel %vm1035_vm1, %v1088_v40, %v1090_v19  ;;  %v1117_v0 = vmul.f32 %v8315_v53, %v1114_v29  ;;  %s8831_s26 = sld [smem:[#allocation3 + $0x16]] }
 0x1e4   : > { %13537 = vst [vmem:[#allocation150_spill] sm:$0xff] %v8624_v48  ;;  %v8642_v48 = vpop.permute.xlu0 %2093  ;;  %v2873_v13 = vmul.f32 %v8412_v41, %v2871_v11  ;;  %v8681_v15 = vadd.f32 %v13542_v36, %v8373_v55  ;;  %v1115_v20 = vmul.f32 %v8109_v45, %v1114_v29  ;;  %v8691_v19 = vsel %vm1035_vm1, %v1105_v58, %v1107_v17  ;;  %v13544_v29 = vld [vmem:[#allocation15_spill] sm:$0xff] }
 0x1e5   : > { %13538 = vst [vmem:[#allocation151_spill] sm:$0xff] %v8642_v48  ;;  %2850 = vrot.lane.b32.xlu1 %v2845_v61, %s7181_s16  ;;  %2848 = vrot.lane.b32.xlu0 %v2844_v12, %s7181_s16  ;;  %v1104_v61 = vrot.slane %v1098_v1, 2  ;;  %v8684_v12 = vsel %vm1035_vm1, %v1087_v59, %v1088_v40  ;;  %v2885_v1 = vstv %s8615_s27  ;;  %v1134_v5 = vmul.f32 %v8315_v53, %v1131_v31  ;;  %s8838_s27 = sld [smem:[#allocation3 + $0xea]] }
 0x1e6   : > { %v2872_v40 = vmul.f32 %v8431_v21, %v2871_v11  ;;  %v454_v59 = vadd.f32 %v13544_v29, %v8499_v2  ;;  %v8704_v36 = vadd.f32 %v8376_v46, %v455_v51  ;;  %v1124_v42 = vrot.slane %v1117_v0, 2  ;;  %v13547_v2 = vld [vmem:[#allocation17_spill] sm:$0xff]  ;;  %v13548_v46 = vld [vmem:[#allocation18_spill] sm:$0xff] }
 0x1e7   : > { %v8660_v10 = vpop.permute.xlu1 %2116  ;;  %v8707_v17 = vsel %vm1035_vm1, %v1104_v61, %v1105_v58  ;;  %v2887_v11 = vmul.f32 %v8412_v41, %v2885_v1  ;;  %v468_v29 = vadd.f32 %v13547_v2, %v8484_v33  ;;  %v483_v51 = vadd.f32 %v13548_v46, %v8543_v43  ;;  %v13550_v33 = vld [vmem:[#allocation19_spill] sm:$0xff] }
 0x1e8   : > { %13539 = vst [vmem:[#allocation152_spill] sm:$0xff] %v8660_v10  ;;  %v8675_v23 = vpop.permute.xlu0 %2114  ;;  %v13545_v10 = vld [vmem:[#allocation16_spill] sm:$0xff]  ;;  %v1121_v58 = vrot.slane %v1115_v20, 2  ;;  %v2899_v61 = vstv %s8653_s8  ;;  %v482_v2 = vadd.f32 %v13550_v33, %v8554_v25  ;;  %v8732_v43 = vadd.f32 %v8394_v34, %v454_v59  ;;  %v13553_v34 = vld [vmem:[#allocation134_spill] sm:$0xff]  ;;  %v13558_v33 = vld [vmem:[#allocation137_spill] sm:$0xff]  ;;  %s8880_s8 = sld [smem:[#allocation3 + $0x14f]] }
 0x1e9   : > { %13541 = vst [vmem:[#allocation13_spill] sm:$0xff] %v8675_v23  ;;  %2864 = vrot.lane.b32.xlu1 %v2859_v62, %s7181_s16  ;;  %v8694_v62 = vmul.f32 %v8137_v18, %v1131_v31  ;;  %2862 = vrot.lane.b32.xlu0 %v2858_v3, %s7181_s16  ;;  %v1122_v23 = vrot.slane %v1116_v8, 2  ;;  %v469_v48 = vadd.f32 %v13545_v10, %v8518_v54  ;;  %v1148_v3 = vstv %s8640_s7  ;;  %s8866_s7 = sld [smem:[#allocation3 + $0x117]] }
 0x1ea   : > { %v1141_v10 = vrot.slane %v1134_v5, 2  ;;  %v1132_v8 = vmul.f32 %v8109_v45, %v1131_v31  ;;  %v1150_v20 = vmul.f32 %v8137_v18, %v1148_v3  ;;  %v13551_v5 = vld [vmem:[#allocation132_spill] sm:$0xff]  ;;  %v2901_v25 = vmul.f32 %v8412_v41, %v2899_v61  ;;  %v13554_v18 = vld [vmem:[#allocation135_spill] sm:$0xff] }
 0x1eb   : > { %v8698_v55 = vpop.permute.xlu1 %2137  ;;  %v1139_v54 = vrot.slane %v8694_v62, 2  ;;  %v1151_v62 = vmul.f32 %v8315_v53, %v1148_v3  ;;  %v8737_v46 = vadd.f32 %v13551_v5, %v469_v48  ;;  %v8740_v31 = vsel %vm1035_vm1, %v1122_v23, %v1124_v42 }
 0x1ec   : > { %13543 = vst [vmem:[#allocation14_spill] sm:$0xff] %v8698_v55  ;;  %v8712_v60 = vpop.permute.xlu0 %2135  ;;  %v8751_v59 = vadd.f32 %v13554_v18, %v483_v51  ;;  %v8754_v53 = vsel %vm1035_vm1, %v1121_v58, %v1122_v23  ;;  %v2913_v48 = vstv %s8688_s6  ;;  %v2900_v51 = vmul.f32 %v8431_v21, %v2899_v61  ;;  %v13557_v23 = vld [vmem:[#allocation21_spill] sm:$0xff]  ;;  %v13560_v18 = vld [vmem:[#allocation23_spill] sm:$0xff]  ;;  %s8893_s6 = sld [smem:[#allocation3 + $0x43]] }
 0x1ed   : > { %13546 = vst [vmem:[#allocation15_spill] sm:$0xff] %v8712_v60  ;;  %2878 = vrot.lane.b32.xlu1 %v2873_v13, %s7181_s16  ;;  %2876 = vrot.lane.b32.xlu0 %v2872_v40, %s7181_s16  ;;  %v2886_v13 = vmul.f32 %v8431_v21, %v2885_v1  ;;  %v1149_v40 = vmul.f32 %v8109_v45, %v1148_v3  ;;  %v13555_v45 = vld [vmem:[#allocation20_spill] sm:$0xff] }
 0x1ee   : > { %v8748_v1 = vadd.f32 %v13553_v34, %v468_v29  ;;  %v497_v42 = vadd.f32 %v13555_v45, %v8564_v28  ;;  %v8762_v3 = vsel %vm1035_vm1, %v1139_v54, %v1141_v10  ;;  %v496_v58 = vadd.f32 %v13557_v23, %v8568_v30  ;;  %v13559_v10 = vld [vmem:[#allocation22_spill] sm:$0xff] }
 0x1ef   : > { %v8726_v0 = vpop.permute.xlu1 %2158  ;;  %v604_v5 = vadd.f32 %v13558_v33, %v482_v2  ;;  %v1156_v34 = vrot.slane %v1150_v20, 2  ;;  %v1158_v28 = vrot.slane %v1151_v62, 2  ;;  %v1155_v45 = vrot.slane %v1149_v40, 2  ;;  %v13562_v2 = vld [vmem:[#allocation24_spill] sm:$0xff]  ;;  %v13563_v62 = vld [vmem:[#allocation25_spill] sm:$0xff] }
 0x1f0   : > { %13549 = vst [vmem:[#allocation16_spill] sm:$0xff] %v8726_v0  ;;  %v8743_v0 = vpop.permute.xlu0 %2156  ;;  %v2915_v30 = vmul.f32 %v8412_v41, %v2913_v48  ;;  %v525_v20 = vadd.f32 %v13562_v2, %v8619_v49  ;;  %v524_v23 = vadd.f32 %v13563_v62, %v8629_v35  ;;  %v2914_v35 = vmul.f32 %v8431_v21, %v2913_v48 }
 0x1f1   : > { %13552 = vst [vmem:[#allocation17_spill] sm:$0xff] %v8743_v0  ;;  %2892 = vrot.lane.b32.xlu1 %v2887_v11, %s7182_s9  ;;  %v1138_v11 = vrot.slane %v1132_v8, 2  ;;  %2890 = vrot.lane.b32.xlu0 %v2886_v13, %s7182_s9  ;;  %v511_v8 = vadd.f32 %v13559_v10, %v8585_v39  ;;  %v510_v13 = vadd.f32 %v13560_v18, %v8589_v16  ;;  %v13564_v39 = vld [vmem:[#allocation26_spill] sm:$0xff]  ;;  %v2927_v10 = vstv %s8721_s10  ;;  %v13565_v16 = vld [vmem:[#allocation27_spill] sm:$0xff]  ;;  %v13566_v18 = vld [vmem:[#allocation28_spill] sm:$0xff]  ;;  %s8914_s10 = sld [smem:[#allocation3 + $0x144]] }
 0x1f2   : > { %v539_v33 = vadd.f32 %v13564_v39, %v8633_v52  ;;  %v538_v40 = vadd.f32 %v13565_v16, %v8657_v6  ;;  %v13568_v52 = vld [vmem:[#allocation29_spill] sm:$0xff]  ;;  %v622_v6 = vadd.f32 %v8454_v37, %v497_v42  ;;  %v621_v62 = vadd.f32 %v8458_v4, %v496_v58  ;;  %v13578_v16 = vld [vmem:[#allocation35_spill] sm:$0xff] }
 0x1f3   : > { %v8767_v29 = vpop.permute.xlu1 %2179  ;;  %v552_v2 = vadd.f32 %v13568_v52, %v8681_v15  ;;  %v8819_v48 = vsel %vm1035_vm1, %v1155_v45, %v1156_v34  ;;  %v2929_v37 = vmul.f32 %v8412_v41, %v2927_v10  ;;  %v656_v4 = vadd.f32 %v8487_v7, %v525_v20  ;;  %v13575_v20 = vld [vmem:[#allocation33_spill] sm:$0xff]  ;;  %v13581_v52 = vld [vmem:[#allocation115_spill] sm:$0xff] }
 0x1f4   : > { %13556 = vst [vmem:[#allocation18_spill] sm:$0xff] %v8767_v29  ;;  %v8781_v61 = vpop.permute.xlu0 %2177  ;;  %v655_v15 = vadd.f32 %v8502_v32, %v524_v23  ;;  %v673_v42 = vadd.f32 %v8508_v27, %v539_v33  ;;  %v2941_v58 = vstv %s8757_s11  ;;  %v2928_v32 = vmul.f32 %v8431_v21, %v2927_v10  ;;  %v13572_v27 = vld [vmem:[#allocation30_spill] sm:$0xff]  ;;  %s8928_s11 = sld [smem:[#allocation3 + $0x70]] }
 0x1f5   : > { %13561 = vst [vmem:[#allocation19_spill] sm:$0xff] %v8781_v61  ;;  %2906 = vrot.lane.b32.xlu1 %v2901_v25, %s7182_s9  ;;  %v553_v25 = vadd.f32 %v13566_v18, %v8669_v14  ;;  %v8799_v61 = vsel %vm1035_vm1, %v1138_v11, %v1139_v54  ;;  %2904 = vrot.lane.b32.xlu0 %v2900_v51, %s7182_s9  ;;  %v13569_v54 = vld [vmem:[#allocation141_spill] sm:$0xff]  ;;  %v13576_v33 = vld [vmem:[#allocation34_spill] sm:$0xff] }
 0x1f6   : > { %v8812_v14 = vsel %vm1035_vm1, %v1156_v34, %v1158_v28  ;;  %v639_v11 = vadd.f32 %v13569_v54, %v511_v8  ;;  %v638_v51 = vadd.f32 %v8476_v63, %v510_v13  ;;  %v672_v63 = vadd.f32 %v8532_v26, %v538_v40  ;;  %v13573_v13 = vld [vmem:[#allocation31_spill] sm:$0xff]  ;;  %v13579_v40 = vld [vmem:[#allocation117_spill] sm:$0xff] }
 0x1f7   : > { %v8804_v49 = vpop.permute.xlu1 %2200  ;;  %v8835_v34 = vadd.f32 %v8535_v38, %v553_v25  ;;  %v1505_v28 = vstv %s8764_s12  ;;  %v711_v8 = vadd.f32 %v13572_v27, %v8704_v36  ;;  %v8848_v26 = vadd.f32 %v13573_v13, %v8732_v43  ;;  %v13574_v38 = vld [vmem:[#allocation32_spill] sm:$0xff]  ;;  %v13583_v27 = vld [vmem:[#allocation37_spill] sm:$0xff]  ;;  %s8973_s12 = sld [smem:[#allocation3 + $0x9d]] }
 0x1f8   : > { %13567 = vst [vmem:[#allocation132_spill] sm:$0xff] %v8804_v49  ;;  %v8821_v39 = vpop.permute.xlu0 %2198  ;;  %v8852_v45 = vadd.f32 %v13574_v38, %v8737_v46  ;;  %v8859_v23 = vadd.f32 %v13575_v20, %v8748_v1  ;;  %v8863_v10 = vadd.f32 %v13576_v33, %v8751_v59  ;;  %v1511_v36 = vstv %s8773_s13  ;;  %v13580_v59 = vld [vmem:[#allocation36_spill] sm:$0xff]  ;;  %v13584_v38 = vld [vmem:[#allocation38_spill] sm:$0xff]  ;;  %s9020_s13 = sld [smem:[#allocation3 + $0xca]] }
 0x1f9   : > { %13570 = vst [vmem:[#allocation134_spill] sm:$0xff] %v8821_v39  ;;  %2920 = vrot.lane.b32.xlu1 %v2915_v30, %s7182_s9  ;;  %2918 = vrot.lane.b32.xlu0 %v2914_v35, %s7182_s9  ;;  %v8855_v30 = vadd.f32 %v8546_v22, %v552_v2  ;;  %v2943_v46 = vmul.f32 %v8412_v41, %v2941_v58  ;;  %v1517_v1 = vstv %s8779_s15  ;;  %v2955_v25 = vstv %s8792_s17  ;;  %v13591_v49 = vld [vmem:[#allocation42_spill] sm:$0xff]  ;;  %s9043_s15 = sld [smem:[#allocation3 + $0xf7]] }
 0x1fa   : > { %v8873_v22 = vadd.f32 %v13578_v16, %v604_v5  ;;  %v8876_v18 = vmul.f32 %v13579_v40, %v1505_v28  ;;  %v8883_v35 = vadd.f32 %v13580_v59, %v622_v6  ;;  %v8886_v2 = vmul.f32 %v13581_v52, %v1505_v28  ;;  %v13586_v16 = vld [vmem:[#allocation39_spill] sm:$0xff]  ;;  %s9061_s17 = sld [smem:[#allocation3 + $0xc]] }
 0x1fb   : > { %v8841_v7 = vpop.permute.xlu1 %2221  ;;  %v1523_v54 = vstv %s8801_s18  ;;  %v2942_v5 = vmul.f32 %v8431_v21, %v2941_v58  ;;  %v8896_v13 = vadd.f32 %v13583_v27, %v621_v62  ;;  %v8899_v6 = vadd.f32 %v13584_v38, %v639_v11  ;;  %v13587_v38 = vld [vmem:[#allocation40_spill] sm:$0xff]  ;;  %s9079_s18 = sld [smem:[#allocation3 + $0x124]] }
 0x1fc   : > { %13571 = vst [vmem:[#allocation135_spill] sm:$0xff] %v8841_v7  ;;  %v8868_v43 = vpop.permute.xlu0 %2219  ;;  %v8902_v28 = vmul.f32 %v13579_v40, %v1511_v36  ;;  %v8908_v20 = vmul.f32 %v13579_v40, %v1517_v1  ;;  %v8911_v58 = vmul.f32 %v13581_v52, %v1517_v1  ;;  %v1529_v33 = vstv %s8814_s19  ;;  %v13590_v7 = vld [vmem:[#allocation41_spill] sm:$0xff]  ;;  %s9106_s19 = sld [smem:[#allocation3 + $0x39]] }
 0x1fd   : > { %13577 = vst [vmem:[#allocation20_spill] sm:$0xff] %v8868_v43  ;;  %2934 = vrot.lane.b32.xlu1 %v2929_v37, %s7182_s9  ;;  %2932 = vrot.lane.b32.xlu0 %v2928_v32, %s7182_s9  ;;  %v8905_v32 = vmul.f32 %v13581_v52, %v1511_v36  ;;  %v2957_v11 = vmul.f32 %v8412_v41, %v2955_v25  ;;  %v2969_v27 = vstv %s8825_s24  ;;  %v3133_v1 = vstv %s8831_s26  ;;  %s9124_s24 = sld [smem:[#allocation3 + $0x151]] }
 0x1fe   : > { %v8921_v59 = vadd.f32 %v13586_v16, %v638_v51  ;;  %v8924_v36 = vmul.f32 %v13579_v40, %v1523_v54  ;;  %v2956_v16 = vmul.f32 %v8431_v21, %v2955_v25  ;;  %v8942_v43 = vld [vmem:[%s7328_s14 + $0x40] sm:$0x3]  ;;  %v8945_v39 = vadd.f32 %v13590_v7, %v655_v15  ;;  %s9141_s26 = sld [smem:[#allocation3 + $0x17]] }
 0x1ff   : > { %v8890_v37 = vpop.permute.xlu1 %2242  ;;  %v8948_v29 = vadd.f32 %v13591_v49, %v673_v42  ;;  %v2971_v15 = vmul.f32 %v8412_v41, %v2969_v27  ;;  %v3135_v49 = vmul.f32 %v8412_v41, %v3133_v1  ;;  %v2970_v55 = vmul.f32 %v8431_v21, %v2969_v27 }
 0x200   : > { %13582 = vst [vmem:[#allocation21_spill] sm:$0xff] %v8890_v37  ;;  %v8916_v62 = vpop.permute.xlu0 %2240  ;;  %v8931_v37 = vadd.f32 %v13587_v38, %v656_v4  ;;  %v8951_v4 = vmul.f32 %v13579_v40, %v1529_v33  ;;  %v1547_v27 = vstv %s8914_s10  ;;  %s9228_s10 = sld [smem:[#allocation3 + $0x9e]] }
 0x201   : > { %13585 = vst [vmem:[#allocation137_spill] sm:$0xff] %v8916_v62  ;;  %2948 = vrot.lane.b32.xlu1 %v2943_v46, %s7182_s9  ;;  %v8934_v62 = vmul.f32 %v13581_v52, %v1523_v54  ;;  %v1535_v46 = vstv %s8838_s27  ;;  %2946 = vrot.lane.b32.xlu0 %v2942_v5, %s7182_s9  ;;  %v8954_v54 = vmul.f32 %v13581_v52, %v1529_v33  ;;  %v13594_v5 = vld [vmem:[#allocation43_spill] sm:$0xff]  ;;  %s9169_s27 = sld [smem:[#allocation3 + $0x44]] }
 0x202   : > { %13592 = vst [vmem:[#allocation24_spill] sm:$0xff] %v8951_v4  ;;  %v8957_v38 = vadd.f32 %v13594_v5, %v672_v63  ;;  %v8966_v42 = vmul.f32 %v13579_v40, %v1535_v46  ;;  %v8969_v7 = vmul.f32 %v13581_v52, %v1535_v46  ;;  %v2983_v63 = vstv %s8880_s8  ;;  %v13598_v5 = vld [vmem:[#allocation44_spill] sm:$0xff]  ;;  %v13601_v46 = vld [vmem:[#allocation45_spill] sm:$0xff]  ;;  %s9181_s8 = sld [smem:[#allocation3 + $0x93]] }
 0x203   : > { %13588 = vst [vmem:[#allocation22_spill] sm:$0xff] %v8934_v62  ;;  %v8938_v51 = vpop.permute.xlu1 %2399  ;;  %13593 = vst [vmem:[#allocation25_spill] sm:$0xff] %v8954_v54  ;;  %v3136_v33 = vmul.f32 %v8942_v43, %v3133_v1  ;;  %v3154_v52 = vstv %s8893_s6  ;;  %v8993_v54 = vld [vmem:[%s7328_s14 + $0x18] sm:$0xff]  ;;  %v3196_v62 = vstv %s8973_s12  ;;  %s9213_s6 = sld [smem:[#allocation3 + $0x71]] }
 0x204   : > { %13589 = vst [vmem:[#allocation23_spill] sm:$0xff] %v8938_v51  ;;  %v1541_v51 = vstv %s8866_s7  ;;  %v8960_v25 = vpop.permute.xlu0 %2397  ;;  %13596 = vst [vmem:[#allocation27_spill] sm:$0xff] %v8966_v42  ;;  %s9175_s7 = sld [smem:[#allocation3 + $0x66]] }
 0x205   : > { %13595 = vst [vmem:[#allocation26_spill] sm:$0xff] %v8960_v25  ;;  %2962 = vrot.lane.b32.xlu1 %v2957_v11, %s7182_s9  ;;  %13597 = vst [vmem:[#allocation28_spill] sm:$0xff] %v8969_v7  ;;  %v8977_v11 = vadd.f32 %v13598_v5, %v8835_v34  ;;  %v13599_v25 = vld [vmem:[#allocation46_spill] sm:$0xff]  ;;  %2960 = vrot.lane.b32.xlu0 %v2956_v16, %s7182_s9  ;;  %v8987_v7 = vadd.f32 %v13601_v46, %v8855_v30  ;;  %v13604_v16 = vld [vmem:[#allocation47_spill] sm:$0xff]  ;;  %v3143_v46 = vrot.slane %v3136_v33, 1  ;;  %s9264_s12 = sld [smem:[#allocation3 + $0xcb]] }
 0x206   : > { %v879_v0 = vadd.f32 %v13599_v25, %v711_v8  ;;  %v8990_v42 = vmul.f32 %v13579_v40, %v1541_v51  ;;  %v8996_v34 = vmul.f32 %v8993_v54, %v1541_v51  ;;  %v3134_v8 = vmul.f32 %v8431_v21, %v3133_v1  ;;  %v13606_v1 = vld [vmem:[#allocation48_spill] sm:$0xff]  ;;  %v9023_v33 = vld [vmem:[%s7328_s14 + $0x20] sm:$0xff] }
 0x207   : > { %v8981_v60 = vpop.permute.xlu1 %2420  ;;  %v878_v25 = vadd.f32 %v13604_v16, %v8848_v26  ;;  %v2985_v30 = vmul.f32 %v8412_v41, %v2983_v63  ;;  %v3141_v40 = vrot.slane %v3135_v49, 1  ;;  %v3157_v51 = vmul.f32 %v8942_v43, %v3154_v52  ;;  %v13607_v26 = vld [vmem:[#allocation49_spill] sm:$0xff] }
 0x208   : > { %13600 = vst [vmem:[#allocation29_spill] sm:$0xff] %v8981_v60  ;;  %13602 = vst [vmem:[#allocation141_spill] sm:$0xff] %v8990_v42  ;;  %v9002_v5 = vpop.permute.xlu0 %2418  ;;  %v3156_v60 = vmul.f32 %v8412_v41, %v3154_v52  ;;  %v900_v42 = vadd.f32 %v13606_v1, %v8852_v45  ;;  %v899_v16 = vadd.f32 %v13607_v26, %v8859_v23  ;;  %v3140_v23 = vrot.slane %v3134_v8, 1  ;;  %v13612_v1 = vld [vmem:[#allocation51_spill] sm:$0xff] }
 0x209   : > { %13603 = vst [vmem:[#allocation30_spill] sm:$0xff] %v8996_v34  ;;  %13605 = vst [vmem:[#allocation31_spill] sm:$0xff] %v9002_v5  ;;  %2976 = vrot.lane.b32.xlu1 %v2971_v15, %s7182_s9  ;;  %v3175_v34 = vstv %s8928_s11  ;;  %v9014_v4 = vadd.f32 %v8592_v50, %v879_v0  ;;  %2974 = vrot.lane.b32.xlu0 %v2970_v55, %s7182_s9  ;;  %v2984_v49 = vmul.f32 %v8431_v21, %v2983_v63  ;;  %v13611_v55 = vld [vmem:[#allocation50_spill] sm:$0xff]  ;;  %s9249_s11 = sld [smem:[#allocation3 + $0xc0]] }
 0x20a   : > { %v9026_v5 = vmul.f32 %v9023_v33, %v1547_v27  ;;  %v9029_v45 = vmul.f32 %v8993_v54, %v1547_v27  ;;  %v3155_v50 = vmul.f32 %v8431_v21, %v3154_v52  ;;  %v921_v0 = vadd.f32 %v13611_v55, %v8863_v10  ;;  %v13614_v10 = vld [vmem:[#allocation52_spill] sm:$0xff] }
 0x20b   : > { %v9017_v15 = vpop.permute.xlu1 %2441  ;;  %v920_v63 = vadd.f32 %v13612_v1, %v8873_v22  ;;  %v3144_v27 = vsel %vm562_vm0, %v3141_v40, %v3143_v46  ;;  %v3164_v8 = vrot.slane %v3157_v51, 1  ;;  %v942_v52 = vadd.f32 %v13614_v10, %v8883_v35  ;;  %v13622_v10 = vld [vmem:[#allocation57_spill] sm:$0xff] }
 0x20c   : > { %13608 = vst [vmem:[#allocation32_spill] sm:$0xff] %v9017_v15  ;;  %13609 = vst [vmem:[#allocation33_spill] sm:$0xff] %v9026_v5  ;;  %v9036_v26 = vpop.permute.xlu0 %2439  ;;  %v3177_v15 = vmul.f32 %v8412_v41, %v3175_v34  ;;  %v3178_v5 = vmul.f32 %v8942_v43, %v3175_v34  ;;  %v9048_v22 = vadd.f32 %v8599_v56, %v878_v25  ;;  %v3161_v1 = vrot.slane %v3155_v50, 1 }
 0x20d   : > { %13610 = vst [vmem:[#allocation34_spill] sm:$0xff] %v9029_v45  ;;  %13613 = vst [vmem:[#allocation35_spill] sm:$0xff] %v9036_v26  ;;  %2990 = vrot.lane.b32.xlu1 %v2985_v30, %s7182_s9  ;;  %v3162_v45 = vrot.slane %v3156_v60, 1  ;;  %v9051_v55 = vadd.f32 %v8602_v47, %v900_v42  ;;  %v9054_v30 = vadd.f32 %v8636_v57, %v899_v16  ;;  %2988 = vrot.lane.b32.xlu0 %v2984_v49, %s7182_s9  ;;  %v13616_v60 = vld [vmem:[#allocation53_spill] sm:$0xff]  ;;  %v13617_v47 = vld [vmem:[#allocation54_spill] sm:$0xff] }
 0x20e   : > { %v941_v51 = vadd.f32 %v13616_v60, %v8896_v13  ;;  %v3142_v35 = vsel %vm562_vm0, %v3140_v23, %v3141_v40  ;;  %v3176_v56 = vmul.f32 %v8431_v21, %v3175_v34  ;;  %v963_v42 = vadd.f32 %v13617_v47, %v8899_v6  ;;  %v13619_v6 = vld [vmem:[#allocation55_spill] sm:$0xff] }
 0x20f   : > { %v9057_v46 = vpop.permute.xlu1 %2462  ;;  %v3183_v25 = vrot.slane %v3177_v15, 1  ;;  %v3185_v16 = vrot.slane %v3178_v5, 1  ;;  %v3198_v49 = vmul.f32 %v8412_v41, %v3196_v62  ;;  %v9072_v13 = vadd.f32 %v8647_v9, %v921_v0  ;;  %v13620_v15 = vld [vmem:[#allocation56_spill] sm:$0xff] }
 0x210   : > { %13615 = vst [vmem:[#allocation117_spill] sm:$0xff] %v9057_v46  ;;  %v9067_v57 = vpop.permute.xlu0 %2460  ;;  %v9075_v40 = vadd.f32 %v8650_v24, %v920_v63  ;;  %v3165_v34 = vsel %vm562_vm0, %v3162_v45, %v3164_v8  ;;  %v3199_v23 = vmul.f32 %v8942_v43, %v3196_v62  ;;  %v962_v50 = vadd.f32 %v13619_v6, %v8921_v59 }
 0x211   : > { %13618 = vst [vmem:[#allocation36_spill] sm:$0xff] %v9067_v57  ;;  %3147 = vrot.lane.b32.xlu1 %v3144_v27, %s7181_s16  ;;  %v984_v5 = vadd.f32 %v13620_v15, %v8931_v37  ;;  %v9086_v27 = vadd.f32 %v8672_v44, %v942_v52  ;;  %3145 = vrot.lane.b32.xlu0 %v3142_v35, %s7181_s16  ;;  %v3217_v24 = vstv %s9020_s13  ;;  %v3182_v8 = vrot.slane %v3176_v56, 1  ;;  %s9299_s13 = sld [smem:[#allocation3 + $0xf8]] }
 0x212   : > { %v9093_v0 = vadd.f32 %v8684_v12, %v941_v51  ;;  %v3163_v63 = vsel %vm562_vm0, %v3161_v1, %v3162_v45  ;;  %v3197_v59 = vmul.f32 %v8431_v21, %v3196_v62  ;;  %v983_v37 = vadd.f32 %v13622_v10, %v8945_v39  ;;  %v13624_v39 = vld [vmem:[#allocation58_spill] sm:$0xff]  ;;  %v13625_v1 = vld [vmem:[#allocation59_spill] sm:$0xff] }
 0x213   : > { %v9089_v9 = vpop.permute.xlu1 %2483  ;;  %v9100_v44 = vadd.f32 %v8691_v19, %v963_v42  ;;  %v3186_v60 = vsel %vm562_vm0, %v3183_v25, %v3185_v16  ;;  %v3204_v12 = vrot.slane %v3198_v49, 1  ;;  %v3206_v45 = vrot.slane %v3199_v23, 1 }
 0x214   : > { %13621 = vst [vmem:[#allocation115_spill] sm:$0xff] %v9089_v9  ;;  %v9102_v52 = vpop.permute.xlu0 %2481  ;;  %v3219_v51 = vmul.f32 %v8412_v41, %v3217_v24  ;;  %v3220_v62 = vmul.f32 %v8942_v43, %v3217_v24  ;;  %v3238_v35 = vstv %s9043_s15  ;;  %v1005_v19 = vadd.f32 %v13624_v39, %v8948_v29  ;;  %s9302_s15 = sld [smem:[#allocation3 + $0xed]] }
 0x215   : > { %13623 = vst [vmem:[#allocation37_spill] sm:$0xff] %v9102_v52  ;;  %3168 = vrot.lane.b32.xlu1 %v3165_v34, %s7181_s16  ;;  %v1004_v56 = vadd.f32 %v13625_v1, %v8957_v38  ;;  %v9116_v47 = vadd.f32 %v8707_v17, %v962_v50  ;;  %v9119_v42 = vadd.f32 %v8740_v31, %v984_v5  ;;  %v1777_v49 = vstv %s9061_s17  ;;  %v13627_v38 = vld [vmem:[#allocation60_spill] sm:$0xff]  ;;  %s9314_s17 = sld [smem:[#allocation3 + $0x125]] }
 0x216   : > { %3166 = vrot.lane.b32.xlu0 %v3163_v63, %s7181_s16  ;;  %v3184_v34 = vsel %vm562_vm0, %v3182_v8, %v3183_v25  ;;  %v3203_v29 = vrot.slane %v3197_v59, 1  ;;  %v3218_v23 = vmul.f32 %v8431_v21, %v3217_v24  ;;  %v1026_v17 = vadd.f32 %v13627_v38, %v8977_v11  ;;  %v13629_v59 = vld [vmem:[#allocation128_spill] sm:$0xff] }
 0x217   : > { %v9122_v16 = vpop.permute.xlu1 %2504  ;;  %v9132_v6 = vadd.f32 %v8754_v53, %v983_v37  ;;  %v3240_v50 = vmul.f32 %v8412_v41, %v3238_v35  ;;  %v3241_v15 = vmul.f32 %v8942_v43, %v3238_v35  ;;  %v3207_v5 = vsel %vm562_vm0, %v3204_v12, %v3206_v45 }
 0x218   : > { %13626 = vst [vmem:[#allocation38_spill] sm:$0xff] %v9122_v16  ;;  %v9134_v31 = vpop.permute.xlu0 %2502  ;;  %v3225_v25 = vrot.slane %v3219_v51, 1  ;;  %v3227_v63 = vrot.slane %v3220_v62, 1  ;;  %v3259_v8 = vstv %s9079_s18  ;;  %v9144_v11 = vadd.f32 %v8762_v3, %v1005_v19  ;;  %v13631_v62 = vld [vmem:[#allocation61_spill] sm:$0xff]  ;;  %s9349_s18 = sld [smem:[#allocation3 + $0x152]] }
 0x219   : > { %13628 = vst [vmem:[#allocation39_spill] sm:$0xff] %v9134_v31  ;;  %3189 = vrot.lane.b32.xlu1 %v3186_v60, %s7181_s16  ;;  %v9147_v53 = vadd.f32 %v8799_v61, %v1004_v56  ;;  %v1779_v24 = vmul.f32 %v9023_v33, %v1777_v49  ;;  %v1780_v10 = vmul.f32 %v13629_v59, %v1777_v49  ;;  %v3224_v51 = vrot.slane %v3218_v23, 1 }
 0x21a   : > { %3187 = vrot.lane.b32.xlu0 %v3184_v34, %s7181_s16  ;;  %v1778_v60 = vmul.f32 %v8993_v54, %v1777_v49  ;;  %v3205_v45 = vsel %vm562_vm0, %v3203_v29, %v3204_v12  ;;  %v3239_v3 = vmul.f32 %v8431_v21, %v3238_v35  ;;  %v1025_v61 = vadd.f32 %v13631_v62, %v8987_v7  ;;  %v13633_v7 = vld [vmem:[#allocation62_spill] sm:$0xff] }
 0x21b   : > { %v9152_v37 = vpop.permute.xlu1 %2525  ;;  %v3246_v19 = vrot.slane %v3240_v50, 1  ;;  %v3248_v1 = vrot.slane %v3241_v15, 1  ;;  %v3261_v56 = vmul.f32 %v8412_v41, %v3259_v8  ;;  %v9164_v34 = vadd.f32 %v8812_v14, %v1026_v17 }
 0x21c   : > { %13630 = vst [vmem:[#allocation40_spill] sm:$0xff] %v9152_v37  ;;  %v9159_v39 = vpop.permute.xlu0 %2523  ;;  %v1794_v49 = vstv %s9106_s19  ;;  %v3228_v12 = vsel %vm562_vm0, %v3225_v25, %v3227_v63  ;;  %v3262_v35 = vmul.f32 %v8942_v43, %v3259_v8  ;;  %v9173_v29 = vadd.f32 %v13633_v7, %v9014_v4  ;;  %s9362_s19 = sld [smem:[#allocation3 + $0x11a]] }
 0x21d   : > { %13632 = vst [vmem:[#allocation41_spill] sm:$0xff] %v9159_v39  ;;  %3210 = vrot.lane.b32.xlu1 %v3207_v5, %s7181_s16  ;;  %v1785_v23 = vrot.slane %v1779_v24, 1  ;;  %v1787_v38 = vrot.slane %v1780_v10, 1  ;;  %v3280_v17 = vstv %s9124_s24  ;;  %v1784_v50 = vrot.slane %v1778_v60, 1  ;;  %v9189_v24 = vld [vmem:[%s7328_s14 + $0x28] sm:$0x3] }
 0x21e   : > { %3208 = vrot.lane.b32.xlu0 %v3205_v45, %s7181_s16  ;;  %v3226_v15 = vsel %vm562_vm0, %v3224_v51, %v3225_v25  ;;  %v3245_v5 = vrot.slane %v3239_v3, 1  ;;  %v3260_v63 = vmul.f32 %v8431_v21, %v3259_v8  ;;  %v9186_v4 = vmul.f32 %v9023_v33, %v1794_v49  ;;  %v13636_v3 = vld [vmem:[#allocation63_spill] sm:$0xff]  ;;  %s9373_s24 = sld [smem:[#allocation3 + $0x147]] }
 0x21f   : > { %v9178_v14 = vpop.permute.xlu1 %2546  ;;  %v1797_v59 = vmul.f32 %v9189_v24, %v1794_v49  ;;  %v3249_v60 = vsel %vm562_vm0, %v3246_v19, %v3248_v1  ;;  %v3267_v45 = vrot.slane %v3261_v56, 1  ;;  %v3269_v62 = vrot.slane %v3262_v35, 1 }
 0x220   : > { %13634 = vst [vmem:[#allocation42_spill] sm:$0xff] %v9178_v14  ;;  %v9192_v10 = vpop.permute.xlu0 %2544  ;;  %v3282_v25 = vmul.f32 %v8412_v41, %v3280_v17  ;;  %v3283_v51 = vmul.f32 %v8942_v43, %v3280_v17  ;;  %v3301_v8 = vstv %s9141_s26  ;;  %v9201_v7 = vadd.f32 %v13636_v3, %v9048_v22  ;;  %s9385_s26 = sld [smem:[#allocation3 + $0x19]] }
 0x221   : > { %13635 = vst [vmem:[#allocation43_spill] sm:$0xff] %v9192_v10  ;;  %3231 = vrot.lane.b32.xlu1 %v3228_v12, %s7181_s16  ;;  %v9204_v14 = vadd.f32 %v8819_v48, %v1025_v61  ;;  %v9207_v10 = vsel %vm562_vm0, %v1785_v23, %v1787_v38  ;;  %v1795_v12 = vmul.f32 %v8993_v54, %v1794_v49  ;;  %v3266_v35 = vrot.slane %v3260_v63, 1 }
 0x222   : > { %3229 = vrot.lane.b32.xlu0 %v3226_v15, %s7181_s16  ;;  %v9216_v56 = vsel %vm562_vm0, %v1784_v50, %v1785_v23  ;;  %v3247_v22 = vsel %vm562_vm0, %v3245_v5, %v3246_v19  ;;  %v3281_v48 = vmul.f32 %v8431_v21, %v3280_v17  ;;  %v1802_v61 = vrot.slane %v9186_v4, 1  ;;  %v13639_v17 = vld [vmem:[#allocation64_spill] sm:$0xff]  ;;  %v13640_v4 = vld [vmem:[#allocation65_spill] sm:$0xff] }
 0x223   : > { %v9211_v1 = vpop.permute.xlu1 %2567  ;;  %v1804_v38 = vrot.slane %v1797_v59, 1  ;;  %v3303_v15 = vmul.f32 %v8412_v41, %v3301_v8  ;;  %v3304_v3 = vmul.f32 %v8942_v43, %v3301_v8  ;;  %v3270_v23 = vsel %vm562_vm0, %v3267_v45, %v3269_v62 }
 0x224   : > { %13637 = vst [vmem:[#allocation44_spill] sm:$0xff] %v9211_v1  ;;  %v9221_v49 = vpop.permute.xlu0 %2565  ;;  %v3288_v50 = vrot.slane %v3282_v25, 1  ;;  %v3290_v19 = vrot.slane %v3283_v51, 1  ;;  %v3322_v5 = vstv %s9169_s27  ;;  %v9232_v63 = vadd.f32 %v13639_v17, %v9051_v55  ;;  %v13642_v55 = vld [vmem:[#allocation66_spill] sm:$0xff]  ;;  %s9405_s27 = sld [smem:[#allocation3 + $0x46]] }
 0x225   : > { %13638 = vst [vmem:[#allocation46_spill] sm:$0xff] %v9221_v49  ;;  %3252 = vrot.lane.b32.xlu1 %v3249_v60, %s7181_s16  ;;  %v9236_v59 = vadd.f32 %v13640_v4, %v9054_v30  ;;  %v1801_v60 = vrot.slane %v1795_v12, 1  ;;  %v1811_v41 = vstv %s9175_s7  ;;  %v1828_v62 = vstv %s9181_s8  ;;  %v9255_v4 = vld [vmem:[%s7328_s14 + $0x38] sm:$0xff]  ;;  %s9431_s7 = sld [smem:[#allocation3 + $0x73]] }
 0x226   : > { %3250 = vrot.lane.b32.xlu0 %v3247_v22, %s7181_s16  ;;  %v3268_v25 = vsel %vm562_vm0, %v3266_v35, %v3267_v45  ;;  %v3287_v51 = vrot.slane %v3281_v48, 1  ;;  %v3302_v1 = vmul.f32 %v8431_v21, %v3301_v8  ;;  %v9247_v17 = vadd.f32 %v13642_v55, %v9072_v13  ;;  %s9443_s8 = sld [smem:[#allocation3 + $0xf]] }
 0x227   : > { %v9240_v49 = vpop.permute.xlu1 %2588  ;;  %v3309_v12 = vrot.slane %v3303_v15, 1  ;;  %v3311_v22 = vrot.slane %v3304_v3, 1  ;;  %v3324_v45 = vmul.f32 %v9255_v4, %v3322_v5  ;;  %v9259_v21 = vsel %vm562_vm0, %v1802_v61, %v1804_v38 }
 0x228   : > { %13641 = vst [vmem:[#allocation45_spill] sm:$0xff] %v9240_v49  ;;  %v9251_v30 = vpop.permute.xlu0 %2586  ;;  %v1813_v13 = vmul.f32 %v9023_v33, %v1811_v41  ;;  %v3291_v8 = vsel %vm562_vm0, %v3288_v50, %v3290_v19  ;;  %v3325_v35 = vmul.f32 %v8942_v43, %v3322_v5  ;;  %v1814_v48 = vmul.f32 %v9189_v24, %v1811_v41  ;;  %v9280_v49 = vld [vmem:[%s7328_s14 + $0x30] sm:$0xff] }
 0x229   : > { %13643 = vst [vmem:[#allocation47_spill] sm:$0xff] %v9251_v30  ;;  %3273 = vrot.lane.b32.xlu1 %v3270_v23, %s7181_s16  ;;  %v1812_v15 = vmul.f32 %v8993_v54, %v1811_v41  ;;  %v9269_v3 = vmul.f32 %v9023_v33, %v1828_v62  ;;  %v3343_v38 = vstv %s9213_s6  ;;  %v9276_v55 = vsel %vm562_vm0, %v1801_v60, %v1802_v61  ;;  %v13645_v41 = vld [vmem:[#allocation67_spill] sm:$0xff]  ;;  %s9463_s6 = sld [smem:[#allocation3 + $0xa0]] }
 0x22a   : > { %3271 = vrot.lane.b32.xlu0 %v3268_v25, %s7181_s16  ;;  %v3289_v19 = vsel %vm562_vm0, %v3287_v51, %v3288_v50  ;;  %v3308_v30 = vrot.slane %v3302_v1, 1  ;;  %v3323_v39 = vmul.f32 %v9280_v49, %v3322_v5  ;;  %v9285_v37 = vadd.f32 %v13645_v41, %v9075_v40 }
 0x22b   : > { %v9272_v23 = vpop.permute.xlu1 %2609  ;;  %v1831_v25 = vmul.f32 %v9189_v24, %v1828_v62  ;;  %v3312_v61 = vsel %vm562_vm0, %v3309_v12, %v3311_v22  ;;  %v3330_v60 = vrot.slane %v3324_v45, 1  ;;  %v3345_v1 = vmul.f32 %v9255_v4, %v3343_v38 }
 0x22c   : > { %13644 = vst [vmem:[#allocation48_spill] sm:$0xff] %v9272_v23  ;;  %v9288_v31 = vpop.permute.xlu0 %2607  ;;  %v3332_v23 = vrot.slane %v3325_v35, 1  ;;  %v3346_v50 = vmul.f32 %v8942_v43, %v3343_v38  ;;  %v3364_v5 = vstv %s9228_s10  ;;  %v1819_v51 = vrot.slane %v1813_v13, 1  ;;  %s9467_s10 = sld [smem:[#allocation3 + $0x3c]] }
 0x22d   : > { %13646 = vst [vmem:[#allocation49_spill] sm:$0xff] %v9288_v31  ;;  %3294 = vrot.lane.b32.xlu1 %v3291_v8, %s7181_s16  ;;  %v1821_v16 = vrot.slane %v1814_v48, 1  ;;  %v1818_v40 = vrot.slane %v1812_v15, 1  ;;  %v1836_v41 = vrot.slane %v9269_v3, 1  ;;  %v1829_v22 = vmul.f32 %v8993_v54, %v1828_v62 }
 0x22e   : > { %3292 = vrot.lane.b32.xlu0 %v3289_v19, %s7181_s16  ;;  %v3310_v45 = vsel %vm562_vm0, %v3308_v30, %v3309_v12  ;;  %v3329_v8 = vrot.slane %v3323_v39, 1  ;;  %v3344_v13 = vmul.f32 %v9280_v49, %v3343_v38  ;;  %v1838_v35 = vrot.slane %v1831_v25, 1  ;;  %v13649_v39 = vld [vmem:[#allocation68_spill] sm:$0xff]  ;;  %v13650_v12 = vld [vmem:[#allocation69_spill] sm:$0xff] }
 0x22f   : > { %v9297_v31 = vpop.permute.xlu1 %2630  ;;  %v1845_v48 = vstv %s9249_s11  ;;  %v3366_v3 = vmul.f32 %v9255_v4, %v3364_v5  ;;  %v3367_v19 = vmul.f32 %v8942_v43, %v3364_v5  ;;  %v3351_v62 = vrot.slane %v3345_v1, 1  ;;  %s9476_s11 = sld [smem:[#allocation3 + $0xcd]] }
 0x230   : > { %13647 = vst [vmem:[#allocation50_spill] sm:$0xff] %v9297_v31  ;;  %v9307_v15 = vpop.permute.xlu0 %2628  ;;  %v3333_v31 = vsel %vm562_vm0, %v3330_v60, %v3332_v23  ;;  %v3353_v52 = vrot.slane %v3346_v50, 1  ;;  %v3385_v9 = vstv %s9264_s12  ;;  %v9318_v30 = vadd.f32 %v13649_v39, %v9086_v27  ;;  %s9511_s12 = sld [smem:[#allocation3 + $0xfa]] }
 0x231   : > { %13648 = vst [vmem:[#allocation51_spill] sm:$0xff] %v9307_v15  ;;  %3315 = vrot.lane.b32.xlu1 %v3312_v61, %s7182_s9  ;;  %v9322_v38 = vadd.f32 %v13650_v12, %v9093_v0  ;;  %v9325_v25 = vsel %vm562_vm0, %v1819_v51, %v1821_v16  ;;  %v9328_v61 = vsel %vm562_vm0, %v1818_v40, %v1819_v51  ;;  %v1835_v1 = vrot.slane %v1829_v22, 1 }
 0x232   : > { %3313 = vrot.lane.b32.xlu0 %v3310_v45, %s7182_s9  ;;  %v3331_v50 = vsel %vm562_vm0, %v3329_v8, %v3330_v60  ;;  %v3350_v15 = vrot.slane %v3344_v13, 1  ;;  %v3365_v27 = vmul.f32 %v9280_v49, %v3364_v5  ;;  %v1847_v39 = vmul.f32 %v9023_v33, %v1845_v48  ;;  %v13653_v45 = vld [vmem:[#allocation70_spill] sm:$0xff]  ;;  %v13655_v13 = vld [vmem:[#allocation71_spill] sm:$0xff] }
 0x233   : > { %v9331_v23 = vpop.permute.xlu1 %2651  ;;  %v3372_v16 = vrot.slane %v3366_v3, 1  ;;  %v3374_v51 = vrot.slane %v3367_v19, 1  ;;  %v3387_v40 = vmul.f32 %v9255_v4, %v3385_v9  ;;  %v9342_v22 = vadd.f32 %v13653_v45, %v9100_v44 }
 0x234   : > { %13651 = vst [vmem:[#allocation52_spill] sm:$0xff] %v9331_v23  ;;  %v9336_v0 = vpop.permute.xlu0 %2649  ;;  %v9345_v60 = vsel %vm562_vm0, %v1836_v41, %v1838_v35  ;;  %v3354_v5 = vsel %vm562_vm0, %v3351_v62, %v3353_v52  ;;  %v3388_v8 = vmul.f32 %v8942_v43, %v3385_v9  ;;  %v1848_v3 = vmul.f32 %v9189_v24, %v1845_v48 }
 0x235   : > { %13652 = vst [vmem:[#allocation53_spill] sm:$0xff] %v9336_v0  ;;  %3336 = vrot.lane.b32.xlu1 %v3333_v31, %s7182_s9  ;;  %13654 = vst [vmem:[#allocation54_spill] sm:$0xff] %v9345_v60  ;;  %v9353_v31 = vadd.f32 %v13655_v13, %v9116_v47  ;;  %v1846_v19 = vmul.f32 %v8993_v54, %v1845_v48  ;;  %v3406_v35 = vstv %s9299_s13  ;;  %v1862_v12 = vstv %s9302_s15  ;;  %s9532_s13 = sld [smem:[#allocation3 + $0x69]] }
 0x236   : > { %3334 = vrot.lane.b32.xlu0 %v3331_v50, %s7182_s9  ;;  %v3352_v52 = vsel %vm562_vm0, %v3350_v15, %v3351_v62  ;;  %v3371_v45 = vrot.slane %v3365_v27, 1  ;;  %v3386_v0 = vmul.f32 %v9280_v49, %v3385_v9  ;;  %v9367_v47 = vsel %vm562_vm0, %v1835_v1, %v1836_v41  ;;  %s9545_s15 = sld [smem:[#allocation3 + $0x127]] }
 0x237   : > { %v9358_v44 = vpop.permute.xlu1 %2672  ;;  %13657 = vst [vmem:[#allocation56_spill] sm:$0xff] %v9367_v47  ;;  %v1853_v13 = vrot.slane %v1847_v39, 1  ;;  %v3375_v48 = vsel %vm562_vm0, %v3372_v16, %v3374_v51  ;;  %v3393_v50 = vrot.slane %v3387_v40, 1  ;;  %v3408_v57 = vmul.f32 %v9255_v4, %v3406_v35  ;;  %v13660_v51 = vld [vmem:[#allocation72_spill] sm:$0xff] }
 0x238   : > { %13656 = vst [vmem:[#allocation55_spill] sm:$0xff] %v9358_v44  ;;  %v9369_v23 = vpop.permute.xlu0 %2670  ;;  %v3395_v44 = vrot.slane %v3388_v8, 1  ;;  %v3409_v15 = vmul.f32 %v8942_v43, %v3406_v35  ;;  %v3427_v62 = vstv %s9314_s17  ;;  %v1855_v9 = vrot.slane %v1848_v3, 1  ;;  %s9558_s17 = sld [smem:[#allocation3 + $0x154]] }
 0x239   : > { %13658 = vst [vmem:[#allocation57_spill] sm:$0xff] %v9369_v23  ;;  %3357 = vrot.lane.b32.xlu1 %v3354_v5, %s7182_s9  ;;  %v1852_v27 = vrot.slane %v1846_v19, 1  ;;  %v9379_v41 = vmul.f32 %v9023_v33, %v1862_v12  ;;  %v1865_v1 = vmul.f32 %v9189_v24, %v1862_v12  ;;  %v9389_v40 = vadd.f32 %v13660_v51, %v9119_v42  ;;  %v13661_v19 = vld [vmem:[#allocation73_spill] sm:$0xff] }
 0x23a   : > { %3355 = vrot.lane.b32.xlu0 %v3352_v52, %s7182_s9  ;;  %v3373_v5 = vsel %vm562_vm0, %v3371_v45, %v3372_v16  ;;  %v3392_v8 = vrot.slane %v3386_v0, 1  ;;  %v3407_v3 = vmul.f32 %v9280_v49, %v3406_v35  ;;  %v9395_v23 = vadd.f32 %v13661_v19, %v9132_v6 }
 0x23b   : > { %v9383_v39 = vpop.permute.xlu1 %2693  ;;  %v1863_v52 = vmul.f32 %v8993_v54, %v1862_v12  ;;  %v3430_v42 = vmul.f32 %v8942_v43, %v3427_v62  ;;  %v3396_v16 = vsel %vm562_vm0, %v3393_v50, %v3395_v44  ;;  %v3414_v0 = vrot.slane %v3408_v57, 1 }
 0x23c   : > { %13659 = vst [vmem:[#allocation58_spill] sm:$0xff] %v9383_v39  ;;  %v9398_v46 = vpop.permute.xlu0 %2691  ;;  %v3429_v39 = vmul.f32 %v9255_v4, %v3427_v62  ;;  %v3416_v45 = vrot.slane %v3409_v15, 1  ;;  %v3448_v35 = vstv %s9349_s18  ;;  %v9408_v6 = vsel %vm562_vm0, %v1853_v13, %v1855_v9  ;;  %s9573_s18 = sld [smem:[#allocation3 + $0x96]] }
 0x23d   : > { %13662 = vst [vmem:[#allocation59_spill] sm:$0xff] %v9398_v46  ;;  %3378 = vrot.lane.b32.xlu1 %v3375_v48, %s7182_s9  ;;  %13663 = vst [vmem:[#allocation60_spill] sm:$0xff] %v9408_v6  ;;  %v9411_v12 = vsel %vm562_vm0, %v1852_v27, %v1853_v13  ;;  %v1870_v48 = vrot.slane %v9379_v41, 1  ;;  %v1872_v51 = vrot.slane %v1865_v1, 1  ;;  %v1879_v44 = vstv %s9362_s19  ;;  %v13667_v1 = vld [vmem:[#allocation74_spill] sm:$0xff]  ;;  %s9587_s19 = sld [smem:[#allocation3 + $0x1a]] }
 0x23e   : > { %13664 = vst [vmem:[#allocation128_spill] sm:$0xff] %v9411_v12  ;;  %3376 = vrot.lane.b32.xlu0 %v3373_v5, %s7182_s9  ;;  %v3394_v57 = vsel %vm562_vm0, %v3392_v8, %v3393_v50  ;;  %v3413_v15 = vrot.slane %v3407_v3, 1  ;;  %v3428_v46 = vmul.f32 %v9280_v49, %v3427_v62  ;;  %v1869_v26 = vrot.slane %v1863_v52, 1 }
 0x23f   : > { %v9415_v19 = vpop.permute.xlu1 %2714  ;;  %v3435_v13 = vrot.slane %v3429_v39, 1  ;;  %v3437_v27 = vrot.slane %v3430_v42, 1  ;;  %v3450_v41 = vmul.f32 %v9255_v4, %v3448_v35  ;;  %v9426_v5 = vadd.f32 %v13667_v1, %v9144_v11 }
 0x240   : > { %13665 = vst [vmem:[#allocation61_spill] sm:$0xff] %v9415_v19  ;;  %v9420_v9 = vpop.permute.xlu0 %2712  ;;  %v1896_v19 = vstv %s9373_s24  ;;  %v3417_v50 = vsel %vm562_vm0, %v3414_v0, %v3416_v45  ;;  %v3451_v8 = vmul.f32 %v8942_v43, %v3448_v35  ;;  %v9434_v62 = vsel %vm562_vm0, %v1870_v48, %v1872_v51  ;;  %s9624_s24 = sld [smem:[#allocation3 + $0x47]] }
 0x241   : > { %13666 = vst [vmem:[#allocation62_spill] sm:$0xff] %v9420_v9  ;;  %3399 = vrot.lane.b32.xlu1 %v3396_v16, %s7182_s9  ;;  %13668 = vst [vmem:[#allocation63_spill] sm:$0xff] %v9434_v62  ;;  %v1881_v3 = vmul.f32 %v9023_v33, %v1879_v44  ;;  %v1882_v39 = vmul.f32 %v9189_v24, %v1879_v44  ;;  %v3605_v11 = vstv %s9385_s26  ;;  %v3434_v45 = vrot.slane %v3428_v46, 1  ;;  %s9632_s26 = sld [smem:[#allocation3 + $0xc3]] }
 0x242   : > { %3397 = vrot.lane.b32.xlu0 %v3394_v57, %s7182_s9  ;;  %v1880_v42 = vmul.f32 %v8993_v54, %v1879_v44  ;;  %v3415_v16 = vsel %vm562_vm0, %v3413_v15, %v3414_v0  ;;  %v3449_v51 = vmul.f32 %v9280_v49, %v3448_v35  ;;  %v1898_v1 = vmul.f32 %v9023_v33, %v1896_v19 }
 0x243   : > { %v9439_v52 = vpop.permute.xlu1 %2780  ;;  %v1899_v9 = vmul.f32 %v9189_v24, %v1896_v19  ;;  %v3438_v57 = vsel %vm562_vm0, %v3435_v13, %v3437_v27  ;;  %v3458_v12 = vrot.slane %v3451_v8, 1  ;;  %v3607_v44 = vmul.f32 %v9255_v4, %v3605_v11 }
 0x244   : > { %13669 = vst [vmem:[#allocation64_spill] sm:$0xff] %v9439_v52  ;;  %v9449_v62 = vpop.permute.xlu0 %2778  ;;  %v3456_v52 = vrot.slane %v3450_v41, 1  ;;  %v3608_v6 = vmul.f32 %v8942_v43, %v3605_v11  ;;  %v3626_v0 = vstv %s9405_s27  ;;  %v9457_v46 = vsel %vm562_vm0, %v1869_v26, %v1870_v48  ;;  %s9641_s27 = sld [smem:[#allocation3 + $0x74]] }
 0x245   : > { %13670 = vst [vmem:[#allocation65_spill] sm:$0xff] %v9449_v62  ;;  %3420 = vrot.lane.b32.xlu1 %v3417_v50, %s7182_s9  ;;  %v1887_v35 = vrot.slane %v1881_v3, 1  ;;  %v1889_v15 = vrot.slane %v1882_v39, 1  ;;  %v1897_v47 = vmul.f32 %v8993_v54, %v1896_v19  ;;  %v1886_v27 = vrot.slane %v1880_v42, 1 }
 0x246   : > { %3418 = vrot.lane.b32.xlu0 %v3415_v16, %s7182_s9  ;;  %v3436_v41 = vsel %vm562_vm0, %v3434_v45, %v3435_v13  ;;  %v3455_v50 = vrot.slane %v3449_v51, 1  ;;  %v3606_v8 = vmul.f32 %v9280_v49, %v3605_v11  ;;  %v1904_v60 = vrot.slane %v1898_v1, 1  ;;  %v13674_v45 = vld [vmem:[#allocation76_spill] sm:$0xff] }
 0x247   : > { %v9461_v62 = vpop.permute.xlu1 %2794  ;;  %v1906_v26 = vrot.slane %v1899_v9, 1  ;;  %v3628_v19 = vmul.f32 %v9255_v4, %v3626_v0  ;;  %v3629_v3 = vmul.f32 %v8942_v43, %v3626_v0  ;;  %v3459_v39 = vsel %vm562_vm0, %v3456_v52, %v3458_v12  ;;  %v13673_v9 = vld [vmem:[#allocation75_spill] sm:$0xff] }
 0x248   : > { %13671 = vst [vmem:[#allocation66_spill] sm:$0xff] %v9461_v62  ;;  %v9469_v48 = vpop.permute.xlu0 %2792  ;;  %v3613_v42 = vrot.slane %v3607_v44, 2  ;;  %v3615_v13 = vrot.slane %v3608_v6, 2  ;;  %v3647_v16 = vstv %s9431_s7  ;;  %v9480_v11 = vadd.f32 %v13673_v9, %v9147_v53  ;;  %v13676_v53 = vld [vmem:[#allocation77_spill] sm:$0xff]  ;;  %s9669_s7 = sld [smem:[#allocation3 + $0xa1]] }
 0x249   : > { %13672 = vst [vmem:[#allocation67_spill] sm:$0xff] %v9469_v48  ;;  %3441 = vrot.lane.b32.xlu1 %v3438_v57, %s7182_s9  ;;  %v9484_v51 = vadd.f32 %v13674_v45, %v9164_v34  ;;  %v9487_v1 = vsel %vm562_vm0, %v1887_v35, %v1889_v15  ;;  %v1903_v57 = vrot.slane %v1897_v47, 1  ;;  %v2249_v6 = vstv %s9443_s8  ;;  %s9683_s8 = sld [smem:[#allocation3 + $0xf0]] }
 0x24a   : > { %3439 = vrot.lane.b32.xlu0 %v3436_v41, %s7182_s9  ;;  %v3457_v44 = vsel %vm562_vm0, %v3455_v50, %v3456_v52  ;;  %v3612_v48 = vrot.slane %v3606_v8, 2  ;;  %v3627_v62 = vmul.f32 %v9280_v49, %v3626_v0  ;;  %v9497_v9 = vadd.f32 %v13676_v53, %v9204_v14  ;;  %v13680_v50 = vld [vmem:[#allocation78_spill] sm:$0xff] }
 0x24b   : > { %v9490_v12 = vpop.permute.xlu1 %2808  ;;  %v3634_v47 = vrot.slane %v3628_v19, 2  ;;  %v3636_v15 = vrot.slane %v3629_v3, 2  ;;  %v3649_v41 = vmul.f32 %v9255_v4, %v3647_v16  ;;  %v9504_v45 = vsel %vm562_vm0, %v1886_v27, %v1887_v35 }
 0x24c   : > { %13675 = vst [vmem:[#allocation68_spill] sm:$0xff] %v9490_v12  ;;  %v9499_v34 = vpop.permute.xlu0 %2806  ;;  %13678 = vst [vmem:[#allocation70_spill] sm:$0xff] %v9504_v45  ;;  %v9507_v52 = vsel %vm562_vm0, %v1904_v60, %v1906_v26  ;;  %v3616_v0 = vsel %vm1035_vm1, %v3613_v42, %v3615_v13  ;;  %v3650_v14 = vmul.f32 %v8942_v43, %v3647_v16  ;;  %v3668_v27 = vstv %s9463_s6  ;;  %s9703_s6 = sld [smem:[#allocation3 + $0xce]] }
 0x24d   : > { %13677 = vst [vmem:[#allocation69_spill] sm:$0xff] %v9499_v34  ;;  %3462 = vrot.lane.b32.xlu1 %v3459_v39, %s7182_s9  ;;  %13679 = vst [vmem:[#allocation71_spill] sm:$0xff] %v9507_v52  ;;  %v1352_v8 = vadd.f32 %v13680_v50, %v9173_v29  ;;  %v2251_v19 = vmul.f32 %v9023_v33, %v2249_v6  ;;  %v2252_v3 = vmul.f32 %v9189_v24, %v2249_v6 }
 0x24e   : > { %3460 = vrot.lane.b32.xlu0 %v3457_v44, %s7182_s9  ;;  %v9522_v26 = vsel %vm562_vm0, %v1903_v57, %v1904_v60  ;;  %v3614_v39 = vsel %vm1035_vm1, %v3612_v48, %v3613_v42  ;;  %v3633_v13 = vrot.slane %v3627_v62, 2  ;;  %v3648_v53 = vmul.f32 %v9280_v49, %v3647_v16  ;;  %v13684_v42 = vld [vmem:[#allocation79_spill] sm:$0xff] }
 0x24f   : > { %v9518_v35 = vpop.permute.xlu1 %2822  ;;  %13682 = vst [vmem:[#allocation73_spill] sm:$0xff] %v9522_v26  ;;  %v2250_v29 = vmul.f32 %v8993_v54, %v2249_v6  ;;  %v2266_v50 = vstv %s9467_s10  ;;  %v3637_v44 = vsel %vm1035_vm1, %v3634_v47, %v3636_v15  ;;  %v3657_v12 = vrot.slane %v3650_v14, 2  ;;  %s9723_s10 = sld [smem:[#allocation3 + $0xfb]] }
 0x250   : > { %13681 = vst [vmem:[#allocation72_spill] sm:$0xff] %v9518_v35  ;;  %v9528_v34 = vpop.permute.xlu0 %2820  ;;  %v3655_v35 = vrot.slane %v3649_v41, 2  ;;  %v3670_v60 = vmul.f32 %v9255_v4, %v3668_v27  ;;  %v3671_v48 = vmul.f32 %v8942_v43, %v3668_v27  ;;  %v3689_v62 = vstv %s9476_s11  ;;  %s9740_s11 = sld [smem:[#allocation3 + $0x11d]] }
 0x251   : > { %13683 = vst [vmem:[#allocation74_spill] sm:$0xff] %v9528_v34  ;;  %3619 = vrot.lane.b32.xlu1 %v3616_v0, %s7181_s16  ;;  %v1351_v16 = vadd.f32 %v13684_v42, %v9201_v7  ;;  %v9540_v57 = vadd.f32 %v8876_v18, %v1352_v8  ;;  %v2257_v6 = vrot.slane %v2251_v19, 2  ;;  %v2259_v34 = vrot.slane %v2252_v3, 2 }
 0x252   : > { %3617 = vrot.lane.b32.xlu0 %v3614_v39, %s7181_s16  ;;  %v2268_v41 = vmul.f32 %v9023_v33, %v2266_v50  ;;  %v3635_v0 = vsel %vm1035_vm1, %v3633_v13, %v3634_v47  ;;  %v3654_v14 = vrot.slane %v3648_v53, 2  ;;  %v3669_v26 = vmul.f32 %v9280_v49, %v3668_v27  ;;  %v13687_v47 = vld [vmem:[#allocation80_spill] sm:$0xff]  ;;  %v13688_v13 = vld [vmem:[#allocation81_spill] sm:$0xff] }
 0x253   : > { %v9543_v15 = vpop.permute.xlu1 %2836  ;;  %v2256_v7 = vrot.slane %v2250_v29, 2  ;;  %v2269_v18 = vmul.f32 %v9189_v24, %v2266_v50  ;;  %v3691_v19 = vmul.f32 %v9255_v4, %v3689_v62  ;;  %v3692_v3 = vmul.f32 %v8942_v43, %v3689_v62 }
 0x254   : > { %13685 = vst [vmem:[#allocation75_spill] sm:$0xff] %v9543_v15  ;;  %v9551_v8 = vpop.permute.xlu0 %2834  ;;  %v3658_v39 = vsel %vm1035_vm1, %v3655_v35, %v3657_v12  ;;  %v3676_v42 = vrot.slane %v3670_v60, 2  ;;  %v3678_v15 = vrot.slane %v3671_v48, 2  ;;  %v3710_v52 = vstv %s9511_s12  ;;  %s9762_s12 = sld [smem:[#allocation3 + $0x128]] }
 0x255   : > { %13686 = vst [vmem:[#allocation76_spill] sm:$0xff] %v9551_v8  ;;  %3640 = vrot.lane.b32.xlu1 %v3637_v44, %s7181_s16  ;;  %v1373_v27 = vadd.f32 %v13687_v47, %v9232_v63  ;;  %v1372_v53 = vadd.f32 %v13688_v13, %v9236_v59  ;;  %v9565_v29 = vadd.f32 %v8886_v2, %v1351_v16  ;;  %v2274_v12 = vrot.slane %v2268_v41, 2 }
 0x256   : > { %v2267_v44 = vmul.f32 %v8993_v54, %v2266_v50  ;;  %3638 = vrot.lane.b32.xlu0 %v3635_v0, %s7181_s16  ;;  %v3656_v60 = vsel %vm1035_vm1, %v3654_v14, %v3655_v35  ;;  %v3675_v48 = vrot.slane %v3669_v26, 2  ;;  %v3690_v45 = vmul.f32 %v9280_v49, %v3689_v62 }
 0x257   : > { %v9569_v8 = vpop.permute.xlu1 %2850  ;;  %v2276_v63 = vrot.slane %v2269_v18, 2  ;;  %v3697_v2 = vrot.slane %v3691_v19, 2  ;;  %v3699_v50 = vrot.slane %v3692_v3, 2  ;;  %v3712_v16 = vmul.f32 %v9255_v4, %v3710_v52 }
 0x258   : > { %13689 = vst [vmem:[#allocation77_spill] sm:$0xff] %v9569_v8  ;;  %v9575_v59 = vpop.permute.xlu0 %2848  ;;  %v9580_v41 = vsel %vm1035_vm1, %v2257_v6, %v2259_v34  ;;  %v9583_v35 = vsel %vm1035_vm1, %v2256_v7, %v2257_v6  ;;  %v3679_v26 = vsel %vm1035_vm1, %v3676_v42, %v3678_v15  ;;  %v3713_v62 = vmul.f32 %v8942_v43, %v3710_v52  ;;  %v13692_v6 = vld [vmem:[#allocation82_spill] sm:$0xff] }
 0x259   : > { %13690 = vst [vmem:[#allocation78_spill] sm:$0xff] %v9575_v59  ;;  %3661 = vrot.lane.b32.xlu1 %v3658_v39, %s7181_s16  ;;  %v9590_v0 = vadd.f32 %v8902_v28, %v1373_v27  ;;  %v2273_v14 = vrot.slane %v2267_v44, 2  ;;  %v2283_v18 = vstv %s9532_s13  ;;  %v3731_v34 = vstv %s9545_s15  ;;  %s9766_s13 = sld [smem:[#allocation3 + $0x14a]] }
 0x25a   : > { %3659 = vrot.lane.b32.xlu0 %v3656_v60, %s7181_s16  ;;  %v1394_v7 = vadd.f32 %v13692_v6, %v9247_v17  ;;  %v3677_v15 = vsel %vm1035_vm1, %v3675_v48, %v3676_v42  ;;  %v3696_v3 = vrot.slane %v3690_v45, 2  ;;  %v3711_v39 = vmul.f32 %v9280_v49, %v3710_v52  ;;  %s9796_s15 = sld [smem:[#allocation3 + $0x155]] }
 0x25b   : > { %v9594_v19 = vpop.permute.xlu1 %2864  ;;  %v9602_v47 = vadd.f32 %v8905_v32, %v1372_v53  ;;  %v9605_v28 = vsel %vm1035_vm1, %v2274_v12, %v2276_v63  ;;  %v3700_v13 = vsel %vm1035_vm1, %v3697_v2, %v3699_v50  ;;  %v3718_v44 = vrot.slane %v3712_v16, 2  ;;  %v13694_v32 = vld [vmem:[#allocation83_spill] sm:$0xff] }
 0x25c   : > { %13691 = vst [vmem:[#allocation79_spill] sm:$0xff] %v9594_v19  ;;  %v9607_v27 = vpop.permute.xlu0 %2862  ;;  %v3720_v60 = vrot.slane %v3713_v62, 2  ;;  %v3733_v17 = vmul.f32 %v9255_v4, %v3731_v34  ;;  %v3734_v45 = vmul.f32 %v8942_v43, %v3731_v34  ;;  %v3752_v52 = vstv %s9558_s17  ;;  %s9852_s17 = sld [smem:[#allocation3 + $0x1c]] }
 0x25d   : > { %13693 = vst [vmem:[#allocation80_spill] sm:$0xff] %v9607_v27  ;;  %3682 = vrot.lane.b32.xlu1 %v3679_v26, %s7181_s16  ;;  %v1393_v42 = vadd.f32 %v13694_v32, %v9285_v37  ;;  %v9617_v53 = vsel %vm1035_vm1, %v2273_v14, %v2274_v12  ;;  %v2285_v48 = vmul.f32 %v9023_v33, %v2283_v18  ;;  %v3717_v62 = vrot.slane %v3711_v39, 2  ;;  %v13696_v12 = vld [vmem:[#allocation84_spill] sm:$0xff] }
 0x25e   : > { %v2286_v63 = vmul.f32 %v9189_v24, %v2283_v18  ;;  %3680 = vrot.lane.b32.xlu0 %v3677_v15, %s7181_s16  ;;  %v2284_v16 = vmul.f32 %v8993_v54, %v2283_v18  ;;  %v3698_v26 = vsel %vm1035_vm1, %v3696_v3, %v3697_v2  ;;  %v3732_v37 = vmul.f32 %v9280_v49, %v3731_v34 }
 0x25f   : > { %v9622_v50 = vpop.permute.xlu1 %2878  ;;  %v1415_v14 = vadd.f32 %v13696_v12, %v9318_v30  ;;  %v2300_v6 = vstv %s9573_s18  ;;  %v3754_v15 = vmul.f32 %v9255_v4, %v3752_v52  ;;  %v3721_v18 = vsel %vm1035_vm1, %v3718_v44, %v3720_v60  ;;  %s9864_s18 = sld [smem:[#allocation3 + $0x12]] }
 0x260   : > { %13695 = vst [vmem:[#allocation81_spill] sm:$0xff] %v9622_v50  ;;  %v9634_v32 = vpop.permute.xlu0 %2876  ;;  %v3755_v50 = vmul.f32 %v8942_v43, %v3752_v52  ;;  %v3739_v2 = vrot.slane %v3733_v17, 2  ;;  %v3741_v3 = vrot.slane %v3734_v45, 2  ;;  %v3773_v39 = vstv %s9587_s19  ;;  %s9885_s19 = sld [smem:[#allocation3 + $0x49]] }
 0x261   : > { %13697 = vst [vmem:[#allocation82_spill] sm:$0xff] %v9634_v32  ;;  %3703 = vrot.lane.b32.xlu1 %v3700_v13, %s7181_s16  ;;  %v9644_v30 = vadd.f32 %v8908_v20, %v1394_v7  ;;  %v9647_v34 = vadd.f32 %v8911_v58, %v1393_v42  ;;  %v2291_v12 = vrot.slane %v2285_v48, 2  ;;  %v2293_v32 = vrot.slane %v2286_v63, 2  ;;  %v13700_v48 = vld [vmem:[#allocation85_spill] sm:$0xff] }
 0x262   : > { %3701 = vrot.lane.b32.xlu0 %v3698_v26, %s7181_s16  ;;  %v2290_v43 = vrot.slane %v2284_v16, 2  ;;  %v3719_v60 = vsel %vm1035_vm1, %v3717_v62, %v3718_v44  ;;  %v3738_v17 = vrot.slane %v3732_v37, 2  ;;  %v3753_v45 = vmul.f32 %v9280_v49, %v3752_v52  ;;  %v9666_v52 = vld [vmem:[%s7328_s14 + $0x40] sm:$0x3] }
 0x263   : > { %v9650_v13 = vpop.permute.xlu1 %2892  ;;  %v2302_v27 = vmul.f32 %v9023_v33, %v2300_v6  ;;  %v3760_v58 = vrot.slane %v3754_v15, 2  ;;  %v3762_v7 = vrot.slane %v3755_v50, 2  ;;  %v3775_v42 = vmul.f32 %v9255_v4, %v3773_v39 }
 0x264   : > { %13698 = vst [vmem:[#allocation83_spill] sm:$0xff] %v9650_v13  ;;  %v9655_v20 = vpop.permute.xlu0 %2890  ;;  %v1414_v63 = vadd.f32 %v13700_v48, %v9322_v38  ;;  %v9662_v16 = vadd.f32 %v8924_v36, %v1415_v14  ;;  %v3742_v44 = vsel %vm1035_vm1, %v3739_v2, %v3741_v3  ;;  %v3776_v33 = vmul.f32 %v9666_v52, %v3773_v39  ;;  %v13715_v13 = vld [vmem:[#allocation25_spill] sm:$0xff] }
 0x265   : > { %13699 = vst [vmem:[#allocation84_spill] sm:$0xff] %v9655_v20  ;;  %3724 = vrot.lane.b32.xlu1 %v3721_v18, %s7181_s16  ;;  %v9672_v26 = vsel %vm1035_vm1, %v2291_v12, %v2293_v32  ;;  %v2303_v50 = vmul.f32 %v9189_v24, %v2300_v6  ;;  %v2301_v62 = vmul.f32 %v8993_v54, %v2300_v6  ;;  %v3794_v38 = vstv %s9624_s24  ;;  %v13703_v18 = vld [vmem:[#allocation86_spill] sm:$0xff]  ;;  %s9895_s24 = sld [smem:[#allocation3 + $0x3f]] }
 0x266   : > { %3722 = vrot.lane.b32.xlu0 %v3719_v60, %s7181_s16  ;;  %v9681_v37 = vsel %vm1035_vm1, %v2290_v43, %v2291_v12  ;;  %v3740_v14 = vsel %vm1035_vm1, %v3738_v17, %v3739_v2  ;;  %v3759_v15 = vrot.slane %v3753_v45, 2  ;;  %v3774_v32 = vmul.f32 %v9280_v49, %v3773_v39  ;;  %v13705_v45 = vld [vmem:[#allocation22_spill] sm:$0xff] }
 0x267   : > { %v9677_v36 = vpop.permute.xlu1 %2906  ;;  %13702 = vst [vmem:[#allocation153_spill] sm:$0xff] %v9681_v37  ;;  %v1436_v3 = vadd.f32 %v13703_v18, %v9342_v22  ;;  %v2317_v54 = vstv %s9632_s26  ;;  %v3763_v60 = vsel %vm1035_vm1, %v3760_v58, %v3762_v7  ;;  %v3781_v12 = vrot.slane %v3775_v42, 2  ;;  %v9706_v7 = vld [vmem:[%s7328_s14 + $0x20] sm:$0xff]  ;;  %s9914_s26 = sld [smem:[#allocation3 + $0x6c]] }
 0x268   : > { %13701 = vst [vmem:[#allocation85_spill] sm:$0xff] %v9677_v36  ;;  %v9690_v6 = vpop.permute.xlu0 %2904  ;;  %v3783_v43 = vrot.slane %v3776_v33, 2  ;;  %v3796_v48 = vmul.f32 %v9255_v4, %v3794_v38  ;;  %v3797_v2 = vmul.f32 %v9666_v52, %v3794_v38  ;;  %v3815_v17 = vstv %s9641_s27  ;;  %s9927_s27 = sld [smem:[#allocation3 + $0x76]] }
 0x269   : > { %13704 = vst [vmem:[#allocation86_spill] sm:$0xff] %v9690_v6  ;;  %3745 = vrot.lane.b32.xlu1 %v3742_v44, %s7181_s16  ;;  %v9698_v39 = vadd.f32 %v13705_v45, %v1414_v63  ;;  %v2308_v36 = vrot.slane %v2302_v27, 2  ;;  %v2310_v22 = vrot.slane %v2303_v50, 2  ;;  %v2307_v18 = vrot.slane %v2301_v62, 2  ;;  %v13707_v27 = vld [vmem:[#allocation87_spill] sm:$0xff]  ;;  %v13708_v62 = vld [vmem:[#allocation24_spill] sm:$0xff] }
 0x26a   : > { %3743 = vrot.lane.b32.xlu0 %v3740_v14, %s7181_s16  ;;  %v2319_v42 = vmul.f32 %v9706_v7, %v2317_v54  ;;  %v3761_v44 = vsel %vm1035_vm1, %v3759_v15, %v3760_v58  ;;  %v3780_v33 = vrot.slane %v3774_v32, 2  ;;  %v3795_v63 = vmul.f32 %v9280_v49, %v3794_v38 }
 0x26b   : > { %v9701_v6 = vpop.permute.xlu1 %2920  ;;  %v1435_v50 = vadd.f32 %v13707_v27, %v9353_v31  ;;  %v9714_v14 = vadd.f32 %v13708_v62, %v1436_v3  ;;  %v3818_v19 = vmul.f32 %v9666_v52, %v3815_v17  ;;  %v3784_v58 = vsel %vm1035_vm1, %v3781_v12, %v3783_v43 }
 0x26c   : > { %13706 = vst [vmem:[#allocation22_spill] sm:$0xff] %v9701_v6  ;;  %v9716_v45 = vpop.permute.xlu0 %2918  ;;  %v3817_v6 = vmul.f32 %v9255_v4, %v3815_v17  ;;  %v3802_v15 = vrot.slane %v3796_v48, 2  ;;  %v3804_v32 = vrot.slane %v3797_v2, 2  ;;  %v3836_v38 = vstv %s9669_s7  ;;  %s9938_s7 = sld [smem:[#allocation3 + $0x99]] }
 0x26d   : > { %13709 = vst [vmem:[#allocation87_spill] sm:$0xff] %v9716_v45  ;;  %3766 = vrot.lane.b32.xlu1 %v3763_v60, %s7181_s16  ;;  %v9726_v31 = vsel %vm1035_vm1, %v2308_v36, %v2310_v22  ;;  %v9729_v3 = vsel %vm1035_vm1, %v2307_v18, %v2308_v36  ;;  %v2320_v27 = vmul.f32 %v9189_v24, %v2317_v54  ;;  %v9733_v60 = vld [vmem:[%s7328_s14 + $0x18] sm:$0xff]  ;;  %v2334_v48 = vstv %s9683_s8  ;;  %s9961_s8 = sld [smem:[#allocation3 + $0xc6]] }
 0x26e   : > { %13710 = vst [vmem:[#allocation24_spill] sm:$0xff] %v9726_v31  ;;  %13711 = vst [vmem:[#allocation154_spill] sm:$0xff] %v9729_v3  ;;  %v2318_v62 = vmul.f32 %v9733_v60, %v2317_v54  ;;  %3764 = vrot.lane.b32.xlu0 %v3761_v44, %s7181_s16  ;;  %v3782_v2 = vsel %vm1035_vm1, %v3780_v33, %v3781_v12  ;;  %v3801_v22 = vrot.slane %v3795_v63, 2  ;;  %v13713_v36 = vld [vmem:[#allocation88_spill] sm:$0xff]  ;;  %v3823_v54 = vrot.slane %v3817_v6, 2 }
 0x26f   : > { %v9737_v43 = vpop.permute.xlu1 %2934  ;;  %v3816_v45 = vmul.f32 %v9280_v49, %v3815_v17  ;;  %v1457_v18 = vadd.f32 %v13713_v36, %v9389_v40  ;;  %v3825_v44 = vrot.slane %v3818_v19, 2  ;;  %v9751_v59 = vadd.f32 %v13715_v13, %v1435_v50  ;;  %v13717_v13 = vld [vmem:[#allocation89_spill] sm:$0xff] }
 0x270   : > { %13712 = vst [vmem:[#allocation155_spill] sm:$0xff] %v9737_v43  ;;  %v9746_v20 = vpop.permute.xlu0 %2932  ;;  %v3838_v43 = vmul.f32 %v9255_v4, %v3836_v38  ;;  %v2325_v8 = vrot.slane %v2319_v42, 2  ;;  %v3805_v12 = vsel %vm1035_vm1, %v3802_v15, %v3804_v32  ;;  %v3839_v17 = vmul.f32 %v9666_v52, %v3836_v38 }
 0x271   : > { %13714 = vst [vmem:[#allocation88_spill] sm:$0xff] %v9746_v20  ;;  %3787 = vrot.lane.b32.xlu1 %v3784_v58, %s7182_s9  ;;  %v2327_v33 = vrot.slane %v2320_v27, 2  ;;  %v2324_v63 = vrot.slane %v2318_v62, 2  ;;  %v9756_v40 = vmul.f32 %v9706_v7, %v2334_v48  ;;  %v3857_v19 = vstv %s9703_s6  ;;  %v13718_v27 = vld [vmem:[#allocation27_spill] sm:$0xff]  ;;  %s9975_s6 = sld [smem:[#allocation3 + $0xa3]] }
 0x272   : > { %3785 = vrot.lane.b32.xlu0 %v3782_v2, %s7182_s9  ;;  %v1456_v6 = vadd.f32 %v13717_v13, %v9395_v23  ;;  %v3803_v42 = vsel %vm1035_vm1, %v3801_v22, %v3802_v15  ;;  %v3822_v50 = vrot.slane %v3816_v45, 2  ;;  %v3837_v32 = vmul.f32 %v9280_v49, %v3836_v38 }
 0x273   : > { %v9759_v58 = vpop.permute.xlu1 %2948  ;;  %v9771_v62 = vadd.f32 %v13718_v27, %v1457_v18  ;;  %v9774_v2 = vmul.f32 %v9189_v24, %v2334_v48  ;;  %v3826_v23 = vsel %vm1035_vm1, %v3823_v54, %v3825_v44  ;;  %v3844_v13 = vrot.slane %v3838_v43, 2  ;;  %v13724_v27 = vld [vmem:[#allocation28_spill] sm:$0xff] }
 0x274   : > { %13716 = vst [vmem:[#allocation25_spill] sm:$0xff] %v9759_v58  ;;  %v9776_v36 = vpop.permute.xlu0 %2946  ;;  %v3846_v58 = vrot.slane %v3839_v17, 2  ;;  %v3859_v15 = vmul.f32 %v9255_v4, %v3857_v19  ;;  %v3860_v45 = vmul.f32 %v9666_v52, %v3857_v19  ;;  %v3878_v38 = vstv %s9723_s10  ;;  %s10002_s10 = sld [smem:[#allocation3 + $0xf3]] }
 0x275   : > { %13719 = vst [vmem:[#allocation89_spill] sm:$0xff] %v9776_v36  ;;  %3808 = vrot.lane.b32.xlu1 %v3805_v12, %s7182_s9  ;;  %v9784_v22 = vsel %vm1035_vm1, %v2325_v8, %v2327_v33  ;;  %v9787_v18 = vsel %vm1035_vm1, %v2324_v63, %v2325_v8  ;;  %v9791_v36 = vmul.f32 %v9733_v60, %v2334_v48  ;;  %v2351_v44 = vstv %s9740_s11  ;;  %v13723_v8 = vld [vmem:[#allocation90_spill] sm:$0xff]  ;;  %s10007_s11 = sld [smem:[#allocation3 + $0x120]] }
 0x276   : > { %13720 = vst [vmem:[#allocation27_spill] sm:$0xff] %v9784_v22  ;;  %13721 = vst [vmem:[#allocation156_spill] sm:$0xff] %v9787_v18  ;;  %3806 = vrot.lane.b32.xlu0 %v3803_v42, %s7182_s9  ;;  %v3824_v12 = vsel %vm1035_vm1, %v3822_v50, %v3823_v54  ;;  %v3843_v17 = vrot.slane %v3837_v32, 2  ;;  %v3858_v33 = vmul.f32 %v9280_v49, %v3857_v19  ;;  %v2344_v54 = vrot.slane %v9774_v2, 2 }
 0x277   : > { %v9794_v43 = vpop.permute.xlu1 %2962  ;;  %v1478_v63 = vadd.f32 %v13723_v8, %v9426_v5  ;;  %v9804_v48 = vadd.f32 %v13724_v27, %v1456_v6  ;;  %v3880_v42 = vmul.f32 %v9255_v4, %v3878_v38  ;;  %v3847_v19 = vsel %vm1035_vm1, %v3844_v13, %v3846_v58  ;;  %v13726_v5 = vld [vmem:[#allocation91_spill] sm:$0xff] }
 0x278   : > { %13722 = vst [vmem:[#allocation157_spill] sm:$0xff] %v9794_v43  ;;  %v9806_v20 = vpop.permute.xlu0 %2960  ;;  %v3881_v43 = vmul.f32 %v9666_v52, %v3878_v38  ;;  %v3865_v50 = vrot.slane %v3859_v15, 2  ;;  %v3867_v32 = vrot.slane %v3860_v45, 2  ;;  %v1477_v8 = vadd.f32 %v13726_v5, %v9480_v11  ;;  %v13729_v5 = vld [vmem:[#allocation141_spill] sm:$0xff] }
 0x279   : > { %13725 = vst [vmem:[#allocation90_spill] sm:$0xff] %v9806_v20  ;;  %3829 = vrot.lane.b32.xlu1 %v3826_v23, %s7182_s9  ;;  %v2341_v6 = vrot.slane %v9791_v36, 2  ;;  %v2353_v27 = vmul.f32 %v9706_v7, %v2351_v44  ;;  %v3899_v20 = vstv %s9762_s12  ;;  %v2368_v18 = vstv %s9766_s13  ;;  %s10023_s12 = sld [smem:[#allocation3 + $0xd0]] }
 0x27a   : > { %3827 = vrot.lane.b32.xlu0 %v3824_v12, %s7182_s9  ;;  %v3845_v22 = vsel %vm1035_vm1, %v3843_v17, %v3844_v13  ;;  %v3864_v2 = vrot.slane %v3858_v33, 2  ;;  %v3879_v58 = vmul.f32 %v9280_v49, %v3878_v38  ;;  %v2354_v15 = vmul.f32 %v9189_v24, %v2351_v44  ;;  %s10028_s13 = sld [smem:[#allocation3 + $0x14d]] }
 0x27b   : > { %v9818_v23 = vpop.permute.xlu1 %2976  ;;  %v2352_v11 = vmul.f32 %v9733_v60, %v2351_v44  ;;  %v3886_v36 = vrot.slane %v3880_v42, 2  ;;  %v3888_v12 = vrot.slane %v3881_v43, 2  ;;  %v3868_v3 = vsel %vm1035_vm1, %v3865_v50, %v3867_v32 }
 0x27c   : > { %13727 = vst [vmem:[#allocation28_spill] sm:$0xff] %v9818_v23  ;;  %v9826_v45 = vpop.permute.xlu0 %2974  ;;  %v9830_v23 = vadd.f32 %v13729_v5, %v1478_v63  ;;  %v3901_v13 = vmul.f32 %v9255_v4, %v3899_v20  ;;  %v3902_v38 = vmul.f32 %v9666_v52, %v3899_v20  ;;  %v2359_v17 = vrot.slane %v2353_v27, 2  ;;  %v13731_v5 = vld [vmem:[#allocation92_spill] sm:$0xff] }
 0x27d   : > { %13728 = vst [vmem:[#allocation91_spill] sm:$0xff] %v9826_v45  ;;  %3850 = vrot.lane.b32.xlu1 %v3847_v19, %s7182_s9  ;;  %v2370_v33 = vmul.f32 %v9706_v7, %v2368_v18  ;;  %v2371_v44 = vmul.f32 %v9189_v24, %v2368_v18  ;;  %v3920_v42 = vstv %s9796_s15  ;;  %v2369_v43 = vmul.f32 %v9733_v60, %v2368_v18  ;;  %s10064_s15 = sld [smem:[#allocation3 + $0xfd]] }
 0x27e   : > { %3848 = vrot.lane.b32.xlu0 %v3845_v22, %s7182_s9  ;;  %v3866_v63 = vsel %vm1035_vm1, %v3864_v2, %v3865_v50  ;;  %v3885_v19 = vrot.slane %v3879_v58, 2  ;;  %v3900_v32 = vmul.f32 %v9280_v49, %v3899_v20  ;;  %v1499_v31 = vadd.f32 %v13731_v5, %v9484_v51  ;;  %v13733_v20 = vld [vmem:[#allocation93_spill] sm:$0xff] }
 0x27f   : > { %v9838_v45 = vpop.permute.xlu1 %2990  ;;  %v2361_v27 = vrot.slane %v2354_v15, 2  ;;  %v2358_v37 = vrot.slane %v2352_v11, 2  ;;  %v3889_v24 = vsel %vm1035_vm1, %v3886_v36, %v3888_v12  ;;  %v3907_v22 = vrot.slane %v3901_v13, 2  ;;  %v13737_v5 = vld [vmem:[#allocation33_spill] sm:$0xff] }
 0x280   : > { %13730 = vst [vmem:[#allocation141_spill] sm:$0xff] %v9838_v45  ;;  %v9846_v7 = vpop.permute.xlu0 %2988  ;;  %v3909_v45 = vrot.slane %v3902_v38, 2  ;;  %v3922_v60 = vmul.f32 %v9255_v4, %v3920_v42  ;;  %v3923_v18 = vmul.f32 %v9666_v52, %v3920_v42  ;;  %v1498_v50 = vadd.f32 %v13733_v20, %v9497_v9  ;;  %v13736_v9 = vld [vmem:[#allocation30_spill] sm:$0xff] }
 0x281   : > { %13732 = vst [vmem:[#allocation92_spill] sm:$0xff] %v9846_v7  ;;  %3871 = vrot.lane.b32.xlu1 %v3868_v3, %s7182_s9  ;;  %v13734_v51 = vrot.slane %v9756_v40, 2  ;;  %v2376_v58 = vrot.slane %v2370_v33, 2  ;;  %v2378_v3 = vrot.slane %v2371_v44, 2  ;;  %v2375_v11 = vrot.slane %v2369_v43, 2  ;;  %v13807_v7 = vld [vmem:[#allocation142_spill] sm:$0xff] }
 0x282   : > { %3869 = vrot.lane.b32.xlu0 %v3866_v63, %s7182_s9  ;;  %v3887_v4 = vsel %vm1035_vm1, %v3885_v19, %v3886_v36  ;;  %v3906_v12 = vrot.slane %v3900_v32, 2  ;;  %v3921_v13 = vmul.f32 %v9280_v49, %v3920_v42  ;;  %v1544_v38 = vadd.f32 %v13736_v9, %v1477_v8  ;;  %v13742_v19 = vld [vmem:[#allocation34_spill] sm:$0xff]  ;;  %v13748_v9 = vld [vmem:[#allocation100_spill] sm:$0xff] }
 0x283   : > { %v9859_v2 = vsel %vm1035_vm1, %v13734_v51, %v2344_v54  ;;  %v9862_v15 = vpop.permute.xlu1 %3147  ;;  %v1551_v20 = vadd.f32 %v13737_v5, %v1499_v31  ;;  %v13738_v54 = vmov %v13734_v51  ;;  %v9876_v44 = vsel %vm1035_vm1, %v2359_v17, %v2361_v27  ;;  %v13740_v31 = vld [vmem:[#allocation94_spill] sm:$0xff] }
 0x284   : > { %13735 = vst [vmem:[#allocation93_spill] sm:$0xff] %v9862_v15  ;;  %v9873_v33 = vsel %vm1035_vm1, %v2341_v6, %v13738_v54  ;;  %v9878_v43 = vpop.permute.xlu0 %3145  ;;  %v9882_v36 = vsel %vm1035_vm1, %v2358_v37, %v2359_v17  ;;  %v3910_v49 = vsel %vm1035_vm1, %v3907_v22, %v3909_v45  ;;  %v3928_v8 = vrot.slane %v3922_v60, 2  ;;  %v13741_v6 = vld [vmem:[#allocation95_spill] sm:$0xff]  ;;  %v13744_v45 = vld [vmem:[#allocation96_spill] sm:$0xff]  ;;  %v13745_v60 = vld [vmem:[#allocation97_spill] sm:$0xff] }
 0x285   : > { %13739 = vst [vmem:[#allocation30_spill] sm:$0xff] %v9878_v43  ;;  %3892 = vrot.lane.b32.xlu1 %v3889_v24, %s7182_s9  ;;  %v3930_v42 = vrot.slane %v3923_v18, 2  ;;  %v1565_v40 = vadd.f32 %v13740_v31, %v9540_v57  ;;  %v1564_v63 = vadd.f32 %v13741_v6, %v9565_v29  ;;  %v1550_v32 = vadd.f32 %v13742_v19, %v1498_v50  ;;  %v13746_v50 = vld [vmem:[#allocation98_spill] sm:$0xff]  ;;  %v13753_v54 = vld [vmem:[#allocation103_spill] sm:$0xff]  ;;  %v13754_v31 = vld [vmem:[#allocation104_spill] sm:$0xff] }
 0x286   : > { %v9893_v27 = vsel %vm1035_vm1, %v2376_v58, %v2378_v3  ;;  %3890 = vrot.lane.b32.xlu0 %v3887_v4, %s7182_s9  ;;  %v1579_v17 = vadd.f32 %v13744_v45, %v9590_v0  ;;  %v9903_v57 = vsel %vm1035_vm1, %v2375_v11, %v2376_v58  ;;  %v3908_v29 = vsel %vm1035_vm1, %v3906_v12, %v3907_v22  ;;  %v13747_v3 = vld [vmem:[#allocation99_spill] sm:$0xff]  ;;  %v13750_v22 = vld [vmem:[#allocation101_spill] sm:$0xff] }
 0x287   : > { %v9898_v37 = vpop.permute.xlu1 %3168  ;;  %v3927_v24 = vrot.slane %v3921_v13, 2  ;;  %v1578_v18 = vadd.f32 %v13745_v60, %v9602_v47  ;;  %v1593_v51 = vadd.f32 %v13746_v50, %v9644_v30  ;;  %v1592_v4 = vadd.f32 %v13747_v3, %v9647_v34  ;;  %v13751_v47 = vld [vmem:[#allocation110_spill] sm:$0xff]  ;;  %v9924_v12 = vld [vmem:[%s7328_s14 + $0x50] sm:$0xff]  ;;  %v13757_v19 = vld [vmem:[#allocation105_spill] sm:$0xff] }
 0x288   : > { %13743 = vst [vmem:[#allocation33_spill] sm:$0xff] %v9898_v37  ;;  %v1607_v5 = vadd.f32 %v13748_v9, %v9662_v16  ;;  %v9916_v0 = vpop.permute.xlu0 %3166  ;;  %v1606_v58 = vadd.f32 %v13750_v22, %v9698_v39  ;;  %v1677_v11 = vadd.f32 %v13751_v47, %v1565_v40  ;;  %v3931_v30 = vsel %vm1035_vm1, %v3928_v8, %v3930_v42  ;;  %v13752_v16 = vld [vmem:[#allocation102_spill] sm:$0xff]  ;;  %v13755_v39 = vld [vmem:[#allocation111_spill] sm:$0xff]  ;;  %v13761_v22 = vld [vmem:[#allocation108_spill] sm:$0xff] }
 0x289   : > { %13749 = vst [vmem:[#allocation94_spill] sm:$0xff] %v9916_v0  ;;  %3913 = vrot.lane.b32.xlu1 %v3910_v49, %s7182_s9  ;;  %v3993_v34 = vstv %s9852_s17  ;;  %v1621_v13 = vadd.f32 %v13752_v16, %v9714_v14  ;;  %v1620_v49 = vadd.f32 %v13753_v54, %v9751_v59  ;;  %v9935_v6 = vadd.f32 %v13754_v31, %v9771_v62  ;;  %v13758_v14 = vld [vmem:[#allocation112_spill] sm:$0xff]  ;;  %v9949_v62 = vld [vmem:[%s7328_s14 + $0x48] sm:$0xff]  ;;  %s10071_s17 = sld [smem:[#allocation3 + $0x15]]  ;;  %v13795_v43 = vld [vmem:[#allocation73_spill] sm:$0xff] }
 0x28a   : > { %v1676_v40 = vadd.f32 %v13755_v39, %v1564_v63  ;;  %3911 = vrot.lane.b32.xlu0 %v3908_v29, %s7182_s9  ;;  %v1634_v45 = vadd.f32 %v13757_v19, %v9804_v48  ;;  %v1691_v60 = vadd.f32 %v13758_v14, %v1579_v17  ;;  %v2725_v50 = vstv %s9864_s18  ;;  %v13759_v63 = vld [vmem:[#allocation106_spill] sm:$0xff]  ;;  %v13760_v29 = vld [vmem:[#allocation107_spill] sm:$0xff]  ;;  %v13763_v17 = vld [vmem:[#allocation109_spill] sm:$0xff]  ;;  %s10090_s18 = sld [smem:[#allocation3 + $0x42]] }
 0x28b   : > { %v9941_v42 = vpop.permute.xlu1 %3189  ;;  %v3929_v59 = vsel %vm1035_vm1, %v3927_v24, %v3928_v8  ;;  %v9953_v3 = vadd.f32 %v13759_v63, %v9830_v23  ;;  %v9956_v9 = vadd.f32 %v13760_v29, %v1544_v38  ;;  %v9959_v47 = vadd.f32 %v13761_v22, %v1551_v20  ;;  %v13764_v23 = vld [vmem:[#allocation113_spill] sm:$0xff]  ;;  %v9981_v31 = vld [vmem:[%s7328_s14 + $0x38] sm:$0xff]  ;;  %v13769_v22 = vld [vmem:[#allocation119_spill] sm:$0xff] }
 0x28c   : > { %13756 = vst [vmem:[#allocation95_spill] sm:$0xff] %v9941_v42  ;;  %v9963_v48 = vpop.permute.xlu0 %3187  ;;  %v3995_v8 = vmul.f32 %v9924_v12, %v3993_v34  ;;  %v9968_v24 = vadd.f32 %v13763_v17, %v1550_v32  ;;  %v1690_v16 = vadd.f32 %v13764_v23, %v1578_v18  ;;  %v9972_v38 = vadd.f32 %v9207_v10, %v1677_v11  ;;  %v13766_v18 = vld [vmem:[#allocation114_spill] sm:$0xff]  ;;  %v13767_v19 = vld [vmem:[#allocation116_spill] sm:$0xff] }
 0x28d   : > { %13762 = vst [vmem:[#allocation34_spill] sm:$0xff] %v9963_v48  ;;  %3934 = vrot.lane.b32.xlu1 %v3931_v30, %s7182_s9  ;;  %v4007_v54 = vstv %s9885_s19  ;;  %v9978_v20 = vadd.f32 %v9216_v56, %v1676_v40  ;;  %v9984_v30 = vmul.f32 %v9981_v31, %v2725_v50  ;;  %v2731_v39 = vstv %s9895_s24  ;;  %v9997_v40 = vld [vmem:[%s7328_s14 + $0x30] sm:$0xff]  ;;  %s10102_s19 = sld [smem:[#allocation3 + $0x12a]] }
 0x28e   : > { %3932 = vrot.lane.b32.xlu0 %v3929_v59, %s7182_s9  ;;  %v3994_v10 = vmul.f32 %v9949_v62, %v3993_v34  ;;  %v1705_v11 = vadd.f32 %v13766_v18, %v1593_v51  ;;  %v1704_v14 = vadd.f32 %v13767_v19, %v1592_v4  ;;  %v9994_v56 = vadd.f32 %v9259_v21, %v1691_v60  ;;  %v13768_v59 = vld [vmem:[#allocation118_spill] sm:$0xff]  ;;  %v13772_v18 = vld [vmem:[#allocation121_spill] sm:$0xff]  ;;  %s10140_s24 = sld [smem:[#allocation3 + $0x157]] }
 0x28f   : > { %v9988_v32 = vpop.permute.xlu1 %3210  ;;  %v10000_v63 = vmul.f32 %v9997_v40, %v2725_v50  ;;  %v1719_v29 = vadd.f32 %v13768_v59, %v1607_v5  ;;  %v1718_v34 = vadd.f32 %v13769_v22, %v1606_v58  ;;  %v2737_v17 = vstv %s9914_s26  ;;  %v13771_v58 = vld [vmem:[#allocation120_spill] sm:$0xff]  ;;  %v13774_v22 = vld [vmem:[#allocation54_spill] sm:$0xff]  ;;  %s10164_s26 = sld [smem:[#allocation3 + $0x6f]] }
 0x290   : > { %13765 = vst [vmem:[#allocation96_spill] sm:$0xff] %v9988_v32  ;;  %v10009_v51 = vpop.permute.xlu0 %3208  ;;  %v4009_v21 = vmul.f32 %v9924_v12, %v4007_v54  ;;  %v10014_v4 = vadd.f32 %v9276_v55, %v1690_v16  ;;  %v10017_v60 = vmul.f32 %v9981_v31, %v2731_v39  ;;  %v10020_v50 = vmul.f32 %v9997_v40, %v2731_v39  ;;  %v13783_v32 = vld [vmem:[#allocation125_spill] sm:$0xff] }
 0x291   : > { %13770 = vst [vmem:[#allocation97_spill] sm:$0xff] %v10009_v51  ;;  %4000 = vrot.lane.b32.xlu1 %v3995_v8, %s7181_s16  ;;  %v4021_v5 = vstv %s9927_s27  ;;  %v1733_v23 = vadd.f32 %v13771_v58, %v1621_v13  ;;  %v1732_v19 = vadd.f32 %v13772_v18, %v1620_v49  ;;  %v2743_v8 = vstv %s9938_s7  ;;  %s10174_s27 = sld [smem:[#allocation3 + $0x1d]] }
 0x292   : > { %3998 = vrot.lane.b32.xlu0 %v3994_v10, %s7181_s16  ;;  %v4008_v16 = vmul.f32 %v9949_v62, %v4007_v54  ;;  %v10035_v39 = vadd.f32 %v9325_v25, %v1705_v11  ;;  %v10038_v59 = vadd.f32 %v9328_v61, %v1704_v14  ;;  %v10041_v13 = vmul.f32 %v9981_v31, %v2737_v17  ;;  %v13775_v10 = vld [vmem:[#allocation56_spill] sm:$0xff]  ;;  %v13777_v61 = vld [vmem:[#allocation122_spill] sm:$0xff]  ;;  %v13778_v14 = vld [vmem:[#allocation123_spill] sm:$0xff]  ;;  %s10211_s7 = sld [smem:[#allocation3 + $0x4a]] }
 0x293   : > { %v10031_v55 = vpop.permute.xlu1 %3231  ;;  %v10044_v49 = vmul.f32 %v9997_v40, %v2737_v17  ;;  %v10047_v58 = vadd.f32 %v13774_v22, %v1719_v29  ;;  %v10050_v18 = vadd.f32 %v13775_v10, %v1718_v34  ;;  %v4023_v25 = vmul.f32 %v9924_v12, %v4021_v5  ;;  %v13779_v34 = vld [vmem:[#allocation60_spill] sm:$0xff] }
 0x294   : > { %13773 = vst [vmem:[#allocation98_spill] sm:$0xff] %v10031_v55  ;;  %v2749_v55 = vstv %s9961_s8  ;;  %v10053_v54 = vpop.permute.xlu0 %3229  ;;  %v1747_v11 = vadd.f32 %v13777_v61, %v9935_v6  ;;  %v1746_v17 = vadd.f32 %v13778_v14, %v1634_v45  ;;  %v10061_v51 = vmul.f32 %v9981_v31, %v2743_v8  ;;  %v13780_v10 = vld [vmem:[#allocation128_spill] sm:$0xff]  ;;  %s10217_s8 = sld [smem:[#allocation3 + $0x9c]] }
 0x295   : > { %13776 = vst [vmem:[#allocation99_spill] sm:$0xff] %v10053_v54  ;;  %4014 = vrot.lane.b32.xlu1 %v4009_v21, %s7181_s16  ;;  %v4035_v29 = vstv %s9975_s6  ;;  %v1860_v22 = vadd.f32 %v13779_v34, %v1733_v23  ;;  %v1859_v54 = vadd.f32 %v13780_v10, %v1732_v19  ;;  %v10069_v21 = vmul.f32 %v9997_v40, %v2743_v8  ;;  %v13782_v61 = vld [vmem:[#allocation124_spill] sm:$0xff]  ;;  %v13784_v34 = vld [vmem:[#allocation126_spill] sm:$0xff]  ;;  %s10238_s6 = sld [smem:[#allocation3 + $0x77]] }
 0x296   : > { %4012 = vrot.lane.b32.xlu0 %v4008_v16, %s7181_s16  ;;  %v4022_v45 = vmul.f32 %v9949_v62, %v4021_v5  ;;  %v1761_v14 = vadd.f32 %v13782_v61, %v9953_v3  ;;  %v1760_v23 = vadd.f32 %v13783_v32, %v9956_v9  ;;  %v10082_v19 = vmul.f32 %v9981_v31, %v2749_v55  ;;  %v13785_v16 = vld [vmem:[#allocation127_spill] sm:$0xff] }
 0x297   : > { %v10074_v6 = vpop.permute.xlu1 %3252  ;;  %v2755_v8 = vstv %s10002_s10  ;;  %v1775_v10 = vadd.f32 %v13784_v34, %v9959_v47  ;;  %v2761_v48 = vstv %s10007_s11  ;;  %v4037_v3 = vmul.f32 %v9924_v12, %v4035_v29  ;;  %v13787_v9 = vld [vmem:[#allocation63_spill] sm:$0xff]  ;;  %s10266_s10 = sld [smem:[#allocation3 + $0xc9]] }
 0x298   : > { %13781 = vst [vmem:[#allocation100_spill] sm:$0xff] %v10074_v6  ;;  %v1774_v6 = vadd.f32 %v13785_v16, %v9968_v24  ;;  %v10092_v5 = vpop.permute.xlu0 %3250  ;;  %v1877_v32 = vadd.f32 %v13787_v9, %v1747_v11  ;;  %v1876_v61 = vadd.f32 %v9457_v46, %v1746_v17  ;;  %v10099_v42 = vmul.f32 %v9997_v40, %v2749_v55  ;;  %v13790_v11 = vld [vmem:[#allocation70_spill] sm:$0xff]  ;;  %s10282_s11 = sld [smem:[#allocation3 + $0xa4]] }
 0x299   : > { %13786 = vst [vmem:[#allocation101_spill] sm:$0xff] %v10092_v5  ;;  %4028 = vrot.lane.b32.xlu1 %v4023_v25, %s7181_s16  ;;  %v4049_v47 = vstv %s10023_s12  ;;  %v10105_v24 = vmul.f32 %v9981_v31, %v2755_v8  ;;  %v10108_v34 = vmul.f32 %v9997_v40, %v2755_v8  ;;  %v2767_v16 = vstv %s10028_s13  ;;  %v13793_v8 = vld [vmem:[#allocation129_spill] sm:$0xff]  ;;  %s10299_s12 = sld [smem:[#allocation3 + $0xf6]] }
 0x29a   : > { %4026 = vrot.lane.b32.xlu0 %v4022_v45, %s7181_s16  ;;  %v4036_v46 = vmul.f32 %v9949_v62, %v4035_v29  ;;  %v1894_v55 = vadd.f32 %v9487_v1, %v1761_v14  ;;  %v1893_v17 = vadd.f32 %v13790_v11, %v1760_v23  ;;  %v10118_v9 = vmul.f32 %v9981_v31, %v2761_v48  ;;  %v13794_v45 = vld [vmem:[#allocation71_spill] sm:$0xff]  ;;  %v13797_v29 = vld [vmem:[#allocation130_spill] sm:$0xff]  ;;  %s10312_s13 = sld [smem:[#allocation3 + $0xd1]] }
 0x29b   : > { %13788 = vst [vmem:[#allocation110_spill] sm:$0xff] %v10108_v34  ;;  %v10112_v25 = vpop.permute.xlu1 %3273  ;;  %v10121_v5 = vmul.f32 %v9997_v40, %v2761_v48  ;;  %v1932_v0 = vadd.f32 %v13793_v8, %v9972_v38  ;;  %v1911_v37 = vadd.f32 %v13794_v45, %v1775_v10  ;;  %v4051_v1 = vmul.f32 %v9924_v12, %v4049_v47  ;;  %v13801_v10 = vld [vmem:[#allocation133_spill] sm:$0xff] }
 0x29c   : > { %13789 = vst [vmem:[#allocation102_spill] sm:$0xff] %v10112_v25  ;;  %13791 = vst [vmem:[#allocation103_spill] sm:$0xff] %v10118_v9  ;;  %v1910_v25 = vadd.f32 %v13795_v43, %v1774_v6  ;;  %v10127_v15 = vpop.permute.xlu0 %3271  ;;  %v1931_v14 = vadd.f32 %v13797_v29, %v9978_v20  ;;  %v10134_v23 = vmul.f32 %v9981_v31, %v2767_v16  ;;  %v4063_v38 = vstv %s10064_s15  ;;  %v13800_v43 = vld [vmem:[#allocation131_spill] sm:$0xff]  ;;  %v13804_v29 = vld [vmem:[#allocation138_spill] sm:$0xff]  ;;  %s10319_s15 = sld [smem:[#allocation3 + $0x123]] }
 0x29d   : > { %13792 = vst [vmem:[#allocation104_spill] sm:$0xff] %v10121_v5  ;;  %13796 = vst [vmem:[#allocation111_spill] sm:$0xff] %v10127_v15  ;;  %4042 = vrot.lane.b32.xlu1 %v4037_v3, %s7181_s16  ;;  %v10137_v48 = vmul.f32 %v9997_v40, %v2767_v16  ;;  %v1953_v6 = vadd.f32 %v13800_v43, %v9994_v56  ;;  %v1952_v3 = vadd.f32 %v13801_v10, %v10014_v4  ;;  %v13803_v16 = vld [vmem:[#allocation136_spill] sm:$0xff]  ;;  %v13805_v56 = vld [vmem:[#allocation139_spill] sm:$0xff] }
 0x29e   : > { %13798 = vst [vmem:[#allocation105_spill] sm:$0xff] %v10134_v23  ;;  %v2997_v11 = vstv %s10071_s17  ;;  %4040 = vrot.lane.b32.xlu0 %v4036_v46, %s7181_s16  ;;  %v4050_v8 = vmul.f32 %v9949_v62, %v4049_v47  ;;  %v1974_v45 = vadd.f32 %v13803_v16, %v10035_v39  ;;  %v1973_v15 = vadd.f32 %v13804_v29, %v10038_v59  ;;  %v13806_v4 = vld [vmem:[#allocation140_spill] sm:$0xff]  ;;  %v13811_v59 = vld [vmem:[#allocation150_spill] sm:$0xff]  ;;  %v13819_v9 = vld [vmem:[#allocation149_spill] sm:$0xff]  ;;  %s10342_s17 = sld [smem:[#allocation3 + $0x150]] }
 0x29f   : > { %13799 = vst [vmem:[#allocation112_spill] sm:$0xff] %v10137_v48  ;;  %v10148_v20 = vpop.permute.xlu1 %3294  ;;  %v1995_v43 = vadd.f32 %v13805_v56, %v10047_v58  ;;  %v1994_v10 = vadd.f32 %v13806_v4, %v10050_v18  ;;  %v2016_v46 = vadd.f32 %v13807_v7, %v1860_v22  ;;  %v13808_v48 = vld [vmem:[#allocation143_spill] sm:$0xff]  ;;  %v4065_v39 = vmul.f32 %v9924_v12, %v4063_v38  ;;  %v13812_v7 = vld [vmem:[#allocation145_spill] sm:$0xff] }
 0x2a0   : > { %13802 = vst [vmem:[#allocation106_spill] sm:$0xff] %v10148_v20  ;;  %v2015_v23 = vadd.f32 %v13808_v48, %v1859_v54  ;;  %v13809_v20 = vld [vmem:[#allocation144_spill] sm:$0xff]  ;;  %v10166_v47 = vpop.permute.xlu0 %3292  ;;  %v2100_v58 = vadd.f32 %v13811_v59, %v1932_v0  ;;  %v2999_v16 = vmul.f32 %v9981_v31, %v2997_v11  ;;  %v3014_v18 = vstv %s10090_s18  ;;  %v13813_v22 = vld [vmem:[#allocation151_spill] sm:$0xff]  ;;  %s10352_s18 = sld [smem:[#allocation3 + $0xfe]] }
 0x2a1   : > { %v10162_v5 = vadd.f32 %v13809_v20, %v1877_v32  ;;  %13810 = vst [vmem:[#allocation107_spill] sm:$0xff] %v10166_v47  ;;  %4056 = vrot.lane.b32.xlu1 %v4051_v1, %s7181_s16  ;;  %v4077_v29 = vstv %s10102_s19  ;;  %v10177_v54 = vadd.f32 %v13812_v7, %v1876_v61  ;;  %v2099_v32 = vadd.f32 %v13813_v22, %v1931_v14  ;;  %v13815_v20 = vld [vmem:[#allocation146_spill] sm:$0xff]  ;;  %v13816_v4 = vld [vmem:[#allocation147_spill] sm:$0xff]  ;;  %v13817_v47 = vld [vmem:[#allocation152_spill] sm:$0xff]  ;;  %s10384_s19 = sld [smem:[#allocation3 + $0x12b]] }
 0x2a2   : > { %v3000_v48 = vmul.f32 %v9666_v52, %v2997_v11  ;;  %4054 = vrot.lane.b32.xlu0 %v4050_v8, %s7181_s16  ;;  %v4064_v0 = vmul.f32 %v9949_v62, %v4063_v38  ;;  %v10186_v56 = vadd.f32 %v13815_v20, %v1894_v55  ;;  %v10189_v59 = vadd.f32 %v13816_v4, %v1893_v17  ;;  %v13818_v14 = vld [vmem:[#allocation148_spill] sm:$0xff]  ;;  %v13824_v4 = vld [vmem:[#allocation15_spill] sm:$0xff] }
 0x2a3   : > { %v10182_v1 = vpop.permute.xlu1 %3315  ;;  %v2121_v61 = vadd.f32 %v13817_v47, %v1953_v6  ;;  %v2998_v7 = vmul.f32 %v9997_v40, %v2997_v11  ;;  %v10194_v22 = vadd.f32 %v13818_v14, %v1911_v37  ;;  %v10197_v8 = vadd.f32 %v13819_v9, %v1910_v25  ;;  %v13821_v25 = vld [vmem:[#allocation13_spill] sm:$0xff] }
 0x2a4   : > { %13814 = vst [vmem:[#allocation108_spill] sm:$0xff] %v10182_v1  ;;  %v10200_v1 = vmul.f32 %v9981_v31, %v3014_v18  ;;  %v10202_v38 = vpop.permute.xlu0 %3313  ;;  %v4079_v55 = vmul.f32 %v9924_v12, %v4077_v29  ;;  %v10207_v17 = vadd.f32 %v9580_v41, %v2100_v58  ;;  %v3005_v6 = vrot.slane %v2999_v16, 1  ;;  %v13823_v58 = vld [vmem:[#allocation14_spill] sm:$0xff] }
 0x2a5   : > { %13820 = vst [vmem:[#allocation109_spill] sm:$0xff] %v10202_v38  ;;  %4070 = vrot.lane.b32.xlu1 %v4065_v39, %s7181_s16  ;;  %v3017_v11 = vmul.f32 %v9666_v52, %v3014_v18  ;;  %v4091_v37 = vstv %s10140_s24  ;;  %v2120_v9 = vadd.f32 %v13821_v25, %v1952_v3  ;;  %v10215_v47 = vadd.f32 %v9583_v35, %v2099_v32  ;;  %v13825_v32 = vld [vmem:[#allocation16_spill] sm:$0xff]  ;;  %v13826_v25 = vld [vmem:[#allocation17_spill] sm:$0xff]  ;;  %s10398_s24 = sld [smem:[#allocation3 + $0x1f]] }
 0x2a6   : > { %v3007_v20 = vrot.slane %v3000_v48, 1  ;;  %4068 = vrot.lane.b32.xlu0 %v4064_v0, %s7181_s16  ;;  %v4078_v39 = vmul.f32 %v9949_v62, %v4077_v29  ;;  %v2142_v16 = vadd.f32 %v13823_v58, %v1974_v45  ;;  %v2141_v14 = vadd.f32 %v13824_v4, %v1973_v15 }
 0x2a7   : > { %v10220_v41 = vpop.permute.xlu1 %3336  ;;  %v10226_v3 = vadd.f32 %v9605_v28, %v2121_v61  ;;  %v3004_v35 = vrot.slane %v2998_v7, 1  ;;  %v2163_v48 = vadd.f32 %v13825_v32, %v1995_v43  ;;  %v2162_v38 = vadd.f32 %v13826_v25, %v1994_v10  ;;  %v13830_v61 = vld [vmem:[#allocation19_spill] sm:$0xff] }
 0x2a8   : > { %13822 = vst [vmem:[#allocation113_spill] sm:$0xff] %v10220_v41  ;;  %v3022_v34 = vrot.slane %v10200_v1, 1  ;;  %v10231_v0 = vpop.permute.xlu0 %3334  ;;  %v4093_v29 = vmul.f32 %v9924_v12, %v4091_v37  ;;  %v13828_v41 = vld [vmem:[#allocation18_spill] sm:$0xff]  ;;  %v3024_v58 = vrot.slane %v3017_v11, 1  ;;  %v3031_v15 = vstv %s10164_s26  ;;  %v13831_v11 = vld [vmem:[#allocation153_spill] sm:$0xff]  ;;  %s10420_s26 = sld [smem:[#allocation3 + $0x18]] }
 0x2a9   : > { %13827 = vst [vmem:[#allocation114_spill] sm:$0xff] %v10231_v0  ;;  %4084 = vrot.lane.b32.xlu1 %v4079_v55, %s7181_s16  ;;  %v2184_v45 = vadd.f32 %v13828_v41, %v2016_v46  ;;  %v4105_v4 = vstv %s10174_s27  ;;  %v10241_v28 = vadd.f32 %v9617_v53, %v2120_v9  ;;  %v10244_v43 = vsel %vm562_vm0, %v3005_v6, %v3007_v20  ;;  %s10429_s27 = sld [smem:[#allocation3 + $0x158]] }
 0x2aa   : > { %v3015_v10 = vmul.f32 %v9997_v40, %v3014_v18  ;;  %4082 = vrot.lane.b32.xlu0 %v4078_v39, %s7181_s16  ;;  %v4092_v46 = vmul.f32 %v9949_v62, %v4091_v37  ;;  %v2183_v7 = vadd.f32 %v13830_v61, %v2015_v23  ;;  %v10253_v55 = vadd.f32 %v9672_v26, %v2142_v16  ;;  %v13832_v18 = vld [vmem:[#allocation24_spill] sm:$0xff]  ;;  %v13834_v37 = vld [vmem:[#allocation154_spill] sm:$0xff] }
 0x2ab   : > { %v10248_v1 = vpop.permute.xlu1 %3357  ;;  %v10256_v53 = vadd.f32 %v13831_v11, %v2141_v14  ;;  %v10259_v9 = vsel %vm562_vm0, %v3004_v35, %v3005_v6  ;;  %v10262_v20 = vadd.f32 %v13832_v18, %v2163_v48  ;;  %v3033_v41 = vmul.f32 %v9981_v31, %v3031_v15  ;;  %v13835_v6 = vld [vmem:[#allocation27_spill] sm:$0xff] }
 0x2ac   : > { %13829 = vst [vmem:[#allocation116_spill] sm:$0xff] %v10248_v1  ;;  %v3034_v39 = vmul.f32 %v9666_v52, %v3031_v15  ;;  %v10268_v23 = vpop.permute.xlu0 %3355  ;;  %v4107_v26 = vmul.f32 %v9924_v12, %v4105_v4  ;;  %v10273_v16 = vadd.f32 %v13834_v37, %v2162_v38  ;;  %v10276_v14 = vadd.f32 %v13835_v6, %v2184_v45  ;;  %v13837_v45 = vld [vmem:[#allocation132_spill] sm:$0xff]  ;;  %v13839_v37 = vld [vmem:[#allocation135_spill] sm:$0xff] }
 0x2ad   : > { %13833 = vst [vmem:[#allocation118_spill] sm:$0xff] %v10268_v23  ;;  %4098 = vrot.lane.b32.xlu1 %v4093_v29, %s7181_s16  ;;  %v10279_v35 = vsel %vm562_vm0, %v3022_v34, %v3024_v58  ;;  %v4119_v32 = vstv %s10211_s7  ;;  %v3021_v48 = vrot.slane %v3015_v10, 1  ;;  %v3032_v25 = vmul.f32 %v9997_v40, %v3031_v15  ;;  %v13838_v58 = vld [vmem:[#allocation134_spill] sm:$0xff]  ;;  %v13840_v10 = vld [vmem:[#allocation156_spill] sm:$0xff]  ;;  %s10436_s7 = sld [smem:[#allocation3 + $0x4c]] }
 0x2ae   : > { %v3048_v61 = vstv %s10217_s8  ;;  %4096 = vrot.lane.b32.xlu0 %v4092_v46, %s7181_s16  ;;  %v4106_v38 = vmul.f32 %v9949_v62, %v4105_v4  ;;  %v2205_v11 = vadd.f32 %v13837_v45, %v10162_v5  ;;  %v2204_v18 = vadd.f32 %v13838_v58, %v10177_v54  ;;  %v13841_v15 = vld [vmem:[#allocation20_spill] sm:$0xff]  ;;  %v13843_v54 = vld [vmem:[#allocation21_spill] sm:$0xff]  ;;  %s10457_s8 = sld [smem:[#allocation3 + $0x79]] }
 0x2af   : > { %v10287_v29 = vpop.permute.xlu1 %3378  ;;  %v2226_v6 = vadd.f32 %v13839_v37, %v10186_v56  ;;  %v10297_v23 = vadd.f32 %v13840_v10, %v2183_v7  ;;  %v2225_v46 = vadd.f32 %v13841_v15, %v10189_v59  ;;  %v3041_v1 = vrot.slane %v3034_v39, 1  ;;  %v13844_v59 = vld [vmem:[#allocation137_spill] sm:$0xff] }
 0x2b0   : > { %13836 = vst [vmem:[#allocation119_spill] sm:$0xff] %v10287_v29  ;;  %v3039_v29 = vrot.slane %v3033_v41, 1  ;;  %v10303_v4 = vpop.permute.xlu0 %3376  ;;  %v4121_v5 = vmul.f32 %v9924_v12, %v4119_v32  ;;  %v2247_v45 = vadd.f32 %v13843_v54, %v10194_v22  ;;  %v3050_v56 = vmul.f32 %v9981_v31, %v3048_v61 }
 0x2b1   : > { %13842 = vst [vmem:[#allocation120_spill] sm:$0xff] %v10303_v4  ;;  %4112 = vrot.lane.b32.xlu1 %v4107_v26, %s7182_s9  ;;  %v3051_v7 = vmul.f32 %v9666_v52, %v3048_v61  ;;  %v4133_v58 = vstv %s10238_s6  ;;  %v2246_v41 = vadd.f32 %v13844_v59, %v10197_v8  ;;  %v10317_v39 = vsel %vm562_vm0, %v3021_v48, %v3022_v34  ;;  %s10484_s6 = sld [smem:[#allocation3 + $0x45]] }
 0x2b2   : > { %v3038_v26 = vrot.slane %v3032_v25, 1  ;;  %4110 = vrot.lane.b32.xlu0 %v4106_v38, %s7182_s9  ;;  %v4120_v37 = vmul.f32 %v9949_v62, %v4119_v32  ;;  %v10326_v10 = vadd.f32 %v9859_v2, %v2205_v11  ;;  %v10329_v15 = vadd.f32 %v9873_v33, %v2204_v18 }
 0x2b3   : > { %v10322_v22 = vpop.permute.xlu1 %3399  ;;  %v10332_v8 = vadd.f32 %v9876_v44, %v2226_v6  ;;  %v3049_v34 = vmul.f32 %v9997_v40, %v3048_v61  ;;  %v10336_v48 = vadd.f32 %v9882_v36, %v2225_v46  ;;  %v10339_v25 = vsel %vm562_vm0, %v3039_v29, %v3041_v1  ;;  %v13847_v1 = vld [vmem:[#allocation23_spill] sm:$0xff] }
 0x2b4   : > { %13845 = vst [vmem:[#allocation121_spill] sm:$0xff] %v10322_v22  ;;  %v3065_v38 = vstv %s10266_s10  ;;  %v10344_v32 = vpop.permute.xlu0 %3397  ;;  %v4135_v2 = vmul.f32 %v9924_v12, %v4133_v58  ;;  %v10349_v33 = vadd.f32 %v9893_v27, %v2247_v45  ;;  %v3056_v44 = vrot.slane %v3050_v56, 1  ;;  %v13850_v56 = vld [vmem:[#allocation29_spill] sm:$0xff]  ;;  %s10497_s10 = sld [smem:[#allocation3 + $0xa6]] }
 0x2b5   : > { %13846 = vst [vmem:[#allocation54_spill] sm:$0xff] %v10344_v32  ;;  %4126 = vrot.lane.b32.xlu1 %v4121_v5, %s7182_s9  ;;  %v3058_v61 = vrot.slane %v3051_v7, 1  ;;  %v4147_v36 = vstv %s10282_s11  ;;  %v10356_v11 = vadd.f32 %v13847_v1, %v10207_v17  ;;  %v10359_v18 = vadd.f32 %v9903_v57, %v2246_v41  ;;  %v13849_v5 = vld [vmem:[#allocation26_spill] sm:$0xff]  ;;  %s10545_s11 = sld [smem:[#allocation3 + $0xd3]] }
 0x2b6   : > { %v10362_v6 = vsel %vm562_vm0, %v3038_v26, %v3039_v29  ;;  %4124 = vrot.lane.b32.xlu0 %v4120_v37, %s7182_s9  ;;  %v4134_v27 = vmul.f32 %v9949_v62, %v4133_v58  ;;  %v10370_v54 = vadd.f32 %v13849_v5, %v10215_v47  ;;  %v3055_v45 = vrot.slane %v3049_v34, 1  ;;  %v13852_v58 = vld [vmem:[#allocation31_spill] sm:$0xff]  ;;  %v13853_v37 = vld [vmem:[#allocation32_spill] sm:$0xff] }
 0x2b7   : > { %v10365_v46 = vpop.permute.xlu1 %3420  ;;  %v3067_v17 = vmul.f32 %v9981_v31, %v3065_v38  ;;  %v3082_v57 = vstv %s10299_s12  ;;  %v10376_v29 = vadd.f32 %v13850_v56, %v10226_v3  ;;  %v3068_v7 = vmul.f32 %v9666_v52, %v3065_v38  ;;  %v13856_v56 = vld [vmem:[#allocation35_spill] sm:$0xff]  ;;  %s10551_s12 = sld [smem:[#allocation3 + $0x72]] }
 0x2b8   : > { %13848 = vst [vmem:[#allocation56_spill] sm:$0xff] %v10365_v46  ;;  %v3066_v59 = vmul.f32 %v9997_v40, %v3065_v38  ;;  %v10380_v41 = vpop.permute.xlu0 %3418  ;;  %v4149_v47 = vmul.f32 %v9924_v12, %v4147_v36  ;;  %v10388_v26 = vadd.f32 %v13852_v58, %v10241_v28  ;;  %v10392_v3 = vadd.f32 %v13853_v37, %v10253_v55 }
 0x2b9   : > { %13851 = vst [vmem:[#allocation122_spill] sm:$0xff] %v10380_v41  ;;  %4140 = vrot.lane.b32.xlu1 %v4135_v2, %s7182_s9  ;;  %v10395_v34 = vsel %vm562_vm0, %v3056_v44, %v3058_v61  ;;  %v4161_v38 = vstv %s10312_s13  ;;  %v3084_v2 = vmul.f32 %v9981_v31, %v3082_v57  ;;  %v3085_v1 = vmul.f32 %v9666_v52, %v3082_v57  ;;  %s10562_s13 = sld [smem:[#allocation3 + $0x100]] }
 0x2ba   : > { %13854 = vst [vmem:[#allocation123_spill] sm:$0xff] %v10395_v34  ;;  %v3099_v5 = vstv %s10319_s15  ;;  %4138 = vrot.lane.b32.xlu0 %v4134_v27, %s7182_s9  ;;  %v4148_v55 = vmul.f32 %v9949_v62, %v4147_v36  ;;  %v10409_v58 = vadd.f32 %v13856_v56, %v10256_v53  ;;  %v10412_v61 = vsel %vm562_vm0, %v3055_v45, %v3056_v44  ;;  %v13859_v53 = vld [vmem:[#allocation117_spill] sm:$0xff]  ;;  %v13861_v56 = vld [vmem:[#allocation36_spill] sm:$0xff]  ;;  %s10592_s15 = sld [smem:[#allocation3 + $0x12d]] }
 0x2bb   : > { %v10404_v28 = vpop.permute.xlu1 %3441  ;;  %13857 = vst [vmem:[#allocation128_spill] sm:$0xff] %v10412_v61  ;;  %v3073_v37 = vrot.slane %v3067_v17, 1  ;;  %v3083_v41 = vmul.f32 %v9997_v40, %v3082_v57  ;;  %v3075_v46 = vrot.slane %v3068_v7, 1  ;;  %v3072_v32 = vrot.slane %v3066_v59, 1 }
 0x2bc   : > { %13855 = vst [vmem:[#allocation60_spill] sm:$0xff] %v10404_v28  ;;  %v3116_v22 = vstv %s10342_s17  ;;  %v10416_v4 = vpop.permute.xlu0 %3439  ;;  %v4163_v27 = vmul.f32 %v9924_v12, %v4161_v38  ;;  %v10424_v36 = vadd.f32 %v13859_v53, %v10262_v20  ;;  %v3101_v44 = vmul.f32 %v9981_v31, %v3099_v5  ;;  %s10607_s17 = sld [smem:[#allocation3 + $0x9f]] }
 0x2bd   : > { %13858 = vst [vmem:[#allocation124_spill] sm:$0xff] %v10416_v4  ;;  %4154 = vrot.lane.b32.xlu1 %v4149_v47, %s7182_s9  ;;  %v3102_v45 = vmul.f32 %v9666_v52, %v3099_v5  ;;  %v4175_v17 = vstv %s10352_s18  ;;  %v3090_v57 = vrot.slane %v3084_v2, 1  ;;  %v3092_v7 = vrot.slane %v3085_v1, 1  ;;  %s10631_s18 = sld [smem:[#allocation3 + $0x15a]] }
 0x2be   : > { %v3100_v59 = vmul.f32 %v9997_v40, %v3099_v5  ;;  %4152 = vrot.lane.b32.xlu0 %v4148_v55, %s7182_s9  ;;  %v4162_v20 = vmul.f32 %v9949_v62, %v4161_v38  ;;  %v10440_v53 = vadd.f32 %v13861_v56, %v10273_v16  ;;  %v3089_v4 = vrot.slane %v3083_v41, 1 }
 0x2bf   : > { %v10433_v47 = vpop.permute.xlu1 %3462  ;;  %v3118_v2 = vmul.f32 %v9981_v31, %v3116_v22  ;;  %v3119_v1 = vmul.f32 %v9666_v52, %v3116_v22  ;;  %v10445_v5 = vsel %vm562_vm0, %v3073_v37, %v3075_v46  ;;  %v10448_v55 = vsel %vm562_vm0, %v3072_v32, %v3073_v37  ;;  %v13865_v46 = vld [vmem:[#allocation115_spill] sm:$0xff] }
 0x2c0   : > { %13860 = vst [vmem:[#allocation125_spill] sm:$0xff] %v10433_v47  ;;  %13862 = vst [vmem:[#allocation126_spill] sm:$0xff] %v10445_v5  ;;  %v3117_v38 = vmul.f32 %v9997_v40, %v3116_v22  ;;  %v10451_v47 = vpop.permute.xlu0 %3460  ;;  %v4177_v16 = vmul.f32 %v9924_v12, %v4175_v17  ;;  %v3107_v41 = vrot.slane %v3101_v44, 1  ;;  %v3109_v56 = vrot.slane %v3102_v45, 1  ;;  %v10471_v45 = vld [vmem:[%s7328_s14 + $0x58] sm:$0x3] }
 0x2c1   : > { %13863 = vst [vmem:[#allocation127_spill] sm:$0xff] %v10448_v55  ;;  %13864 = vst [vmem:[#allocation63_spill] sm:$0xff] %v10451_v47  ;;  %4168 = vrot.lane.b32.xlu1 %v4163_v27, %s7182_s9  ;;  %v4189_v28 = vstv %s10384_s19  ;;  %v4353_v52 = vstv %s10398_s24  ;;  %v10461_v32 = vadd.f32 %v13865_v46, %v10276_v14  ;;  %v10464_v37 = vsel %vm562_vm0, %v3090_v57, %v3092_v7  ;;  %v13868_v47 = vld [vmem:[#allocation37_spill] sm:$0xff]  ;;  %s10647_s19 = sld [smem:[#allocation3 + $0x20]] }
 0x2c2   : > { %13866 = vst [vmem:[#allocation70_spill] sm:$0xff] %v10464_v37  ;;  %v3106_v22 = vrot.slane %v3100_v59, 1  ;;  %4166 = vrot.lane.b32.xlu0 %v4162_v20, %s7182_s9  ;;  %v4176_v44 = vmul.f32 %v9949_v62, %v4175_v17  ;;  %v10475_v0 = vadd.f32 %v13868_v47, %v10297_v23  ;;  %v10478_v14 = vsel %vm562_vm0, %v3089_v4, %v3090_v57  ;;  %v13871_v23 = vld [vmem:[#allocation38_spill] sm:$0xff]  ;;  %s10658_s24 = sld [smem:[#allocation3 + $0xcc]] }
 0x2c3   : > { %v10467_v27 = vpop.permute.xlu1 %3619  ;;  %13869 = vst [vmem:[#allocation71_spill] sm:$0xff] %v10478_v14  ;;  %v3124_v46 = vrot.slane %v3118_v2, 1  ;;  %v3126_v7 = vrot.slane %v3119_v1, 1  ;;  %v3123_v37 = vrot.slane %v3117_v38, 1  ;;  %v3469_v59 = vstv %s10420_s26  ;;  %v13873_v1 = vld [vmem:[#allocation39_spill] sm:$0xff]  ;;  %s10676_s26 = sld [smem:[#allocation3 + $0x4d]] }
 0x2c4   : > { %13867 = vst [vmem:[#allocation129_spill] sm:$0xff] %v10467_v27  ;;  %v10481_v20 = vpop.permute.xlu0 %3617  ;;  %v4191_v17 = vmul.f32 %v9924_v12, %v4189_v28  ;;  %v4355_v27 = vmul.f32 %v9924_v12, %v4353_v52  ;;  %v10490_v47 = vadd.f32 %v13871_v23, %v10326_v10  ;;  %v10493_v4 = vsel %vm562_vm0, %v3107_v41, %v3109_v56 }
 0x2c5   : > { %13870 = vst [vmem:[#allocation73_spill] sm:$0xff] %v10481_v20  ;;  %4182 = vrot.lane.b32.xlu1 %v4177_v16, %s7182_s9  ;;  %13872 = vst [vmem:[#allocation130_spill] sm:$0xff] %v10493_v4  ;;  %v4203_v57 = vstv %s10429_s27  ;;  %v4356_v2 = vmul.f32 %v10471_v45, %v4353_v52  ;;  %v10501_v38 = vadd.f32 %v13873_v1, %v10329_v15  ;;  %v4374_v56 = vstv %s10436_s7  ;;  %v13876_v20 = vld [vmem:[#allocation40_spill] sm:$0xff]  ;;  %s10698_s27 = sld [smem:[#allocation3 + $0xf9]] }
 0x2c6   : > { %v10504_v16 = vsel %vm562_vm0, %v3106_v22, %v3107_v41  ;;  %4180 = vrot.lane.b32.xlu0 %v4176_v44, %s7182_s9  ;;  %v4190_v23 = vmul.f32 %v9949_v62, %v4189_v28  ;;  %v10513_v4 = vadd.f32 %v13876_v20, %v10332_v8  ;;  %v10516_v14 = vsel %vm562_vm0, %v3124_v46, %v3126_v7  ;;  %v10524_v44 = vld [vmem:[%s7328_s14 + $0x40] sm:$0x3]  ;;  %s10713_s7 = sld [smem:[#allocation3 + $0x7a]] }
 0x2c7   : > { %13874 = vst [vmem:[#allocation131_spill] sm:$0xff] %v10504_v16  ;;  %v10507_v10 = vpop.permute.xlu1 %3640  ;;  %13877 = vst [vmem:[#allocation136_spill] sm:$0xff] %v10516_v14  ;;  %v3471_v15 = vmul.f32 %v9981_v31, %v3469_v59  ;;  %v4354_v41 = vmul.f32 %v9949_v62, %v4353_v52  ;;  %v10521_v22 = vsel %vm562_vm0, %v3123_v37, %v3124_v46  ;;  %v4361_v20 = vrot.slane %v4355_v27, 1  ;;  %v13880_v37 = vld [vmem:[#allocation41_spill] sm:$0xff] }
 0x2c8   : > { %13875 = vst [vmem:[#allocation133_spill] sm:$0xff] %v10507_v10  ;;  %13878 = vst [vmem:[#allocation138_spill] sm:$0xff] %v10521_v22  ;;  %v3472_v28 = vmul.f32 %v10524_v44, %v3469_v59  ;;  %v10527_v1 = vpop.permute.xlu0 %3638  ;;  %v4205_v8 = vmul.f32 %v9924_v12, %v4203_v57  ;;  %v4363_v7 = vrot.slane %v4356_v2, 1  ;;  %v4376_v10 = vmul.f32 %v9924_v12, %v4374_v56  ;;  %v13881_v22 = vld [vmem:[#allocation44_spill] sm:$0xff]  ;;  %v13883_v2 = vld [vmem:[#allocation42_spill] sm:$0xff] }
 0x2c9   : > { %13879 = vst [vmem:[#allocation139_spill] sm:$0xff] %v10527_v1  ;;  %4196 = vrot.lane.b32.xlu1 %v4191_v17, %s7182_s9  ;;  %v4377_v52 = vmul.f32 %v10471_v45, %v4374_v56  ;;  %v4395_v14 = vstv %s10457_s8  ;;  %v10536_v46 = vadd.f32 %v13880_v37, %v10336_v48  ;;  %v2572_v16 = vadd.f32 %v13881_v22, %v10356_v11  ;;  %s10732_s8 = sld [smem:[#allocation3 + $0xa7]] }
 0x2ca   : > { %v3470_v1 = vmul.f32 %v9997_v40, %v3469_v59  ;;  %4194 = vrot.lane.b32.xlu0 %v4190_v23, %s7182_s9  ;;  %v4204_v27 = vmul.f32 %v9949_v62, %v4203_v57  ;;  %v10549_v55 = vadd.f32 %v13883_v2, %v10349_v33  ;;  %v3477_v48 = vrot.slane %v3471_v15, 2 }
 0x2cb   : > { %v10542_v17 = vpop.permute.xlu1 %3661  ;;  %v4360_v37 = vrot.slane %v4354_v41, 1  ;;  %v4375_v11 = vmul.f32 %v9949_v62, %v4374_v56  ;;  %v3479_v59 = vrot.slane %v3472_v28, 2  ;;  %v3486_v22 = vstv %s10484_s6  ;;  %v13885_v41 = vld [vmem:[#allocation43_spill] sm:$0xff]  ;;  %v13886_v28 = vld [vmem:[#allocation46_spill] sm:$0xff]  ;;  %s10765_s6 = sld [smem:[#allocation3 + $0xd4]] }
 0x2cc   : > { %13882 = vst [vmem:[#allocation140_spill] sm:$0xff] %v10542_v17  ;;  %v10555_v23 = vpop.permute.xlu0 %3659  ;;  %v4397_v57 = vmul.f32 %v9924_v12, %v4395_v14  ;;  %v4398_v17 = vmul.f32 %v10471_v45, %v4395_v14  ;;  %v4364_v5 = vsel %vm562_vm0, %v4361_v20, %v4363_v7  ;;  %v4382_v33 = vrot.slane %v4376_v10, 1 }
 0x2cd   : > { %13884 = vst [vmem:[#allocation142_spill] sm:$0xff] %v10555_v23  ;;  %4210 = vrot.lane.b32.xlu1 %v4205_v8, %s7182_s9  ;;  %v4384_v2 = vrot.slane %v4377_v52, 1  ;;  %v4416_v15 = vstv %s10497_s10  ;;  %v10566_v56 = vadd.f32 %v13885_v41, %v10359_v18  ;;  %v2571_v23 = vadd.f32 %v13886_v28, %v10370_v54  ;;  %s10771_s10 = sld [smem:[#allocation3 + $0x126]] }
 0x2ce   : > { %v10571_v8 = vadd.f32 %v9984_v30, %v2572_v16  ;;  %v3476_v61 = vrot.slane %v3470_v1, 2  ;;  %4208 = vrot.lane.b32.xlu0 %v4204_v27, %s7182_s9  ;;  %v10577_v10 = vmul.f32 %v9981_v31, %v3486_v22  ;;  %v4362_v7 = vsel %vm562_vm0, %v4360_v37, %v4361_v20 }
 0x2cf   : > { %v10574_v34 = vpop.permute.xlu1 %3682  ;;  %v4381_v52 = vrot.slane %v4375_v11, 1  ;;  %v4396_v18 = vmul.f32 %v9949_v62, %v4395_v14  ;;  %v3489_v41 = vmul.f32 %v10524_v44, %v3486_v22  ;;  %v4403_v30 = vrot.slane %v4397_v57, 1  ;;  %v13889_v11 = vld [vmem:[#allocation45_spill] sm:$0xff] }
 0x2d0   : > { %13887 = vst [vmem:[#allocation143_spill] sm:$0xff] %v10574_v34  ;;  %v10582_v54 = vpop.permute.xlu0 %3680  ;;  %v4405_v16 = vrot.slane %v4398_v17, 1  ;;  %v4418_v1 = vmul.f32 %v9924_v12, %v4416_v15  ;;  %v10587_v27 = vsel %vm1035_vm1, %v3477_v48, %v3479_v59  ;;  %v3487_v20 = vmul.f32 %v9997_v40, %v3486_v22 }
 0x2d1   : > { %13888 = vst [vmem:[#allocation144_spill] sm:$0xff] %v10582_v54  ;;  %4367 = vrot.lane.b32.xlu1 %v4364_v5, %s7181_s16  ;;  %v4385_v37 = vsel %vm562_vm0, %v4382_v33, %v4384_v2  ;;  %v4419_v14 = vmul.f32 %v10471_v45, %v4416_v15  ;;  %v2593_v28 = vadd.f32 %v13889_v11, %v10376_v29  ;;  %v4437_v22 = vstv %s10545_s11  ;;  %s10812_s11 = sld [smem:[#allocation3 + $0x101]] }
 0x2d2   : > { %v10597_v5 = vadd.f32 %v10000_v63, %v2571_v23  ;;  %v10600_v17 = vsel %vm1035_vm1, %v3476_v61, %v3477_v48  ;;  %4365 = vrot.lane.b32.xlu0 %v4362_v7, %s7181_s16  ;;  %v3503_v57 = vstv %s10551_s12  ;;  %v4383_v2 = vsel %vm562_vm0, %v4381_v52, %v4382_v33  ;;  %v13893_v33 = vld [vmem:[#allocation47_spill] sm:$0xff]  ;;  %s10816_s12 = sld [smem:[#allocation3 + $0x153]] }
 0x2d3   : > { %13890 = vst [vmem:[#allocation150_spill] sm:$0xff] %v10600_v17  ;;  %v10603_v59 = vpop.permute.xlu1 %3703  ;;  %v4402_v54 = vrot.slane %v4396_v18, 1  ;;  %v4417_v29 = vmul.f32 %v9949_v62, %v4416_v15  ;;  %v3494_v63 = vrot.slane %v10577_v10, 2  ;;  %v3496_v23 = vrot.slane %v3489_v41, 2 }
 0x2d4   : > { %13891 = vst [vmem:[#allocation145_spill] sm:$0xff] %v10603_v59  ;;  %v10612_v11 = vpop.permute.xlu0 %3701  ;;  %v4406_v61 = vsel %vm562_vm0, %v4403_v30, %v4405_v16  ;;  %v4424_v48 = vrot.slane %v4418_v1, 1  ;;  %v4426_v7 = vrot.slane %v4419_v14, 1  ;;  %v4439_v59 = vmul.f32 %v9924_v12, %v4437_v22 }
 0x2d5   : > { %13892 = vst [vmem:[#allocation151_spill] sm:$0xff] %v10612_v11  ;;  %4388 = vrot.lane.b32.xlu1 %v4385_v37, %s7181_s16  ;;  %v4440_v34 = vmul.f32 %v10471_v45, %v4437_v22  ;;  %v4458_v17 = vstv %s10562_s13  ;;  %v2592_v52 = vadd.f32 %v13893_v33, %v10388_v26  ;;  %v10622_v15 = vadd.f32 %v10017_v60, %v2593_v28  ;;  %v13895_v60 = vld [vmem:[#allocation48_spill] sm:$0xff]  ;;  %s10828_s13 = sld [smem:[#allocation3 + $0x12e]] }
 0x2d6   : > { %v10625_v10 = vmul.f32 %v9981_v31, %v3503_v57  ;;  %v3506_v18 = vmul.f32 %v10524_v44, %v3503_v57  ;;  %4386 = vrot.lane.b32.xlu0 %v4383_v2, %s7181_s16  ;;  %v3493_v16 = vrot.slane %v3487_v20, 2  ;;  %v4404_v1 = vsel %vm562_vm0, %v4402_v54, %v4403_v30 }
 0x2d7   : > { %v10629_v41 = vpop.permute.xlu1 %3724  ;;  %v4423_v37 = vrot.slane %v4417_v29, 1  ;;  %v4438_v26 = vmul.f32 %v9949_v62, %v4437_v22  ;;  %v2614_v14 = vadd.f32 %v13895_v60, %v10392_v3  ;;  %v10638_v28 = vsel %vm1035_vm1, %v3494_v63, %v3496_v23 }
 0x2d8   : > { %13894 = vst [vmem:[#allocation146_spill] sm:$0xff] %v10629_v41  ;;  %v10640_v33 = vpop.permute.xlu0 %3722  ;;  %v4460_v2 = vmul.f32 %v9924_v12, %v4458_v17  ;;  %v4461_v20 = vmul.f32 %v10471_v45, %v4458_v17  ;;  %v4427_v54 = vsel %vm562_vm0, %v4424_v48, %v4426_v7  ;;  %v4445_v30 = vrot.slane %v4439_v59, 1 }
 0x2d9   : > { %13896 = vst [vmem:[#allocation147_spill] sm:$0xff] %v10640_v33  ;;  %4409 = vrot.lane.b32.xlu1 %v4406_v61, %s7181_s16  ;;  %v4447_v29 = vrot.slane %v4440_v34, 1  ;;  %v4479_v22 = vstv %s10592_s15  ;;  %v10650_v3 = vadd.f32 %v10020_v50, %v2592_v52  ;;  %v3511_v23 = vrot.slane %v10625_v10, 2  ;;  %s10859_s15 = sld [smem:[#allocation3 + $0x15b]] }
 0x2da   : > { %v3513_v60 = vrot.slane %v3506_v18, 2  ;;  %v3504_v33 = vmul.f32 %v9997_v40, %v3503_v57  ;;  %4407 = vrot.lane.b32.xlu0 %v4404_v1, %s7181_s16  ;;  %v3520_v41 = vstv %s10607_s17  ;;  %v4425_v34 = vsel %vm562_vm0, %v4423_v37, %v4424_v48  ;;  %v13899_v1 = vld [vmem:[#allocation49_spill] sm:$0xff]  ;;  %s10893_s17 = sld [smem:[#allocation3 + $0x22]] }
 0x2db   : > { %v10655_v61 = vpop.permute.xlu1 %3745  ;;  %v4444_v59 = vrot.slane %v4438_v26, 1  ;;  %v4459_v7 = vmul.f32 %v9949_v62, %v4458_v17  ;;  %v10663_v50 = vsel %vm1035_vm1, %v3493_v16, %v3494_v63  ;;  %v4466_v57 = vrot.slane %v4460_v2, 1 }
 0x2dc   : > { %13897 = vst [vmem:[#allocation152_spill] sm:$0xff] %v10655_v61  ;;  %v10665_v52 = vpop.permute.xlu0 %3743  ;;  %v4468_v10 = vrot.slane %v4461_v20, 1  ;;  %v4481_v18 = vmul.f32 %v9924_v12, %v4479_v22  ;;  %v2613_v61 = vadd.f32 %v13899_v1, %v10409_v58  ;;  %v10672_v48 = vadd.f32 %v10041_v13, %v2614_v14 }
 0x2dd   : > { %13898 = vst [vmem:[#allocation148_spill] sm:$0xff] %v10665_v52  ;;  %4430 = vrot.lane.b32.xlu1 %v4427_v54, %s7181_s16  ;;  %v4448_v17 = vsel %vm562_vm0, %v4445_v30, %v4447_v29  ;;  %v4482_v63 = vmul.f32 %v10471_v45, %v4479_v22  ;;  %v3510_v16 = vrot.slane %v3504_v33, 2  ;;  %v10679_v37 = vmul.f32 %v9981_v31, %v3520_v41  ;;  %v13901_v33 = vld [vmem:[#allocation50_spill] sm:$0xff] }
 0x2de   : > { %v3523_v26 = vmul.f32 %v10524_v44, %v3520_v41  ;;  %4428 = vrot.lane.b32.xlu0 %v4425_v34, %s7181_s16  ;;  %v4500_v58 = vstv %s10631_s18  ;;  %v10687_v13 = vsel %vm1035_vm1, %v3511_v23, %v3513_v60  ;;  %v4446_v14 = vsel %vm562_vm0, %v4444_v59, %v4445_v30  ;;  %s10910_s18 = sld [smem:[#allocation3 + $0x4f]] }
 0x2df   : > { %v10683_v2 = vpop.permute.xlu1 %3766  ;;  %v4465_v20 = vrot.slane %v4459_v7, 1  ;;  %v4480_v54 = vmul.f32 %v9949_v62, %v4479_v22  ;;  %v2635_v29 = vadd.f32 %v13901_v33, %v10424_v36  ;;  %v3521_v1 = vmul.f32 %v9997_v40, %v3520_v41 }
 0x2e0   : > { %13900 = vst [vmem:[#allocation149_spill] sm:$0xff] %v10683_v2  ;;  %v10694_v52 = vpop.permute.xlu0 %3764  ;;  %v4469_v34 = vsel %vm562_vm0, %v4466_v57, %v4468_v10  ;;  %v4487_v2 = vrot.slane %v4481_v18, 1  ;;  %v4489_v60 = vrot.slane %v4482_v63, 1  ;;  %v4502_v30 = vmul.f32 %v9924_v12, %v4500_v58 }
 0x2e1   : > { %13902 = vst [vmem:[#allocation13_spill] sm:$0xff] %v10694_v52  ;;  %4451 = vrot.lane.b32.xlu1 %v4448_v17, %s7181_s16  ;;  %v4503_v22 = vmul.f32 %v10471_v45, %v4500_v58  ;;  %v4521_v59 = vstv %s10647_s19  ;;  %v10704_v36 = vadd.f32 %v10044_v49, %v2613_v61  ;;  %v10707_v41 = vsel %vm1035_vm1, %v3510_v16, %v3511_v23  ;;  %v13904_v61 = vld [vmem:[#allocation51_spill] sm:$0xff]  ;;  %s10934_s19 = sld [smem:[#allocation3 + $0x7c]] }
 0x2e2   : > { %v3528_v7 = vrot.slane %v10679_v37, 2  ;;  %v3530_v17 = vrot.slane %v3523_v26, 2  ;;  %4449 = vrot.lane.b32.xlu0 %v4446_v14, %s7181_s16  ;;  %v3537_v18 = vstv %s10658_s24  ;;  %v4467_v63 = vsel %vm562_vm0, %v4465_v20, %v4466_v57  ;;  %s10979_s24 = sld [smem:[#allocation3 + $0xa9]] }
 0x2e3   : > { %v10711_v10 = vpop.permute.xlu1 %3787  ;;  %v4486_v33 = vrot.slane %v4480_v54, 1  ;;  %v4501_v49 = vmul.f32 %v9949_v62, %v4500_v58  ;;  %v2634_v23 = vadd.f32 %v13904_v61, %v10440_v53  ;;  %v10721_v16 = vadd.f32 %v10061_v51, %v2635_v29 }
 0x2e4   : > { %13903 = vst [vmem:[#allocation14_spill] sm:$0xff] %v10711_v10  ;;  %v10723_v37 = vpop.permute.xlu0 %3785  ;;  %v10727_v26 = vmul.f32 %v9924_v12, %v4521_v59  ;;  %v4524_v14 = vmul.f32 %v10471_v45, %v4521_v59  ;;  %v4490_v57 = vsel %vm562_vm0, %v4487_v2, %v4489_v60  ;;  %v4508_v20 = vrot.slane %v4502_v30, 1 }
 0x2e5   : > { %13905 = vst [vmem:[#allocation15_spill] sm:$0xff] %v10723_v37  ;;  %4472 = vrot.lane.b32.xlu1 %v4469_v34, %s7181_s16  ;;  %v4510_v54 = vrot.slane %v4503_v22, 1  ;;  %v4542_v58 = vstv %s10676_s26  ;;  %v10735_v51 = vsel %vm1035_vm1, %v3528_v7, %v3530_v17  ;;  %v3527_v53 = vrot.slane %v3521_v1, 2  ;;  %v13907_v1 = vld [vmem:[#allocation52_spill] sm:$0xff]  ;;  %s10985_s26 = sld [smem:[#allocation3 + $0x1b]] }
 0x2e6   : > { %v10738_v29 = vmul.f32 %v9981_v31, %v3537_v18  ;;  %v3540_v12 = vmul.f32 %v10524_v44, %v3537_v18  ;;  %4470 = vrot.lane.b32.xlu0 %v4467_v63, %s7181_s16  ;;  %v10745_v60 = vmul.f32 %v9997_v40, %v3537_v18  ;;  %v4488_v30 = vsel %vm562_vm0, %v4486_v33, %v4487_v2 }
 0x2e7   : > { %v10742_v34 = vpop.permute.xlu1 %3808  ;;  %v4507_v22 = vrot.slane %v4501_v49, 1  ;;  %v4522_v17 = vmul.f32 %v9949_v62, %v4521_v59  ;;  %v2656_v61 = vadd.f32 %v13907_v1, %v10461_v32  ;;  %v4529_v63 = vrot.slane %v10727_v26, 1  ;;  %v13910_v26 = vld [vmem:[#allocation53_spill] sm:$0xff]  ;;  %v10781_v1 = vld [vmem:[%s7328_s14 + $0x48] sm:$0xff] }
 0x2e8   : > { %13906 = vst [vmem:[#allocation16_spill] sm:$0xff] %v10742_v34  ;;  %v10751_v31 = vpop.permute.xlu0 %3806  ;;  %v4531_v52 = vrot.slane %v4524_v14, 1  ;;  %v10756_v34 = vld [vmem:[%s7328_s14 + $0x50] sm:$0xff]  ;;  %v10760_v2 = vadd.f32 %v10069_v21, %v2634_v23  ;;  %v3554_v62 = vstv %s10698_s27  ;;  %v4511_v32 = vsel %vm562_vm0, %v4508_v20, %v4510_v54  ;;  %s11004_s27 = sld [smem:[#allocation3 + $0xd6]] }
 0x2e9   : > { %13908 = vst [vmem:[#allocation17_spill] sm:$0xff] %v10751_v31  ;;  %4493 = vrot.lane.b32.xlu1 %v4490_v57, %s7181_s16  ;;  %v4544_v40 = vmul.f32 %v10756_v34, %v4542_v58  ;;  %v4545_v59 = vmul.f32 %v10471_v45, %v4542_v58  ;;  %v10768_v18 = vsel %vm1035_vm1, %v3527_v53, %v3528_v7  ;;  %v3545_v33 = vrot.slane %v10738_v29, 2  ;;  %v10785_v53 = vld [vmem:[%s7328_s14 + $0x38] sm:$0xff] }
 0x2ea   : > { %v3547_v49 = vrot.slane %v3540_v12, 2  ;;  %4491 = vrot.lane.b32.xlu0 %v4488_v30, %s7181_s16  ;;  %v4563_v23 = vstv %s10713_s7  ;;  %v2655_v14 = vadd.f32 %v13910_v26, %v10475_v0  ;;  %v4509_v57 = vsel %vm562_vm0, %v4507_v22, %v4508_v20  ;;  %s11026_s7 = sld [smem:[#allocation3 + $0x48]] }
 0x2eb   : > { %v10774_v21 = vpop.permute.xlu1 %3829  ;;  %v4528_v54 = vrot.slane %v4522_v17, 1  ;;  %v4543_v7 = vmul.f32 %v10781_v1, %v4542_v58  ;;  %v10788_v29 = vmul.f32 %v10785_v53, %v3554_v62  ;;  %v3557_v12 = vmul.f32 %v10524_v44, %v3554_v62 }
 0x2ec   : > { %13909 = vst [vmem:[#allocation18_spill] sm:$0xff] %v10774_v21  ;;  %v10791_v30 = vpop.permute.xlu0 %3827  ;;  %v4532_v0 = vsel %vm562_vm0, %v4529_v63, %v4531_v52  ;;  %v4550_v20 = vrot.slane %v4544_v40, 1  ;;  %v4552_v22 = vrot.slane %v4545_v59, 1  ;;  %v4565_v17 = vmul.f32 %v10756_v34, %v4563_v23  ;;  %v13913_v40 = vld [vmem:[#allocation55_spill] sm:$0xff] }
 0x2ed   : > { %13911 = vst [vmem:[#allocation19_spill] sm:$0xff] %v10791_v30  ;;  %4514 = vrot.lane.b32.xlu1 %v4511_v32, %s7181_s16  ;;  %v4566_v26 = vmul.f32 %v10471_v45, %v4563_v23  ;;  %v4584_v58 = vstv %s10732_s8  ;;  %v10799_v21 = vadd.f32 %v10082_v19, %v2656_v61  ;;  %v10802_v31 = vsel %vm1035_vm1, %v3545_v33, %v3547_v49  ;;  %v10806_v30 = vld [vmem:[%s7328_s14 + $0x30] sm:$0xff]  ;;  %s11045_s8 = sld [smem:[#allocation3 + $0x103]] }
 0x2ee   : > { %v3544_v37 = vrot.slane %v10745_v60, 2  ;;  %v3555_v32 = vmul.f32 %v10806_v30, %v3554_v62  ;;  %4512 = vrot.lane.b32.xlu0 %v4509_v57, %s7181_s16  ;;  %v2677_v19 = vadd.f32 %v13913_v40, %v10490_v47  ;;  %v4530_v61 = vsel %vm562_vm0, %v4528_v54, %v4529_v63 }
 0x2ef   : > { %v10810_v52 = vpop.permute.xlu1 %3850  ;;  %v4549_v59 = vrot.slane %v4543_v7, 1  ;;  %v4564_v60 = vmul.f32 %v10781_v1, %v4563_v23  ;;  %v3562_v62 = vrot.slane %v10788_v29, 2  ;;  %v3564_v49 = vrot.slane %v3557_v12, 2  ;;  %v13915_v23 = vld [vmem:[#allocation57_spill] sm:$0xff] }
 0x2f0   : > { %13912 = vst [vmem:[#allocation153_spill] sm:$0xff] %v10810_v52  ;;  %v10821_v57 = vpop.permute.xlu0 %3848  ;;  %v4586_v52 = vmul.f32 %v10756_v34, %v4584_v58  ;;  %v4587_v10 = vmul.f32 %v10471_v45, %v4584_v58  ;;  %v4553_v47 = vsel %vm562_vm0, %v4550_v20, %v4552_v22  ;;  %v4571_v40 = vrot.slane %v4565_v17, 1 }
 0x2f1   : > { %13914 = vst [vmem:[#allocation24_spill] sm:$0xff] %v10821_v57  ;;  %4535 = vrot.lane.b32.xlu1 %v4532_v0, %s7182_s9  ;;  %v4573_v11 = vrot.slane %v4566_v26, 1  ;;  %v4605_v63 = vstv %s10765_s6  ;;  %v2676_v54 = vadd.f32 %v13915_v23, %v10501_v38  ;;  %v10833_v7 = vadd.f32 %v10099_v42, %v2655_v14  ;;  %s11060_s6 = sld [smem:[#allocation3 + $0x75]] }
 0x2f2   : > { %v10836_v29 = vsel %vm1035_vm1, %v3544_v37, %v3545_v33  ;;  %v3571_v12 = vstv %s10771_s10  ;;  %4533 = vrot.lane.b32.xlu0 %v4530_v61, %s7182_s9  ;;  %v10843_v22 = vadd.f32 %v10105_v24, %v2677_v19  ;;  %v4551_v17 = vsel %vm562_vm0, %v4549_v59, %v4550_v20  ;;  %s11091_s10 = sld [smem:[#allocation3 + $0x130]] }
 0x2f3   : > { %v10840_v0 = vpop.permute.xlu1 %3871  ;;  %v4570_v26 = vrot.slane %v4564_v60, 1  ;;  %v4585_v57 = vmul.f32 %v10781_v1, %v4584_v58  ;;  %v3561_v38 = vrot.slane %v3555_v32, 2  ;;  %v4592_v37 = vrot.slane %v4586_v52, 1  ;;  %v13919_v32 = vld [vmem:[#allocation58_spill] sm:$0xff] }
 0x2f4   : > { %13916 = vst [vmem:[#allocation154_spill] sm:$0xff] %v10840_v0  ;;  %v10847_v42 = vpop.permute.xlu0 %3869  ;;  %v4594_v33 = vrot.slane %v4587_v10, 1  ;;  %v4607_v14 = vmul.f32 %v10756_v34, %v4605_v63  ;;  %v10852_v61 = vsel %vm1035_vm1, %v3562_v62, %v3564_v49  ;;  %v10855_v24 = vmul.f32 %v10785_v53, %v3571_v12 }
 0x2f5   : > { %13917 = vst [vmem:[#allocation27_spill] sm:$0xff] %v10847_v42  ;;  %4556 = vrot.lane.b32.xlu1 %v4553_v47, %s7182_s9  ;;  %13918 = vst [vmem:[#allocation132_spill] sm:$0xff] %v10852_v61  ;;  %v4574_v20 = vsel %vm562_vm0, %v4571_v40, %v4573_v11  ;;  %v4608_v58 = vmul.f32 %v10471_v45, %v4605_v63  ;;  %v2698_v19 = vadd.f32 %v13919_v32, %v10513_v4  ;;  %v13921_v42 = vld [vmem:[#allocation110_spill] sm:$0xff] }
 0x2f6   : > { %v3574_v52 = vmul.f32 %v10524_v44, %v3571_v12  ;;  %v10865_v10 = vmul.f32 %v10806_v30, %v3571_v12  ;;  %4554 = vrot.lane.b32.xlu0 %v4551_v17, %s7182_s9  ;;  %v4626_v60 = vstv %s10812_s11  ;;  %v3588_v49 = vstv %s10816_s12  ;;  %s11094_s11 = sld [smem:[#allocation3 + $0xa2]] }
 0x2f7   : > { %v10868_v59 = vpop.permute.xlu1 %3892  ;;  %v4572_v11 = vsel %vm562_vm0, %v4570_v26, %v4571_v40  ;;  %v4591_v47 = vrot.slane %v4585_v57, 1  ;;  %v4606_v23 = vmul.f32 %v10781_v1, %v4605_v63  ;;  %v10875_v0 = vadd.f32 %v13921_v42, %v2676_v54  ;;  %v13925_v42 = vld [vmem:[#allocation59_spill] sm:$0xff]  ;;  %s11109_s12 = sld [smem:[#allocation3 + $0x15d]] }
 0x2f8   : > { %13920 = vst [vmem:[#allocation134_spill] sm:$0xff] %v10868_v59  ;;  %v10878_v4 = vsel %vm1035_vm1, %v3561_v38, %v3562_v62  ;;  %v10880_v12 = vpop.permute.xlu0 %3890  ;;  %v4595_v17 = vsel %vm562_vm0, %v4592_v37, %v4594_v33  ;;  %v4613_v32 = vrot.slane %v4607_v14, 1  ;;  %v4615_v59 = vrot.slane %v4608_v58, 1  ;;  %v13926_v58 = vld [vmem:[#allocation103_spill] sm:$0xff] }
 0x2f9   : > { %13922 = vst [vmem:[#allocation135_spill] sm:$0xff] %v10878_v4  ;;  %13923 = vst [vmem:[#allocation156_spill] sm:$0xff] %v10880_v12  ;;  %4577 = vrot.lane.b32.xlu1 %v4574_v20, %s7182_s9  ;;  %v4628_v61 = vmul.f32 %v10756_v34, %v4626_v60  ;;  %v4629_v57 = vmul.f32 %v10471_v45, %v4626_v60  ;;  %v4647_v40 = vstv %s10828_s13  ;;  %v3579_v63 = vrot.slane %v10855_v24, 2  ;;  %s11122_s13 = sld [smem:[#allocation3 + $0xcf]] }
 0x2fa   : > { %v3581_v54 = vrot.slane %v3574_v52, 2  ;;  %v3590_v26 = vmul.f32 %v10785_v53, %v3588_v49  ;;  %v3591_v62 = vmul.f32 %v10524_v44, %v3588_v49  ;;  %4575 = vrot.lane.b32.xlu0 %v4572_v11, %s7182_s9  ;;  %v2697_v33 = vadd.f32 %v13925_v42, %v10536_v46 }
 0x2fb   : > { %v10891_v38 = vpop.permute.xlu1 %3913  ;;  %v4593_v14 = vsel %vm562_vm0, %v4591_v47, %v4592_v37  ;;  %v4612_v20 = vrot.slane %v4606_v23, 1  ;;  %v4627_v24 = vmul.f32 %v10781_v1, %v4626_v60  ;;  %v10900_v52 = vadd.f32 %v13926_v58, %v2698_v19  ;;  %v13928_v19 = vld [vmem:[#allocation61_spill] sm:$0xff]  ;;  %v13930_v58 = vld [vmem:[#allocation62_spill] sm:$0xff] }
 0x2fc   : > { %13924 = vst [vmem:[#allocation20_spill] sm:$0xff] %v10891_v38  ;;  %v3589_v44 = vmul.f32 %v10806_v30, %v3588_v49  ;;  %v10903_v53 = vpop.permute.xlu0 %3911  ;;  %v4649_v11 = vmul.f32 %v10756_v34, %v4647_v40  ;;  %v4650_v38 = vmul.f32 %v10471_v45, %v4647_v40  ;;  %v4616_v46 = vsel %vm562_vm0, %v4613_v32, %v4615_v59 }
 0x2fd   : > { %13927 = vst [vmem:[#allocation21_spill] sm:$0xff] %v10903_v53  ;;  %4598 = vrot.lane.b32.xlu1 %v4595_v17, %s7182_s9  ;;  %v4634_v42 = vrot.slane %v4628_v61, 1  ;;  %v4636_v37 = vrot.slane %v4629_v57, 1  ;;  %v4668_v47 = vstv %s10859_s15  ;;  %v2719_v60 = vadd.f32 %v13928_v19, %v10549_v55  ;;  %s11144_s15 = sld [smem:[#allocation3 + $0x23]] }
 0x2fe   : > { %v3578_v30 = vrot.slane %v10865_v10, 2  ;;  %v3596_v49 = vrot.slane %v3590_v26, 2  ;;  %v3598_v23 = vrot.slane %v3591_v62, 2  ;;  %4596 = vrot.lane.b32.xlu0 %v4593_v14, %s7182_s9  ;;  %v2718_v53 = vadd.f32 %v13930_v58, %v10566_v56  ;;  %v13932_v62 = vld [vmem:[#allocation104_spill] sm:$0xff] }
 0x2ff   : > { %v10916_v17 = vpop.permute.xlu1 %3934  ;;  %v4614_v61 = vsel %vm562_vm0, %v4612_v20, %v4613_v32  ;;  %v4633_v59 = vrot.slane %v4627_v24, 1  ;;  %v4648_v57 = vmul.f32 %v10781_v1, %v4647_v40  ;;  %v3595_v12 = vrot.slane %v3589_v44, 2  ;;  %v13933_v20 = vld [vmem:[#allocation105_spill] sm:$0xff]  ;;  %v13936_v58 = vld [vmem:[#allocation112_spill] sm:$0xff] }
 0x300   : > { %13929 = vst [vmem:[#allocation137_spill] sm:$0xff] %v10916_v17  ;;  %v10922_v4 = vpop.permute.xlu0 %3932  ;;  %v4655_v55 = vrot.slane %v4649_v11, 1  ;;  %v4657_v10 = vrot.slane %v4650_v38, 1  ;;  %v4670_v26 = vmul.f32 %v10756_v34, %v4668_v47  ;;  %v10927_v14 = vadd.f32 %v13932_v62, %v2697_v33  ;;  %v13935_v11 = vld [vmem:[#allocation64_spill] sm:$0xff] }
 0x301   : > { %13931 = vst [vmem:[#allocation23_spill] sm:$0xff] %v10922_v4  ;;  %4619 = vrot.lane.b32.xlu1 %v4616_v46, %s7182_s9  ;;  %v10930_v56 = vsel %vm1035_vm1, %v3579_v63, %v3581_v54  ;;  %v4637_v32 = vsel %vm562_vm0, %v4634_v42, %v4636_v37  ;;  %v4671_v40 = vmul.f32 %v10471_v45, %v4668_v47  ;;  %v4825_v33 = vstv %s10893_s17  ;;  %s11155_s17 = sld [smem:[#allocation3 + $0xfc]] }
 0x302   : > { %v10937_v24 = vadd.f32 %v13933_v20, %v2719_v60  ;;  %v10940_v44 = vsel %vm1035_vm1, %v3578_v30, %v3579_v63  ;;  %v10943_v38 = vsel %vm1035_vm1, %v3596_v49, %v3598_v23  ;;  %4617 = vrot.lane.b32.xlu0 %v4614_v61, %s7182_s9  ;;  %v2785_v46 = vadd.f32 %v13935_v11, %v10571_v8 }
 0x303   : > { %v10946_v54 = vpop.permute.xlu1 %4000  ;;  %v4635_v37 = vsel %vm562_vm0, %v4633_v59, %v4634_v42  ;;  %v4654_v19 = vrot.slane %v4648_v57, 1  ;;  %v4669_v60 = vmul.f32 %v10781_v1, %v4668_v47  ;;  %v2770_v63 = vadd.f32 %v13936_v58, %v2718_v53  ;;  %v13938_v47 = vld [vmem:[#allocation65_spill] sm:$0xff]  ;;  %v13939_v53 = vld [vmem:[#allocation66_spill] sm:$0xff] }
 0x304   : > { %13934 = vst [vmem:[#allocation26_spill] sm:$0xff] %v10946_v54  ;;  %v10955_v30 = vsel %vm1035_vm1, %v3595_v12, %v3596_v49  ;;  %v10957_v23 = vpop.permute.xlu0 %3998  ;;  %v4658_v61 = vsel %vm562_vm0, %v4655_v55, %v4657_v10  ;;  %v4676_v62 = vrot.slane %v4670_v26, 1  ;;  %v4678_v20 = vrot.slane %v4671_v40, 1  ;;  %v13940_v49 = vld [vmem:[#allocation67_spill] sm:$0xff] }
 0x305   : > { %13937 = vst [vmem:[#allocation29_spill] sm:$0xff] %v10957_v23  ;;  %4640 = vrot.lane.b32.xlu1 %v4637_v32, %s7182_s9  ;;  %v4827_v8 = vmul.f32 %v10756_v34, %v4825_v33  ;;  %v4828_v42 = vmul.f32 %v10471_v45, %v4825_v33  ;;  %v4846_v59 = vstv %s10910_s18  ;;  %v2784_v57 = vadd.f32 %v13938_v47, %v10597_v5  ;;  %v13941_v32 = vld [vmem:[#allocation68_spill] sm:$0xff]  ;;  %v13943_v5 = vld [vmem:[#allocation69_spill] sm:$0xff]  ;;  %s11188_s18 = sld [smem:[#allocation3 + $0x50]] }
 0x306   : > { %v2799_v12 = vadd.f32 %v13939_v53, %v10622_v15  ;;  %v10970_v11 = vadd.f32 %v13940_v49, %v10650_v3  ;;  %v10974_v10 = vadd.f32 %v13941_v32, %v10672_v48  ;;  %4638 = vrot.lane.b32.xlu0 %v4635_v37, %s7182_s9  ;;  %v10983_v40 = vadd.f32 %v13943_v5, %v10704_v36  ;;  %v13944_v48 = vld [vmem:[#allocation72_spill] sm:$0xff]  ;;  %v13945_v37 = vld [vmem:[#allocation74_spill] sm:$0xff] }
 0x307   : > { %v10977_v26 = vpop.permute.xlu1 %4014  ;;  %v4656_v15 = vsel %vm562_vm0, %v4654_v19, %v4655_v55  ;;  %v4675_v3 = vrot.slane %v4669_v60, 1  ;;  %v4826_v58 = vmul.f32 %v10781_v1, %v4825_v33  ;;  %v10991_v47 = vadd.f32 %v13944_v48, %v10721_v16  ;;  %v13947_v16 = vld [vmem:[#allocation75_spill] sm:$0xff] }
 0x308   : > { %13942 = vst [vmem:[#allocation31_spill] sm:$0xff] %v10977_v26  ;;  %v10995_v53 = vadd.f32 %v13945_v37, %v10760_v2  ;;  %v10997_v49 = vpop.permute.xlu0 %4012  ;;  %v4848_v36 = vmul.f32 %v10756_v34, %v4846_v59  ;;  %v4849_v32 = vmul.f32 %v10471_v45, %v4846_v59  ;;  %v4679_v55 = vsel %vm562_vm0, %v4676_v62, %v4678_v20  ;;  %v13948_v2 = vld [vmem:[#allocation76_spill] sm:$0xff] }
 0x309   : > { %13946 = vst [vmem:[#allocation32_spill] sm:$0xff] %v10997_v49  ;;  %4661 = vrot.lane.b32.xlu1 %v4658_v61, %s7182_s9  ;;  %v4833_v19 = vrot.slane %v4827_v8, 2  ;;  %v4835_v33 = vrot.slane %v4828_v42, 2  ;;  %v4867_v60 = vstv %s10934_s19  ;;  %v11008_v5 = vadd.f32 %v13947_v16, %v10799_v21  ;;  %v13949_v61 = vld [vmem:[#allocation77_spill] sm:$0xff]  ;;  %v13950_v49 = vld [vmem:[#allocation78_spill] sm:$0xff]  ;;  %v13952_v42 = vld [vmem:[#allocation83_spill] sm:$0xff] }
 0x30a   : > { %v11012_v48 = vadd.f32 %v13948_v2, %v10833_v7  ;;  %v11016_v37 = vadd.f32 %v13949_v61, %v10843_v22  ;;  %v11020_v20 = vadd.f32 %v13950_v49, %v10875_v0  ;;  %4659 = vrot.lane.b32.xlu0 %v4656_v15, %s7182_s9  ;;  %v2897_v26 = vadd.f32 %v13952_v42, %v2785_v46  ;;  %v13953_v2 = vld [vmem:[#allocation84_spill] sm:$0xff]  ;;  %v13955_v46 = vld [vmem:[#allocation79_spill] sm:$0xff]  ;;  %s11192_s19 = sld [smem:[#allocation3 + $0x129]] }
 0x30b   : > { %v11023_v8 = vpop.permute.xlu1 %4028  ;;  %v4677_v21 = vsel %vm562_vm0, %v4675_v3, %v4676_v62  ;;  %v4832_v7 = vrot.slane %v4826_v58, 2  ;;  %v4847_v16 = vmul.f32 %v10781_v1, %v4846_v59  ;;  %v2896_v22 = vadd.f32 %v13953_v2, %v2784_v57  ;;  %v13956_v62 = vld [vmem:[#allocation80_spill] sm:$0xff]  ;;  %v13957_v58 = vld [vmem:[#allocation81_spill] sm:$0xff] }
 0x30c   : > { %13951 = vst [vmem:[#allocation35_spill] sm:$0xff] %v11023_v8  ;;  %v11031_v61 = vpop.permute.xlu0 %4026  ;;  %v4854_v0 = vrot.slane %v4848_v36, 2  ;;  %v4856_v15 = vrot.slane %v4849_v32, 2  ;;  %v4869_v49 = vmul.f32 %v10756_v34, %v4867_v60  ;;  %v11037_v42 = vadd.f32 %v13955_v46, %v10900_v52  ;;  %v13958_v32 = vld [vmem:[#allocation82_spill] sm:$0xff]  ;;  %v13959_v2 = vld [vmem:[#allocation85_spill] sm:$0xff] }
 0x30d   : > { %13954 = vst [vmem:[#allocation117_spill] sm:$0xff] %v11031_v61  ;;  %4682 = vrot.lane.b32.xlu1 %v4679_v55, %s7182_s9  ;;  %v11041_v3 = vadd.f32 %v13956_v62, %v10927_v14  ;;  %v4836_v59 = vsel %vm1035_vm1, %v4833_v19, %v4835_v33  ;;  %v4870_v57 = vmul.f32 %v10471_v45, %v4867_v60  ;;  %v4888_v14 = vstv %s10979_s24  ;;  %s11208_s24 = sld [smem:[#allocation3 + $0x7d]] }
 0x30e   : > { %v11049_v36 = vadd.f32 %v13957_v58, %v10937_v24  ;;  %v11052_v55 = vadd.f32 %v13958_v32, %v2770_v63  ;;  %v2911_v52 = vadd.f32 %v13959_v2, %v2799_v12  ;;  %4680 = vrot.lane.b32.xlu0 %v4677_v21, %s7182_s9  ;;  %v3945_v33 = vstv %s10985_s26  ;;  %s11226_s26 = sld [smem:[#allocation3 + $0x156]] }
 0x30f   : > { %v11056_v46 = vpop.permute.xlu1 %4042  ;;  %v4834_v62 = vsel %vm1035_vm1, %v4832_v7, %v4833_v19  ;;  %v4853_v61 = vrot.slane %v4847_v16, 2  ;;  %v4868_v24 = vmul.f32 %v10781_v1, %v4867_v60  ;;  %v11065_v58 = vadd.f32 %v10244_v43, %v2897_v26  ;;  %v13962_v43 = vld [vmem:[#allocation86_spill] sm:$0xff] }
 0x310   : > { %13960 = vst [vmem:[#allocation36_spill] sm:$0xff] %v11056_v46  ;;  %v11068_v63 = vadd.f32 %v10259_v9, %v2896_v22  ;;  %v11070_v12 = vpop.permute.xlu0 %4040  ;;  %v4857_v21 = vsel %vm1035_vm1, %v4854_v0, %v4856_v15  ;;  %v4875_v32 = vrot.slane %v4869_v49, 2  ;;  %v4877_v2 = vrot.slane %v4870_v57, 2  ;;  %v13964_v57 = vld [vmem:[#allocation22_spill] sm:$0xff] }
 0x311   : > { %13961 = vst [vmem:[#allocation115_spill] sm:$0xff] %v11070_v12  ;;  %4839 = vrot.lane.b32.xlu1 %v4836_v59, %s7181_s16  ;;  %v4890_v19 = vmul.f32 %v10756_v34, %v4888_v14  ;;  %v4891_v7 = vmul.f32 %v10471_v45, %v4888_v14  ;;  %v4909_v60 = vstv %s11004_s27  ;;  %v2910_v26 = vadd.f32 %v13962_v43, %v10970_v11  ;;  %s11247_s27 = sld [smem:[#allocation3 + $0xaa]] }
 0x312   : > { %v11080_v9 = vadd.f32 %v10279_v35, %v2911_v52  ;;  %v11083_v16 = vmul.f32 %v10756_v34, %v3945_v33  ;;  %v11086_v22 = vmul.f32 %v10781_v1, %v3945_v33  ;;  %4837 = vrot.lane.b32.xlu0 %v4834_v62, %s7181_s16  ;;  %v3951_v49 = vstv %s11026_s7  ;;  %v13965_v33 = vld [vmem:[#allocation87_spill] sm:$0xff]  ;;  %s11290_s7 = sld [smem:[#allocation3 + $0xd7]] }
 0x313   : > { %v11089_v15 = vpop.permute.xlu1 %4056  ;;  %v4855_v11 = vsel %vm1035_vm1, %v4853_v61, %v4854_v0  ;;  %v4874_v35 = vrot.slane %v4868_v24, 2  ;;  %v4889_v59 = vmul.f32 %v10781_v1, %v4888_v14  ;;  %v2925_v52 = vadd.f32 %v13964_v57, %v10974_v10  ;;  %v13967_v10 = vld [vmem:[#allocation155_spill] sm:$0xff] }
 0x314   : > { %13963 = vst [vmem:[#allocation37_spill] sm:$0xff] %v11089_v15  ;;  %v2924_v43 = vadd.f32 %v13965_v33, %v10983_v40  ;;  %v11102_v62 = vpop.permute.xlu0 %4054  ;;  %v4911_v15 = vmul.f32 %v10756_v34, %v4909_v60  ;;  %v4912_v12 = vmul.f32 %v10471_v45, %v4909_v60  ;;  %v4878_v61 = vsel %vm1035_vm1, %v4875_v32, %v4877_v2 }
 0x315   : > { %13966 = vst [vmem:[#allocation38_spill] sm:$0xff] %v11102_v62  ;;  %4860 = vrot.lane.b32.xlu1 %v4857_v21, %s7181_s16  ;;  %v4896_v0 = vrot.slane %v4890_v19, 2  ;;  %v4898_v24 = vrot.slane %v4891_v7, 2  ;;  %v4930_v14 = vstv %s11045_s8  ;;  %v2939_v57 = vadd.f32 %v13967_v10, %v10991_v47  ;;  %s11303_s8 = sld [smem:[#allocation3 + $0x1e]] }
 0x316   : > { %v11114_v40 = vadd.f32 %v10317_v39, %v2910_v26  ;;  %v11117_v33 = vmul.f32 %v10756_v34, %v3951_v49  ;;  %v11120_v21 = vmul.f32 %v10781_v1, %v3951_v49  ;;  %4858 = vrot.lane.b32.xlu0 %v4855_v11, %s7181_s16  ;;  %v3957_v19 = vstv %s11060_s6  ;;  %v13969_v39 = vld [vmem:[#allocation88_spill] sm:$0xff]  ;;  %s11307_s6 = sld [smem:[#allocation3 + $0x104]] }
 0x317   : > { %v11125_v2 = vpop.permute.xlu1 %4070  ;;  %v4876_v7 = vsel %vm1035_vm1, %v4874_v35, %v4875_v32  ;;  %v4895_v62 = vrot.slane %v4889_v59, 2  ;;  %v4910_v47 = vmul.f32 %v10781_v1, %v4909_v60  ;;  %v2938_v26 = vadd.f32 %v13969_v39, %v10995_v53  ;;  %v13971_v35 = vld [vmem:[#allocation123_spill] sm:$0xff] }
 0x318   : > { %13968 = vst [vmem:[#allocation39_spill] sm:$0xff] %v11125_v2  ;;  %v11132_v10 = vpop.permute.xlu0 %4068  ;;  %v4917_v49 = vrot.slane %v4911_v15, 2  ;;  %v4919_v46 = vrot.slane %v4912_v12, 2  ;;  %v4932_v11 = vmul.f32 %v10756_v34, %v4930_v14  ;;  %v11137_v2 = vadd.f32 %v10339_v25, %v2925_v52 }
 0x319   : > { %13970 = vst [vmem:[#allocation40_spill] sm:$0xff] %v11132_v10  ;;  %4881 = vrot.lane.b32.xlu1 %v4878_v61, %s7181_s16  ;;  %v11140_v32 = vadd.f32 %v10362_v6, %v2924_v43  ;;  %v4899_v60 = vsel %vm1035_vm1, %v4896_v0, %v4898_v24  ;;  %v4933_v53 = vmul.f32 %v10471_v45, %v4930_v14  ;;  %v4951_v6 = vstv %s11091_s10  ;;  %s11362_s10 = sld [smem:[#allocation3 + $0x131]] }
 0x31a   : > { %v11147_v59 = vadd.f32 %v13971_v35, %v2939_v57  ;;  %v11150_v15 = vmul.f32 %v10756_v34, %v3957_v19  ;;  %v11153_v12 = vmul.f32 %v10781_v1, %v3957_v19  ;;  %4879 = vrot.lane.b32.xlu0 %v4876_v7, %s7181_s16  ;;  %v3963_v52 = vstv %s11094_s11  ;;  %v13973_v57 = vld [vmem:[#allocation25_spill] sm:$0xff]  ;;  %v13974_v19 = vld [vmem:[#allocation128_spill] sm:$0xff]  ;;  %s11370_s11 = sld [smem:[#allocation3 + $0x4b]] }
 0x31b   : > { %v11158_v25 = vpop.permute.xlu1 %4084  ;;  %v4897_v43 = vsel %vm1035_vm1, %v4895_v62, %v4896_v0  ;;  %v4916_v61 = vrot.slane %v4910_v47, 2  ;;  %v4931_v24 = vmul.f32 %v10781_v1, %v4930_v14  ;;  %v2953_v39 = vadd.f32 %v13973_v57, %v11008_v5  ;;  %v13976_v14 = vld [vmem:[#allocation89_spill] sm:$0xff] }
 0x31c   : > { %13972 = vst [vmem:[#allocation41_spill] sm:$0xff] %v11158_v25  ;;  %v11167_v35 = vadd.f32 %v13974_v19, %v2938_v26  ;;  %v11169_v10 = vpop.permute.xlu0 %4082  ;;  %v4920_v7 = vsel %vm1035_vm1, %v4917_v49, %v4919_v46  ;;  %v4938_v25 = vrot.slane %v4932_v11, 2  ;;  %v4940_v8 = vrot.slane %v4933_v53, 2  ;;  %v13980_v11 = vld [vmem:[#allocation157_spill] sm:$0xff]  ;;  %v13981_v19 = vld [vmem:[#allocation90_spill] sm:$0xff] }
 0x31d   : > { %13975 = vst [vmem:[#allocation44_spill] sm:$0xff] %v11169_v10  ;;  %4902 = vrot.lane.b32.xlu1 %v4899_v60, %s7181_s16  ;;  %v4953_v62 = vmul.f32 %v10756_v34, %v4951_v6  ;;  %v4954_v0 = vmul.f32 %v10471_v45, %v4951_v6  ;;  %v4972_v47 = vstv %s11109_s12  ;;  %v2952_v23 = vadd.f32 %v13976_v14, %v11012_v48  ;;  %s11400_s12 = sld [smem:[#allocation3 + $0x15e]] }
 0x31e   : > { %v11179_v5 = vmul.f32 %v10756_v34, %v3963_v52  ;;  %v11182_v26 = vmul.f32 %v10781_v1, %v3963_v52  ;;  %v3969_v57 = vstv %s11122_s13  ;;  %4900 = vrot.lane.b32.xlu0 %v4897_v43, %s7181_s16  ;;  %v2967_v60 = vadd.f32 %v13980_v11, %v11016_v37  ;;  %v13982_v43 = vld [vmem:[#allocation126_spill] sm:$0xff]  ;;  %s11430_s13 = sld [smem:[#allocation3 + $0x78]] }
 0x31f   : > { %v11186_v46 = vpop.permute.xlu1 %4098  ;;  %v4918_v48 = vsel %vm1035_vm1, %v4916_v61, %v4917_v49  ;;  %v4937_v53 = vrot.slane %v4931_v24, 2  ;;  %v4952_v52 = vmul.f32 %v10781_v1, %v4951_v6  ;;  %v2966_v14 = vadd.f32 %v13981_v19, %v11020_v20  ;;  %v13984_v6 = vld [vmem:[#allocation127_spill] sm:$0xff] }
 0x320   : > { %13977 = vst [vmem:[#allocation42_spill] sm:$0xff] %v11179_v5  ;;  %13978 = vst [vmem:[#allocation43_spill] sm:$0xff] %v11182_v26  ;;  %v11199_v10 = vadd.f32 %v13982_v43, %v2953_v39  ;;  %v4974_v37 = vmul.f32 %v10756_v34, %v4972_v47  ;;  %v4975_v11 = vmul.f32 %v10471_v45, %v4972_v47  ;;  %v4959_v61 = vrot.slane %v4953_v62, 2 }
 0x321   : > { %13979 = vst [vmem:[#allocation46_spill] sm:$0xff] %v11186_v46  ;;  %v11201_v46 = vpop.permute.xlu0 %4096  ;;  %4923 = vrot.lane.b32.xlu1 %v4920_v7, %s7181_s16  ;;  %v4941_v49 = vsel %vm1035_vm1, %v4938_v25, %v4940_v8  ;;  %v4961_v24 = vrot.slane %v4954_v0, 2  ;;  %v4993_v54 = vstv %s11144_s15  ;;  %v11211_v20 = vadd.f32 %v13984_v6, %v2952_v23  ;;  %v13988_v8 = vld [vmem:[#allocation70_spill] sm:$0xff]  ;;  %v13989_v6 = vld [vmem:[#allocation28_spill] sm:$0xff]  ;;  %s11466_s15 = sld [smem:[#allocation3 + $0xa5]] }
 0x322   : > { %13983 = vst [vmem:[#allocation45_spill] sm:$0xff] %v11201_v46  ;;  %v11214_v39 = vmul.f32 %v10756_v34, %v3969_v57  ;;  %v11217_v19 = vmul.f32 %v10781_v1, %v3969_v57  ;;  %v3975_v7 = vstv %s11155_s17  ;;  %4921 = vrot.lane.b32.xlu0 %v4918_v48, %s7181_s16  ;;  %v11224_v62 = vadd.f32 %v13988_v8, %v2967_v60  ;;  %v13991_v8 = vld [vmem:[#allocation71_spill] sm:$0xff]  ;;  %s11470_s17 = sld [smem:[#allocation3 + $0x25]] }
 0x323   : > { %v11221_v45 = vpop.permute.xlu1 %4112  ;;  %v4939_v23 = vsel %vm1035_vm1, %v4937_v53, %v4938_v25  ;;  %v4958_v0 = vrot.slane %v4952_v52, 2  ;;  %v4973_v43 = vmul.f32 %v10781_v1, %v4972_v47  ;;  %v2981_v57 = vadd.f32 %v13989_v6, %v11037_v42  ;;  %v11244_v53 = vld [vmem:[%s7328_s14 + $0x58] sm:$0x3]  ;;  %v13993_v52 = vld [vmem:[#allocation91_spill] sm:$0xff] }
 0x324   : > { %13985 = vst [vmem:[#allocation47_spill] sm:$0xff] %v11214_v39  ;;  %13986 = vst [vmem:[#allocation48_spill] sm:$0xff] %v11217_v19  ;;  %v4980_v48 = vrot.slane %v4974_v37, 2  ;;  %v4995_v60 = vmul.f32 %v10756_v34, %v4993_v54  ;;  %v11237_v4 = vadd.f32 %v13991_v8, %v2966_v14  ;;  %v11240_v25 = vmul.f32 %v10756_v34, %v3975_v7  ;;  %v13998_v19 = vld [vmem:[#allocation130_spill] sm:$0xff] }
 0x325   : > { %13987 = vst [vmem:[#allocation49_spill] sm:$0xff] %v11221_v45  ;;  %v11232_v46 = vpop.permute.xlu0 %4110  ;;  %4944 = vrot.lane.b32.xlu1 %v4941_v49, %s7181_s16  ;;  %v4982_v45 = vrot.slane %v4975_v11, 2  ;;  %v4962_v47 = vsel %vm1035_vm1, %v4959_v61, %v4961_v24  ;;  %v4996_v42 = vmul.f32 %v11244_v53, %v4993_v54  ;;  %v2980_v37 = vadd.f32 %v13993_v52, %v11041_v3  ;;  %v13994_v11 = vld [vmem:[#allocation141_spill] sm:$0xff]  ;;  %v13997_v3 = vld [vmem:[#allocation92_spill] sm:$0xff] }
 0x326   : > { %13990 = vst [vmem:[#allocation50_spill] sm:$0xff] %v11232_v46  ;;  %13992 = vst [vmem:[#allocation51_spill] sm:$0xff] %v11240_v25  ;;  %v2995_v49 = vadd.f32 %v13994_v11, %v11049_v36  ;;  %v11254_v14 = vmul.f32 %v10781_v1, %v3975_v7  ;;  %4942 = vrot.lane.b32.xlu0 %v4939_v23, %s7181_s16  ;;  %v5014_v24 = vstv %s11188_s18  ;;  %v3981_v8 = vstv %s11192_s19  ;;  %s11498_s18 = sld [smem:[#allocation3 + $0x52]] }
 0x327   : > { %v11257_v6 = vpop.permute.xlu1 %4126  ;;  %v4960_v46 = vsel %vm1035_vm1, %v4958_v0, %v4959_v61  ;;  %v4979_v25 = vrot.slane %v4973_v43, 2  ;;  %v4994_v17 = vmul.f32 %v10781_v1, %v4993_v54  ;;  %v2994_v52 = vadd.f32 %v13997_v3, %v11052_v55  ;;  %v14000_v43 = vld [vmem:[#allocation131_spill] sm:$0xff]  ;;  %v14001_v55 = vld [vmem:[#allocation136_spill] sm:$0xff]  ;;  %v14005_v3 = vld [vmem:[#allocation93_spill] sm:$0xff]  ;;  %s11519_s19 = sld [smem:[#allocation3 + $0xd2]] }
 0x328   : > { %13995 = vst [vmem:[#allocation52_spill] sm:$0xff] %v11254_v14  ;;  %13996 = vst [vmem:[#allocation53_spill] sm:$0xff] %v11257_v6  ;;  %v11266_v36 = vadd.f32 %v13998_v19, %v2981_v57  ;;  %v4983_v23 = vsel %vm1035_vm1, %v4980_v48, %v4982_v45  ;;  %v5001_v11 = vrot.slane %v4995_v60, 2  ;;  %v5003_v6 = vrot.slane %v4996_v42, 2 }
 0x329   : > { %v11268_v7 = vpop.permute.xlu0 %4124  ;;  %4965 = vrot.lane.b32.xlu1 %v4962_v47, %s7181_s16  ;;  %v5016_v61 = vmul.f32 %v10756_v34, %v5014_v24  ;;  %v5017_v0 = vmul.f32 %v11244_v53, %v5014_v24  ;;  %v5035_v54 = vstv %s11208_s24  ;;  %v11276_v14 = vadd.f32 %v14000_v43, %v2980_v37  ;;  %s11541_s24 = sld [smem:[#allocation3 + $0x7f]] }
 0x32a   : > { %13999 = vst [vmem:[#allocation55_spill] sm:$0xff] %v11268_v7  ;;  %v11279_v19 = vadd.f32 %v14001_v55, %v2995_v49  ;;  %v11282_v57 = vmul.f32 %v10756_v34, %v3981_v8  ;;  %v11285_v47 = vmul.f32 %v10781_v1, %v3981_v8  ;;  %4963 = vrot.lane.b32.xlu0 %v4960_v46, %s7181_s16  ;;  %v3987_v60 = vstv %s11226_s26  ;;  %v14006_v55 = vld [vmem:[#allocation138_spill] sm:$0xff]  ;;  %s11554_s26 = sld [smem:[#allocation3 + $0xff]] }
 0x32b   : > { %v11288_v45 = vpop.permute.xlu1 %4140  ;;  %v4981_v42 = vsel %vm1035_vm1, %v4979_v25, %v4980_v48  ;;  %v5000_v37 = vrot.slane %v4994_v17, 2  ;;  %v5015_v49 = vmul.f32 %v10781_v1, %v5014_v24  ;;  %v3152_v43 = vadd.f32 %v14005_v3, %v11065_v58  ;;  %v14008_v58 = vld [vmem:[#allocation30_spill] sm:$0xff]  ;;  %v14009_v3 = vld [vmem:[#allocation33_spill] sm:$0xff] }
 0x32c   : > { %14002 = vst [vmem:[#allocation57_spill] sm:$0xff] %v11282_v57  ;;  %14003 = vst [vmem:[#allocation58_spill] sm:$0xff] %v11285_v47  ;;  %v3130_v7 = vadd.f32 %v14006_v55, %v2994_v52  ;;  %v5037_v46 = vmul.f32 %v10756_v34, %v5035_v54  ;;  %v5004_v48 = vsel %vm1035_vm1, %v5001_v11, %v5003_v6  ;;  %v5022_v17 = vrot.slane %v5016_v61, 2  ;;  %v14013_v61 = vld [vmem:[#allocation94_spill] sm:$0xff] }
 0x32d   : > { %14004 = vst [vmem:[#allocation110_spill] sm:$0xff] %v11288_v45  ;;  %v11298_v8 = vpop.permute.xlu0 %4138  ;;  %4986 = vrot.lane.b32.xlu1 %v4983_v23, %s7181_s16  ;;  %v5038_v45 = vmul.f32 %v11244_v53, %v5035_v54  ;;  %v5024_v25 = vrot.slane %v5017_v0, 2  ;;  %v5056_v24 = vstv %s11247_s27  ;;  %v3151_v52 = vadd.f32 %v14008_v58, %v11068_v63  ;;  %s11577_s27 = sld [smem:[#allocation3 + $0x12c]] }
 0x32e   : > { %14007 = vst [vmem:[#allocation59_spill] sm:$0xff] %v11298_v8  ;;  %v3173_v55 = vadd.f32 %v14009_v3, %v11080_v9  ;;  %v11314_v23 = vmul.f32 %v10756_v34, %v3987_v60  ;;  %v11317_v8 = vmul.f32 %v10781_v1, %v3987_v60  ;;  %4984 = vrot.lane.b32.xlu0 %v4981_v42, %s7181_s16  ;;  %v5021_v63 = vrot.slane %v5015_v49, 2  ;;  %v14014_v9 = vld [vmem:[#allocation95_spill] sm:$0xff]  ;;  %v14018_v49 = vld [vmem:[#allocation97_spill] sm:$0xff] }
 0x32f   : > { %v11320_v6 = vpop.permute.xlu1 %4154  ;;  %v11324_v0 = vadd.f32 %v14013_v61, %v11114_v40  ;;  %v5002_v47 = vsel %vm1035_vm1, %v5000_v37, %v5001_v11  ;;  %v5036_v58 = vmul.f32 %v10781_v1, %v5035_v54  ;;  %v11330_v3 = vadd.f32 %v14014_v9, %v11137_v2  ;;  %v14016_v40 = vld [vmem:[#allocation34_spill] sm:$0xff]  ;;  %v14017_v11 = vld [vmem:[#allocation96_spill] sm:$0xff] }
 0x330   : > { %14010 = vst [vmem:[#allocation103_spill] sm:$0xff] %v11314_v23  ;;  %14011 = vst [vmem:[#allocation61_spill] sm:$0xff] %v11317_v8  ;;  %v5043_v42 = vrot.slane %v5037_v46, 2  ;;  %v5058_v8 = vmul.f32 %v10756_v34, %v5056_v24  ;;  %v11338_v61 = vadd.f32 %v14016_v40, %v11140_v32  ;;  %v11342_v54 = vadd.f32 %v14017_v11, %v11147_v59  ;;  %v14030_v23 = vld [vmem:[#allocation107_spill] sm:$0xff] }
 0x331   : > { %14012 = vst [vmem:[#allocation62_spill] sm:$0xff] %v11320_v6  ;;  %v11332_v60 = vpop.permute.xlu0 %4152  ;;  %5007 = vrot.lane.b32.xlu1 %v5004_v48, %s7182_s9  ;;  %v5045_v6 = vrot.slane %v5038_v45, 2  ;;  %v5025_v37 = vsel %vm1035_vm1, %v5022_v17, %v5024_v25  ;;  %v5059_v2 = vmul.f32 %v11244_v53, %v5056_v24  ;;  %v11348_v9 = vadd.f32 %v14018_v49, %v11167_v35  ;;  %v14019_v45 = vld [vmem:[#allocation98_spill] sm:$0xff]  ;;  %v14020_v48 = vld [vmem:[#allocation99_spill] sm:$0xff]  ;;  %v14022_v35 = vld [vmem:[#allocation100_spill] sm:$0xff] }
 0x332   : > { %14015 = vst [vmem:[#allocation104_spill] sm:$0xff] %v11332_v60  ;;  %v11352_v46 = vadd.f32 %v14019_v45, %v11199_v10  ;;  %v11356_v32 = vadd.f32 %v14020_v48, %v11211_v20  ;;  %5005 = vrot.lane.b32.xlu0 %v5002_v47, %s7182_s9  ;;  %v5077_v25 = vstv %s11290_s7  ;;  %v11366_v40 = vadd.f32 %v14022_v35, %v11224_v62  ;;  %v14023_v20 = vld [vmem:[#allocation101_spill] sm:$0xff]  ;;  %s11586_s7 = sld [smem:[#allocation3 + $0xac]] }
 0x333   : > { %v11359_v59 = vpop.permute.xlu1 %4168  ;;  %v5023_v10 = vsel %vm1035_vm1, %v5021_v63, %v5022_v17  ;;  %v5042_v11 = vrot.slane %v5036_v58, 2  ;;  %v5057_v49 = vmul.f32 %v10781_v1, %v5056_v24  ;;  %v11374_v47 = vadd.f32 %v14023_v20, %v11237_v4  ;;  %v14025_v58 = vld [vmem:[#allocation102_spill] sm:$0xff]  ;;  %v14026_v4 = vld [vmem:[#allocation111_spill] sm:$0xff] }
 0x334   : > { %14021 = vst [vmem:[#allocation105_spill] sm:$0xff] %v11359_v59  ;;  %v5046_v48 = vsel %vm1035_vm1, %v5043_v42, %v5045_v6  ;;  %v5064_v59 = vrot.slane %v5058_v8, 2  ;;  %v4217_v62 = vstv %s11303_s8  ;;  %v5066_v35 = vrot.slane %v5059_v2, 2  ;;  %v14028_v8 = vld [vmem:[#allocation108_spill] sm:$0xff]  ;;  %s11608_s8 = sld [smem:[#allocation3 + $0x159]] }
 0x335   : > { %v11376_v45 = vpop.permute.xlu0 %4166  ;;  %5028 = vrot.lane.b32.xlu1 %v5025_v37, %s7182_s9  ;;  %v5079_v17 = vmul.f32 %v10756_v34, %v5077_v25  ;;  %v5080_v63 = vmul.f32 %v11244_v53, %v5077_v25  ;;  %v5098_v24 = vstv %s11307_s6  ;;  %v11386_v60 = vadd.f32 %v14025_v58, %v11266_v36  ;;  %v14027_v37 = vld [vmem:[#allocation106_spill] sm:$0xff]  ;;  %s11625_s6 = sld [smem:[#allocation3 + $0xd9]] }
 0x336   : > { %14024 = vst [vmem:[#allocation64_spill] sm:$0xff] %v11376_v45  ;;  %v11390_v20 = vadd.f32 %v14026_v4, %v11276_v14  ;;  %v11394_v45 = vadd.f32 %v14027_v37, %v11279_v19  ;;  %v3320_v6 = vadd.f32 %v14028_v8, %v3152_v43  ;;  %5026 = vrot.lane.b32.xlu0 %v5023_v10, %s7182_s9  ;;  %v5063_v58 = vrot.slane %v5057_v49, 2  ;;  %v14033_v37 = vld [vmem:[#allocation113_spill] sm:$0xff] }
 0x337   : > { %v11398_v2 = vpop.permute.xlu1 %4182  ;;  %v11403_v57 = vadd.f32 %v14030_v23, %v3130_v7  ;;  %v5044_v36 = vsel %vm1035_vm1, %v5042_v11, %v5043_v42  ;;  %v5078_v14 = vmul.f32 %v10781_v1, %v5077_v25  ;;  %v11411_v19 = vmul.f32 %v10756_v34, %v4217_v62  ;;  %v14032_v23 = vld [vmem:[#allocation109_spill] sm:$0xff] }
 0x338   : > { %14029 = vst [vmem:[#allocation112_spill] sm:$0xff] %v11398_v2  ;;  %v4220_v43 = vmul.f32 %v11244_v53, %v4217_v62  ;;  %v5100_v10 = vmul.f32 %v10756_v34, %v5098_v24  ;;  %v5101_v7 = vmul.f32 %v11244_v53, %v5098_v24  ;;  %v3319_v42 = vadd.f32 %v14032_v23, %v3151_v52 }
 0x339   : > { %v11407_v4 = vpop.permute.xlu0 %4180  ;;  %5049 = vrot.lane.b32.xlu1 %v5046_v48, %s7182_s9  ;;  %v5067_v11 = vsel %vm1035_vm1, %v5064_v59, %v5066_v35  ;;  %v5085_v25 = vrot.slane %v5079_v17, 2  ;;  %v5087_v49 = vrot.slane %v5080_v63, 2  ;;  %v3341_v8 = vadd.f32 %v14033_v37, %v3173_v55 }
 0x33a   : > { %14031 = vst [vmem:[#allocation65_spill] sm:$0xff] %v11407_v4  ;;  %v11420_v48 = vadd.f32 %v10587_v27, %v3320_v6  ;;  %5047 = vrot.lane.b32.xlu0 %v5044_v36, %s7182_s9  ;;  %v4218_v2 = vmul.f32 %v10781_v1, %v4217_v62  ;;  %v5119_v39 = vstv %s11362_s10  ;;  %v5065_v26 = vsel %vm1035_vm1, %v5063_v58, %v5064_v59  ;;  %v14035_v62 = vld [vmem:[#allocation150_spill] sm:$0xff]  ;;  %s11658_s10 = sld [smem:[#allocation3 + $0x21]] }
 0x33b   : > { %v11423_v4 = vpop.permute.xlu1 %4196  ;;  %v5084_v5 = vrot.slane %v5078_v14, 2  ;;  %v5099_v52 = vmul.f32 %v10781_v1, %v5098_v24  ;;  %v4234_v35 = vstv %s11370_s11  ;;  %v4225_v27 = vrot.slane %v11411_v19, 1  ;;  %v14036_v14 = vld [vmem:[#allocation114_spill] sm:$0xff]  ;;  %s11667_s11 = sld [smem:[#allocation3 + $0x106]] }
 0x33c   : > { %v4227_v17 = vrot.slane %v4220_v43, 1  ;;  %v5106_v63 = vrot.slane %v5100_v10, 2  ;;  %v5108_v6 = vrot.slane %v5101_v7, 2  ;;  %v11437_v36 = vadd.f32 %v14035_v62, %v3319_v42  ;;  %v14038_v62 = vld [vmem:[#allocation116_spill] sm:$0xff] }
 0x33d   : > { %v11432_v55 = vpop.permute.xlu0 %4194  ;;  %5070 = vrot.lane.b32.xlu1 %v5067_v11, %s7182_s9  ;;  %v5088_v59 = vsel %vm1035_vm1, %v5085_v25, %v5087_v49  ;;  %v5121_v24 = vmul.f32 %v10756_v34, %v5119_v39  ;;  %v5122_v58 = vmul.f32 %v11244_v53, %v5119_v39  ;;  %v3340_v23 = vadd.f32 %v14036_v14, %v11324_v0 }
 0x33e   : > { %14034 = vst [vmem:[#allocation66_spill] sm:$0xff] %v11432_v55  ;;  %5068 = vrot.lane.b32.xlu0 %v5065_v26, %s7182_s9  ;;  %v4224_v19 = vrot.slane %v4218_v2, 1  ;;  %v11448_v43 = vmul.f32 %v10756_v34, %v4234_v35  ;;  %v5140_v10 = vstv %s11400_s12  ;;  %v11452_v7 = vadd.f32 %v10638_v28, %v3341_v8  ;;  %v14040_v8 = vld [vmem:[#allocation118_spill] sm:$0xff]  ;;  %s11692_s12 = sld [smem:[#allocation3 + $0x4e]] }
 0x33f   : > { %v11445_v11 = vpop.permute.xlu1 %4210  ;;  %v5086_v42 = vsel %vm1035_vm1, %v5084_v5, %v5085_v25  ;;  %v5105_v49 = vrot.slane %v5099_v52, 2  ;;  %v5120_v37 = vmul.f32 %v10781_v1, %v5119_v39  ;;  %v3362_v0 = vadd.f32 %v14038_v62, %v11330_v3 }
 0x340   : > { %14037 = vst [vmem:[#allocation67_spill] sm:$0xff] %v11445_v11  ;;  %v11462_v26 = vsel %vm562_vm0, %v4225_v27, %v4227_v17  ;;  %v5109_v2 = vsel %vm1035_vm1, %v5106_v63, %v5108_v6  ;;  %v4237_v28 = vmul.f32 %v11244_v53, %v4234_v35  ;;  %v5127_v5 = vrot.slane %v5121_v24, 2  ;;  %v14041_v17 = vld [vmem:[#allocation119_spill] sm:$0xff] }
 0x341   : > { %v11458_v14 = vpop.permute.xlu0 %4208  ;;  %5091 = vrot.lane.b32.xlu1 %v5088_v59, %s7182_s9  ;;  %v5129_v25 = vrot.slane %v5122_v58, 2  ;;  %v5142_v39 = vmul.f32 %v10756_v34, %v5140_v10  ;;  %v5143_v3 = vmul.f32 %v11244_v53, %v5140_v10  ;;  %v3361_v52 = vadd.f32 %v14040_v8, %v11338_v61  ;;  %v14043_v61 = vld [vmem:[#allocation120_spill] sm:$0xff] }
 0x342   : > { %14039 = vst [vmem:[#allocation68_spill] sm:$0xff] %v11458_v14  ;;  %v3383_v59 = vadd.f32 %v14041_v17, %v11342_v54  ;;  %v11477_v6 = vadd.f32 %v10663_v50, %v3340_v23  ;;  %5089 = vrot.lane.b32.xlu0 %v5086_v42, %s7182_s9  ;;  %v4242_v24 = vrot.slane %v11448_v43, 1  ;;  %v5107_v58 = vsel %vm1035_vm1, %v5105_v49, %v5106_v63  ;;  %v14044_v54 = vld [vmem:[#allocation121_spill] sm:$0xff] }
 0x343   : > { %v11480_v62 = vpop.permute.xlu1 %4367  ;;  %v5126_v14 = vrot.slane %v5120_v37, 2  ;;  %v4251_v11 = vstv %s11430_s13  ;;  %v5141_v55 = vmul.f32 %v10781_v1, %v5140_v10  ;;  %v3382_v8 = vadd.f32 %v14043_v61, %v11348_v9  ;;  %v14046_v9 = vld [vmem:[#allocation54_spill] sm:$0xff]  ;;  %s11696_s13 = sld [smem:[#allocation3 + $0x133]] }
 0x344   : > { %14042 = vst [vmem:[#allocation69_spill] sm:$0xff] %v11480_v62  ;;  %v3404_v17 = vadd.f32 %v14044_v54, %v11352_v46  ;;  %v4244_v23 = vrot.slane %v4237_v28, 1  ;;  %v4235_v42 = vmul.f32 %v10781_v1, %v4234_v35  ;;  %v11495_v43 = vsel %vm562_vm0, %v4224_v19, %v4225_v27 }
 0x345   : > { %v11490_v50 = vpop.permute.xlu0 %4365  ;;  %5112 = vrot.lane.b32.xlu1 %v5109_v2, %s7182_s9  ;;  %v5130_v63 = vsel %vm1035_vm1, %v5127_v5, %v5129_v25  ;;  %v5148_v49 = vrot.slane %v5142_v39, 2  ;;  %v5150_v10 = vrot.slane %v5143_v3, 2  ;;  %v3403_v37 = vadd.f32 %v14046_v9, %v11356_v32  ;;  %v14050_v39 = vld [vmem:[#allocation122_spill] sm:$0xff]  ;;  %v11572_v9 = vld [vmem:[%s7328_s14 + $0x50] sm:$0xff] }
 0x346   : > { %14045 = vst [vmem:[#allocation72_spill] sm:$0xff] %v11490_v50  ;;  %v11503_v46 = vadd.f32 %v10687_v13, %v3362_v0  ;;  %v11506_v2 = vadd.f32 %v10707_v41, %v3361_v52  ;;  %5110 = vrot.lane.b32.xlu0 %v5107_v58, %s7182_s9  ;;  %v11512_v35 = vmul.f32 %v10756_v34, %v4251_v11  ;;  %v5147_v19 = vrot.slane %v5141_v55, 2  ;;  %v14051_v52 = vld [vmem:[#allocation60_spill] sm:$0xff] }
 0x347   : > { %v11509_v1 = vpop.permute.xlu1 %4388  ;;  %v11515_v27 = vadd.f32 %v10735_v51, %v3383_v59  ;;  %v5128_v32 = vsel %vm1035_vm1, %v5126_v14, %v5127_v5  ;;  %v4254_v13 = vmul.f32 %v11244_v53, %v4251_v11  ;;  %v11522_v41 = vadd.f32 %v10768_v18, %v3382_v8  ;;  %v14049_v51 = vld [vmem:[#allocation56_spill] sm:$0xff]  ;;  %v11538_v18 = vld [vmem:[%s7328_s14 + $0x68] sm:$0xff] }
 0x348   : > { %14047 = vst [vmem:[#allocation74_spill] sm:$0xff] %v11509_v1  ;;  %v11525_v0 = vadd.f32 %v10802_v31, %v3404_v17  ;;  %v11528_v34 = vsel %vm562_vm0, %v4242_v24, %v4244_v23  ;;  %v4241_v28 = vrot.slane %v4235_v42, 1  ;;  %v3425_v55 = vadd.f32 %v14049_v51, %v11366_v40  ;;  %v14053_v8 = vld [vmem:[#allocation124_spill] sm:$0xff]  ;;  %v11564_v23 = vld [vmem:[%s7328_s14 + $0x60] sm:$0xff] }
 0x349   : > { %v11530_v25 = vpop.permute.xlu0 %4386  ;;  %5133 = vrot.lane.b32.xlu1 %v5130_v63, %s7182_s9  ;;  %v5151_v14 = vsel %vm1035_vm1, %v5148_v49, %v5150_v10  ;;  %v4268_v5 = vstv %s11466_s15  ;;  %v5213_v31 = vstv %s11470_s17  ;;  %v3424_v3 = vadd.f32 %v14050_v39, %v11374_v47  ;;  %v11559_v47 = vld [vmem:[%s7328_s14 + $0x48] sm:$0xff]  ;;  %v14054_v42 = vld [vmem:[#allocation125_spill] sm:$0xff]  ;;  %s11720_s15 = sld [smem:[#allocation3 + $0x7b]] }
 0x34a   : > { %14048 = vst [vmem:[#allocation75_spill] sm:$0xff] %v11530_v25  ;;  %v3446_v59 = vadd.f32 %v14051_v52, %v11386_v60  ;;  %v11548_v58 = vadd.f32 %v10836_v29, %v3403_v37  ;;  %5131 = vrot.lane.b32.xlu0 %v5128_v32, %s7182_s9  ;;  %v4259_v40 = vrot.slane %v11512_v35, 1  ;;  %v3445_v54 = vadd.f32 %v14053_v8, %v11390_v20  ;;  %s11730_s17 = sld [smem:[#allocation3 + $0x160]] }
 0x34b   : > { %v11552_v61 = vpop.permute.xlu1 %4409  ;;  %v4261_v17 = vrot.slane %v4254_v13, 1  ;;  %v4252_v60 = vmul.f32 %v11559_v47, %v4251_v11  ;;  %v5149_v29 = vsel %vm1035_vm1, %v5147_v19, %v5148_v49  ;;  %v3467_v63 = vadd.f32 %v14054_v42, %v11394_v45  ;;  %v14056_v11 = vld [vmem:[#allocation63_spill] sm:$0xff]  ;;  %v14057_v19 = vld [vmem:[#allocation132_spill] sm:$0xff] }
 0x34c   : > { %14052 = vst [vmem:[#allocation76_spill] sm:$0xff] %v11552_v61  ;;  %v4270_v20 = vmul.f32 %v11572_v9, %v4268_v5  ;;  %v4271_v37 = vmul.f32 %v11244_v53, %v4268_v5  ;;  %v5215_v35 = vmul.f32 %v11538_v18, %v5213_v31  ;;  %v3466_v49 = vadd.f32 %v14056_v11, %v11403_v57  ;;  %v14064_v11 = vld [vmem:[#allocation133_spill] sm:$0xff] }
 0x34d   : > { %v11568_v10 = vpop.permute.xlu0 %4407  ;;  %5154 = vrot.lane.b32.xlu1 %v5151_v14, %s7182_s9  ;;  %v11582_v45 = vsel %vm562_vm0, %v4241_v28, %v4242_v24  ;;  %v4269_v32 = vmul.f32 %v11559_v47, %v4268_v5  ;;  %v5227_v13 = vstv %s11498_s18  ;;  %v11589_v51 = vadd.f32 %v14057_v19, %v3425_v55  ;;  %v14058_v14 = vld [vmem:[#allocation135_spill] sm:$0xff]  ;;  %s11759_s18 = sld [smem:[#allocation3 + $0xa8]] }
 0x34e   : > { %14055 = vst [vmem:[#allocation77_spill] sm:$0xff] %v11568_v10  ;;  %v11592_v39 = vadd.f32 %v14058_v14, %v3424_v3  ;;  %v11595_v52 = vadd.f32 %v10930_v56, %v3446_v59  ;;  %5152 = vrot.lane.b32.xlu0 %v5149_v29, %s7182_s9  ;;  %v5214_v24 = vmul.f32 %v11564_v23, %v5213_v31  ;;  %v4258_v55 = vrot.slane %v4252_v60, 1  ;;  %v14061_v31 = vld [vmem:[#allocation129_spill] sm:$0xff]  ;;  %v14065_v14 = vld [vmem:[#allocation139_spill] sm:$0xff] }
 0x34f   : > { %v11598_v57 = vpop.permute.xlu1 %4430  ;;  %v11602_v28 = vadd.f32 %v10940_v44, %v3445_v54  ;;  %v11605_v5 = vsel %vm562_vm0, %v4259_v40, %v4261_v17  ;;  %v4285_v8 = vstv %s11519_s19  ;;  %v11611_v56 = vadd.f32 %v10943_v38, %v3467_v63  ;;  %s11773_s19 = sld [smem:[#allocation3 + $0x26]] }
 0x350   : > { %14059 = vst [vmem:[#allocation78_spill] sm:$0xff] %v11598_v57  ;;  %v4276_v3 = vrot.slane %v4270_v20, 1  ;;  %v4278_v59 = vrot.slane %v4271_v37, 1  ;;  %v5229_v44 = vmul.f32 %v11538_v18, %v5227_v13  ;;  %v11619_v54 = vadd.f32 %v14061_v31, %v11420_v48  ;;  %v14069_v57 = vld [vmem:[#allocation142_spill] sm:$0xff] }
 0x351   : > { %v11613_v29 = vpop.permute.xlu0 %4428  ;;  %5220 = vrot.lane.b32.xlu1 %v5215_v35, %s7181_s16  ;;  %v11622_v17 = vadd.f32 %v10955_v30, %v3466_v49  ;;  %v4275_v60 = vrot.slane %v4269_v32, 1  ;;  %v5241_v42 = vstv %s11541_s24  ;;  %v4287_v38 = vmul.f32 %v11572_v9, %v4285_v8  ;;  %v14063_v30 = vld [vmem:[#allocation73_spill] sm:$0xff]  ;;  %s11803_s24 = sld [smem:[#allocation3 + $0xd5]] }
 0x352   : > { %14060 = vst [vmem:[#allocation83_spill] sm:$0xff] %v11613_v29  ;;  %5218 = vrot.lane.b32.xlu0 %v5214_v24, %s7181_s16  ;;  %v4288_v63 = vmul.f32 %v11244_v53, %v4285_v8  ;;  %v5228_v37 = vmul.f32 %v11564_v23, %v5227_v13  ;;  %v4302_v48 = vstv %s11554_s26  ;;  %v11636_v35 = vadd.f32 %v14063_v30, %v11437_v36  ;;  %s11808_s26 = sld [smem:[#allocation3 + $0x53]] }
 0x353   : > { %v11630_v20 = vpop.permute.xlu1 %4451  ;;  %v11640_v49 = vadd.f32 %v14064_v11, %v11452_v7  ;;  %v11643_v32 = vsel %vm562_vm0, %v4258_v55, %v4259_v40  ;;  %v4286_v19 = vmul.f32 %v11559_v47, %v4285_v8  ;;  %v11648_v24 = vadd.f32 %v14065_v14, %v11477_v6  ;;  %v14067_v40 = vld [vmem:[#allocation140_spill] sm:$0xff] }
 0x354   : > { %14062 = vst [vmem:[#allocation84_spill] sm:$0xff] %v11630_v20  ;;  %v11651_v13 = vsel %vm562_vm0, %v4276_v3, %v4278_v59  ;;  %v5243_v36 = vmul.f32 %v11538_v18, %v5241_v42  ;;  %v4319_v7 = vstv %s11577_s27  ;;  %v11662_v55 = vadd.f32 %v14067_v40, %v11503_v46  ;;  %s11841_s27 = sld [smem:[#allocation3 + $0x80]] }
 0x355   : > { %v11653_v31 = vpop.permute.xlu0 %4449  ;;  %5234 = vrot.lane.b32.xlu1 %v5229_v44, %s7181_s16  ;;  %v4304_v6 = vmul.f32 %v11572_v9, %v4302_v48  ;;  %v4305_v8 = vmul.f32 %v11244_v53, %v4302_v48  ;;  %v5255_v59 = vstv %s11586_s7  ;;  %v11670_v30 = vsel %vm562_vm0, %v4275_v60, %v4276_v3  ;;  %v14070_v3 = vld [vmem:[#allocation143_spill] sm:$0xff]  ;;  %s11861_s7 = sld [smem:[#allocation3 + $0x102]] }
 0x356   : > { %14066 = vst [vmem:[#allocation79_spill] sm:$0xff] %v11653_v31  ;;  %v4293_v44 = vrot.slane %v4287_v38, 1  ;;  %v4295_v11 = vrot.slane %v4288_v63, 1  ;;  %5232 = vrot.lane.b32.xlu0 %v5228_v37, %s7181_s16  ;;  %v5242_v46 = vmul.f32 %v11564_v23, %v5241_v42  ;;  %v4292_v40 = vrot.slane %v4286_v19, 1 }
 0x357   : > { %v11673_v14 = vpop.permute.xlu1 %4472  ;;  %v4303_v31 = vmul.f32 %v11559_v47, %v4302_v48  ;;  %v4321_v20 = vmul.f32 %v11572_v9, %v4319_v7  ;;  %v4336_v29 = vstv %s11608_s8  ;;  %v11681_v10 = vadd.f32 %v14069_v57, %v11506_v2  ;;  %s11868_s8 = sld [smem:[#allocation3 + $0x12f]] }
 0x358   : > { %14068 = vst [vmem:[#allocation80_spill] sm:$0xff] %v11673_v14  ;;  %v11685_v60 = vadd.f32 %v14070_v3, %v11515_v27  ;;  %v4322_v42 = vmul.f32 %v11244_v53, %v4319_v7  ;;  %v5257_v63 = vmul.f32 %v11538_v18, %v5255_v59  ;;  %v4310_v37 = vrot.slane %v4304_v6, 1  ;;  %v14072_v27 = vld [vmem:[#allocation144_spill] sm:$0xff] }
 0x359   : > { %v11687_v38 = vpop.permute.xlu0 %4470  ;;  %5248 = vrot.lane.b32.xlu1 %v5243_v36, %s7181_s16  ;;  %v4312_v48 = vrot.slane %v4305_v8, 1  ;;  %v4320_v19 = vmul.f32 %v11559_v47, %v4319_v7  ;;  %v5269_v2 = vstv %s11625_s6  ;;  %v11700_v57 = vadd.f32 %v14072_v27, %v11522_v41  ;;  %s11874_s6 = sld [smem:[#allocation3 + $0xad]] }
 0x35a   : > { %14071 = vst [vmem:[#allocation81_spill] sm:$0xff] %v11687_v38  ;;  %5246 = vrot.lane.b32.xlu0 %v5242_v46, %s7181_s16  ;;  %v5256_v3 = vmul.f32 %v11564_v23, %v5255_v59  ;;  %v4338_v38 = vmul.f32 %v11572_v9, %v4336_v29  ;;  %v4339_v6 = vmul.f32 %v11244_v53, %v4336_v29  ;;  %v4309_v14 = vrot.slane %v4303_v31, 1 }
 0x35b   : > { %v11703_v36 = vpop.permute.xlu1 %4493  ;;  %v11709_v7 = vsel %vm562_vm0, %v4293_v44, %v4295_v11  ;;  %v11712_v8 = vsel %vm562_vm0, %v4292_v40, %v4293_v44  ;;  %v4327_v41 = vrot.slane %v4321_v20, 1  ;;  %v4329_v27 = vrot.slane %v4322_v42, 1  ;;  %v14075_v11 = vld [vmem:[#allocation145_spill] sm:$0xff]  ;;  %v14076_v40 = vld [vmem:[#allocation151_spill] sm:$0xff] }
 0x35c   : > { %14073 = vst [vmem:[#allocation82_spill] sm:$0xff] %v11703_v36  ;;  %v4337_v59 = vmul.f32 %v11559_v47, %v4336_v29  ;;  %v5271_v46 = vmul.f32 %v11538_v18, %v5269_v2  ;;  %v4689_v36 = vstv %s11658_s10  ;;  %v11724_v25 = vadd.f32 %v14075_v11, %v11525_v0  ;;  %s11888_s10 = sld [smem:[#allocation3 + $0x15c]] }
 0x35d   : > { %v11714_v61 = vpop.permute.xlu0 %4491  ;;  %5262 = vrot.lane.b32.xlu1 %v5257_v63, %s7181_s16  ;;  %v11727_v44 = vsel %vm562_vm0, %v4310_v37, %v4312_v48  ;;  %v4326_v20 = vrot.slane %v4320_v19, 1  ;;  %v5283_v31 = vstv %s11667_s11  ;;  %v11734_v29 = vadd.f32 %v14076_v40, %v11548_v58  ;;  %v14078_v48 = vld [vmem:[#allocation146_spill] sm:$0xff]  ;;  %v14081_v40 = vld [vmem:[#allocation152_spill] sm:$0xff]  ;;  %s11907_s11 = sld [smem:[#allocation3 + $0xda]] }
 0x35e   : > { %14074 = vst [vmem:[#allocation85_spill] sm:$0xff] %v11714_v61  ;;  %5260 = vrot.lane.b32.xlu0 %v5256_v3, %s7181_s16  ;;  %v4344_v42 = vrot.slane %v4338_v38, 1  ;;  %v4346_v63 = vrot.slane %v4339_v6, 1  ;;  %v5270_v0 = vmul.f32 %v11564_v23, %v5269_v2  ;;  %v11742_v19 = vadd.f32 %v14078_v48, %v11589_v51 }
 0x35f   : > { %v11737_v61 = vpop.permute.xlu1 %4514  ;;  %v11745_v11 = vsel %vm562_vm0, %v4309_v14, %v4310_v37  ;;  %v11748_v1 = vmul.f32 %v11572_v9, %v4689_v36  ;;  %v4692_v58 = vmul.f32 %v11244_v53, %v4689_v36  ;;  %v11752_v38 = vsel %vm562_vm0, %v4327_v41, %v4329_v27  ;;  %v14080_v14 = vld [vmem:[#allocation147_spill] sm:$0xff] }
 0x360   : > { %14077 = vst [vmem:[#allocation86_spill] sm:$0xff] %v11737_v61  ;;  %v4343_v3 = vrot.slane %v4337_v59, 1  ;;  %v5285_v2 = vmul.f32 %v11538_v18, %v5283_v31  ;;  %v4706_v51 = vstv %s11692_s12  ;;  %v11763_v37 = vadd.f32 %v14080_v14, %v11592_v39  ;;  %s11941_s12 = sld [smem:[#allocation3 + $0x107]] }
 0x361   : > { %v11754_v6 = vpop.permute.xlu0 %4512  ;;  %5276 = vrot.lane.b32.xlu1 %v5271_v46, %s7181_s16  ;;  %v11767_v48 = vadd.f32 %v14081_v40, %v11595_v52  ;;  %v11770_v27 = vsel %vm562_vm0, %v4326_v20, %v4327_v41  ;;  %v5297_v59 = vstv %s11696_s13  ;;  %v14082_v46 = vld [vmem:[#allocation14_spill] sm:$0xff]  ;;  %v11778_v61 = vsel %vm562_vm0, %v4344_v42, %v4346_v63  ;;  %v14084_v63 = vld [vmem:[#allocation148_spill] sm:$0xff]  ;;  %s11968_s13 = sld [smem:[#allocation3 + $0x28]] }
 0x362   : > { %14079 = vst [vmem:[#allocation22_spill] sm:$0xff] %v11754_v6  ;;  %v3792_v6 = vadd.f32 %v14082_v46, %v11619_v54  ;;  %5274 = vrot.lane.b32.xlu0 %v5270_v0, %s7181_s16  ;;  %v5284_v52 = vmul.f32 %v11564_v23, %v5283_v31  ;;  %v4690_v14 = vmul.f32 %v11559_v47, %v4689_v36  ;;  %v4697_v41 = vrot.slane %v11748_v1, 2  ;;  %v14085_v0 = vld [vmem:[#allocation149_spill] sm:$0xff] }
 0x363   : > { %v11781_v39 = vpop.permute.xlu1 %4535  ;;  %v4699_v20 = vrot.slane %v4692_v58, 2  ;;  %v4708_v40 = vmul.f32 %v11572_v9, %v4706_v51  ;;  %v4709_v54 = vmul.f32 %v11244_v53, %v4706_v51  ;;  %v11790_v46 = vadd.f32 %v14084_v63, %v11602_v28  ;;  %v14088_v58 = vld [vmem:[#allocation15_spill] sm:$0xff] }
 0x364   : > { %14083 = vst [vmem:[#allocation87_spill] sm:$0xff] %v11781_v39  ;;  %v11794_v50 = vadd.f32 %v14085_v0, %v11611_v56  ;;  %v11797_v31 = vsel %vm562_vm0, %v4343_v3, %v4344_v42  ;;  %v5299_v1 = vmul.f32 %v11538_v18, %v5297_v59  ;;  %v3791_v39 = vadd.f32 %v14088_v58, %v11636_v35  ;;  %v14089_v42 = vld [vmem:[#allocation13_spill] sm:$0xff] }
 0x365   : > { %14086 = vst [vmem:[#allocation155_spill] sm:$0xff] %v11797_v31  ;;  %v11799_v36 = vpop.permute.xlu0 %4533  ;;  %5290 = vrot.lane.b32.xlu1 %v5285_v2, %s7181_s16  ;;  %v5311_v28 = vstv %s11730_s17  ;;  %v4707_v56 = vmul.f32 %v11559_v47, %v4706_v51  ;;  %v4723_v63 = vstv %s11720_s15  ;;  %v11814_v3 = vadd.f32 %v14089_v42, %v11622_v17  ;;  %v14090_v2 = vld [vmem:[#allocation16_spill] sm:$0xff]  ;;  %s11972_s15 = sld [smem:[#allocation3 + $0x134]] }
 0x366   : > { %14087 = vst [vmem:[#allocation88_spill] sm:$0xff] %v11799_v36  ;;  %v3813_v0 = vadd.f32 %v14090_v2, %v11640_v49  ;;  %5288 = vrot.lane.b32.xlu0 %v5284_v52, %s7181_s16  ;;  %v5298_v35 = vmul.f32 %v11564_v23, %v5297_v59  ;;  %v4696_v58 = vrot.slane %v4690_v14, 2  ;;  %v11823_v31 = vadd.f32 %v11083_v16, %v3792_v6  ;;  %v14092_v14 = vld [vmem:[#allocation17_spill] sm:$0xff]  ;;  %s11987_s17 = sld [smem:[#allocation3 + $0x55]] }
 0x367   : > { %v11819_v36 = vpop.permute.xlu1 %4556  ;;  %v11826_v51 = vsel %vm1035_vm1, %v4697_v41, %v4699_v20  ;;  %v4714_v62 = vrot.slane %v4708_v40, 2  ;;  %v4716_v17 = vrot.slane %v4709_v54, 2  ;;  %v5313_v49 = vmul.f32 %v11538_v18, %v5311_v28 }
 0x368   : > { %v4725_v52 = vmul.f32 %v11572_v9, %v4723_v63  ;;  %v4726_v2 = vmul.f32 %v11244_v53, %v4723_v63  ;;  %v4740_v59 = vstv %s11759_s18  ;;  %v3812_v16 = vadd.f32 %v14092_v14, %v11648_v24  ;;  %s11991_s18 = sld [smem:[#allocation3 + $0x161]] }
 0x369   : > { %v11828_v42 = vpop.permute.xlu0 %4554  ;;  %5304 = vrot.lane.b32.xlu1 %v5299_v1, %s7181_s16  ;;  %v11838_v6 = vadd.f32 %v11086_v22, %v3791_v39  ;;  %v5325_v20 = vstv %s11773_s19  ;;  %v4713_v40 = vrot.slane %v4707_v56, 2  ;;  %v11844_v54 = vadd.f32 %v11117_v33, %v3813_v0  ;;  %v14095_v39 = vld [vmem:[#allocation18_spill] sm:$0xff]  ;;  %s12003_s19 = sld [smem:[#allocation3 + $0x82]] }
 0x36a   : > { %14091 = vst [vmem:[#allocation123_spill] sm:$0xff] %v11828_v42  ;;  %5302 = vrot.lane.b32.xlu0 %v5298_v35, %s7181_s16  ;;  %v5312_v42 = vmul.f32 %v11564_v23, %v5311_v28  ;;  %v11851_v24 = vsel %vm1035_vm1, %v4696_v58, %v4697_v41  ;;  %v4724_v22 = vmul.f32 %v11559_v47, %v4723_v63  ;;  %v4731_v28 = vrot.slane %v4725_v52, 2  ;;  %v14100_v52 = vld [vmem:[#allocation153_spill] sm:$0xff] }
 0x36b   : > { %v11847_v1 = vpop.permute.xlu1 %4577  ;;  %14094 = vst [vmem:[#allocation128_spill] sm:$0xff] %v11851_v24  ;;  %v3834_v14 = vadd.f32 %v14095_v39, %v11662_v55  ;;  %v11857_v56 = vsel %vm1035_vm1, %v4714_v62, %v4716_v17  ;;  %v4742_v33 = vmul.f32 %v11572_v9, %v4740_v59  ;;  %v4743_v0 = vmul.f32 %v11244_v53, %v4740_v59 }
 0x36c   : > { %14093 = vst [vmem:[#allocation25_spill] sm:$0xff] %v11847_v1  ;;  %14096 = vst [vmem:[#allocation89_spill] sm:$0xff] %v11857_v56  ;;  %v5327_v41 = vmul.f32 %v11538_v18, %v5325_v20  ;;  %v4733_v63 = vrot.slane %v4726_v2, 2  ;;  %v4757_v58 = vstv %s11803_s24  ;;  %v11871_v55 = vadd.f32 %v11120_v21, %v3812_v16  ;;  %s12030_s24 = sld [smem:[#allocation3 + $0xaf]] }
 0x36d   : > { %v11863_v35 = vpop.permute.xlu0 %4575  ;;  %5318 = vrot.lane.b32.xlu1 %v5313_v49, %s7181_s16  ;;  %v5339_v17 = vstv %s11808_s26  ;;  %v11877_v39 = vsel %vm1035_vm1, %v4713_v40, %v4714_v62  ;;  %v14099_v49 = vld [vmem:[#allocation19_spill] sm:$0xff]  ;;  %v3855_v2 = vadd.f32 %v14100_v52, %v11685_v60  ;;  %v5326_v21 = vmul.f32 %v11564_v23, %v5325_v20  ;;  %s12065_s26 = sld [smem:[#allocation3 + $0xdc]] }
 0x36e   : > { %14097 = vst [vmem:[#allocation157_spill] sm:$0xff] %v11863_v35  ;;  %14098 = vst [vmem:[#allocation90_spill] sm:$0xff] %v11877_v39  ;;  %v4741_v35 = vmul.f32 %v11559_v47, %v4740_v59  ;;  %v3833_v56 = vadd.f32 %v14099_v49, %v11681_v10  ;;  %5316 = vrot.lane.b32.xlu0 %v5312_v42, %s7181_s16  ;;  %v4730_v16 = vrot.slane %v4724_v22, 2  ;;  %v4748_v62 = vrot.slane %v4742_v33, 2  ;;  %v14102_v10 = vld [vmem:[#allocation24_spill] sm:$0xff]  ;;  %v14105_v33 = vld [vmem:[#allocation154_spill] sm:$0xff] }
 0x36f   : > { %v11885_v1 = vpop.permute.xlu1 %4598  ;;  %v4750_v40 = vrot.slane %v4743_v0, 2  ;;  %v4759_v59 = vmul.f32 %v11572_v9, %v4757_v58  ;;  %v4760_v39 = vmul.f32 %v11244_v53, %v4757_v58  ;;  %v3854_v49 = vadd.f32 %v14102_v10, %v11700_v57 }
 0x370   : > { %14101 = vst [vmem:[#allocation126_spill] sm:$0xff] %v11885_v1  ;;  %v11895_v60 = vadd.f32 %v11150_v15, %v3834_v14  ;;  %v5341_v20 = vmul.f32 %v11538_v18, %v5339_v17  ;;  %v11902_v22 = vsel %vm1035_vm1, %v4731_v28, %v4733_v63  ;;  %v3876_v0 = vadd.f32 %v14105_v33, %v11724_v25 }
 0x371   : > { %v11897_v42 = vpop.permute.xlu0 %4596  ;;  %5332 = vrot.lane.b32.xlu1 %v5327_v41, %s7182_s9  ;;  %14104 = vst [vmem:[#allocation70_spill] sm:$0xff] %v11902_v22  ;;  %v5353_v52 = vstv %s11841_s27  ;;  %v4747_v57 = vrot.slane %v4741_v35, 2  ;;  %v4758_v15 = vmul.f32 %v11559_v47, %v4757_v58  ;;  %v11911_v14 = vadd.f32 %v11153_v12, %v3833_v56  ;;  %v14106_v41 = vld [vmem:[#allocation42_spill] sm:$0xff]  ;;  %v14110_v56 = vld [vmem:[#allocation27_spill] sm:$0xff]  ;;  %s12086_s27 = sld [smem:[#allocation3 + $0x109]] }
 0x372   : > { %14103 = vst [vmem:[#allocation127_spill] sm:$0xff] %v11897_v42  ;;  %v11914_v10 = vadd.f32 %v14106_v41, %v3855_v2  ;;  %5330 = vrot.lane.b32.xlu0 %v5326_v21, %s7182_s9  ;;  %v5340_v25 = vmul.f32 %v11564_v23, %v5339_v17  ;;  %v11921_v33 = vsel %vm1035_vm1, %v4730_v16, %v4731_v28  ;;  %v4765_v58 = vrot.slane %v4759_v59, 2  ;;  %v14111_v41 = vld [vmem:[#allocation43_spill] sm:$0xff] }
 0x373   : > { %v11917_v63 = vpop.permute.xlu1 %4619  ;;  %14108 = vst [vmem:[#allocation71_spill] sm:$0xff] %v11921_v33  ;;  %v11924_v35 = vsel %vm1035_vm1, %v4748_v62, %v4750_v40  ;;  %v4767_v42 = vrot.slane %v4760_v39, 2  ;;  %v4774_v12 = vstv %s11861_s7  ;;  %v3875_v2 = vadd.f32 %v14110_v56, %v11734_v29  ;;  %v14113_v16 = vld [vmem:[#allocation47_spill] sm:$0xff]  ;;  %s12130_s7 = sld [smem:[#allocation3 + $0x136]] }
 0x374   : > { %14107 = vst [vmem:[#allocation28_spill] sm:$0xff] %v11917_v63  ;;  %14109 = vst [vmem:[#allocation91_spill] sm:$0xff] %v11924_v35  ;;  %v11930_v1 = vadd.f32 %v14111_v41, %v3854_v49  ;;  %v5355_v28 = vmul.f32 %v11538_v18, %v5353_v52  ;;  %v4791_v17 = vstv %s11868_s8  ;;  %v11938_v40 = vadd.f32 %v14113_v16, %v3876_v0  ;;  %s12144_s8 = sld [smem:[#allocation3 + $0x163]] }
 0x375   : > { %v11932_v21 = vpop.permute.xlu0 %4617  ;;  %5346 = vrot.lane.b32.xlu1 %v5341_v20, %s7182_s9  ;;  %v5367_v59 = vstv %s11874_s6  ;;  %v11944_v39 = vsel %vm1035_vm1, %v4747_v57, %v4748_v62  ;;  %v4764_v29 = vrot.slane %v4758_v15, 2  ;;  %v5354_v20 = vmul.f32 %v11564_v23, %v5353_v52  ;;  %v14117_v15 = vld [vmem:[#allocation134_spill] sm:$0xff]  ;;  %s12161_s6 = sld [smem:[#allocation3 + $0x24]] }
 0x376   : > { %14112 = vst [vmem:[#allocation141_spill] sm:$0xff] %v11932_v21  ;;  %14114 = vst [vmem:[#allocation92_spill] sm:$0xff] %v11944_v39  ;;  %5344 = vrot.lane.b32.xlu0 %v5340_v25, %s7182_s9  ;;  %v4776_v56 = vmul.f32 %v11572_v9, %v4774_v12  ;;  %v4777_v41 = vmul.f32 %v11244_v53, %v4774_v12  ;;  %v4808_v0 = vstv %s11888_s10  ;;  %v5657_v22 = vstv %s12065_s26  ;;  %s12175_s10 = sld [smem:[#allocation3 + $0x29]] }
 0x377   : > { %v11947_v49 = vpop.permute.xlu1 %4640  ;;  %v11954_v16 = vsel %vm1035_vm1, %v4765_v58, %v4767_v42  ;;  %v4775_v21 = vmul.f32 %v11559_v47, %v4774_v12  ;;  %v4793_v62 = vmul.f32 %v11572_v9, %v4791_v17  ;;  %v4794_v57 = vmul.f32 %v11244_v53, %v4791_v17  ;;  %s12337_s26 = sld [smem:[#allocation3 + $0x105]] }
 0x378   : > { %14115 = vst [vmem:[#allocation130_spill] sm:$0xff] %v11947_v49  ;;  %14116 = vst [vmem:[#allocation131_spill] sm:$0xff] %v11954_v16  ;;  %v3897_v25 = vadd.f32 %v14117_v15, %v11742_v19  ;;  %v14118_v49 = vld [vmem:[#allocation48_spill] sm:$0xff]  ;;  %v5369_v63 = vmul.f32 %v11538_v18, %v5367_v59  ;;  %v4792_v42 = vmul.f32 %v11559_v47, %v4791_v17  ;;  %v5381_v12 = vstv %s11907_s11  ;;  %s12192_s11 = sld [smem:[#allocation3 + $0x51]] }
 0x379   : > { %v11962_v39 = vadd.f32 %v14118_v49, %v3875_v2  ;;  %v11964_v52 = vpop.permute.xlu0 %4638  ;;  %5360 = vrot.lane.b32.xlu1 %v5355_v28, %s7182_s9  ;;  %v11975_v16 = vsel %vm1035_vm1, %v4764_v29, %v4765_v58  ;;  %v11978_v19 = vmul.f32 %v11572_v9, %v4808_v0  ;;  %v4811_v2 = vmul.f32 %v11244_v53, %v4808_v0  ;;  %v14121_v49 = vld [vmem:[#allocation156_spill] sm:$0xff] }
 0x37a   : > { %14119 = vst [vmem:[#allocation136_spill] sm:$0xff] %v11964_v52  ;;  %14120 = vst [vmem:[#allocation93_spill] sm:$0xff] %v11975_v16  ;;  %v3896_v28 = vadd.f32 %v14121_v49, %v11763_v37  ;;  %5358 = vrot.lane.b32.xlu0 %v5354_v20, %s7182_s9  ;;  %v5368_v17 = vmul.f32 %v11564_v23, %v5367_v59  ;;  %v4782_v52 = vrot.slane %v4776_v56, 2  ;;  %v4784_v58 = vrot.slane %v4777_v41, 2  ;;  %v14123_v29 = vld [vmem:[#allocation20_spill] sm:$0xff]  ;;  %v14124_v37 = vld [vmem:[#allocation21_spill] sm:$0xff] }
 0x37b   : > { %v11984_v15 = vpop.permute.xlu1 %4661  ;;  %v3918_v9 = vadd.f32 %v14123_v29, %v11767_v48  ;;  %v4781_v53 = vrot.slane %v4775_v21, 2  ;;  %v4799_v16 = vrot.slane %v4793_v62, 2  ;;  %v4801_v35 = vrot.slane %v4794_v57, 2  ;;  %v14126_v41 = vld [vmem:[#allocation137_spill] sm:$0xff] }
 0x37c   : > { %14122 = vst [vmem:[#allocation138_spill] sm:$0xff] %v11984_v15  ;;  %v3917_v20 = vadd.f32 %v14124_v37, %v11790_v46  ;;  %v5383_v59 = vmul.f32 %v11538_v18, %v5381_v12  ;;  %v4798_v15 = vrot.slane %v4792_v42, 2  ;;  %v4809_v56 = vmul.f32 %v11559_v47, %v4808_v0  ;;  %v14127_v46 = vld [vmem:[#allocation23_spill] sm:$0xff]  ;;  %v14131_v42 = vld [vmem:[#allocation52_spill] sm:$0xff] }
 0x37d   : > { %v11995_v49 = vpop.permute.xlu0 %4659  ;;  %5374 = vrot.lane.b32.xlu1 %v5369_v63, %s7182_s9  ;;  %v3939_v48 = vadd.f32 %v14126_v41, %v11794_v50  ;;  %v5395_v29 = vstv %s11941_s12  ;;  %v4816_v21 = vrot.slane %v11978_v19, 2  ;;  %v4818_v62 = vrot.slane %v4811_v2, 2  ;;  %v14128_v37 = vld [vmem:[#allocation51_spill] sm:$0xff]  ;;  %v14132_v2 = vld [vmem:[#allocation57_spill] sm:$0xff]  ;;  %s12206_s12 = sld [smem:[#allocation3 + $0x56]] }
 0x37e   : > { %14125 = vst [vmem:[#allocation30_spill] sm:$0xff] %v11995_v49  ;;  %v3938_v57 = vadd.f32 %v14127_v46, %v11814_v3  ;;  %v12009_v63 = vadd.f32 %v14128_v37, %v3897_v25  ;;  %5372 = vrot.lane.b32.xlu0 %v5368_v17, %s7182_s9  ;;  %v5382_v50 = vmul.f32 %v11564_v23, %v5381_v12  ;;  %v14135_v17 = vld [vmem:[#allocation58_spill] sm:$0xff]  ;;  %v5409_v37 = vstv %s11972_s15  ;;  %s12248_s15 = sld [smem:[#allocation3 + $0x83]] }
 0x37f   : > { %v12012_v47 = vpop.permute.xlu1 %4682  ;;  %v12016_v0 = vsel %vm1035_vm1, %v4782_v52, %v4784_v58  ;;  %v12019_v19 = vadd.f32 %v14131_v42, %v3896_v28  ;;  %v12022_v41 = vadd.f32 %v14132_v2, %v3918_v9  ;;  %v12025_v3 = vsel %vm1035_vm1, %v4781_v53, %v4782_v52  ;;  %v12040_v58 = vld [vmem:[%s7328_s14 + $0x70] sm:$0x3]  ;;  %v14140_v2 = vld [vmem:[#allocation26_spill] sm:$0xff] }
 0x380   : > { %14129 = vst [vmem:[#allocation33_spill] sm:$0xff] %v12012_v47  ;;  %14130 = vst [vmem:[#allocation94_spill] sm:$0xff] %v12016_v0  ;;  %v12028_v25 = vsel %vm1035_vm1, %v4799_v16, %v4801_v35  ;;  %v12033_v46 = vadd.f32 %v14135_v17, %v3917_v20  ;;  %v5397_v28 = vmul.f32 %v11538_v18, %v5395_v29  ;;  %v5573_v52 = vstv %s11968_s13  ;;  %v14137_v53 = vld [vmem:[#allocation103_spill] sm:$0xff]  ;;  %v14141_v17 = vld [vmem:[#allocation61_spill] sm:$0xff]  ;;  %s12227_s13 = sld [smem:[#allocation3 + $0x7e]] }
 0x381   : > { %14133 = vst [vmem:[#allocation95_spill] sm:$0xff] %v12025_v3  ;;  %14134 = vst [vmem:[#allocation34_spill] sm:$0xff] %v12028_v25  ;;  %v12035_v12 = vpop.permute.xlu0 %4680  ;;  %5388 = vrot.lane.b32.xlu1 %v5383_v59, %s7182_s9  ;;  %v4815_v9 = vrot.slane %v4809_v56, 2  ;;  %v12044_v35 = vadd.f32 %v14137_v53, %v3939_v48  ;;  %v12048_v42 = vsel %vm1035_vm1, %v4798_v15, %v4799_v16  ;;  %v5594_v53 = vstv %s11987_s17  ;;  %s12267_s17 = sld [smem:[#allocation3 + $0xab]] }
 0x382   : > { %14136 = vst [vmem:[#allocation96_spill] sm:$0xff] %v12035_v12  ;;  %14138 = vst [vmem:[#allocation97_spill] sm:$0xff] %v12048_v42  ;;  %v12051_v20 = vsel %vm1035_vm1, %v4816_v21, %v4818_v62  ;;  %v12055_v59 = vadd.f32 %v14140_v2, %v11823_v31  ;;  %v12058_v25 = vadd.f32 %v14141_v17, %v3938_v57  ;;  %5386 = vrot.lane.b32.xlu0 %v5382_v50, %s7182_s9  ;;  %v14143_v57 = vld [vmem:[#allocation29_spill] sm:$0xff]  ;;  %v14144_v50 = vld [vmem:[#allocation31_spill] sm:$0xff] }
 0x383   : > { %14139 = vst [vmem:[#allocation98_spill] sm:$0xff] %v12051_v20  ;;  %v12061_v56 = vpop.permute.xlu1 %4839  ;;  %v5396_v48 = vmul.f32 %v11564_v23, %v5395_v29  ;;  %v5423_v16 = vstv %s11991_s18  ;;  %v5575_v15 = vmul.f32 %v11538_v18, %v5573_v52  ;;  %v5576_v62 = vmul.f32 %v12040_v58, %v5573_v52  ;;  %v14150_v20 = vld [vmem:[#allocation117_spill] sm:$0xff]  ;;  %s12275_s18 = sld [smem:[#allocation3 + $0x2b]] }
 0x384   : > { %14142 = vst [vmem:[#allocation99_spill] sm:$0xff] %v12061_v56  ;;  %v5574_v31 = vmul.f32 %v11564_v23, %v5573_v52  ;;  %v12073_v2 = vadd.f32 %v14143_v57, %v11838_v6  ;;  %v12077_v17 = vadd.f32 %v14144_v50, %v11844_v54  ;;  %v5411_v42 = vmul.f32 %v11538_v18, %v5409_v37  ;;  %v14147_v50 = vld [vmem:[#allocation32_spill] sm:$0xff] }
 0x385   : > { %v12079_v29 = vpop.permute.xlu0 %4837  ;;  %5402 = vrot.lane.b32.xlu1 %v5397_v28, %s7182_s9  ;;  %v12084_v3 = vsel %vm1035_vm1, %v4815_v9, %v4816_v21  ;;  %v5410_v52 = vmul.f32 %v11564_v23, %v5409_v37  ;;  %v5596_v6 = vmul.f32 %v11538_v18, %v5594_v53  ;;  %v5597_v57 = vmul.f32 %v12040_v58, %v5594_v53  ;;  %v14148_v28 = vld [vmem:[#allocation35_spill] sm:$0xff] }
 0x386   : > { %14145 = vst [vmem:[#allocation100_spill] sm:$0xff] %v12079_v29  ;;  %14146 = vst [vmem:[#allocation101_spill] sm:$0xff] %v12084_v3  ;;  %v5615_v54 = vstv %s12003_s19  ;;  %v12094_v49 = vadd.f32 %v14147_v50, %v11871_v55  ;;  %v12098_v0 = vadd.f32 %v14148_v28, %v11895_v60  ;;  %5400 = vrot.lane.b32.xlu0 %v5396_v48, %s7182_s9  ;;  %v5581_v29 = vrot.slane %v5575_v15, 1  ;;  %s12290_s19 = sld [smem:[#allocation3 + $0xb0]] }
 0x387   : > { %v12101_v21 = vpop.permute.xlu1 %4860  ;;  %v5425_v9 = vmul.f32 %v11538_v18, %v5423_v16  ;;  %v5595_v37 = vmul.f32 %v11564_v23, %v5594_v53  ;;  %v5583_v56 = vrot.slane %v5576_v62, 1  ;;  %v5580_v33 = vrot.slane %v5574_v31, 1  ;;  %v14152_v53 = vld [vmem:[#allocation36_spill] sm:$0xff] }
 0x388   : > { %14149 = vst [vmem:[#allocation102_spill] sm:$0xff] %v12101_v21  ;;  %v5636_v3 = vstv %s12030_s24  ;;  %v12108_v55 = vadd.f32 %v14150_v20, %v11911_v14  ;;  %v5424_v60 = vmul.f32 %v11564_v23, %v5423_v16  ;;  %v5617_v48 = vmul.f32 %v11538_v18, %v5615_v54  ;;  %v14153_v14 = vld [vmem:[#allocation115_spill] sm:$0xff]  ;;  %s12301_s24 = sld [smem:[#allocation3 + $0xd8]] }
 0x389   : > { %v12110_v50 = vpop.permute.xlu0 %4858  ;;  %5416 = vrot.lane.b32.xlu1 %v5411_v42, %s7182_s9  ;;  %v5618_v28 = vmul.f32 %v12040_v58, %v5615_v54  ;;  %v12118_v15 = vadd.f32 %v14152_v53, %v11914_v10  ;;  %v5602_v62 = vrot.slane %v5596_v6, 1  ;;  %v5604_v31 = vrot.slane %v5597_v57, 1  ;;  %v14155_v10 = vld [vmem:[#allocation37_spill] sm:$0xff] }
 0x38a   : > { %14151 = vst [vmem:[#allocation111_spill] sm:$0xff] %v12110_v50  ;;  %v5616_v21 = vmul.f32 %v11564_v23, %v5615_v54  ;;  %v12123_v20 = vadd.f32 %v14153_v14, %v11930_v1  ;;  %5414 = vrot.lane.b32.xlu0 %v5410_v52, %s7182_s9  ;;  %v5601_v16 = vrot.slane %v5595_v37, 1  ;;  %v5638_v50 = vmul.f32 %v11538_v18, %v5636_v3 }
 0x38b   : > { %v12126_v42 = vpop.permute.xlu1 %4881  ;;  %v12134_v6 = vadd.f32 %v14155_v10, %v11938_v40  ;;  %v5584_v57 = vsel %vm562_vm0, %v5581_v29, %v5583_v56  ;;  %v5582_v1 = vsel %vm562_vm0, %v5580_v33, %v5581_v29  ;;  %v5639_v54 = vmul.f32 %v12040_v58, %v5636_v3  ;;  %v14157_v40 = vld [vmem:[#allocation38_spill] sm:$0xff] }
 0x38c   : > { %14154 = vst [vmem:[#allocation106_spill] sm:$0xff] %v12126_v42  ;;  %v5623_v52 = vrot.slane %v5617_v48, 1  ;;  %v5625_v37 = vrot.slane %v5618_v28, 1  ;;  %v5637_v14 = vmul.f32 %v11564_v23, %v5636_v3  ;;  %v5678_v42 = vstv %s12086_s27  ;;  %s12359_s27 = sld [smem:[#allocation3 + $0x58]] }
 0x38d   : > { %v12139_v53 = vpop.permute.xlu0 %4879  ;;  %5430 = vrot.lane.b32.xlu1 %v5425_v9, %s7182_s9  ;;  %v12148_v10 = vadd.f32 %v14157_v40, %v11962_v39  ;;  %v5605_v56 = vsel %vm562_vm0, %v5602_v62, %v5604_v31  ;;  %v5622_v33 = vrot.slane %v5616_v21, 1  ;;  %v5659_v29 = vmul.f32 %v11538_v18, %v5657_v22 }
 0x38e   : > { %14156 = vst [vmem:[#allocation108_spill] sm:$0xff] %v12139_v53  ;;  %5428 = vrot.lane.b32.xlu0 %v5424_v60, %s7182_s9  ;;  %v5603_v9 = vsel %vm562_vm0, %v5601_v16, %v5602_v62  ;;  %v5644_v48 = vrot.slane %v5638_v50, 1  ;;  %v5660_v3 = vmul.f32 %v12040_v58, %v5657_v22  ;;  %v5658_v28 = vmul.f32 %v11564_v23, %v5657_v22  ;;  %v14159_v60 = vld [vmem:[#allocation39_spill] sm:$0xff]  ;;  %v14160_v62 = vld [vmem:[#allocation40_spill] sm:$0xff] }
 0x38f   : > { %v12153_v53 = vpop.permute.xlu1 %4902  ;;  %v5646_v12 = vrot.slane %v5639_v54, 1  ;;  %v5680_v39 = vmul.f32 %v11538_v18, %v5678_v42  ;;  %v5681_v40 = vmul.f32 %v12040_v58, %v5678_v42  ;;  %v5679_v21 = vmul.f32 %v11564_v23, %v5678_v42  ;;  %v14162_v42 = vld [vmem:[#allocation41_spill] sm:$0xff] }
 0x390   : > { %14158 = vst [vmem:[#allocation107_spill] sm:$0xff] %v12153_v53  ;;  %v12165_v31 = vadd.f32 %v14159_v60, %v12009_v63  ;;  %v12169_v50 = vadd.f32 %v14160_v62, %v12019_v19  ;;  %v5626_v22 = vsel %vm562_vm0, %v5623_v52, %v5625_v37  ;;  %v5643_v54 = vrot.slane %v5637_v14, 1  ;;  %v14163_v63 = vld [vmem:[#allocation44_spill] sm:$0xff] }
 0x391   : > { %v12171_v16 = vpop.permute.xlu0 %4900  ;;  %5587 = vrot.lane.b32.xlu1 %v5584_v57, %s7181_s16  ;;  %v12179_v53 = vadd.f32 %v14162_v42, %v12022_v41  ;;  %v12183_v60 = vadd.f32 %v14163_v63, %v12033_v46  ;;  %v5624_v19 = vsel %vm562_vm0, %v5622_v33, %v5623_v52  ;;  %v5665_v62 = vrot.slane %v5659_v29, 1  ;;  %v14166_v52 = vld [vmem:[#allocation46_spill] sm:$0xff] }
 0x392   : > { %14161 = vst [vmem:[#allocation109_spill] sm:$0xff] %v12171_v16  ;;  %v14164_v16 = vld [vmem:[#allocation49_spill] sm:$0xff]  ;;  %5585 = vrot.lane.b32.xlu0 %v5582_v1, %s7181_s16  ;;  %v5667_v37 = vrot.slane %v5660_v3, 1  ;;  %v5664_v14 = vrot.slane %v5658_v28, 1  ;;  %v5699_v24 = vstv %s12130_s7  ;;  %v5647_v41 = vsel %vm562_vm0, %v5644_v48, %v5646_v12  ;;  %s12378_s7 = sld [smem:[#allocation3 + $0x132]] }
 0x393   : > { %v4117_v47 = vadd.f32 %v14164_v16, %v12055_v59  ;;  %v12189_v57 = vpop.permute.xlu1 %4923  ;;  %v5686_v46 = vrot.slane %v5680_v39, 1  ;;  %v5688_v42 = vrot.slane %v5681_v40, 1  ;;  %v5685_v63 = vrot.slane %v5679_v21, 1  ;;  %v14167_v59 = vld [vmem:[#allocation50_spill] sm:$0xff]  ;;  %v14169_v12 = vld [vmem:[#allocation45_spill] sm:$0xff] }
 0x394   : > { %14165 = vst [vmem:[#allocation113_spill] sm:$0xff] %v12189_v57  ;;  %v12197_v33 = vadd.f32 %v14166_v52, %v12044_v35  ;;  %v4116_v29 = vadd.f32 %v14167_v59, %v12073_v2  ;;  %v5645_v3 = vsel %vm562_vm0, %v5643_v54, %v5644_v48  ;;  %v5720_v28 = vstv %s12144_s8  ;;  %v14170_v21 = vld [vmem:[#allocation53_spill] sm:$0xff]  ;;  %s12393_s8 = sld [smem:[#allocation3 + $0x2c]] }
 0x395   : > { %v12201_v1 = vpop.permute.xlu0 %4921  ;;  %5608 = vrot.lane.b32.xlu1 %v5605_v56, %s7181_s16  ;;  %v12210_v39 = vadd.f32 %v14169_v12, %v12058_v25  ;;  %v5701_v35 = vmul.f32 %v11538_v18, %v5699_v24  ;;  %v5702_v40 = vmul.f32 %v12040_v58, %v5699_v24  ;;  %v5700_v2 = vmul.f32 %v11564_v23, %v5699_v24 }
 0x396   : > { %14168 = vst [vmem:[#allocation150_spill] sm:$0xff] %v12201_v1  ;;  %v4131_v16 = vadd.f32 %v14170_v21, %v12077_v17  ;;  %v12218_v56 = vadd.f32 %v11462_v26, %v4117_v47  ;;  %5606 = vrot.lane.b32.xlu0 %v5603_v9, %s7181_s16  ;;  %v5668_v25 = vsel %vm562_vm0, %v5665_v62, %v5667_v37  ;;  %v5165_v47 = vstv %s12161_s6  ;;  %s12412_s6 = sld [smem:[#allocation3 + $0xdd]] }
 0x397   : > { %v12221_v48 = vpop.permute.xlu1 %4944  ;;  %v12225_v54 = vsel %vm562_vm0, %v5664_v14, %v5665_v62  ;;  %v12230_v24 = vsel %vm562_vm0, %v5686_v46, %v5688_v42  ;;  %v12233_v17 = vsel %vm562_vm0, %v5685_v63, %v5686_v46  ;;  %v5722_v26 = vmul.f32 %v11538_v18, %v5720_v28  ;;  %v14173_v42 = vld [vmem:[#allocation55_spill] sm:$0xff] }
 0x398   : > { %14171 = vst [vmem:[#allocation114_spill] sm:$0xff] %v12221_v48  ;;  %v12238_v9 = vadd.f32 %v11495_v43, %v4116_v29  ;;  %v5723_v62 = vmul.f32 %v12040_v58, %v5720_v28  ;;  %v5721_v37 = vmul.f32 %v11564_v23, %v5720_v28  ;;  %v5741_v14 = vstv %s12175_s10  ;;  %s12425_s10 = sld [smem:[#allocation3 + $0x15f]] }
 0x399   : > { %v12240_v52 = vpop.permute.xlu0 %4942  ;;  %5629 = vrot.lane.b32.xlu1 %v5626_v22, %s7181_s16  ;;  %v4130_v46 = vadd.f32 %v14173_v42, %v12094_v49  ;;  %v5707_v63 = vrot.slane %v5701_v35, 1  ;;  %v5709_v59 = vrot.slane %v5702_v40, 1  ;;  %v5706_v12 = vrot.slane %v5700_v2, 1  ;;  %v14175_v35 = vld [vmem:[#allocation110_spill] sm:$0xff] }
 0x39a   : > { %14172 = vst [vmem:[#allocation116_spill] sm:$0xff] %v12240_v52  ;;  %v12251_v43 = vadd.f32 %v11528_v34, %v4131_v16  ;;  %5627 = vrot.lane.b32.xlu0 %v5624_v19, %s7181_s16  ;;  %v12257_v29 = vmul.f32 %v11538_v18, %v5165_v47  ;;  %v12260_v28 = vmul.f32 %v11564_v23, %v5165_v47  ;;  %v5171_v49 = vstv %s12192_s11  ;;  %v14176_v19 = vld [vmem:[#allocation59_spill] sm:$0xff]  ;;  %s12442_s11 = sld [smem:[#allocation3 + $0x85]] }
 0x39b   : > { %v12254_v22 = vpop.permute.xlu1 %4965  ;;  %v4145_v40 = vadd.f32 %v14175_v35, %v12098_v0  ;;  %v5728_v2 = vrot.slane %v5722_v26, 1  ;;  %v5743_v21 = vmul.f32 %v11538_v18, %v5741_v14  ;;  %v5744_v34 = vmul.f32 %v12040_v58, %v5741_v14 }
 0x39c   : > { %14174 = vst [vmem:[#allocation118_spill] sm:$0xff] %v12254_v22  ;;  %v4144_v16 = vadd.f32 %v14176_v19, %v12108_v55  ;;  %v5730_v47 = vrot.slane %v5723_v62, 1  ;;  %v5727_v22 = vrot.slane %v5721_v37, 1  ;;  %v5762_v52 = vstv %s12206_s12  ;;  %v14178_v19 = vld [vmem:[#allocation62_spill] sm:$0xff]  ;;  %s12473_s12 = sld [smem:[#allocation3 + $0x59]] }
 0x39d   : > { %v12271_v42 = vpop.permute.xlu0 %4963  ;;  %5650 = vrot.lane.b32.xlu1 %v5647_v41, %s7181_s16  ;;  %v12278_v0 = vadd.f32 %v11582_v45, %v4130_v46  ;;  %v5710_v26 = vsel %vm562_vm0, %v5707_v63, %v5709_v59  ;;  %v12282_v35 = vsel %vm562_vm0, %v5706_v12, %v5707_v63  ;;  %v5742_v55 = vmul.f32 %v11564_v23, %v5741_v14 }
 0x39e   : > { %14177 = vst [vmem:[#allocation119_spill] sm:$0xff] %v12271_v42  ;;  %v4159_v42 = vadd.f32 %v14178_v19, %v12118_v15  ;;  %5648 = vrot.lane.b32.xlu0 %v5645_v3, %s7181_s16  ;;  %v12293_v62 = vmul.f32 %v11538_v18, %v5171_v49  ;;  %v12296_v45 = vmul.f32 %v11564_v23, %v5171_v49  ;;  %v5177_v37 = vstv %s12227_s13  ;;  %s12503_s13 = sld [smem:[#allocation3 + $0x10a]] }
 0x39f   : > { %v12288_v41 = vpop.permute.xlu1 %4986  ;;  %v5749_v46 = vrot.slane %v5743_v21, 1  ;;  %v5751_v63 = vrot.slane %v5744_v34, 1  ;;  %v5764_v14 = vmul.f32 %v11538_v18, %v5762_v52  ;;  %v5765_v15 = vmul.f32 %v12040_v58, %v5762_v52  ;;  %v14181_v34 = vld [vmem:[#allocation104_spill] sm:$0xff] }
 0x3a0   : > { %14179 = vst [vmem:[#allocation120_spill] sm:$0xff] %v12293_v62  ;;  %14180 = vst [vmem:[#allocation121_spill] sm:$0xff] %v12296_v45  ;;  %v12304_v3 = vadd.f32 %v11605_v5, %v4145_v40  ;;  %v12307_v59 = vadd.f32 %v11643_v32, %v4144_v16  ;;  %v12313_v49 = vsel %vm562_vm0, %v5728_v2, %v5730_v47  ;;  %v5748_v48 = vrot.slane %v5742_v55, 1  ;;  %v14182_v32 = vld [vmem:[#allocation105_spill] sm:$0xff] }
 0x3a1   : > { %v12309_v12 = vpop.permute.xlu0 %4984  ;;  %5671 = vrot.lane.b32.xlu1 %v5668_v25, %s7181_s16  ;;  %v12316_v21 = vsel %vm562_vm0, %v5727_v22, %v5728_v2  ;;  %v4158_v19 = vadd.f32 %v14181_v34, %v12123_v20  ;;  %v5763_v5 = vmul.f32 %v11564_v23, %v5762_v52  ;;  %v5783_v40 = vstv %s12248_s15  ;;  %s12529_s15 = sld [smem:[#allocation3 + $0xb2]] }
 0x3a2   : > { %v4173_v16 = vadd.f32 %v14182_v32, %v12134_v6  ;;  %v12325_v25 = vadd.f32 %v11651_v13, %v4159_v42  ;;  %5669 = vrot.lane.b32.xlu0 %v12225_v54, %s7181_s16  ;;  %v12332_v22 = vmul.f32 %v11538_v18, %v5177_v37  ;;  %v12335_v20 = vmul.f32 %v11564_v23, %v5177_v37 }
 0x3a3   : > { %v12329_v47 = vpop.permute.xlu1 %5007  ;;  %v12340_v52 = vsel %vm562_vm0, %v5749_v46, %v5751_v63  ;;  %v5770_v6 = vrot.slane %v5764_v14, 1  ;;  %v5772_v2 = vrot.slane %v5765_v15, 1  ;;  %v5183_v13 = vstv %s12267_s17  ;;  %v14185_v63 = vld [vmem:[#allocation64_spill] sm:$0xff]  ;;  %s12549_s17 = sld [smem:[#allocation3 + $0x86]] }
 0x3a4   : > { %14183 = vst [vmem:[#allocation54_spill] sm:$0xff] %v12332_v22  ;;  %14184 = vst [vmem:[#allocation56_spill] sm:$0xff] %v12335_v20  ;;  %v5785_v54 = vmul.f32 %v11538_v18, %v5783_v40  ;;  %v5786_v55 = vmul.f32 %v12040_v58, %v5783_v40  ;;  %v5784_v37 = vmul.f32 %v11564_v23, %v5783_v40  ;;  %v6045_v34 = vstv %s12275_s18  ;;  %v12402_v20 = vld [vmem:[%s7328_s14 + $0x60] sm:$0xff]  ;;  %s12564_s18 = sld [smem:[#allocation3 + $0x137]] }
 0x3a5   : > { %v12343_v42 = vpop.permute.xlu0 %5005  ;;  %5692 = vrot.lane.b32.xlu1 %v12230_v24, %s7181_s16  ;;  %v4172_v32 = vadd.f32 %v14185_v63, %v12148_v10  ;;  %v12354_v14 = vadd.f32 %v11670_v30, %v4158_v19  ;;  %v12357_v15 = vsel %vm562_vm0, %v5748_v48, %v5749_v46  ;;  %v5769_v1 = vrot.slane %v5763_v5, 1  ;;  %v12370_v10 = vld [vmem:[%s7328_s14 + $0x68] sm:$0xff]  ;;  %v14188_v5 = vld [vmem:[#allocation112_spill] sm:$0xff]  ;;  %v14215_v22 = vld [vmem:[#allocation77_spill] sm:$0xff] }
 0x3a6   : > { %v12362_v18 = vadd.f32 %v11709_v7, %v4173_v16  ;;  %5690 = vrot.lane.b32.xlu0 %v12233_v17, %s7181_s16  ;;  %v5804_v40 = vstv %s12290_s19  ;;  %v12373_v30 = vmul.f32 %v12370_v10, %v5183_v13  ;;  %v12376_v48 = vmul.f32 %v11564_v23, %v5183_v13  ;;  %s12600_s19 = sld [smem:[#allocation3 + $0xdf]] }
 0x3a7   : > { %v12366_v24 = vpop.permute.xlu1 %5028  ;;  %v12381_v7 = vsel %vm562_vm0, %v5770_v6, %v5772_v2  ;;  %v6046_v46 = vmul.f32 %v11564_v23, %v6045_v34  ;;  %v12385_v17 = vmul.f32 %v12370_v10, %v6045_v34  ;;  %v5189_v19 = vstv %s12301_s24  ;;  %s12620_s24 = sld [smem:[#allocation3 + $0x27]] }
 0x3a8   : > { %14186 = vst [vmem:[#allocation122_spill] sm:$0xff] %v12373_v30  ;;  %14187 = vst [vmem:[#allocation60_spill] sm:$0xff] %v12376_v48  ;;  %v4187_v16 = vadd.f32 %v14188_v5, %v12165_v31  ;;  %v5791_v13 = vrot.slane %v5785_v54, 1  ;;  %v5793_v48 = vrot.slane %v5786_v55, 1  ;;  %v5790_v30 = vrot.slane %v5784_v37, 1 }
 0x3a9   : > { %v12390_v63 = vpop.permute.xlu0 %5026  ;;  %5713 = vrot.lane.b32.xlu1 %v5710_v26, %s7181_s16  ;;  %v12396_v2 = vadd.f32 %v11712_v8, %v4172_v32  ;;  %v12399_v23 = vsel %vm562_vm0, %v5769_v1, %v5770_v6  ;;  %v5805_v31 = vmul.f32 %v12402_v20, %v5804_v40  ;;  %v5806_v5 = vmul.f32 %v12370_v10, %v5804_v40  ;;  %v14189_v26 = vld [vmem:[#allocation65_spill] sm:$0xff] }
 0x3aa   : > { %v4186_v57 = vadd.f32 %v14189_v26, %v12169_v50  ;;  %5711 = vrot.lane.b32.xlu0 %v12282_v35, %s7181_s16  ;;  %v12415_v8 = vmul.f32 %v12370_v10, %v5189_v19  ;;  %v12418_v1 = vmul.f32 %v12402_v20, %v5189_v19  ;;  %v5195_v6 = vstv %s12337_s26  ;;  %s12657_s26 = sld [smem:[#allocation3 + $0xb3]] }
 0x3ab   : > { %v12410_v54 = vpop.permute.xlu1 %5049  ;;  %v4201_v55 = vadd.f32 %v11423_v4, %v12179_v53  ;;  %v6052_v37 = vrot.slane %v6046_v46, 2  ;;  %v6053_v50 = vrot.slane %v12385_v17, 2  ;;  %v5807_v35 = vmul.f32 %v12040_v58, %v5804_v40  ;;  %v14194_v40 = vld [vmem:[#allocation66_spill] sm:$0xff] }
 0x3ac   : > { %14190 = vst [vmem:[#allocation124_spill] sm:$0xff] %v12410_v54  ;;  %14191 = vst [vmem:[#allocation125_spill] sm:$0xff] %v12415_v8  ;;  %v12428_v32 = vadd.f32 %v11727_v44, %v4187_v16  ;;  %v5794_v19 = vsel %vm562_vm0, %v5791_v13, %v5793_v48  ;;  %v12436_v4 = vsel %vm562_vm0, %v5790_v30, %v5791_v13  ;;  %v5811_v17 = vrot.slane %v5805_v31, 1  ;;  %v14195_v16 = vld [vmem:[#allocation67_spill] sm:$0xff] }
 0x3ad   : > { %14192 = vst [vmem:[#allocation63_spill] sm:$0xff] %v12418_v1  ;;  %v12430_v26 = vpop.permute.xlu0 %5047  ;;  %5734 = vrot.lane.b32.xlu1 %v12313_v49, %s7181_s16  ;;  %v6048_v53 = vmul.f32 %v12040_v58, %v6045_v34  ;;  %v4200_v46 = vadd.f32 %v14194_v40, %v12183_v60  ;;  %v5812_v1 = vrot.slane %v5806_v5, 1  ;;  %v6066_v44 = vstv %s12359_s27  ;;  %s12682_s27 = sld [smem:[#allocation3 + $0x164]] }
 0x3ae   : > { %14193 = vst [vmem:[#allocation132_spill] sm:$0xff] %v12430_v26  ;;  %v4215_v8 = vadd.f32 %v14195_v16, %v12197_v33  ;;  %v12447_v49 = vadd.f32 %v11745_v11, %v4186_v57  ;;  %5732 = vrot.lane.b32.xlu0 %v12316_v21, %s7181_s16  ;;  %v12454_v34 = vmul.f32 %v12370_v10, %v5195_v6  ;;  %v5201_v60 = vstv %s12378_s7  ;;  %s12710_s7 = sld [smem:[#allocation3 + $0x54]] }
 0x3af   : > { %v12451_v30 = vpop.permute.xlu1 %5070  ;;  %v12458_v48 = vadd.f32 %v11752_v38, %v4201_v55  ;;  %v12461_v13 = vsel %vm1035_vm1, %v6052_v37, %v6053_v50  ;;  %v5814_v31 = vrot.slane %v5807_v35, 1  ;;  %v12464_v33 = vmul.f32 %v12402_v20, %v5195_v6  ;;  %v14202_v35 = vld [vmem:[#allocation68_spill] sm:$0xff] }
 0x3b0   : > { %14196 = vst [vmem:[#allocation135_spill] sm:$0xff] %v12451_v30  ;;  %14197 = vst [vmem:[#allocation129_spill] sm:$0xff] %v12454_v34  ;;  %v6055_v57 = vrot.slane %v6048_v53, 2  ;;  %v6068_v21 = vmul.f32 %v12370_v10, %v6066_v44  ;;  %v6069_v5 = vmul.f32 %v12040_v58, %v6066_v44  ;;  %v6213_v38 = vstv %s12393_s8  ;;  %s12746_s8 = sld [smem:[#allocation3 + $0x10c]] }
 0x3b1   : > { %14198 = vst [vmem:[#allocation73_spill] sm:$0xff] %v12464_v33  ;;  %v12466_v11 = vpop.permute.xlu0 %5068  ;;  %5755 = vrot.lane.b32.xlu1 %v12340_v52, %s7182_s9  ;;  %v12476_v55 = vadd.f32 %v11770_v27, %v4200_v46  ;;  %v12479_v6 = vsel %vm562_vm0, %v5811_v17, %v5812_v1  ;;  %v12482_v37 = vmul.f32 %v12370_v10, %v5201_v60  ;;  %v5825_v17 = vstv %s12412_s6  ;;  %s12798_s6 = sld [smem:[#allocation3 + $0xe0]] }
 0x3b2   : > { %14199 = vst [vmem:[#allocation133_spill] sm:$0xff] %v12466_v11  ;;  %v12485_v52 = vmul.f32 %v12402_v20, %v5201_v60  ;;  %v4214_v53 = vadd.f32 %v14202_v35, %v12210_v39  ;;  %v12490_v40 = vadd.f32 %v11778_v61, %v4215_v8  ;;  %5753 = vrot.lane.b32.xlu0 %v12357_v15, %s7182_s9  ;;  %v5207_v61 = vstv %s12425_s10  ;;  %v14204_v39 = vld [vmem:[#allocation69_spill] sm:$0xff]  ;;  %s12890_s10 = sld [smem:[#allocation3 + $0x139]] }
 0x3b3   : > { %14200 = vst [vmem:[#allocation139_spill] sm:$0xff] %v12482_v37  ;;  %v12494_v27 = vpop.permute.xlu1 %5091  ;;  %v6067_v46 = vmul.f32 %v12402_v20, %v6066_v44  ;;  %v12499_v16 = vsel %vm562_vm0, %v5812_v1, %v5814_v31  ;;  %v6215_v60 = vmul.f32 %v12370_v10, %v6213_v38  ;;  %v12508_v8 = vadd.f32 %v14204_v39, %v12218_v56 }
 0x3b4   : > { %14201 = vst [vmem:[#allocation140_spill] sm:$0xff] %v12485_v52  ;;  %14203 = vst [vmem:[#allocation142_spill] sm:$0xff] %v12494_v27  ;;  %v6216_v52 = vmul.f32 %v12040_v58, %v6213_v38  ;;  %v12515_v44 = vsel %vm1035_vm1, %v6053_v50, %v6055_v57  ;;  %v6074_v1 = vrot.slane %v6068_v21, 2  ;;  %v6076_v31 = vrot.slane %v6069_v5, 2  ;;  %v14206_v27 = vld [vmem:[#allocation155_spill] sm:$0xff]  ;;  %v14208_v5 = vld [vmem:[#allocation72_spill] sm:$0xff] }
 0x3b5   : > { %v12510_v15 = vpop.permute.xlu0 %5089  ;;  %5776 = vrot.lane.b32.xlu1 %v12381_v7, %s7182_s9  ;;  %v6214_v35 = vmul.f32 %v12402_v20, %v6213_v38  ;;  %v5827_v37 = vmul.f32 %v12370_v10, %v5825_v17  ;;  %v5828_v33 = vmul.f32 %v12040_v58, %v5825_v17  ;;  %v6087_v34 = vstv %s12442_s11  ;;  %s12909_s11 = sld [smem:[#allocation3 + $0x81]] }
 0x3b6   : > { %14205 = vst [vmem:[#allocation143_spill] sm:$0xff] %v12510_v15  ;;  %v12522_v56 = vadd.f32 %v14206_v27, %v4214_v53  ;;  %5774 = vrot.lane.b32.xlu0 %v12399_v23, %s7182_s9  ;;  %v6073_v50 = vrot.slane %v6067_v46, 2  ;;  %v5826_v57 = vmul.f32 %v12402_v20, %v5825_v17  ;;  %v12532_v21 = vmul.f32 %v12370_v10, %v5207_v61 }
 0x3b7   : > { %v12526_v7 = vpop.permute.xlu1 %5112  ;;  %v12536_v38 = vadd.f32 %v14208_v5, %v12238_v9  ;;  %v6221_v53 = vrot.slane %v6215_v60, 2  ;;  %v6223_v27 = vrot.slane %v6216_v52, 2  ;;  %v12539_v39 = vmul.f32 %v12402_v20, %v5207_v61  ;;  %v14210_v61 = vld [vmem:[#allocation74_spill] sm:$0xff] }
 0x3b8   : > { %14207 = vst [vmem:[#allocation144_spill] sm:$0xff] %v12526_v7  ;;  %v6089_v46 = vmul.f32 %v12370_v10, %v6087_v34  ;;  %v6090_v17 = vmul.f32 %v12040_v58, %v6087_v34  ;;  %v6088_v7 = vmul.f32 %v12402_v20, %v6087_v34  ;;  %v6234_v15 = vstv %s12473_s12  ;;  %s12935_s12 = sld [smem:[#allocation3 + $0x10d]] }
 0x3b9   : > { %v12541_v23 = vpop.permute.xlu0 %5110  ;;  %5797 = vrot.lane.b32.xlu1 %v5794_v19, %s7182_s9  ;;  %v6077_v9 = vsel %vm1035_vm1, %v6074_v1, %v6076_v31  ;;  %v6220_v5 = vrot.slane %v6214_v35, 2  ;;  %v5833_v60 = vrot.slane %v5827_v37, 1  ;;  %v5835_v52 = vrot.slane %v5828_v33, 1  ;;  %v14211_v19 = vld [vmem:[#allocation75_spill] sm:$0xff] }
 0x3ba   : > { %14209 = vst [vmem:[#allocation145_spill] sm:$0xff] %v12541_v23  ;;  %v12553_v23 = vadd.f32 %v14210_v61, %v12251_v43  ;;  %v12557_v11 = vadd.f32 %v14211_v19, %v12278_v0  ;;  %5795 = vrot.lane.b32.xlu0 %v12436_v4, %s7182_s9  ;;  %v6075_v31 = vsel %vm1035_vm1, %v6073_v50, %v6074_v1  ;;  %v5832_v35 = vrot.slane %v5826_v57, 1  ;;  %v14214_v57 = vld [vmem:[#allocation76_spill] sm:$0xff] }
 0x3bb   : > { %v12561_v34 = vpop.permute.xlu1 %5133  ;;  %v6236_v33 = vmul.f32 %v12370_v10, %v6234_v15  ;;  %v6237_v37 = vmul.f32 %v12040_v58, %v6234_v15  ;;  %v6235_v43 = vmul.f32 %v12402_v20, %v6234_v15  ;;  %v5846_v61 = vstv %s12503_s13  ;;  %s12960_s13 = sld [smem:[#allocation3 + $0x166]] }
 0x3bc   : > { %14212 = vst [vmem:[#allocation151_spill] sm:$0xff] %v12561_v34  ;;  %v6224_v4 = vsel %vm1035_vm1, %v6221_v53, %v6223_v27  ;;  %v6095_v19 = vrot.slane %v6089_v46, 2  ;;  %v6097_v1 = vrot.slane %v6090_v17, 2  ;;  %v6094_v50 = vrot.slane %v6088_v7, 2 }
 0x3bd   : > { %v12570_v0 = vpop.permute.xlu0 %5131  ;;  %6057 = vrot.lane.b32.xlu1 %v12461_v13, %s7181_s16  ;;  %v12577_v34 = vadd.f32 %v14214_v57, %v12304_v3  ;;  %v12581_v30 = vadd.f32 %v14215_v22, %v12307_v59  ;;  %v12584_v15 = vsel %vm1035_vm1, %v6220_v5, %v6221_v53  ;;  %v12594_v7 = vsel %vm562_vm0, %v5832_v35, %v5833_v60 }
 0x3be   : > { %14213 = vst [vmem:[#allocation146_spill] sm:$0xff] %v12570_v0  ;;  %v12587_v0 = vsel %vm562_vm0, %v5833_v60, %v5835_v52  ;;  %5816 = vrot.lane.b32.xlu0 %v12479_v6, %s7182_s9  ;;  %v5848_v3 = vmul.f32 %v12370_v10, %v5846_v61  ;;  %v5849_v27 = vmul.f32 %v12040_v58, %v5846_v61  ;;  %v6108_v59 = vstv %s12529_s15  ;;  %v14216_v6 = vld [vmem:[#allocation78_spill] sm:$0xff]  ;;  %v14217_v60 = vld [vmem:[#allocation83_spill] sm:$0xff]  ;;  %s12996_s15 = sld [smem:[#allocation3 + $0x13a]] }
 0x3bf   : > { %v12591_v13 = vpop.permute.xlu1 %5154  ;;  %v6242_v22 = vrot.slane %v6236_v33, 2  ;;  %v6244_v53 = vrot.slane %v6237_v37, 2  ;;  %v6241_v46 = vrot.slane %v6235_v43, 2  ;;  %v5847_v17 = vmul.f32 %v12402_v20, %v5846_v61 }
 0x3c0   : > { %v12604_v5 = vadd.f32 %v14216_v6, %v12325_v25  ;;  %v12608_v52 = vadd.f32 %v14217_v60, %v12354_v14  ;;  %v12615_v33 = vsel %vm1035_vm1, %v6095_v19, %v6097_v1  ;;  %v12618_v37 = vsel %vm1035_vm1, %v6094_v50, %v6095_v19  ;;  %v14218_v25 = vld [vmem:[#allocation84_spill] sm:$0xff]  ;;  %v14219_v60 = vld [vmem:[#allocation79_spill] sm:$0xff] }
 0x3c1   : > { %v12610_v35 = vpop.permute.xlu0 %5152  ;;  %5818 = vrot.lane.b32.xlu1 %v12499_v16, %s7182_s9  ;;  %v12624_v43 = vadd.f32 %v14218_v25, %v12362_v18  ;;  %v6110_v14 = vmul.f32 %v12370_v10, %v6108_v59  ;;  %v6111_v61 = vmul.f32 %v12040_v58, %v6108_v59  ;;  %v6255_v57 = vstv %s12549_s17  ;;  %s13021_s17 = sld [smem:[#allocation3 + $0x167]] }
 0x3c2   : > { %6059 = vrot.lane.b32.xlu0 %v12515_v44, %s7181_s16  ;;  %v5854_v1 = vrot.slane %v5848_v3, 1  ;;  %v5856_v6 = vrot.slane %v5849_v27, 1  ;;  %v6109_v19 = vmul.f32 %v12402_v20, %v6108_v59  ;;  %v5867_v50 = vstv %s12564_s18  ;;  %v14220_v44 = vld [vmem:[#allocation80_spill] sm:$0xff]  ;;  %s13037_s18 = sld [smem:[#allocation3 + $0xae]] }
 0x3c3   : > { %v12631_v16 = vpop.permute.xlu1 %5220  ;;  %v12637_v45 = vadd.f32 %v14219_v60, %v12396_v2  ;;  %v12640_v18 = vsel %vm1035_vm1, %v6242_v22, %v6244_v53  ;;  %v12643_v25 = vsel %vm1035_vm1, %v6241_v46, %v6242_v22  ;;  %v5853_v26 = vrot.slane %v5847_v17, 1 }
 0x3c4   : > { %v12647_v62 = vadd.f32 %v14220_v44, %v12428_v32  ;;  %v6257_v27 = vmul.f32 %v12370_v10, %v6255_v57  ;;  %v6258_v2 = vmul.f32 %v12040_v58, %v6255_v57  ;;  %v6256_v59 = vmul.f32 %v12402_v20, %v6255_v57  ;;  %v14223_v32 = vld [vmem:[#allocation81_spill] sm:$0xff]  ;;  %v14225_v57 = vld [vmem:[#allocation82_spill] sm:$0xff] }
 0x3c5   : > { %v12649_v3 = vpop.permute.xlu0 %5218  ;;  %6080 = vrot.lane.b32.xlu1 %v6077_v9, %s7181_s16  ;;  %v6116_v53 = vrot.slane %v6110_v14, 2  ;;  %v6118_v60 = vrot.slane %v6111_v61, 2  ;;  %v5869_v22 = vmul.f32 %v12370_v10, %v5867_v50  ;;  %v5870_v46 = vmul.f32 %v12040_v58, %v5867_v50 }
 0x3c6   : > { %14221 = vst [vmem:[#allocation147_spill] sm:$0xff] %v12647_v62  ;;  %14222 = vst [vmem:[#allocation152_spill] sm:$0xff] %v12649_v3  ;;  %v12661_v17 = vadd.f32 %v14223_v32, %v12447_v49  ;;  %6078 = vrot.lane.b32.xlu0 %v6075_v31, %s7181_s16  ;;  %v12667_v44 = vsel %vm562_vm0, %v5854_v1, %v5856_v6  ;;  %v6115_v14 = vrot.slane %v6109_v19, 2  ;;  %v14227_v3 = vld [vmem:[#allocation85_spill] sm:$0xff]  ;;  %v6129_v31 = vstv %s12600_s19  ;;  %s13055_s19 = sld [smem:[#allocation3 + $0xdb]] }
 0x3c7   : > { %v12664_v9 = vpop.permute.xlu1 %5234  ;;  %v5868_v61 = vmul.f32 %v12402_v20, %v5867_v50  ;;  %v12672_v62 = vadd.f32 %v14225_v57, %v12458_v48  ;;  %v12676_v54 = vadd.f32 %v14227_v3, %v12476_v55  ;;  %v12679_v49 = vsel %vm562_vm0, %v5853_v26, %v5854_v1  ;;  %v14229_v48 = vld [vmem:[#allocation87_spill] sm:$0xff] }
 0x3c8   : > { %14224 = vst [vmem:[#allocation14_spill] sm:$0xff] %v12661_v17  ;;  %v6263_v6 = vrot.slane %v6257_v27, 2  ;;  %v6265_v19 = vrot.slane %v6258_v2, 2  ;;  %v6262_v50 = vrot.slane %v6256_v59, 2  ;;  %v5437_v17 = vstv %s12620_s24  ;;  %s13069_s24 = sld [smem:[#allocation3 + $0x108]] }
 0x3c9   : > { %14226 = vst [vmem:[#allocation148_spill] sm:$0xff] %v12672_v62  ;;  %14228 = vst [vmem:[#allocation149_spill] sm:$0xff] %v12676_v54  ;;  %v12684_v32 = vpop.permute.xlu0 %5232  ;;  %6227 = vrot.lane.b32.xlu1 %v6224_v4, %s7182_s9  ;;  %v4540_v57 = vadd.f32 %v14229_v48, %v12508_v8  ;;  %v12691_v55 = vsel %vm1035_vm1, %v6116_v53, %v6118_v60  ;;  %v5875_v3 = vrot.slane %v5869_v22, 1  ;;  %v5877_v26 = vrot.slane %v5870_v46, 1  ;;  %v14231_v8 = vld [vmem:[#allocation86_spill] sm:$0xff]  ;;  %v14232_v60 = vld [vmem:[#allocation88_spill] sm:$0xff] }
 0x3ca   : > { %6225 = vrot.lane.b32.xlu0 %v12584_v15, %s7182_s9  ;;  %v12698_v54 = vsel %vm1035_vm1, %v6115_v14, %v6116_v53  ;;  %v5874_v4 = vrot.slane %v5868_v61, 1  ;;  %v6131_v27 = vmul.f32 %v12370_v10, %v6129_v31  ;;  %v6132_v2 = vmul.f32 %v12040_v58, %v6129_v31  ;;  %v14233_v53 = vld [vmem:[#allocation22_spill] sm:$0xff] }
 0x3cb   : > { %v12695_v1 = vpop.permute.xlu1 %5248  ;;  %v4519_v59 = vadd.f32 %v14231_v8, %v12490_v40  ;;  %v4539_v22 = vadd.f32 %v14232_v60, %v12536_v38  ;;  %v6130_v46 = vmul.f32 %v12402_v20, %v6129_v31  ;;  %v12708_v15 = vmul.f32 %v12370_v10, %v5437_v17 }
 0x3cc   : > { %14230 = vst [vmem:[#allocation15_spill] sm:$0xff] %v12695_v1  ;;  %v4518_v14 = vadd.f32 %v14233_v53, %v12522_v56  ;;  %v12719_v40 = vsel %vm1035_vm1, %v6263_v6, %v6265_v19  ;;  %v12722_v38 = vsel %vm1035_vm1, %v6262_v50, %v6263_v6  ;;  %v5440_v31 = vmul.f32 %v12040_v58, %v5437_v17 }
 0x3cd   : > { %v12714_v61 = vpop.permute.xlu0 %5246  ;;  %5839 = vrot.lane.b32.xlu1 %v12587_v0, %s7182_s9  ;;  %v12726_v48 = vadd.f32 %v11826_v51, %v4540_v57  ;;  %v12729_v8 = vsel %vm562_vm0, %v5875_v3, %v5877_v26  ;;  %v6276_v56 = vstv %s12657_s26  ;;  %v12733_v60 = vmul.f32 %v12402_v20, %v5437_v17  ;;  %v14237_v57 = vld [vmem:[#allocation128_spill] sm:$0xff]  ;;  %s13109_s26 = sld [smem:[#allocation3 + $0x135]] }
 0x3ce   : > { %14234 = vst [vmem:[#allocation13_spill] sm:$0xff] %v12714_v61  ;;  %v4561_v0 = vadd.f32 %v11819_v36, %v12553_v23  ;;  %5837 = vrot.lane.b32.xlu0 %v12594_v7, %s7182_s9  ;;  %v12742_v19 = vsel %vm562_vm0, %v5874_v4, %v5875_v3  ;;  %v6137_v51 = vrot.slane %v6131_v27, 2  ;;  %v6139_v50 = vrot.slane %v6132_v2, 2  ;;  %v14239_v4 = vld [vmem:[#allocation123_spill] sm:$0xff]  ;;  %v14240_v2 = vld [vmem:[#allocation25_spill] sm:$0xff] }
 0x3cf   : > { %14235 = vst [vmem:[#allocation16_spill] sm:$0xff] %v12733_v60  ;;  %v12739_v6 = vpop.permute.xlu1 %5262  ;;  %v4703_v26 = vadd.f32 %v14237_v57, %v4539_v22  ;;  %v6136_v53 = vrot.slane %v6130_v46, 2  ;;  %v5888_v61 = vstv %s12682_s27  ;;  %v6278_v36 = vmul.f32 %v12370_v10, %v6276_v56  ;;  %v14241_v46 = vld [vmem:[#allocation33_spill] sm:$0xff]  ;;  %s13125_s27 = sld [smem:[#allocation3 + $0x162]] }
 0x3d0   : > { %14236 = vst [vmem:[#allocation17_spill] sm:$0xff] %v12739_v6  ;;  %v6279_v23 = vmul.f32 %v12040_v58, %v6276_v56  ;;  %v6277_v7 = vmul.f32 %v12402_v20, %v6276_v56  ;;  %v5447_v3 = vrot.slane %v5440_v31, 1  ;;  %v4560_v27 = vadd.f32 %v14239_v4, %v12557_v11  ;;  %v14244_v4 = vld [vmem:[#allocation96_spill] sm:$0xff] }
 0x3d1   : > { %v12749_v62 = vpop.permute.xlu0 %5260  ;;  %6101 = vrot.lane.b32.xlu1 %v12615_v33, %s7181_s16  ;;  %v4582_v22 = vadd.f32 %v14240_v2, %v12577_v34  ;;  %v4687_v57 = vadd.f32 %v14241_v46, %v4519_v59  ;;  %v12768_v56 = vsel %vm1035_vm1, %v6137_v51, %v6139_v50  ;;  %v5890_v31 = vmul.f32 %v12370_v10, %v5888_v61 }
 0x3d2   : > { %14238 = vst [vmem:[#allocation18_spill] sm:$0xff] %v12749_v62  ;;  %v14242_v62 = vld [vmem:[#allocation89_spill] sm:$0xff]  ;;  %6099 = vrot.lane.b32.xlu0 %v12618_v37, %s7181_s16  ;;  %v5891_v11 = vmul.f32 %v12040_v58, %v5888_v61  ;;  %v4686_v34 = vadd.f32 %v14244_v4, %v4518_v14  ;;  %v12774_v59 = vsel %vm1035_vm1, %v6136_v53, %v6137_v51  ;;  %v6284_v50 = vrot.slane %v6278_v36, 2  ;;  %v14248_v4 = vld [vmem:[#allocation70_spill] sm:$0xff] }
 0x3d3   : > { %v4721_v33 = vadd.f32 %v14242_v62, %v4561_v0  ;;  %v12765_v6 = vpop.permute.xlu1 %5276  ;;  %14245 = vst [vmem:[#allocation153_spill] sm:$0xff] %v12774_v59  ;;  %v5889_v2 = vmul.f32 %v12402_v20, %v5888_v61  ;;  %v5454_v62 = vstv %s12710_s7  ;;  %v14246_v0 = vld [vmem:[#allocation157_spill] sm:$0xff]  ;;  %v6286_v17 = vrot.slane %v6279_v23, 2  ;;  %v14249_v53 = vld [vmem:[#allocation98_spill] sm:$0xff]  ;;  %s13225_s7 = sld [smem:[#allocation8]] }
 0x3d4   : > { %14243 = vst [vmem:[#allocation19_spill] sm:$0xff] %v12765_v6  ;;  %v4581_v37 = vadd.f32 %v14246_v0, %v12581_v30  ;;  %v6283_v60 = vrot.slane %v6277_v7, 2  ;;  %v14247_v6 = vld [vmem:[#allocation90_spill] sm:$0xff]  ;;  %v4738_v51 = vadd.f32 %v14248_v4, %v4582_v22  ;;  %v4823_v59 = vadd.f32 %v14249_v53, %v4687_v57  ;;  %v14253_v4 = vld [vmem:[#allocation71_spill] sm:$0xff] }
 0x3d5   : > { %v12780_v46 = vpop.permute.xlu0 %5274  ;;  %6248 = vrot.lane.b32.xlu1 %v12640_v18, %s7182_s9  ;;  %v4720_v14 = vadd.f32 %v14247_v6, %v4560_v27  ;;  %v14250_v61 = vrot.slane %v12708_v15, 1  ;;  %v14251_v30 = vld [vmem:[#allocation126_spill] sm:$0xff]  ;;  %v5896_v36 = vrot.slane %v5890_v31, 1  ;;  %v5898_v23 = vrot.slane %v5891_v11, 1  ;;  %v14252_v27 = vld [vmem:[#allocation101_spill] sm:$0xff] }
 0x3d6   : > { %v4603_v0 = vadd.f32 %v14251_v30, %v12604_v5  ;;  %6246 = vrot.lane.b32.xlu0 %v12643_v25, %s7182_s9  ;;  %v12801_v6 = vmul.f32 %v12370_v10, %v5454_v62  ;;  %v4991_v7 = vadd.f32 %v12288_v41, %v4823_v59  ;;  %v5895_v22 = vrot.slane %v5889_v2, 1  ;;  %v14254_v41 = vld [vmem:[#allocation127_spill] sm:$0xff] }
 0x3d7   : > { %v12790_v1 = vsel %vm562_vm0, %v14250_v61, %v5447_v3  ;;  %v12796_v18 = vpop.permute.xlu1 %5290  ;;  %v4822_v3 = vadd.f32 %v14252_v27, %v4686_v34  ;;  %v6150_v57 = vstv %s12746_s8  ;;  %v4737_v5 = vadd.f32 %v14253_v4, %v4581_v37  ;;  %v14255_v59 = vld [vmem:[#allocation99_spill] sm:$0xff]  ;;  %v14257_v27 = vld [vmem:[#allocation100_spill] sm:$0xff]  ;;  %v14259_v4 = vld [vmem:[#allocation102_spill] sm:$0xff]  ;;  %s13229_s8 = sld [smem:[#allocation2]] }
 0x3d8   : > { %v12812_v25 = vsel %vm1035_vm1, %v6284_v50, %v6286_v17  ;;  %v12815_v31 = vsel %vm1035_vm1, %v6283_v60, %v6284_v50  ;;  %v12818_v11 = vmul.f32 %v12040_v58, %v5454_v62  ;;  %v4602_v34 = vadd.f32 %v14254_v41, %v12608_v52  ;;  %v14260_v41 = vld [vmem:[#allocation92_spill] sm:$0xff] }
 0x3d9   : > { %v12807_v53 = vpop.permute.xlu0 %5288  ;;  %5860 = vrot.lane.b32.xlu1 %v12667_v44, %s7182_s9  ;;  %v4844_v2 = vadd.f32 %v14255_v59, %v12726_v48  ;;  %v4990_v37 = vadd.f32 %v12309_v12, %v4822_v3  ;;  %v5159_v61 = vadd.f32 %v12591_v13, %v4991_v7  ;;  %v14256_v44 = vld [vmem:[#allocation91_spill] sm:$0xff]  ;;  %v12832_v17 = vsel %vm562_vm0, %v5896_v36, %v5898_v23 }
 0x3da   : > { %v4755_v30 = vadd.f32 %v14256_v44, %v4603_v0  ;;  %5858 = vrot.lane.b32.xlu0 %v12679_v49, %s7182_s9  ;;  %v6152_v50 = vmul.f32 %v12370_v10, %v6150_v57  ;;  %v5462_v52 = vrot.slane %v12801_v6, 1  ;;  %v4843_v48 = vadd.f32 %v14257_v27, %v4703_v26  ;;  %v14258_v49 = vld [vmem:[#allocation28_spill] sm:$0xff] }
 0x3db   : > { %v12829_v60 = vpop.permute.xlu1 %5304  ;;  %v5012_v12 = vadd.f32 %v12329_v47, %v4844_v2  ;;  %v5158_v13 = vadd.f32 %v12610_v35, %v4990_v37  ;;  %v12840_v0 = vsel %vm562_vm0, %v5895_v22, %v5896_v36  ;;  %v4624_v7 = vadd.f32 %v14258_v49, %v12624_v43  ;;  %v14261_v43 = vld [vmem:[#allocation111_spill] sm:$0xff] }
 0x3dc   : > { %v6153_v23 = vmul.f32 %v12040_v58, %v6150_v57  ;;  %v6151_v26 = vmul.f32 %v12402_v20, %v6150_v57  ;;  %v5464_v47 = vrot.slane %v12818_v11, 1  ;;  %v4865_v35 = vadd.f32 %v14259_v4, %v4721_v33  ;;  %v14265_v49 = vld [vmem:[#allocation131_spill] sm:$0xff]  ;;  %v14268_v4 = vld [vmem:[#allocation120_spill] sm:$0xff] }
 0x3dd   : > { %v12844_v3 = vpop.permute.xlu0 %5302  ;;  %6122 = vrot.lane.b32.xlu1 %v12691_v55, %s7181_s16  ;;  %v4754_v59 = vadd.f32 %v14260_v41, %v4602_v34  ;;  %v5011_v36 = vadd.f32 %v12343_v42, %v4843_v48  ;;  %v5211_v22 = vadd.f32 %v12532_v21, %v5159_v61  ;;  %v4864_v2 = vadd.f32 %v14261_v43, %v4720_v14  ;;  %v14262_v21 = vld [vmem:[#allocation141_spill] sm:$0xff]  ;;  %v14263_v61 = vld [vmem:[#allocation106_spill] sm:$0xff] }
 0x3de   : > { %6120 = vrot.lane.b32.xlu0 %v12698_v54, %s7181_s16  ;;  %v6158_v37 = vrot.slane %v6152_v50, 2  ;;  %v6297_v58 = vstv %s12798_s6  ;;  %v12860_v57 = vmul.f32 %v12402_v20, %v5454_v62  ;;  %v5033_v44 = vadd.f32 %v12366_v24, %v4865_v35  ;;  %s13234_s6 = sld [smem:[#allocation8 + $0x1]] }
 0x3df   : > { %v5319_v55 = vpop.permute.xlu1 %5318  ;;  %v5169_v33 = vadd.f32 %v12257_v29, %v5012_v12  ;;  %v5210_v42 = vadd.f32 %v12539_v39, %v5158_v13  ;;  %v4623_v14 = vadd.f32 %v14262_v21, %v12637_v45  ;;  %v4886_v54 = vadd.f32 %v14263_v61, %v4738_v51  ;;  %v14264_v39 = vld [vmem:[#allocation108_spill] sm:$0xff]  ;;  %v14273_v61 = vld [vmem:[#allocation130_spill] sm:$0xff] }
 0x3e0   : > { %v12864_v34 = vadd.f32 %v5319_v55, %v5211_v22  ;;  %v6160_v62 = vrot.slane %v6153_v23, 2  ;;  %v6157_v50 = vrot.slane %v6151_v26, 2  ;;  %v5032_v24 = vadd.f32 %v12390_v63, %v4864_v2  ;;  %v12885_v23 = vld [vmem:[%s7328_s14 + $0x70] sm:$0x3]  ;;  %v14267_v26 = vld [vmem:[#allocation152_spill] sm:$0xff] }
 0x3e1   : > { %v5317_v27 = vpop.permute.xlu0 %5316  ;;  %6269 = vrot.lane.b32.xlu1 %v12719_v40, %s7182_s9  ;;  %v5225_v29 = vadd.f32 %v12631_v16, %v5169_v33  ;;  %v5168_v48 = vadd.f32 %v12260_v28, %v5011_v36  ;;  %v4885_v13 = vadd.f32 %v14264_v39, %v4737_v5  ;;  %v4772_v45 = vadd.f32 %v14265_v49, %v4624_v7  ;;  %v14266_v28 = vld [vmem:[#allocation124_spill] sm:$0xff] }
 0x3e2   : > { %v12875_v12 = vadd.f32 %v5317_v27, %v5210_v42  ;;  %6267 = vrot.lane.b32.xlu0 %v12722_v38, %s7182_s9  ;;  %v12882_v40 = vmul.f32 %v12370_v10, %v6297_v58  ;;  %v12888_v63 = vmul.f32 %v12885_v23, %v6297_v58  ;;  %v5054_v16 = vadd.f32 %v14266_v28, %v4886_v54  ;;  %v14269_v38 = vld [vmem:[#allocation107_spill] sm:$0xff]  ;;  %v14270_v55 = vld [vmem:[#allocation132_spill] sm:$0xff]  ;;  %v14274_v27 = vld [vmem:[#allocation109_spill] sm:$0xff] }
 0x3e3   : > { %v5333_v51 = vpop.permute.xlu1 %5332  ;;  %v5224_v5 = vadd.f32 %v14267_v26, %v5168_v48  ;;  %v5175_v7 = vadd.f32 %v14268_v4, %v5033_v44  ;;  %v4907_v41 = vadd.f32 %v14269_v38, %v4755_v30  ;;  %v12901_v22 = vsel %vm1035_vm1, %v6158_v37, %v6160_v62  ;;  %v14271_v30 = vld [vmem:[#allocation121_spill] sm:$0xff]  ;;  %v14276_v48 = vld [vmem:[#allocation135_spill] sm:$0xff]  ;;  %v14279_v28 = vld [vmem:[#allocation136_spill] sm:$0xff] }
 0x3e4   : > { %v12895_v35 = vadd.f32 %v5333_v51, %v5225_v29  ;;  %v12904_v43 = vsel %vm1035_vm1, %v6157_v50, %v6158_v37  ;;  %v12907_v2 = vmul.f32 %v12402_v20, %v6297_v58  ;;  %v5053_v44 = vadd.f32 %v14270_v55, %v4885_v13  ;;  %v14275_v37 = vld [vmem:[#allocation93_spill] sm:$0xff]  ;;  %v14278_v51 = vld [vmem:[#allocation14_spill] sm:$0xff] }
 0x3e5   : > { %v5331_v36 = vpop.permute.xlu0 %5330  ;;  %5881 = vrot.lane.b32.xlu1 %v12729_v8, %s7182_s9  ;;  %v5239_v33 = vadd.f32 %v12664_v9, %v5175_v7  ;;  %v5174_v42 = vadd.f32 %v14271_v30, %v5032_v24  ;;  %v14272_v8 = vld [vmem:[#allocation147_spill] sm:$0xff]  ;;  %v4906_v62 = vadd.f32 %v14274_v27, %v4754_v59  ;;  %v4771_v50 = vadd.f32 %v14275_v37, %v4623_v14  ;;  %v14277_v24 = vld [vmem:[#allocation54_spill] sm:$0xff]  ;;  %v14280_v59 = vld [vmem:[#allocation113_spill] sm:$0xff] }
 0x3e6   : > { %v12914_v21 = vadd.f32 %v5331_v36, %v5224_v5  ;;  %v4645_v54 = vadd.f32 %v14273_v61, %v14272_v8  ;;  %5879 = vrot.lane.b32.xlu0 %v12742_v19, %s7182_s9  ;;  %v6305_v29 = vrot.slane %v12882_v40, 2  ;;  %v5075_v39 = vadd.f32 %v14276_v48, %v4907_v41  ;;  %v14282_v7 = vld [vmem:[#allocation15_spill] sm:$0xff]  ;;  %v14283_v41 = vld [vmem:[#allocation56_spill] sm:$0xff]  ;;  %v14287_v8 = vld [vmem:[#allocation94_spill] sm:$0xff] }
 0x3e7   : > { %v5347_v58 = vpop.permute.xlu1 %5346  ;;  %v5238_v9 = vadd.f32 %v12684_v32, %v5174_v42  ;;  %v5181_v13 = vadd.f32 %v14277_v24, %v5054_v16  ;;  %v4644_v26 = vadd.f32 %v14279_v28, %v14278_v51  ;;  %v4928_v14 = vadd.f32 %v14280_v59, %v4772_v45  ;;  %v14281_v32 = vld [vmem:[#allocation133_spill] sm:$0xff]  ;;  %v14285_v45 = vld [vmem:[#allocation138_spill] sm:$0xff] }
 0x3e8   : > { %v12926_v49 = vadd.f32 %v5347_v58, %v5239_v33  ;;  %v6307_v19 = vrot.slane %v12888_v63, 2  ;;  %v6304_v4 = vrot.slane %v12907_v2, 2  ;;  %v5074_v16 = vadd.f32 %v14281_v32, %v4906_v62  ;;  %v14284_v33 = vld [vmem:[#allocation148_spill] sm:$0xff]  ;;  %v14286_v42 = vld [vmem:[#allocation150_spill] sm:$0xff]  ;;  %v14288_v2 = vld [vmem:[#allocation153_spill] sm:$0xff] }
 0x3e9   : > { %v5345_v5 = vpop.permute.xlu0 %5344  ;;  %6143 = vrot.lane.b32.xlu1 %v12768_v56, %s7181_s16  ;;  %v5253_v38 = vadd.f32 %v14282_v7, %v5181_v13  ;;  %v5180_v36 = vadd.f32 %v14283_v41, %v5053_v44  ;;  %v4666_v30 = vadd.f32 %v14285_v45, %v14284_v33  ;;  %v4927_v56 = vadd.f32 %v14286_v42, %v4771_v50  ;;  %v14289_v62 = vld [vmem:[#allocation142_spill] sm:$0xff]  ;;  %v14290_v58 = vld [vmem:[#allocation13_spill] sm:$0xff]  ;;  %v14296_v7 = vld [vmem:[#allocation143_spill] sm:$0xff] }
 0x3ea   : > { %v12940_v55 = vadd.f32 %v5345_v5, %v5238_v9  ;;  %v4789_v63 = vadd.f32 %v14287_v8, %v4645_v54  ;;  %6141 = vrot.lane.b32.xlu0 %v14288_v2, %s7181_s16  ;;  %v6171_v27 = vstv %s12890_s10  ;;  %v5096_v37 = vadd.f32 %v14289_v62, %v4928_v14  ;;  %v14291_v44 = vld [vmem:[#allocation122_spill] sm:$0xff]  ;;  %v14292_v13 = vld [vmem:[#allocation149_spill] sm:$0xff]  ;;  %v14295_v5 = vld [vmem:[#allocation95_spill] sm:$0xff]  ;;  %s6925_s10 = sld [smem:[#allocation3 + $0xb1]] }
 0x3eb   : > { %v5361_v61 = vpop.permute.xlu1 %5360  ;;  %v5252_v48 = vadd.f32 %v14290_v58, %v5180_v36  ;;  %v5187_v9 = vadd.f32 %v14291_v44, %v5075_v39  ;;  %v14293_v51 = vld [vmem:[#allocation30_spill] sm:$0xff]  ;;  %v4788_v54 = vadd.f32 %v14295_v5, %v4644_v26  ;;  %v12963_v14 = vstv %s12909_s11  ;;  %v14297_v39 = vld [vmem:[#allocation17_spill] sm:$0xff]  ;;  %v14298_v36 = vld [vmem:[#allocation60_spill] sm:$0xff]  ;;  %s13248_s11 = sld [smem:[#allocation8 + $0x2]] }
 0x3ec   : > { %v12952_v24 = vadd.f32 %v5361_v61, %v5253_v38  ;;  %v4665_v28 = vadd.f32 %v14293_v51, %v14292_v13  ;;  %v14294_v59 = vld [vmem:[#allocation114_spill] sm:$0xff]  ;;  %v5095_v41 = vadd.f32 %v14296_v7, %v4927_v56  ;;  %v5186_v33 = vadd.f32 %v14298_v36, %v5074_v16  ;;  %v14299_v42 = vld [vmem:[#allocation116_spill] sm:$0xff]  ;;  %v14307_v7 = vld [vmem:[#allocation19_spill] sm:$0xff] }
 0x3ed   : > { %v4949_v50 = vadd.f32 %v14294_v59, %v4789_v63  ;;  %v5359_v32 = vpop.permute.xlu0 %5358  ;;  %6290 = vrot.lane.b32.xlu1 %v12812_v25, %s7182_s9  ;;  %v5267_v38 = vadd.f32 %v14297_v39, %v5187_v9  ;;  %v4948_v8 = vadd.f32 %v14299_v42, %v4788_v54  ;;  %v14300_v26 = vld [vmem:[#allocation34_spill] sm:$0xff]  ;;  %v12975_v2 = vmul.f32 %v12370_v10, %v6171_v27  ;;  %v14301_v61 = vld [vmem:[#allocation144_spill] sm:$0xff] }
 0x3ee   : > { %v12968_v45 = vadd.f32 %v5359_v32, %v5252_v48  ;;  %v4806_v63 = vadd.f32 %v14300_v26, %v4666_v30  ;;  %6288 = vrot.lane.b32.xlu0 %v12815_v31, %s7182_s9  ;;  %v6174_v56 = vmul.f32 %v12885_v23, %v6171_v27  ;;  %v14302_v58 = vld [vmem:[#allocation18_spill] sm:$0xff]  ;;  %v14303_v48 = vld [vmem:[#allocation125_spill] sm:$0xff]  ;;  %v6308_v31 = vsel %vm1035_vm1, %v6305_v29, %v6307_v19  ;;  %v14310_v26 = vld [vmem:[#allocation151_spill] sm:$0xff] }
 0x3ef   : > { %v5375_v25 = vpop.permute.xlu1 %5374  ;;  %v5117_v62 = vadd.f32 %v14301_v61, %v4949_v50  ;;  %v5266_v16 = vadd.f32 %v14302_v58, %v5186_v33  ;;  %v5193_v44 = vadd.f32 %v14303_v48, %v5096_v37  ;;  %v14304_v13 = vld [vmem:[#allocation118_spill] sm:$0xff]  ;;  %v14305_v30 = vld [vmem:[#allocation97_spill] sm:$0xff]  ;;  %v6318_v54 = vstv %s12935_s12  ;;  %v14308_v37 = vld [vmem:[#allocation63_spill] sm:$0xff]  ;;  %s6926_s12 = sld [smem:[#allocation3 + $0xde]] }
 0x3f0   : > { %v12981_v9 = vadd.f32 %v5375_v25, %v5267_v38  ;;  %v4970_v51 = vadd.f32 %v14304_v13, %v4806_v63  ;;  %v4805_v59 = vadd.f32 %v14305_v30, %v4665_v28  ;;  %v14306_v50 = vld [vmem:[#allocation145_spill] sm:$0xff]  ;;  %v5192_v38 = vadd.f32 %v14308_v37, %v5095_v41  ;;  %v14309_v28 = vld [vmem:[#allocation119_spill] sm:$0xff]  ;;  %v14312_v48 = vld [vmem:[#allocation146_spill] sm:$0xff] }
 0x3f1   : > { %v5373_v5 = vpop.permute.xlu0 %5372  ;;  %5902 = vrot.lane.b32.xlu1 %v12832_v17, %s7182_s9  ;;  %v5116_v32 = vadd.f32 %v14306_v50, %v4948_v8  ;;  %v5281_v39 = vadd.f32 %v14307_v7, %v5193_v44  ;;  %v6179_v19 = vrot.slane %v12975_v2, 2  ;;  %v6181_v42 = vrot.slane %v6174_v56, 2  ;;  %v14311_v25 = vld [vmem:[#allocation129_spill] sm:$0xff] }
 0x3f2   : > { %v12994_v36 = vadd.f32 %v5373_v5, %v5266_v16  ;;  %v4969_v33 = vadd.f32 %v14309_v28, %v4805_v59  ;;  %5900 = vrot.lane.b32.xlu0 %v12840_v0, %s7182_s9  ;;  %v6172_v8 = vmul.f32 %v12402_v20, %v6171_v27  ;;  %v5138_v63 = vadd.f32 %v14310_v26, %v4970_v51  ;;  %v14314_v59 = vld [vmem:[#allocation139_spill] sm:$0xff] }
 0x3f3   : > { %v5389_v17 = vpop.permute.xlu1 %5388  ;;  %v5280_v41 = vadd.f32 %v12780_v46, %v5192_v38  ;;  %v5199_v61 = vadd.f32 %v14311_v25, %v5117_v62  ;;  %v6306_v0 = vsel %vm1035_vm1, %v6304_v4, %v6305_v29  ;;  %v6320_v2 = vmul.f32 %v12370_v10, %v6318_v54  ;;  %v14313_v62 = vld [vmem:[#allocation73_spill] sm:$0xff] }
 0x3f4   : > { %v13006_v58 = vadd.f32 %v5389_v17, %v5281_v39  ;;  %v6321_v27 = vmul.f32 %v12885_v23, %v6318_v54  ;;  %v6192_v56 = vstv %s12960_s13  ;;  %v5137_v44 = vadd.f32 %v14312_v48, %v4969_v33  ;;  %s13264_s13 = sld [smem:[#allocation8 + $0x3]] }
 0x3f5   : > { %v5387_v16 = vpop.permute.xlu0 %5386  ;;  %6164 = vrot.lane.b32.xlu1 %v12901_v22, %s7181_s16  ;;  %v5295_v46 = vadd.f32 %v12796_v18, %v5199_v61  ;;  %v5198_v13 = vadd.f32 %v14313_v62, %v5116_v32  ;;  %v6182_v22 = vsel %vm1035_vm1, %v6179_v19, %v6181_v42  ;;  %v6178_v29 = vrot.slane %v6172_v8, 2 }
 0x3f6   : > { %v13019_v51 = vadd.f32 %v5387_v16, %v5280_v41  ;;  %6162 = vrot.lane.b32.xlu0 %v12904_v43, %s7181_s16  ;;  %v13028_v4 = vmul.f32 %v12370_v10, %v12963_v14  ;;  %v5474_v18 = vmul.f32 %v12885_v23, %v12963_v14  ;;  %v5205_v5 = vadd.f32 %v14314_v59, %v5138_v63 }
 0x3f7   : > { %v5403_v40 = vpop.permute.xlu1 %5402  ;;  %v5294_v30 = vadd.f32 %v12807_v53, %v5198_v13  ;;  %v6319_v43 = vmul.f32 %v12402_v20, %v6318_v54  ;;  %v6326_v7 = vrot.slane %v6320_v2, 2  ;;  %v6328_v39 = vrot.slane %v6321_v27, 2  ;;  %v14315_v53 = vld [vmem:[#allocation140_spill] sm:$0xff] }
 0x3f8   : > { %v13034_v50 = vadd.f32 %v5403_v40, %v5295_v46  ;;  %v6194_v37 = vmul.f32 %v12370_v10, %v6192_v56  ;;  %v6195_v38 = vmul.f32 %v12885_v23, %v6192_v56  ;;  %v5309_v28 = vadd.f32 %v12829_v60, %v5205_v5  ;;  %v14317_v2 = vld [vmem:[#allocation16_spill] sm:$0xff] }
 0x3f9   : > { %v5401_v32 = vpop.permute.xlu0 %5400  ;;  %6311 = vrot.lane.b32.xlu1 %v6308_v31, %s7182_s9  ;;  %v5204_v33 = vadd.f32 %v14315_v53, %v5137_v44  ;;  %v6339_v42 = vstv %s12996_s15  ;;  %v6180_v8 = vsel %vm1035_vm1, %v6178_v29, %v6179_v19  ;;  %v6193_v31 = vmul.f32 %v12402_v20, %v6192_v56  ;;  %s6927_s15 = sld [smem:[#allocation3 + $0x10b]] }
 0x3fa   : > { %v13044_v17 = vadd.f32 %v5401_v32, %v5294_v30  ;;  %6309 = vrot.lane.b32.xlu0 %v6306_v0, %s7182_s9  ;;  %v5461_v26 = vrot.slane %v12860_v57, 1  ;;  %v5479_v63 = vrot.slane %v13028_v4, 1  ;;  %v6325_v25 = vrot.slane %v6319_v43, 2 }
 0x3fb   : > { %v5417_v54 = vpop.permute.xlu1 %5416  ;;  %v5308_v41 = vadd.f32 %v12844_v3, %v5204_v33  ;;  %v5481_v61 = vrot.slane %v5474_v18, 1  ;;  %v6329_v19 = vsel %vm1035_vm1, %v6326_v7, %v6328_v39  ;;  %v14316_v0 = vrot.slane %v12708_v15, 1 }
 0x3fc   : > { %v13053_v60 = vadd.f32 %v5417_v54, %v5309_v28  ;;  %v14318_v57 = vrot.slane %v14317_v2, 1  ;;  %v6341_v56 = vmul.f32 %v12370_v10, %v6339_v42  ;;  %v6342_v3 = vmul.f32 %v12885_v23, %v6339_v42 }
 0x3fd   : > { %v5415_v16 = vpop.permute.xlu0 %5414  ;;  %6185 = vrot.lane.b32.xlu1 %v6182_v22, %s7181_s16  ;;  %v6200_v44 = vrot.slane %v6194_v37, 2  ;;  %v6202_v46 = vrot.slane %v6195_v38, 2  ;;  %v6360_v62 = vstv %s13021_s17  ;;  %v6199_v15 = vrot.slane %v6193_v31, 2  ;;  %s6928_s17 = sld [smem:[#allocation3 + $0x138]] }
 0x3fe   : > { %v5446_v27 = vsel %vm562_vm0, %v14318_v57, %v14316_v0  ;;  %v13066_v48 = vadd.f32 %v5415_v16, %v5308_v41  ;;  %6183 = vrot.lane.b32.xlu0 %v6180_v8, %s7181_s16  ;;  %v5465_v40 = vsel %vm562_vm0, %v5462_v52, %v5464_v47  ;;  %v5463_v22 = vsel %vm562_vm0, %v5461_v26, %v5462_v52 }
 0x3ff   : > { %v5431_v13 = vpop.permute.xlu1 %5430  ;;  %v6340_v29 = vmul.f32 %v12402_v20, %v6339_v42  ;;  %v6327_v30 = vsel %vm1035_vm1, %v6325_v25, %v6326_v7  ;;  %v5482_v59 = vsel %vm562_vm0, %v5479_v63, %v5481_v61  ;;  %v5488_v11 = vstv %s13037_s18  ;;  %s13281_s18 = sld [smem:[#allocation8 + $0x4]] }
 0x400   : > { %v13082_v18 = vadd.f32 %v5431_v13, %v12864_v34  ;;  %v6347_v47 = vrot.slane %v6341_v56, 2  ;;  %v6349_v43 = vrot.slane %v6342_v3, 2  ;;  %v5472_v6 = vmul.f32 %v12402_v20, %v12963_v14  ;;  %v13133_v13 = vld [vmem:[%s7328_s14 + $0x68] sm:$0xff] }
 0x401   : > { %v5429_v5 = vpop.permute.xlu0 %5428  ;;  %6332 = vrot.lane.b32.xlu1 %v6329_v19, %s7182_s9  ;;  %v6362_v52 = vmul.f32 %v12370_v10, %v6360_v62  ;;  %v5452_v32 = vadd.f32 %v12790_v1, %v12895_v35  ;;  %v6203_v7 = vsel %vm1035_vm1, %v6200_v44, %v6202_v46  ;;  %v6363_v39 = vmul.f32 %v12885_v23, %v6360_v62 }
 0x402   : > { %v13094_v34 = vadd.f32 %v5429_v5, %v12875_v12  ;;  %6330 = vrot.lane.b32.xlu0 %v6327_v30, %s7182_s9  ;;  %v6201_v38 = vsel %vm1035_vm1, %v6199_v15, %v6200_v44  ;;  %v6346_v28 = vrot.slane %v6340_v29, 2  ;;  %v5490_v14 = vmul.f32 %v12370_v10, %v5488_v11 }
 0x403   : > { %v5588_v37 = vpop.permute.xlu1 %5587  ;;  %v5491_v53 = vmul.f32 %v12885_v23, %v5488_v11  ;;  %v5451_v33 = vadd.f32 %v5446_v27, %v12914_v21  ;;  %v6361_v1 = vmul.f32 %v12402_v20, %v6360_v62  ;;  %v5505_v35 = vstv %s13055_s19  ;;  %s6929_s19 = sld [smem:[#allocation3 + $0x165]] }
 0x404   : > { %v13104_v12 = vadd.f32 %v5588_v37, %v5452_v32  ;;  %v6350_v54 = vsel %vm1035_vm1, %v6347_v47, %v6349_v43  ;;  %v5478_v8 = vrot.slane %v5472_v6, 1  ;;  %v6368_v31 = vrot.slane %v6362_v52, 2  ;;  %v13151_v52 = vld [vmem:[%s7328_s14 + $0x60] sm:$0xff]  ;;  %s6922_s14 = sld [smem:[#allocation3 + $0x2a]] }
 0x405   : > { %v5586_v42 = vpop.permute.xlu0 %5585  ;;  %6206 = vrot.lane.b32.xlu1 %v6203_v7, %s7181_s16  ;;  %v5489_v26 = vmul.f32 %v12402_v20, %v5488_v11  ;;  %v5469_v25 = vadd.f32 %v5465_v40, %v12926_v49  ;;  %v6370_v61 = vrot.slane %v6363_v39, 2  ;;  %v5522_v21 = vstv %s13069_s24  ;;  %s13294_s24 = sld [smem:[#allocation8 + $0x5]] }
 0x406   : > { %v13114_v41 = vadd.f32 %v5586_v42, %v5451_v33  ;;  %6204 = vrot.lane.b32.xlu0 %v6201_v38, %s7181_s16  ;;  %v5496_v19 = vrot.slane %v5490_v14, 1  ;;  %v5498_v0 = vrot.slane %v5491_v53, 1  ;;  %v5507_v2 = vmul.f32 %v12370_v10, %v5505_v35  ;;  %s6923_s16 = sld [smem:[#allocation3 + $0x57]] }
 0x407   : > { %v5609_v16 = vpop.permute.xlu1 %5608  ;;  %v5508_v57 = vmul.f32 %v12885_v23, %v5505_v35  ;;  %v5468_v56 = vadd.f32 %v5463_v22, %v12940_v55  ;;  %v6348_v3 = vsel %vm1035_vm1, %v6346_v28, %v6347_v47  ;;  %v6367_v44 = vrot.slane %v6361_v1, 2 }
 0x408   : > { %v13121_v27 = vadd.f32 %v5609_v16, %v5469_v25  ;;  %v5480_v46 = vsel %vm562_vm0, %v5478_v8, %v5479_v63  ;;  %v5495_v62 = vrot.slane %v5489_v26, 1  ;;  %v5506_v10 = vmul.f32 %v12402_v20, %v5505_v35 }
 0x409   : > { %v5607_v49 = vpop.permute.xlu0 %5606  ;;  %6353 = vrot.lane.b32.xlu1 %v6350_v54, %s7182_s9  ;;  %v5524_v55 = vmul.f32 %v13133_v13, %v5522_v21  ;;  %v5486_v40 = vadd.f32 %v5482_v59, %v12952_v24  ;;  %v6371_v22 = vsel %vm1035_vm1, %v6368_v31, %v6370_v61  ;;  %v5525_v29 = vmul.f32 %v12885_v23, %v5522_v21 }
 0x40a   : > { %v13136_v15 = vadd.f32 %v5607_v49, %v5468_v56  ;;  %6351 = vrot.lane.b32.xlu0 %v6348_v3, %s7182_s9  ;;  %v5499_v63 = vsel %vm562_vm0, %v5496_v19, %v5498_v0  ;;  %v5513_v30 = vrot.slane %v5507_v2, 1  ;;  %v5515_v20 = vrot.slane %v5508_v57, 1 }
 0x40b   : > { %v5630_v4 = vpop.permute.xlu1 %5629  ;;  %v5485_v5 = vadd.f32 %v5480_v46, %v12968_v45  ;;  %v6369_v47 = vsel %vm1035_vm1, %v6367_v44, %v6368_v31  ;;  %v5539_v43 = vstv %s13109_s26  ;;  %v5497_v59 = vsel %vm562_vm0, %v5495_v62, %v5496_v19  ;;  %s13308_s26 = sld [smem:[#allocation8 + $0x6]] }
 0x40c   : > { %v13143_v11 = vadd.f32 %v5630_v4, %v5486_v40  ;;  %v5512_v6 = vrot.slane %v5506_v10, 1  ;;  %v5523_v32 = vmul.f32 %v13151_v52, %v5522_v21  ;;  %v5503_v39 = vadd.f32 %v5499_v63, %v12981_v9 }
 0x40d   : > { %v5628_v24 = vpop.permute.xlu0 %5627  ;;  %6374 = vrot.lane.b32.xlu1 %v6371_v22, %s7182_s9  ;;  %v5530_v37 = vrot.slane %v5524_v55, 1  ;;  %v5532_v45 = vrot.slane %v5525_v29, 1  ;;  %v5516_v28 = vsel %vm562_vm0, %v5513_v30, %v5515_v20  ;;  %v5541_v14 = vmul.f32 %v13133_v13, %v5539_v43 }
 0x40e   : > { %v13154_v7 = vadd.f32 %v5628_v24, %v5485_v5  ;;  %6372 = vrot.lane.b32.xlu0 %v6369_v47, %s7182_s9  ;;  %v5542_v53 = vmul.f32 %v12885_v23, %v5539_v43  ;;  %v5502_v1 = vadd.f32 %v5497_v59, %v12994_v36  ;;  %v5556_v35 = vstv %s13125_s27  ;;  %s6924_s9 = sld [smem:[#allocation3 + $0x84]] }
 0x40f   : > { %v5651_v38 = vpop.permute.xlu1 %5650  ;;  %v5514_v54 = vsel %vm562_vm0, %v5512_v6, %v5513_v30  ;;  %v5529_v9 = vrot.slane %v5523_v32, 1  ;;  %v5540_v8 = vmul.f32 %v13151_v52, %v5539_v43  ;;  %v5520_v26 = vadd.f32 %v5516_v28, %v13006_v58  ;;  %s13314_s27 = sld [smem:[#allocation8 + $0x7]] }
 0x410   : > { %v13161_v33 = vadd.f32 %v5651_v38, %v5503_v39  ;;  %v5533_v25 = vsel %vm562_vm0, %v5530_v37, %v5532_v45  ;;  %v5547_v21 = vrot.slane %v5541_v14, 1  ;;  %v5549_v16 = vrot.slane %v5542_v53, 1 }
 0x411   : > { %v5649_v42 = vpop.permute.xlu0 %5648  ;;  %v5558_v19 = vmul.f32 %v13133_v13, %v5556_v35  ;;  %v5559_v36 = vmul.f32 %v12885_v23, %v5556_v35  ;;  %v5519_v2 = vadd.f32 %v5514_v54, %v13019_v51  ;;  %v5531_v56 = vsel %vm562_vm0, %v5529_v9, %v5530_v37 }
 0x412   : > { %v13167_v31 = vadd.f32 %v5649_v42, %v5502_v1  ;;  %v5546_v3 = vrot.slane %v5540_v8, 1  ;;  %v5557_v44 = vmul.f32 %v13151_v52, %v5556_v35  ;;  %v5537_v49 = vadd.f32 %v5533_v25, %v13034_v50 }
 0x413   : > { %v5672_v61 = vpop.permute.xlu1 %5671  ;;  %v5550_v62 = vsel %vm562_vm0, %v5547_v21, %v5549_v16  ;;  %v5564_v10 = vrot.slane %v5558_v19, 1  ;;  %v5566_v55 = vrot.slane %v5559_v36, 1  ;;  %v5536_v22 = vadd.f32 %v5531_v56, %v13044_v17 }
 0x414   : > { %v13173_v0 = vadd.f32 %v5672_v61, %v5520_v26  ;;  %v5548_v29 = vsel %vm562_vm0, %v5546_v3, %v5547_v21  ;;  %v5563_v4 = vrot.slane %v5557_v44, 1  ;;  %v5554_v30 = vadd.f32 %v5550_v62, %v13053_v60 }
 0x415   : > { %v5670_v57 = vpop.permute.xlu0 %5669  ;;  %v5567_v50 = vsel %vm562_vm0, %v5564_v10, %v5566_v55  ;;  %v5553_v47 = vadd.f32 %v5548_v29, %v13066_v48  ;;  %v5909_v60 = vstv %s6922_s14  ;;  %s255_s14 = sand.u32 1, %s7168_s21  }
 0x416   : > { %v13178_v58 = vadd.f32 %v5670_v57, %v5519_v2  ;;  %v5565_v24 = vsel %vm562_vm0, %v5563_v4, %v5564_v10  ;;  %v5571_v59 = vadd.f32 %v5567_v50, %v13082_v18  ;;  %v5910_v28 = vmul.f32 %v13151_v52, %v5909_v60 }
 0x417   : > { %v5693_v46 = vpop.permute.xlu1 %5692  ;;  %v5570_v39 = vadd.f32 %v5565_v24, %v13094_v34  ;;  %v5911_v48 = vmul.f32 %v13133_v13, %v5909_v60 }
 0x418   : > { %v13182_v40 = vadd.f32 %v5693_v46, %v5537_v49  ;;  %v5916_v35 = vrot.slane %v5910_v28, 2 }
 0x419   : > { %v5691_v51 = vpop.permute.xlu0 %5690  ;;  %v5917_v42 = vrot.slane %v5911_v48, 2 }
 0x41a   : > { %v13186_v63 = vadd.f32 %v5691_v51, %v5536_v22 }
 0x41b   : > { %v5714_v20 = vpop.permute.xlu1 %5713  ;;  %v5918_v26 = vsel %vm1035_vm1, %v5916_v35, %v5917_v42 }
 0x41c   : > { %v13190_v5 = vadd.f32 %v5714_v20, %v5554_v30 }
 0x41d   : > { %v5712_v43 = vpop.permute.xlu0 %5711 }
 0x41e   : > { %v13194_v17 = vadd.f32 %v5712_v43, %v5553_v47  ;;  %v5943_v43 = vstv %s6924_s9  ;;  %s6958_s9 = sshll.u32 %s7240_s4, 8  ;;  %s13334_s4 = scalar_lea.sflag [#allocation4], %s255_s14 }
 0x41f   : > { %v5735_v6 = vpop.permute.xlu1 %5734 }
 0x420   : > { %v13197_v32 = vadd.f32 %v5735_v6, %v5571_v59 }
 0x421   : > { %v5733_v37 = vpop.permute.xlu0 %5732 }
 0x422   : > { %v13200_v45 = vadd.f32 %v5733_v37, %v5570_v39  ;;  %v5945_v37 = vmul.f32 %v13133_v13, %v5943_v43 }
 0x423   : > { %v5756_v38 = vpop.permute.xlu1 %5755 }
 0x424   : > { %v5760_v14 = vadd.f32 %v5756_v38, %v13104_v12  ;;  %v5946_v38 = vmul.f32 %v12885_v23, %v5943_v43 }
 0x425   : > { %v5754_v53 = vpop.permute.xlu0 %5753 }
 0x426   : > { %v5759_v1 = vadd.f32 %v5754_v53, %v13114_v41 }
 0x427   : > { %v5777_v18 = vpop.permute.xlu1 %5776 }
 0x428   : > { %v5781_v54 = vadd.f32 %v5777_v18, %v13121_v27  ;;  %v5923_v21 = vadd.f32 %v5918_v26, %v5759_v1  ;;  %v5912_v27 = vmul.f32 %v12885_v23, %v5909_v60  ;;  %v6385_v60 = vstv %s13225_s7 }
 0x429   : > { %v5775_v34 = vpop.permute.xlu0 %5774  ;;  %v5944_v1 = vmul.f32 %v13151_v52, %v5943_v43  ;;  %v5953_v26 = vrot.slane %v5946_v38, 2 }
 0x42a   : > { %v5780_v9 = vadd.f32 %v5775_v34, %v13136_v15  ;;  %v5919_v2 = vrot.slane %v5912_v27, 2 }
 0x42b   : > { %v5798_v8 = vpop.permute.xlu1 %5797  ;;  %v5950_v27 = vrot.slane %v5944_v1, 2 }
 0x42c   : > { %v13210_v25 = vadd.f32 %v5798_v8, %v13143_v11  ;;  %v5926_v11 = vstv %s6923_s16  ;;  %v5920_v3 = vsel %vm1035_vm1, %v5917_v42, %v5919_v2  ;;  %v6381_v8 = vstv %s13229_s8  ;;  %s6566_s16 = sshll.u32 %s255_s14, 4 }
 0x42d   : > { %v5796_v61 = vpop.permute.xlu0 %5795  ;;  %v5929_v44 = vmul.f32 %v12885_v23, %v5926_v11  ;;  %v5927_v46 = vmul.f32 %v13151_v52, %v5926_v11  ;;  %v5924_v10 = vadd.f32 %v5920_v3, %v5760_v14  ;;  %s257_s7 = scalar_lea.vmem [#allocation9], %s6566_s16 }
 0x42e   : > { %v13213_v12 = vadd.f32 %v5796_v61, %v13154_v7  ;;  %v5928_v7 = vmul.f32 %v13133_v13, %v5926_v11  ;;  %v6393_v61 = vstv %s13234_s6  ;;  %s6463_s8 = sshll.u32 %s257_s7, 4  ;;  %s13330_s8 = int_to_ptr.vmem [resolvable:$true] %s6463_s8 }
 0x42f   : > { %v6058_v41 = vpop.permute.xlu1 %6057  ;;  %v5936_v55 = vrot.slane %v5929_v44, 2  ;;  %v5933_v29 = vrot.slane %v5927_v46, 2 }
 0x430   : > { %v6063_v16 = vadd.f32 %v6058_v41, %v5923_v21 }
 0x431   : > { %v5817_v19 = vpop.permute.xlu0 %5816 }
 0x432   : > { %v13217_v36 = vadd.f32 %v5817_v19, %v13167_v31  ;;  %v5934_v31 = vrot.slane %v5928_v7, 2 }
 0x433   : > { %v13219_v15 = vpop.permute.xlu1 %5818 }
 0x434   : > { %v5937_v20 = vsel %vm1035_vm1, %v5934_v31, %v5936_v55  ;;  %v5935_v24 = vsel %vm1035_vm1, %v5933_v29, %v5934_v31  ;;  %v5960_v55 = vstv %s6925_s10 }
 0x435   : > { %v6060_v57 = vpop.permute.xlu0 %6059  ;;  %v5941_v6 = vadd.f32 %v5937_v20, %v5781_v54  ;;  %v5940_v14 = vadd.f32 %v5935_v24, %v5780_v9  ;;  %v5951_v54 = vrot.slane %v5945_v37, 2  ;;  %v5962_v20 = vmul.f32 %v13133_v13, %v5960_v55 }
 0x436   : > { %v6064_v51 = vadd.f32 %v6060_v57, %v5924_v10 }
 0x437   : > { %v6081_v56 = vpop.permute.xlu1 %6080  ;;  %v5952_v46 = vsel %vm1035_vm1, %v5950_v27, %v5951_v54 }
 0x438   : > { %v6085_v48 = vadd.f32 %v6081_v56, %v5941_v6  ;;  %v5954_v56 = vsel %vm1035_vm1, %v5951_v54, %v5953_v26 }
 0x439   : > { %v6079_v49 = vpop.permute.xlu0 %6078  ;;  %v5958_v10 = vadd.f32 %v5954_v56, %v13210_v25 }
 0x43a   : > { %v6084_v35 = vadd.f32 %v6079_v49, %v5940_v14 }
 0x43b   : > { %v6228_v62 = vpop.permute.xlu1 %6227 }
 0x43c   : > { %v6232_v30 = vadd.f32 %v6228_v62, %v6064_v51 }
 0x43d   : > { %v6226_v22 = vpop.permute.xlu0 %6225 }
 0x43e   : > { %v6231_v47 = vadd.f32 %v6226_v22, %v6063_v16  ;;  %v6384_v39 = vmax.f32 %v6232_v30, 0.0  ;;  %v5963_v22 = vmul.f32 %v12885_v23, %v5960_v55  ;;  %v5957_v30 = vadd.f32 %v5952_v46, %v13213_v12 }
 0x43f   : > { %v13227_v4 = vpop.permute.xlu1 %5839  ;;  %v5823_v12 = vadd.f32 %v13219_v15, %v13161_v33 }
 0x440   : > { %v6383_v53 = vmax.f32 %v6231_v47, 0.0  ;;  %v6387_v42 = vmul.f32 %v6385_v60, %v6384_v39  ;;  %v5961_v47 = vmul.f32 %v13151_v52, %v5960_v55  ;;  %v5970_v39 = vrot.slane %v5963_v22, 2 }
 0x441   : > { %v13232_v50 = vpop.permute.xlu0 %5837 }
 0x442   : > { %v6386_v41 = vmul.f32 %v6385_v60, %v6383_v53  ;;  %v6389_v9 = vadd.f32 %v6387_v42, %v6381_v8  ;;  %v6401_v60 = vstv %s13248_s11  ;;  %v5967_v14 = vrot.slane %v5961_v47, 2  ;;  %s13328_s11 = scalar_lea.hbm %s13379_s5, %s6958_s9 }
 0x443   : > { %v6102_v59 = vpop.permute.xlu1 %6101  ;;  %v5843_v47 = vadd.f32 %v13232_v50, %v13178_v58 }
 0x444   : > { %v6388_v7 = vadd.f32 %v6386_v41, %v6381_v8  ;;  %v6106_v29 = vadd.f32 %v6102_v59, %v5958_v10  ;;  %v5994_v10 = vstv %s6927_s15 }
 0x445   : > { %v6100_v28 = vpop.permute.xlu0 %6099 }
 0x446   : > { %v6105_v24 = vadd.f32 %v6100_v28, %v5957_v30  ;;  %v5996_v30 = vmul.f32 %v13133_v13, %v5994_v10 }
 0x447   : > { %v6249_v18 = vpop.permute.xlu1 %6248 }
 0x448   : > { %v6253_v34 = vadd.f32 %v6249_v18, %v6085_v48  ;;  %v5968_v48 = vrot.slane %v5962_v20, 2  ;;  %v5997_v20 = vmul.f32 %v12885_v23, %v5994_v10 }
 0x449   : > { %v6247_v21 = vpop.permute.xlu0 %6246 }
 0x44a   : > { %v6392_v16 = vmax.f32 %v6253_v34, 0.0  ;;  %v6252_v19 = vadd.f32 %v6247_v21, %v6084_v35  ;;  %v5971_v18 = vsel %vm1035_vm1, %v5968_v48, %v5970_v39  ;;  %v5977_v34 = vstv %s6926_s12  ;;  %s7108_s12 = scalar_lea.vmem %s13330_s8, 256 }
 0x44b   : > { %v13243_v2 = vpop.permute.xlu1 %5860  ;;  %v5969_v8 = vsel %vm1035_vm1, %v5967_v14, %v5968_v48  ;;  %v5975_v26 = vadd.f32 %v5971_v18, %v5823_v12  ;;  %v5979_v33 = vmul.f32 %v13133_v13, %v5977_v34  ;;  %v5980_v15 = vmul.f32 %v12885_v23, %v5977_v34  ;;  %p7109_p12 = scmp.ne.s32.totalorder %s13330_s8, %s7108_s12 }
 0x44c   : > { %v6395_v57 = vmul.f32 %v6393_v61, %v6392_v16  ;;  %v6391_v11 = vmax.f32 %v6252_v19, 0.0  ;;  %v5974_v16 = vadd.f32 %v5969_v8, %v13217_v36  ;;  %v5978_v19 = vmul.f32 %v13151_v52, %v5977_v34 }
 0x44d   : > { %v13246_v3 = vpop.permute.xlu0 %5858  ;;  %v5987_v56 = vrot.slane %v5980_v15, 2  ;;  %v5865_v18 = vadd.f32 %v13243_v2, %v13182_v40  ;;  %v6417_v8 = vstv %s13281_s18  ;;  %p7110_p3 = pnand %p7109_p12, %p14319_p2 }
 0x44e   : > { %v6397_v44 = vadd.f32 %v6395_v57, %v6389_v9  ;;  %v6394_v49 = vmul.f32 %v6393_v61, %v6391_v11  ;;  %v5985_v11 = vrot.slane %v5979_v33, 2 }
 0x44f   : > { %v6123_v62 = vpop.permute.xlu1 %6122  ;;  %p7111_p9 = pneg %p7110_p3 }
 0x450   : > { %v6396_v31 = vadd.f32 %v6394_v49, %v6388_v7  ;;  %v6127_v41 = vadd.f32 %v6123_v62, %v5975_v26  ;;  %v6409_v7 = vstv %s13264_s13  ;;  %v5844_v62 = vadd.f32 %v13227_v4, %v13173_v0  ;;  %s7183_s13 = smov [#allocation9]  }
 0x451   : > { %v6121_v51 = vpop.permute.xlu0 %6120  ;;  %s7112_s15 = sshll.u32 %s7183_s13, 4  ;;  %s7113_s15 = int_to_ptr.vmem [resolvable:$false] %s7112_s15 }
 0x452   : > { %v6126_v9 = vadd.f32 %v6121_v51, %v5974_v16  ;;  %p7115_p4 = scmp.lt.s32.totalorder %s13330_s8, %s7113_s15 }
 0x453   : > { %v6270_v43 = vpop.permute.xlu1 %6269 }
 0x454   : > { %v6274_v6 = vadd.f32 %v6270_v43, %v6106_v29  ;;  %v5988_v29 = vsel %vm1035_vm1, %v5985_v11, %v5987_v56 }
 0x455   : > { %v6268_v37 = vpop.permute.xlu0 %6267  ;;  %v5992_v39 = vadd.f32 %v5988_v29, %v5844_v62 }
 0x456   : > { %v6400_v25 = vmax.f32 %v6274_v6, 0.0  ;;  %v6273_v38 = vadd.f32 %v6268_v37, %v6105_v24  ;;  %v5995_v6 = vmul.f32 %v13151_v52, %v5994_v10  ;;  %v6011_v37 = vstv %s6928_s17  ;;  %s7114_s17 = scalar_lea.vmem %s7113_s15, 512 }
 0x457   : > { %v13257_v53 = vpop.permute.xlu1 %5881  ;;  %v6013_v58 = vmul.f32 %v13133_v13, %v6011_v37  ;;  %v6014_v50 = vmul.f32 %v12885_v23, %v6011_v37  ;;  %p7116_p7 = scmp.lt.s32.totalorder %s7114_s17, %s7108_s12 }
 0x458   : > { %v6403_v59 = vmul.f32 %v6401_v60, %v6400_v25  ;;  %v6399_v1 = vmax.f32 %v6273_v38, 0.0  ;;  %v6002_v25 = vrot.slane %v5996_v30, 2  ;;  %v6004_v38 = vrot.slane %v5997_v20, 2 }
 0x459   : > { %v13262_v35 = vpop.permute.xlu0 %5879  ;;  %v6021_v40 = vrot.slane %v6014_v50, 2  ;;  %v5886_v62 = vadd.f32 %v13257_v53, %v13190_v5  ;;  %v6425_v30 = vstv %s13294_s24  ;;  %p7117_p5 = por %p7116_p7, %p7115_p4 }
 0x45a   : > { %v6405_v28 = vadd.f32 %v6403_v59, %v6397_v44  ;;  %v6402_v42 = vmul.f32 %v6401_v60, %v6399_v1  ;;  %v6001_v59 = vrot.slane %v5995_v6, 2  ;;  %v6005_v34 = vsel %vm1035_vm1, %v6002_v25, %v6004_v38 }
 0x45b   : > { %v6144_v54 = vpop.permute.xlu1 %6143  ;;  %p7118_p6 = pnand %p7117_p5, %p7111_p9 }
 0x45c   : > { %v6404_v61 = vadd.f32 %v6402_v42, %v6396_v31  ;;  %v5984_v31 = vrot.slane %v5978_v19, 2  ;;  %v6148_v14 = vadd.f32 %v6144_v54, %v5992_v39  ;;  %v5864_v54 = vadd.f32 %v13246_v3, %v13186_v63 }
 0x45d   : > { %v6142_v21 = vpop.permute.xlu0 %6141  ;;  %v6003_v16 = vsel %vm1035_vm1, %v6001_v59, %v6002_v25  ;;  %v6019_v19 = vrot.slane %v6013_v58, 2  ;;  %v6433_v58 = vstv %s13308_s26 }
 0x45e   : > { %v5986_v0 = vsel %vm1035_vm1, %v5984_v31, %v5985_v11  ;;  %v6008_v63 = vadd.f32 %v6003_v16, %v5864_v54  ;;  %v6441_v54 = vstv %s13314_s27 }
 0x45f   : > { %v6291_v27 = vpop.permute.xlu1 %6290  ;;  %v5991_v12 = vadd.f32 %v5986_v0, %v5843_v47 }
 0x460   : > { %v6295_v57 = vadd.f32 %v6291_v27, %v6127_v41  ;;  %v6028_v41 = vstv %s6929_s19 }
 0x461   : > { %v6289_v44 = vpop.permute.xlu0 %6288  ;;  %v6030_v56 = vmul.f32 %v13133_v13, %v6028_v41  ;;  %v6029_v31 = vmul.f32 %v13151_v52, %v6028_v41  ;;  %v5885_v13 = vadd.f32 %v13262_v35, %v13194_v17 }
 0x462   : > { %v6408_v49 = vmax.f32 %v6295_v57, 0.0  ;;  %v6294_v46 = vadd.f32 %v6289_v44, %v6126_v9 }
 0x463   : > { %v13272_v55 = vpop.permute.xlu1 %5902  ;;  %v6036_v20 = vrot.slane %v6030_v56, 2 }
 0x464   : > { %v6411_v36 = vmul.f32 %v6409_v7, %v6408_v49  ;;  %v6407_v22 = vmax.f32 %v6294_v46, 0.0  ;;  %v6022_v46 = vsel %vm1035_vm1, %v6019_v19, %v6021_v40  ;;  %v5907_v5 = vadd.f32 %v13272_v55, %v13197_v32 }
 0x465   : > { %v13277_v51 = vpop.permute.xlu0 %5900  ;;  %v6026_v53 = vadd.f32 %v6022_v46, %v5886_v62 }
 0x466   : > { %v6413_v43 = vadd.f32 %v6411_v36, %v6405_v28  ;;  %v6410_v24 = vmul.f32 %v6409_v7, %v6407_v22  ;;  %v6147_v28 = vadd.f32 %v6142_v21, %v5991_v12  ;;  %v6009_v21 = vadd.f32 %v6005_v34, %v5865_v18 }
 0x467   : > { %v6165_v4 = vpop.permute.xlu1 %6164  ;;  %v6031_v7 = vmul.f32 %v12885_v23, %v6028_v41 }
 0x468   : > { %v6412_v60 = vadd.f32 %v6410_v24, %v6404_v61  ;;  %v6012_v61 = vmul.f32 %v13151_v52, %v6011_v37  ;;  %v6169_v44 = vadd.f32 %v6165_v4, %v6009_v21  ;;  %v6035_v4 = vrot.slane %v6029_v31, 2 }
 0x469   : > { %v6163_v48 = vpop.permute.xlu0 %6162  ;;  %v6038_v47 = vrot.slane %v6031_v7, 2  ;;  %v5906_v37 = vadd.f32 %v13277_v51, %v13200_v45 }
 0x46a   : > { %v6018_v57 = vrot.slane %v6012_v61, 2  ;;  %v6168_v36 = vadd.f32 %v6163_v48, %v6008_v63 }
 0x46b   : > { %v6312_v1 = vpop.permute.xlu1 %6311  ;;  %v6039_v35 = vsel %vm1035_vm1, %v6036_v20, %v6038_v47 }
 0x46c   : > { %v6316_v42 = vadd.f32 %v6312_v1, %v6148_v14  ;;  %v6037_v14 = vsel %vm1035_vm1, %v6035_v4, %v6036_v20  ;;  %v6043_v59 = vadd.f32 %v6039_v35, %v5907_v5 }
 0x46d   : > { %v6310_v26 = vpop.permute.xlu0 %6309 }
 0x46e   : > { %v6416_v33 = vmax.f32 %v6316_v42, 0.0  ;;  %v6315_v15 = vadd.f32 %v6310_v26, %v6147_v28  ;;  %v6042_v28 = vadd.f32 %v6037_v14, %v5906_v37 }
 0x46f   : > { %v6186_v2 = vpop.permute.xlu1 %6185 }
 0x470   : > { %v6419_v27 = vmul.f32 %v6417_v8, %v6416_v33  ;;  %v6415_v9 = vmax.f32 %v6315_v15, 0.0  ;;  %v6190_v25 = vadd.f32 %v6186_v2, %v6026_v53 }
 0x471   : > { %v6184_v11 = vpop.permute.xlu0 %6183 }
 0x472   : > { %v6421_v3 = vadd.f32 %v6419_v27, %v6413_v43  ;;  %v6418_v49 = vmul.f32 %v6417_v8, %v6415_v9  ;;  %v6020_v43 = vsel %vm1035_vm1, %v6018_v57, %v6019_v19 }
 0x473   : > { %v6333_v10 = vpop.permute.xlu1 %6332  ;;  %v6025_v17 = vadd.f32 %v6020_v43, %v5885_v13 }
 0x474   : > { %v6420_v22 = vadd.f32 %v6418_v49, %v6412_v60  ;;  %v6337_v29 = vadd.f32 %v6333_v10, %v6169_v44 }
 0x475   : > { %v6331_v23 = vpop.permute.xlu0 %6330  ;;  %v6189_v55 = vadd.f32 %v6184_v11, %v6025_v17 }
 0x476   : > { %v6424_v24 = vmax.f32 %v6337_v29, 0.0  ;;  %v6336_v0 = vadd.f32 %v6331_v23, %v6168_v36 }
 0x477   : > { %v6207_v52 = vpop.permute.xlu1 %6206 }
 0x478   : > { %v6427_v6 = vmul.f32 %v6425_v30, %v6424_v24  ;;  %v6423_v39 = vmax.f32 %v6336_v0, 0.0  ;;  %v6211_v18 = vadd.f32 %v6207_v52, %v6043_v59 }
 0x479   : > { %v6205_v60 = vpop.permute.xlu0 %6204 }
 0x47a   : > { %v6429_v38 = vadd.f32 %v6427_v6, %v6421_v3  ;;  %v6426_v48 = vmul.f32 %v6425_v30, %v6423_v39  ;;  %v6210_v51 = vadd.f32 %v6205_v60, %v6042_v28 }
 0x47b   : > { %v6354_v32 = vpop.permute.xlu1 %6353 }
 0x47c   : > { %v6428_v12 = vadd.f32 %v6426_v48, %v6420_v22  ;;  %v6358_v1 = vadd.f32 %v6354_v32, %v6190_v25 }
 0x47d   : > { %v6352_v50 = vpop.permute.xlu0 %6351 }
 0x47e   : > { %v6432_v42 = vmax.f32 %v6358_v1, 0.0  ;;  %v6357_v34 = vadd.f32 %v6352_v50, %v6189_v55 }
 0x47f   : > { %v6375_v45 = vpop.permute.xlu1 %6374 }
 0x480   : > { %v6435_v8 = vmul.f32 %v6433_v58, %v6432_v42  ;;  %v6431_v26 = vmax.f32 %v6357_v34, 0.0  ;;  %v6379_v61 = vadd.f32 %v6375_v45, %v6211_v18 }
 0x481   : > { %v6373_v33 = vpop.permute.xlu0 %6372 }
 0x482   : > { %v6437_v15 = vadd.f32 %v6435_v8, %v6429_v38  ;;  %v6434_v41 = vmul.f32 %v6433_v58, %v6431_v26  ;;  %v6440_v16 = vmax.f32 %v6379_v61, 0.0  ;;  %v6378_v19 = vadd.f32 %v6373_v33, %v6210_v51 }
 0x484   : > { %v6436_v40 = vadd.f32 %v6434_v41, %v6428_v12  ;;  %v6443_v2 = vmul.f32 %v6441_v54, %v6440_v16  ;;  %v6439_v21 = vmax.f32 %v6378_v19, 0.0 }
 0x486   : > { %v6445_v27 = vadd.f32 %v6443_v2, %v6437_v15  ;;  %v6442_v9 = vmul.f32 %v6441_v54, %v6439_v21 }
 0x488   : > { %6448 = vst.msk [vmem:[%s257_s7 + $0x8] sm:$0xff] %vm6446_vm2, %v6445_v27  ;;  %v6444_v57 = vadd.f32 %v6442_v9, %v6436_v40 }
 0x48a   : > { %6447 = vst.msk [vmem:[%s257_s7] sm:$0xff] %vm6446_vm2, %v6444_v57 }
 0x48b   : > { %7121 = shalt.err (!%p7118_p6)
}
 0x48c   : > { %s7122_s18 = scalar_lea.hbm %s13328_s11, 256  ;;  %s7126_s26 = scalar_lea.hbm %s13379_s5, 512 }
 0x48d   : > { %p7123_p10 = scmp.ne.s32.totalorder %s13328_s11, %s7122_s18  ;;  %p7127_p11 = scmp.lt.s32.totalorder %s13328_s11, %s13379_s5 }
 0x48e   : > { %p7128_p13 = scmp.lt.s32.totalorder %s7126_s26, %s7122_s18 }
 0x48f   : > { %p7124_p8 = pnand %p7123_p10, %p14319_p2 }
 0x490   : > { %p7129_p1 = por %p7128_p13, %p7127_p11 }
 0x491   : > { %p7125_p0 = pneg %p7124_p8 }
 0x493   : > { %p7130_p12 = pnand %p7129_p1, %p7125_p0 }
 0x495   : > { %7133 = shalt.err (!%p7130_p12)
}
 0x496   : > { %s7184_s16 = smov 128   ;;  %s7185_s9 = smov 8  }
 0x497   : > { %6972 = dma.vmem_to_hbm [thread:$0]  (%p14319_p2), %s13330_s8, 256, %s13328_s11, %s13334_s4, %s7184_s16, %s7184_s16, %s7185_s9  }
 0x498 PF: > { %p6994_p3 = scmp.ge.s32.totalorder %s7176_s23, 2  ;;  %s6478_s7 = sand.u32 1, %s7164_s20  }
 0x499   : > { %p14320_p9 = scmp.ne.s32.totalorder %s13390_s30, 0  ;;  %s6479_s6 = scalar_lea.sflag [#allocation4], %s6478_s7 }
 0x49b   : > { %p6985_p4 = pnand %p6994_p3, %p14320_p9 }
 0x49d   : > { %p6986_p7 = pneg %p6985_p4 }
 0x49f   : > { %7159 = dma.done.wait (%p6986_p7), %s6479_s6, 256  }
 0x4a0   : > { %7161 = vsyncadd (%p6986_p7), %s6479_s6, 4294967040  ;;  %p18_p5 = scmp.ge.s32.totalorder %s7244_s25, 4   ;;  %s14321_s20 = smov %s7168_s21 }
 0x4a1   : > { %s14322_s21 = smov %s7172_s22  ;;  %s14323_s22 = smov %s7255_s28 }
 0x4a2   : > { %s14324_s23 = smov %s7244_s25  ;;  %20 = sbr.rel (!%p18_p5) target bundleno = 7 (0x7), region = 92 }
 0x4a7   :  { %6484 = vsyncpa [#allocation4], 1 }
 0x4a8   :  { %6486 = vsyncpa [#allocation4 + $0x1], 1 }
 0x4a9   :  { %6487 = vsyncpa [#allocation5], 1 }
 0x4aa   :  { %6489 = vsyncpa [#allocation5 + $0x1], 1 }
 0x4ab   :  { %6490 = vsyncpa [#allocation7], 1 }

</bundles_post_ra>
